<compile_context>
chip_gen: v6e
topology: v6e:2x2x1
jax: 0.10.0
libtpu: 0.0.40
codegen_flags: <defaults>
</compile_context>

<pallas_src>
import functools

import jax
import jax.numpy as jnp
from jax import lax
from jax.experimental import pallas as pl
from jax.experimental.pallas import tpu as pltpu

EPS = 1e-5
LANE = 128   # channel dims padded to multiples of the lane width
SUB = 8


def _round_up(v, m):
    return (v + m - 1) // m * m


@functools.lru_cache(maxsize=None)
def _vmem_limit_bytes():
    """Generation-aware scoped-VMEM budget: ~3/4 of physical VMEM, capped at
    96 MiB (-> ~96 MiB on v5e/v6e with 128 MiB VMEM, ~48 MiB on v7x's 64 MiB)."""
    try:
        phys = int(pltpu.get_tpu_info().vmem_capacity_bytes)
    except Exception:
        phys = 64 * 1024 * 1024
    return int(min(phys * 3 // 4, 96 * 1024 * 1024))


def _cparams(sem):
    return pltpu.CompilerParams(dimension_semantics=sem,
                                vmem_limit_bytes=_vmem_limit_bytes())


def _pick_rb(nh, wsp, max_c, vmem_limit, row_cap):
    """Leading-dim rows (of the (N*H, W, C) layout) per grid step for the 1x1 /
    elementwise stages.  Sized so the widest f32 operands double-buffer under
    vmem_limit while the flattened matmul M-dim (rb*W) stays large."""
    max_rows = max(SUB, min(row_cap, vmem_limit // (max_c * 4 * 6)))
    rb_cap = max(1, min(nh, max_rows // max(1, wsp)))
    for rb in range(rb_cap, 0, -1):
        if nh % rb == 0:
            return rb
    return 1


# ----------------------------- Pallas kernels ------------------------------ #

def _conv1x1_stats_kernel(x_ref, w_ref, y_ref, psum_ref, pssq_ref, *, compute_dtype):
    """y = x @ w (MXU, f32 accumulation); per-tile channel sum / sum-of-squares."""
    rb, wsp, cin = x_ref.shape
    cout = y_ref.shape[-1]
    y = jnp.dot(x_ref[...].astype(compute_dtype).reshape(rb * wsp, cin), w_ref[...],
                preferred_element_type=jnp.float32)
    y_ref[...] = y.reshape(rb, wsp, cout).astype(y_ref.dtype)
    psum_ref[...] = jnp.sum(y, axis=0, keepdims=True).reshape(psum_ref.shape)
    pssq_ref[...] = jnp.sum(y * y, axis=0, keepdims=True).reshape(pssq_ref.shape)


def _bn_relu_conv3x3_stats_kernel(y1_ref, a_ref, c_ref, w_ref,
                                  y2_ref, psum_ref, pssq_ref,
                                  pad_ref, acc_ref, *, h, w, compute_dtype):
    """Fused bn1-affine + relu + 3x3 conv (pad=1) on a whole (H, W) image block.
    The 1-pixel halo is built in a VMEM scratch (no HBM pad / im2col tensor);
    the conv is 9 shifted MXU matmuls accumulated into a VMEM f32 scratch."""
    cin = y1_ref.shape[-1]
    cout = y2_ref.shape[-1]
    # bn1 affine + relu in f32, cast once to the MXU input dtype.
    o = jnp.maximum(y1_ref[...].astype(jnp.float32) * a_ref[...] + c_ref[...], 0.0)
    pad_ref[...] = jnp.zeros_like(pad_ref)
    pad_ref[pl.ds(1, h), pl.ds(1, w), :] = o.astype(compute_dtype)

    acc_ref[...] = jnp.zeros_like(acc_ref)
    for dy in range(3):
        slab = pad_ref[pl.ds(dy, h), :, :]                       # (h, w+2, cin)
        for dx in range(3):
            # TODO(synk): the dx slice+reshape is a VMEM copy; a pltpu.roll-based
            # shift would move it off the load/store slots.
            xt = slab[:, dx:dx + w, :].reshape(h * w, cin)
            acc_ref[...] += jnp.dot(xt, w_ref[dy * 3 + dx],
                                    preferred_element_type=jnp.float32)

    acc = acc_ref[...]
    y2_ref[...] = acc.reshape(h, w, cout).astype(y2_ref.dtype)
    psum_ref[...] = jnp.sum(acc, axis=0, keepdims=True).reshape(psum_ref.shape)
    pssq_ref[...] = jnp.sum(acc * acc, axis=0, keepdims=True).reshape(pssq_ref.shape)


def _bn_relu_conv1x1_stats_kernel(y_in_ref, a_ref, c_ref, w_ref,
                                  y_ref, psum_ref, pssq_ref, *, compute_dtype):
    """o = relu(y_in * a + c); y = o @ w (MXU); per-tile stats of y."""
    rb, wsp, cin = y_in_ref.shape
    cout = y_ref.shape[-1]
    o = jnp.maximum(y_in_ref[...].astype(jnp.float32) * a_ref[...] + c_ref[...], 0.0)
    y = jnp.dot(o.astype(compute_dtype).reshape(rb * wsp, cin), w_ref[...],
                preferred_element_type=jnp.float32)
    y_ref[...] = y.reshape(rb, wsp, cout).astype(y_ref.dtype)
    psum_ref[...] = jnp.sum(y, axis=0, keepdims=True).reshape(psum_ref.shape)
    pssq_ref[...] = jnp.sum(y * y, axis=0, keepdims=True).reshape(pssq_ref.shape)


def _bn_add_relu_kernel(y_ref, a_ref, c_ref, r_ref, o_ref):
    o_ref[...] = jnp.maximum(
        y_ref[...].astype(jnp.float32) * a_ref[...] + c_ref[...]
        + r_ref[...].astype(jnp.float32), 0.0).astype(o_ref.dtype)


# --------------------------- pallas_call wrappers --------------------------- #

def _conv1x1_with_stats(x3d, wmat, compute_dtype, rb):
    nh, wsp, cin = x3d.shape
    cout = wmat.shape[1]
    nt = nh // rb
    m = nh * wsp
    y_item = jnp.dtype(compute_dtype).itemsize
    ce = pl.CostEstimate(
        flops=2 * m * cin * cout, transcendentals=0,
        bytes_accessed=m * cin * x3d.dtype.itemsize
        + cin * cout * wmat.dtype.itemsize + m * cout * y_item)
    return pl.pallas_call(
        functools.partial(_conv1x1_stats_kernel, compute_dtype=compute_dtype),
        grid=(nt,),
        in_specs=[pl.BlockSpec((rb, wsp, cin), lambda i: (i, 0, 0)),
                  pl.BlockSpec((cin, cout), lambda i: (0, 0))],
        out_specs=(pl.BlockSpec((rb, wsp, cout), lambda i: (i, 0, 0)),
                   pl.BlockSpec((1, 1, cout), lambda i: (i, 0, 0)),
                   pl.BlockSpec((1, 1, cout), lambda i: (i, 0, 0))),
        out_shape=(jax.ShapeDtypeStruct((nh, wsp, cout), compute_dtype),
                   jax.ShapeDtypeStruct((nt, 1, cout), jnp.float32),
                   jax.ShapeDtypeStruct((nt, 1, cout), jnp.float32)),
        compiler_params=_cparams(("parallel",)),
        cost_estimate=ce,
    )(x3d, wmat)


def _bn_relu_conv3x3_with_stats(y1, a1, c1, w9, n, h, wsp, compute_dtype):
    cin = y1.shape[-1]
    cout = w9.shape[-1]
    m = n * h * wsp
    y_item = jnp.dtype(compute_dtype).itemsize
    ce = pl.CostEstimate(
        flops=2 * m * 9 * cin * cout, transcendentals=0,
        bytes_accessed=m * cin * y1.dtype.itemsize
        + 9 * cin * cout * w9.dtype.itemsize + m * cout * y_item)
    return pl.pallas_call(
        functools.partial(_bn_relu_conv3x3_stats_kernel, h=h, w=wsp,
                          compute_dtype=compute_dtype),
        grid=(n,),
        in_specs=[pl.BlockSpec((h, wsp, cin), lambda ni: (ni, 0, 0)),
                  pl.BlockSpec((1, 1, cin), lambda ni: (0, 0, 0)),
                  pl.BlockSpec((1, 1, cin), lambda ni: (0, 0, 0)),
                  pl.BlockSpec((9, cin, cout), lambda ni: (0, 0, 0))],
        out_specs=(pl.BlockSpec((h, wsp, cout), lambda ni: (ni, 0, 0)),
                   pl.BlockSpec((1, 1, cout), lambda ni: (ni, 0, 0)),
                   pl.BlockSpec((1, 1, cout), lambda ni: (ni, 0, 0))),
        out_shape=(jax.ShapeDtypeStruct((n * h, wsp, cout), compute_dtype),
                   jax.ShapeDtypeStruct((n, 1, cout), jnp.float32),
                   jax.ShapeDtypeStruct((n, 1, cout), jnp.float32)),
        scratch_shapes=[pltpu.VMEM((h + 2, wsp + 2, cin), compute_dtype),
                        pltpu.VMEM((h * wsp, cout), jnp.float32)],
        compiler_params=_cparams(("parallel",)),
        cost_estimate=ce,
    )(y1, a1, c1, w9)


def _bn_relu_conv1x1_with_stats(y_in, a, c, wmat, compute_dtype, rb):
    nh, wsp, cin = y_in.shape
    cout = wmat.shape[1]
    nt = nh // rb
    m = nh * wsp
    y_item = jnp.dtype(compute_dtype).itemsize
    ce = pl.CostEstimate(
        flops=2 * m * cin * cout + 3 * m * cin, transcendentals=0,
        bytes_accessed=m * cin * y_in.dtype.itemsize
        + cin * cout * wmat.dtype.itemsize + m * cout * y_item)
    return pl.pallas_call(
        functools.partial(_bn_relu_conv1x1_stats_kernel, compute_dtype=compute_dtype),
        grid=(nt,),
        in_specs=[pl.BlockSpec((rb, wsp, cin), lambda i: (i, 0, 0)),
                  pl.BlockSpec((1, 1, cin), lambda i: (0, 0, 0)),
                  pl.BlockSpec((1, 1, cin), lambda i: (0, 0, 0)),
                  pl.BlockSpec((cin, cout), lambda i: (0, 0))],
        out_specs=(pl.BlockSpec((rb, wsp, cout), lambda i: (i, 0, 0)),
                   pl.BlockSpec((1, 1, cout), lambda i: (i, 0, 0)),
                   pl.BlockSpec((1, 1, cout), lambda i: (i, 0, 0))),
        out_shape=(jax.ShapeDtypeStruct((nh, wsp, cout), compute_dtype),
                   jax.ShapeDtypeStruct((nt, 1, cout), jnp.float32),
                   jax.ShapeDtypeStruct((nt, 1, cout), jnp.float32)),
        compiler_params=_cparams(("parallel",)),
        cost_estimate=ce,
    )(y_in, a, c, wmat)


def _bn_add_relu(y3, a3, c3, resid, rb, out_dtype):
    nh, wsp, cc = y3.shape
    nt = nh // rb
    return pl.pallas_call(
        _bn_add_relu_kernel,
        grid=(nt,),
        in_specs=[pl.BlockSpec((rb, wsp, cc), lambda i: (i, 0, 0)),
                  pl.BlockSpec((1, 1, cc), lambda i: (0, 0, 0)),
                  pl.BlockSpec((1, 1, cc), lambda i: (0, 0, 0)),
                  pl.BlockSpec((rb, wsp, cc), lambda i: (i, 0, 0))],
        out_specs=pl.BlockSpec((rb, wsp, cc), lambda i: (i, 0, 0)),
        out_shape=jax.ShapeDtypeStruct((nh, wsp, cc), out_dtype),
        compiler_params=_cparams(("parallel",)),
    )(y3, a3, c3, resid)


# --------------------------- BN stat folding (JAX) -------------------------- #

def _bn_affine(psum, pssq, gamma, beta, count):
    """Fold training-mode BN (batch mean, biased var, eps=1e-5) + affine into
    y*a + c.  psum/pssq are (tiles, 1, C) f32 partials from the kernels."""
    s = psum.reshape(-1, psum.shape[-1]).sum(axis=0)
    ss = pssq.reshape(-1, pssq.shape[-1]).sum(axis=0)
    mu = s / count
    var = jnp.maximum(ss / count - mu * mu, 0.0)
    inv = lax.rsqrt(var + EPS)
    a = gamma * inv
    c = beta - mu * a
    return a.reshape(1, 1, -1), c.reshape(1, 1, -1)


# ------------------------------ Forward glue -------------------------------- #

def bottleneck_forward(x_nchw, w1, g1, b1, w2, g2, b2, w3, g3, b3,
                       *, compute_dtype=jnp.bfloat16, row_cap=1024):
    """Bottleneck.forward (training-mode BN, stride=1, downsample=None).
    PyTorch weight layouts: w1:(P,Cin,1,1)  w2:(P,P,3,3)  w3:(4P,P,1,1)."""
    n, cin, h, wsp = x_nchw.shape
    p = w1.shape[0]
    cexp = p * 4
    assert cin == cexp, "stride=1 / downsample=None path requires inplanes == planes*4"

    cin_p = _round_up(cin, LANE)
    cmid_p = _round_up(p, LANE)
    cout_p = _round_up(cexp, LANE)       # == cin_p
    nh = n * h
    m = n * h * wsp

    vmem = _vmem_limit_bytes()
    rb = _pick_rb(nh, wsp, max(cin_p, cmid_p, cout_p), vmem, row_cap)

    def pad_last(arr, tgt):
        return jnp.pad(arr, [(0, 0)] * (arr.ndim - 1) + [(0, tgt - arr.shape[-1])])

    def pad2(mat, r, c):
        return jnp.pad(mat, ((0, r - mat.shape[0]), (0, c - mat.shape[1])))

    # NCHW -> NHWC -> (N*H, W, C), lane-dense padded channels.
    # TODO(synk): a caller already holding NHWC activations can skip this transpose.
    x_nhwc = jnp.transpose(x_nchw, (0, 2, 3, 1)).astype(jnp.float32)
    x3d = pad_last(x_nhwc, cin_p).reshape(nh, wsp, cin_p)

    w1m = pad2(w1[:, :, 0, 0].T, cin_p, cmid_p).astype(compute_dtype)       # (Cin_p,Cm_p)
    w2m = jnp.pad(jnp.transpose(w2, (2, 3, 1, 0)),
                  ((0, 0), (0, 0), (0, cmid_p - p), (0, cmid_p - p)))
    w2m = w2m.reshape(9, cmid_p, cmid_p).astype(compute_dtype)              # (9,Cm_p,Cm_p)
    w3m = pad2(w3[:, :, 0, 0].T, cmid_p, cout_p).astype(compute_dtype)      # (Cm_p,Co_p)

    g1p = pad_last(g1.astype(jnp.float32), cmid_p)
    b1p = pad_last(b1.astype(jnp.float32), cmid_p)
    g2p = pad_last(g2.astype(jnp.float32), cmid_p)
    b2p = pad_last(b2.astype(jnp.float32), cmid_p)
    g3p = pad_last(g3.astype(jnp.float32), cout_p)
    b3p = pad_last(b3.astype(jnp.float32), cout_p)

    # A) conv1 (1x1) + partial batch stats
    y1, ps1, pq1 = _conv1x1_with_stats(x3d, w1m, compute_dtype, rb)
    a1, c1 = _bn_affine(ps1, pq1, g1p, b1p, m)

    # B) bn1+relu fused into conv2 (3x3, pad=1; halo built in VMEM) + stats
    y2, ps2, pq2 = _bn_relu_conv3x3_with_stats(y1, a1, c1, w2m, n, h, wsp, compute_dtype)
    a2, c2 = _bn_affine(ps2, pq2, g2p, b2p, m)

    # C) bn2+relu fused into conv3 (1x1) + stats
    y3, ps3, pq3 = _bn_relu_conv1x1_with_stats(y2, a2, c2, w3m, compute_dtype, rb)
    a3, c3 = _bn_affine(ps3, pq3, g3p, b3p, m)

    # D) bn3 + residual add + relu
    out3d = _bn_add_relu(y3, a3, c3, x3d, rb, jnp.float32)

    # TODO(synk): if the caller accepts NHWC and planes >= 32 (Cexp multiple of
    # 128), the channel slice and NCHW transpose below can be skipped entirely.
    out = out3d.reshape(n, h, wsp, cout_p)[..., :cexp]
    return jnp.transpose(out, (0, 3, 1, 2))


# ------------------------- pure-JAX reference check ------------------------- #

def _ref_forward(x_nchw, w1, g1, b1, w2, g2, b2, w3, g3, b3, *, compute_dtype):
    """Reference mirroring the kernel's dtype policy: MXU inputs and stored
    intermediates in compute_dtype, f32 accumulation, f32 batch stats."""
    x = jnp.transpose(x_nchw, (0, 2, 3, 1)).astype(jnp.float32)
    dn = ('NHWC', 'HWIO', 'NHWC')

    def conv(inp, wgt, padding):
        return lax.conv_general_dilated(
            inp.astype(compute_dtype),
            jnp.transpose(wgt, (2, 3, 1, 0)).astype(compute_dtype),
            (1, 1), padding, dimension_numbers=dn,
            preferred_element_type=jnp.float32)

    def bn(y, g, b):
        mu = jnp.mean(y, axis=(0, 1, 2), keepdims=True)
        var = jnp.mean(jnp.square(y - mu), axis=(0, 1, 2), keepdims=True)
        a = g * lax.rsqrt(var + EPS)
        c = b - mu * a
        yq = y.astype(compute_dtype).astype(jnp.float32)   # storage-precision y
        return yq * a + c

    o = jnp.maximum(bn(conv(x, w1, 'VALID'), g1, b1), 0.0)
    o = jnp.maximum(bn(conv(o, w2, ((1, 1), (1, 1))), g2, b2), 0.0)
    o = jnp.maximum(bn(conv(o, w3, 'VALID'), g3, b3) + x, 0.0)
    return jnp.transpose(o, (0, 3, 1, 2))


# ---------------------------------- main ------------------------------------ #

if __name__ == "__main__":
    key = jax.random.PRNGKey(0)
    ks = jax.random.split(key, 10)

    N, H, W = 2, 16, 16
    planes = 4
    inplanes = planes * 4        # downsample=None / stride=1 path

    x = jax.random.normal(ks[0], (N, inplanes, H, W), jnp.float32)
    w1 = jax.random.normal(ks[1], (planes, inplanes, 1, 1), jnp.float32) * 0.1
    g1 = jax.random.uniform(ks[2], (planes,), minval=0.5, maxval=1.5)
    b1 = jax.random.normal(ks[3], (planes,), jnp.float32) * 0.1
    w2 = jax.random.normal(ks[4], (planes, planes, 3, 3), jnp.float32) * 0.1
    g2 = jax.random.uniform(ks[5], (planes,), minval=0.5, maxval=1.5)
    b2 = jax.random.normal(ks[6], (planes,), jnp.float32) * 0.1
    w3 = jax.random.normal(ks[7], (planes * 4, planes, 1, 1), jnp.float32) * 0.1
    g3 = jax.random.uniform(ks[8], (planes * 4,), minval=0.5, maxval=1.5)
    b3 = jax.random.normal(ks[9], (planes * 4,), jnp.float32) * 0.1

    args = (x, w1, g1, b1, w2, g2, b2, w3, g3, b3)

    # Default (performance) config: bf16 MXU inputs + bf16 stored intermediates,
    # f32 accumulation / BN statistics.
    fwd_bf16 = jax.jit(functools.partial(bottleneck_forward, compute_dtype=jnp.bfloat16))
    out = fwd_bf16(*args)
    jax.block_until_ready(out)
    ref = _ref_forward(*args, compute_dtype=jnp.bfloat16)
    assert out.shape == (N, planes * 4, H, W), out.shape
    diff = float(jnp.max(jnp.abs(out - ref)))
    assert diff < 5e-2, diff

    # Full-precision config reproduces the module's exact f32 forward.
    fwd_f32 = jax.jit(functools.partial(bottleneck_forward, compute_dtype=jnp.float32))
    out32 = fwd_f32(*args)
    jax.block_until_ready(out32)
    ref32 = _ref_forward(*args, compute_dtype=jnp.float32)
    diff32 = float(jnp.max(jnp.abs(out32 - ref32)))
    assert diff32 < 1e-3, diff32

    print("KERNEL_OK")
</pallas_src>

<mosaic_0001>
module attributes {stable_mosaic.version = 11 : i64} {
  func.func @_conv1x1_stats_kernel(%arg0: i32, %arg1: memref<32x16x128xf32, #tpu.memory_space<vmem>>, %arg2: memref<128x128xbf16, #tpu.memory_space<vmem>>, %arg3: memref<32x16x128xbf16, #tpu.memory_space<vmem>>, %arg4: memref<1x1x128xf32, #tpu.memory_space<vmem>>, %arg5: memref<1x1x128xf32, #tpu.memory_space<vmem>>) attributes {dimension_semantics = [#tpu.dimension_semantics<parallel>], iteration_bounds = array<i64: 1>, scalar_prefetch = 0 : i64, scratch_operands = 0 : i64, tpu.core_type = #tpu.core_type<tc>, window_params = [{transform_indices = @transform_0, window_bounds = array<i64: 32, 16, 128>}, {pipeline_mode = #tpu.pipeline_mode<synchronous>, transform_indices = @transform_1, window_bounds = array<i64: 128, 128>}, {transform_indices = @transform_2, window_bounds = array<i64: 32, 16, 128>}, {transform_indices = @transform_3, window_bounds = array<i64: 1, 1, 128>}, {transform_indices = @transform_4, window_bounds = array<i64: 1, 1, 128>}]} {
    %c0 = arith.constant 0 : index
    %c0_0 = arith.constant 0 : index
    %c0_1 = arith.constant 0 : index
    %0 = vector.load %arg1[%c0, %c0_0, %c0_1] : memref<32x16x128xf32, #tpu.memory_space<vmem>>, vector<32x16x128xf32>
    %1 = arith.truncf %0 : vector<32x16x128xf32> to vector<32x16x128xbf16>
    %2 = vector.shape_cast %1 : vector<32x16x128xbf16> to vector<512x128xbf16>
    %c0_2 = arith.constant 0 : index
    %c0_3 = arith.constant 0 : index
    %3 = vector.load %arg2[%c0_2, %c0_3] : memref<128x128xbf16, #tpu.memory_space<vmem>>, vector<128x128xbf16>
    %cst = arith.constant dense<0.000000e+00> : vector<512x128xf32>
    %4 = tpu.matmul %2, %3, %cst {dimension_numbers = #tpu.dot_dimension_numbers<[1], [0], [0], [1], [0, 0, 1, 1], [], []>} : vector<512x128xbf16>, vector<128x128xbf16>, vector<512x128xf32> -> vector<512x128xf32>
    %5 = vector.shape_cast %4 : vector<512x128xf32> to vector<32x16x128xf32>
    %6 = arith.truncf %5 : vector<32x16x128xf32> to vector<32x16x128xbf16>
    %c0_4 = arith.constant 0 : index
    %c0_5 = arith.constant 0 : index
    %c0_6 = arith.constant 0 : index
    %7 = vector.load %arg3[%c0_4, %c0_5, %c0_6] : memref<32x16x128xbf16, #tpu.memory_space<vmem>>, vector<32x16x128xbf16>
    tpu.vector_store %arg3[%c0_4, %c0_5, %c0_6], %6 {strides = array<i32>} : memref<32x16x128xbf16, #tpu.memory_space<vmem>>, vector<32x16x128xbf16>,
    %cst_7 = arith.constant dense<0.000000e+00> : vector<128xf32>
    %8 = vector.multi_reduction <add>, %4, %cst_7 [0] : vector<512x128xf32> to vector<128xf32>
    %9 = vector.shape_cast %8 : vector<128xf32> to vector<1x128xf32>
    %10 = vector.shape_cast %9 : vector<1x128xf32> to vector<1x1x128xf32>
    %c0_8 = arith.constant 0 : index
    %c0_9 = arith.constant 0 : index
    %c0_10 = arith.constant 0 : index
    %11 = vector.load %arg4[%c0_8, %c0_9, %c0_10] : memref<1x1x128xf32, #tpu.memory_space<vmem>>, vector<1x1x128xf32>
    tpu.vector_store %arg4[%c0_8, %c0_9, %c0_10], %10 {strides = array<i32>} : memref<1x1x128xf32, #tpu.memory_space<vmem>>, vector<1x1x128xf32>,
    %12 = arith.mulf %4, %4 : vector<512x128xf32>
    %cst_11 = arith.constant dense<0.000000e+00> : vector<128xf32>
    %13 = vector.multi_reduction <add>, %12, %cst_11 [0] : vector<512x128xf32> to vector<128xf32>
    %14 = vector.shape_cast %13 : vector<128xf32> to vector<1x128xf32>
    %15 = vector.shape_cast %14 : vector<1x128xf32> to vector<1x1x128xf32>
    %c0_12 = arith.constant 0 : index
    %c0_13 = arith.constant 0 : index
    %c0_14 = arith.constant 0 : index
    %16 = vector.load %arg5[%c0_12, %c0_13, %c0_14] : memref<1x1x128xf32, #tpu.memory_space<vmem>>, vector<1x1x128xf32>
    tpu.vector_store %arg5[%c0_12, %c0_13, %c0_14], %15 {strides = array<i32>} : memref<1x1x128xf32, #tpu.memory_space<vmem>>, vector<1x1x128xf32>,
    return
  }
  func.func @transform_0(%arg0: i32) -> (i32, i32, i32) {
    %c0_i32 = arith.constant 0 : i32
    %c0_i32_0 = arith.constant 0 : i32
    %c0_i32_1 = arith.constant 0 : i32
    return %arg0, %c0_i32, %c0_i32_0 : i32, i32, i32
  }
  func.func @transform_1(%arg0: i32) -> (i32, i32) {
    %c0_i32 = arith.constant 0 : i32
    %c0_i32_0 = arith.constant 0 : i32
    %c0_i32_1 = arith.constant 0 : i32
    return %c0_i32, %c0_i32_0 : i32, i32
  }
  func.func @transform_2(%arg0: i32) -> (i32, i32, i32) {
    %c0_i32 = arith.constant 0 : i32
    %c0_i32_0 = arith.constant 0 : i32
    %c0_i32_1 = arith.constant 0 : i32
    return %arg0, %c0_i32, %c0_i32_0 : i32, i32, i32
  }
  func.func @transform_3(%arg0: i32) -> (i32, i32, i32) {
    %c0_i32 = arith.constant 0 : i32
    %c0_i32_0 = arith.constant 0 : i32
    %c0_i32_1 = arith.constant 0 : i32
    return %arg0, %c0_i32, %c0_i32_0 : i32, i32, i32
  }
  func.func @transform_4(%arg0: i32) -> (i32, i32, i32) {
    %c0_i32 = arith.constant 0 : i32
    %c0_i32_0 = arith.constant 0 : i32
    %c0_i32_1 = arith.constant 0 : i32
    return %arg0, %c0_i32, %c0_i32_0 : i32, i32, i32
  }
}

module attributes {stable_mosaic.version = 11 : i64} {
  func.func @_bn_relu_conv3x3_stats_kernel(%arg0: i32, %arg1: memref<16x16x128xbf16, #tpu.memory_space<vmem>>, %arg2: memref<1x1x128xf32, #tpu.memory_space<vmem>>, %arg3: memref<1x1x128xf32, #tpu.memory_space<vmem>>, %arg4: memref<9x128x128xbf16, #tpu.memory_space<vmem>>, %arg5: memref<16x16x128xbf16, #tpu.memory_space<vmem>>, %arg6: memref<1x1x128xf32, #tpu.memory_space<vmem>>, %arg7: memref<1x1x128xf32, #tpu.memory_space<vmem>>, %arg8: memref<18x18x128xbf16, #tpu.memory_space<vmem>>, %arg9: memref<256x128xf32, #tpu.memory_space<vmem>>) attributes {dimension_semantics = [#tpu.dimension_semantics<parallel>], iteration_bounds = array<i64: 2>, scalar_prefetch = 0 : i64, scratch_operands = 2 : i64, tpu.core_type = #tpu.core_type<tc>, window_params = [{transform_indices = @transform_0, window_bounds = array<i64: 16, 16, 128>}, {pipeline_mode = #tpu.pipeline_mode<synchronous>, transform_indices = @transform_1, window_bounds = array<i64: 1, 1, 128>}, {pipeline_mode = #tpu.pipeline_mode<synchronous>, transform_indices = @transform_2, window_bounds = array<i64: 1, 1, 128>}, {pipeline_mode = #tpu.pipeline_mode<synchronous>, transform_indices = @transform_3, window_bounds = array<i64: 9, 128, 128>}, {transform_indices = @transform_4, window_bounds = array<i64: 16, 16, 128>}, {transform_indices = @transform_5, window_bounds = array<i64: 1, 1, 128>}, {transform_indices = @transform_6, window_bounds = array<i64: 1, 1, 128>}]} {
    %c0 = arith.constant 0 : index
    %c0_0 = arith.constant 0 : index
    %c0_1 = arith.constant 0 : index
    %0 = vector.load %arg1[%c0, %c0_0, %c0_1] : memref<16x16x128xbf16, #tpu.memory_space<vmem>>, vector<16x16x128xbf16>
    %1 = arith.extf %0 : vector<16x16x128xbf16> to vector<16x16x128xf32>
    %c0_2 = arith.constant 0 : index
    %c0_3 = arith.constant 0 : index
    %c0_4 = arith.constant 0 : index
    %2 = vector.load %arg2[%c0_2, %c0_3, %c0_4] : memref<1x1x128xf32, #tpu.memory_space<vmem>>, vector<1x1x128xf32>
    %3 = vector.broadcast %2 : vector<1x1x128xf32> to vector<16x16x128xf32>
    %4 = arith.mulf %1, %3 : vector<16x16x128xf32>
    %c0_5 = arith.constant 0 : index
    %c0_6 = arith.constant 0 : index
    %c0_7 = arith.constant 0 : index
    %5 = vector.load %arg3[%c0_5, %c0_6, %c0_7] : memref<1x1x128xf32, #tpu.memory_space<vmem>>, vector<1x1x128xf32>
    %6 = vector.broadcast %5 : vector<1x1x128xf32> to vector<16x16x128xf32>
    %7 = arith.addf %4, %6 : vector<16x16x128xf32>
    %cst = arith.constant 0.000000e+00 : f32
    %8 = vector.broadcast %cst : f32 to vector<16x16x128xf32>
    %9 = arith.maximumf %7, %8 : vector<16x16x128xf32>
    %cst_8 = arith.constant 0.000000e+00 : bf16
    %10 = vector.broadcast %cst_8 : bf16 to vector<18x18x128xbf16>
    %c0_9 = arith.constant 0 : index
    %c0_10 = arith.constant 0 : index
    %c0_11 = arith.constant 0 : index
    %11 = vector.load %arg8[%c0_9, %c0_10, %c0_11] : memref<18x18x128xbf16, #tpu.memory_space<vmem>>, vector<18x18x128xbf16>
    tpu.vector_store %arg8[%c0_9, %c0_10, %c0_11], %10 {strides = array<i32>} : memref<18x18x128xbf16, #tpu.memory_space<vmem>>, vector<18x18x128xbf16>,
    %12 = arith.truncf %9 : vector<16x16x128xf32> to vector<16x16x128xbf16>
    %c1 = arith.constant 1 : index
    %c1_12 = arith.constant 1 : index
    %c0_13 = arith.constant 0 : index
    %13 = vector.load %arg8[%c1, %c1_12, %c0_13] : memref<18x18x128xbf16, #tpu.memory_space<vmem>>, vector<16x16x128xbf16>
    tpu.vector_store %arg8[%c1, %c1_12, %c0_13], %12 {strides = array<i32>} : memref<18x18x128xbf16, #tpu.memory_space<vmem>>, vector<16x16x128xbf16>,
    %cst_14 = arith.constant 0.000000e+00 : f32
    %14 = vector.broadcast %cst_14 : f32 to vector<256x128xf32>
    %c0_15 = arith.constant 0 : index
    %c0_16 = arith.constant 0 : index
    %15 = vector.load %arg9[%c0_15, %c0_16] : memref<256x128xf32, #tpu.memory_space<vmem>>, vector<256x128xf32>
    tpu.vector_store %arg9[%c0_15, %c0_16], %14 {strides = array<i32>} : memref<256x128xf32, #tpu.memory_space<vmem>>, vector<256x128xf32>,
    %c0_17 = arith.constant 0 : index
    %c0_18 = arith.constant 0 : index
    %c0_19 = arith.constant 0 : index
    %16 = vector.load %arg8[%c0_17, %c0_18, %c0_19] : memref<18x18x128xbf16, #tpu.memory_space<vmem>>, vector<16x18x128xbf16>
    %17 = vector.extract_strided_slice %16 {offsets = [0, 0, 0], sizes = [16, 16, 128], strides = [1, 1, 1]} : vector<16x18x128xbf16> to vector<16x16x128xbf16>
    %18 = vector.shape_cast %17 : vector<16x16x128xbf16> to vector<256x128xbf16>
    %c0_20 = arith.constant 0 : index
    %c0_21 = arith.constant 0 : index
    %19 = vector.load %arg9[%c0_20, %c0_21] : memref<256x128xf32, #tpu.memory_space<vmem>>, vector<256x128xf32>
    %c0_22 = arith.constant 0 : index
    %c0_23 = arith.constant 0 : index
    %c0_24 = arith.constant 0 : index
    %20 = vector.load %arg4[%c0_22, %c0_23, %c0_24] : memref<9x128x128xbf16, #tpu.memory_space<vmem>>, vector<1x128x128xbf16>
    %21 = vector.shape_cast %20 : vector<1x128x128xbf16> to vector<128x128xbf16>
    %cst_25 = arith.constant dense<0.000000e+00> : vector<256x128xf32>
    %22 = tpu.matmul %18, %21, %cst_25 {dimension_numbers = #tpu.dot_dimension_numbers<[1], [0], [0], [1], [0, 0, 1, 1], [], []>} : vector<256x128xbf16>, vector<128x128xbf16>, vector<256x128xf32> -> vector<256x128xf32>
    %23 = arith.addf %19, %22 : vector<256x128xf32>
    %c0_26 = arith.constant 0 : index
    %c0_27 = arith.constant 0 : index
    %24 = vector.load %arg9[%c0_26, %c0_27] : memref<256x128xf32, #tpu.memory_space<vmem>>, vector<256x128xf32>
    tpu.vector_store %arg9[%c0_26, %c0_27], %23 {strides = array<i32>} : memref<256x128xf32, #tpu.memory_space<vmem>>, vector<256x128xf32>,
    %25 = vector.extract_strided_slice %16 {offsets = [0, 1, 0], sizes = [16, 16, 128], strides = [1, 1, 1]} : vector<16x18x128xbf16> to vector<16x16x128xbf16>
    %26 = vector.shape_cast %25 : vector<16x16x128xbf16> to vector<256x128xbf16>
    %c0_28 = arith.constant 0 : index
    %c0_29 = arith.constant 0 : index
    %27 = vector.load %arg9[%c0_28, %c0_29] : memref<256x128xf32, #tpu.memory_space<vmem>>, vector<256x128xf32>
    %c1_30 = arith.constant 1 : index
    %c0_31 = arith.constant 0 : index
    %c0_32 = arith.constant 0 : index
    %28 = vector.load %arg4[%c1_30, %c0_31, %c0_32] : memref<9x128x128xbf16, #tpu.memory_space<vmem>>, vector<1x128x128xbf16>
    %29 = vector.shape_cast %28 : vector<1x128x128xbf16> to vector<128x128xbf16>
    %cst_33 = arith.constant dense<0.000000e+00> : vector<256x128xf32>
    %30 = tpu.matmul %26, %29, %cst_33 {dimension_numbers = #tpu.dot_dimension_numbers<[1], [0], [0], [1], [0, 0, 1, 1], [], []>} : vector<256x128xbf16>, vector<128x128xbf16>, vector<256x128xf32> -> vector<256x128xf32>
    %31 = arith.addf %27, %30 : vector<256x128xf32>
    %c0_34 = arith.constant 0 : index
    %c0_35 = arith.constant 0 : index
    %32 = vector.load %arg9[%c0_34, %c0_35] : memref<256x128xf32, #tpu.memory_space<vmem>>, vector<256x128xf32>
    tpu.vector_store %arg9[%c0_34, %c0_35], %31 {strides = array<i32>} : memref<256x128xf32, #tpu.memory_space<vmem>>, vector<256x128xf32>,
    %33 = vector.extract_strided_slice %16 {offsets = [0, 2, 0], sizes = [16, 16, 128], strides = [1, 1, 1]} : vector<16x18x128xbf16> to vector<16x16x128xbf16>
    %34 = vector.shape_cast %33 : vector<16x16x128xbf16> to vector<256x128xbf16>
    %c0_36 = arith.constant 0 : index
    %c0_37 = arith.constant 0 : index
    %35 = vector.load %arg9[%c0_36, %c0_37] : memref<256x128xf32, #tpu.memory_space<vmem>>, vector<256x128xf32>
    %c2 = arith.constant 2 : index
    %c0_38 = arith.constant 0 : index
    %c0_39 = arith.constant 0 : index
    %36 = vector.load %arg4[%c2, %c0_38, %c0_39] : memref<9x128x128xbf16, #tpu.memory_space<vmem>>, vector<1x128x128xbf16>
    %37 = vector.shape_cast %36 : vector<1x128x128xbf16> to vector<128x128xbf16>
    %cst_40 = arith.constant dense<0.000000e+00> : vector<256x128xf32>
    %38 = tpu.matmul %34, %37, %cst_40 {dimension_numbers = #tpu.dot_dimension_numbers<[1], [0], [0], [1], [0, 0, 1, 1], [], []>} : vector<256x128xbf16>, vector<128x128xbf16>, vector<256x128xf32> -> vector<256x128xf32>
    %39 = arith.addf %35, %38 : vector<256x128xf32>
    %c0_41 = arith.constant 0 : index
    %c0_42 = arith.constant 0 : index
    %40 = vector.load %arg9[%c0_41, %c0_42] : memref<256x128xf32, #tpu.memory_space<vmem>>, vector<256x128xf32>
    tpu.vector_store %arg9[%c0_41, %c0_42], %39 {strides = array<i32>} : memref<256x128xf32, #tpu.memory_space<vmem>>, vector<256x128xf32>,
    %c1_43 = arith.constant 1 : index
    %c0_44 = arith.constant 0 : index
    %c0_45 = arith.constant 0 : index
    %41 = vector.load %arg8[%c1_43, %c0_44, %c0_45] : memref<18x18x128xbf16, #tpu.memory_space<vmem>>, vector<16x18x128xbf16>
    %42 = vector.extract_strided_slice %41 {offsets = [0, 0, 0], sizes = [16, 16, 128], strides = [1, 1, 1]} : vector<16x18x128xbf16> to vector<16x16x128xbf16>
    %43 = vector.shape_cast %42 : vector<16x16x128xbf16> to vector<256x128xbf16>
    %c0_46 = arith.constant 0 : index
    %c0_47 = arith.constant 0 : index
    %44 = vector.load %arg9[%c0_46, %c0_47] : memref<256x128xf32, #tpu.memory_space<vmem>>, vector<256x128xf32>
    %c3 = arith.constant 3 : index
    %c0_48 = arith.constant 0 : index
    %c0_49 = arith.constant 0 : index
    %45 = vector.load %arg4[%c3, %c0_48, %c0_49] : memref<9x128x128xbf16, #tpu.memory_space<vmem>>, vector<1x128x128xbf16>
    %46 = vector.shape_cast %45 : vector<1x128x128xbf16> to vector<128x128xbf16>
    %cst_50 = arith.constant dense<0.000000e+00> : vector<256x128xf32>
    %47 = tpu.matmul %43, %46, %cst_50 {dimension_numbers = #tpu.dot_dimension_numbers<[1], [0], [0], [1], [0, 0, 1, 1], [], []>} : vector<256x128xbf16>, vector<128x128xbf16>, vector<256x128xf32> -> vector<256x128xf32>
    %48 = arith.addf %44, %47 : vector<256x128xf32>
    %c0_51 = arith.constant 0 : index
    %c0_52 = arith.constant 0 : index
    %49 = vector.load %arg9[%c0_51, %c0_52] : memref<256x128xf32, #tpu.memory_space<vmem>>, vector<256x128xf32>
    tpu.vector_store %arg9[%c0_51, %c0_52], %48 {strides = array<i32>} : memref<256x128xf32, #tpu.memory_space<vmem>>, vector<256x128xf32>,
    %50 = vector.extract_strided_slice %41 {offsets = [0, 1, 0], sizes = [16, 16, 128], strides = [1, 1, 1]} : vector<16x18x128xbf16> to vector<16x16x128xbf16>
    %51 = vector.shape_cast %50 : vector<16x16x128xbf16> to vector<256x128xbf16>
    %c0_53 = arith.constant 0 : index
    %c0_54 = arith.constant 0 : index
    %52 = vector.load %arg9[%c0_53, %c0_54] : memref<256x128xf32, #tpu.memory_space<vmem>>, vector<256x128xf32>
    %c4 = arith.constant 4 : index
    %c0_55 = arith.constant 0 : index
    %c0_56 = arith.constant 0 : index
    %53 = vector.load %arg4[%c4, %c0_55, %c0_56] : memref<9x128x128xbf16, #tpu.memory_space<vmem>>, vector<1x128x128xbf16>
    %54 = vector.shape_cast %53 : vector<1x128x128xbf16> to vector<128x128xbf16>
    %cst_57 = arith.constant dense<0.000000e+00> : vector<256x128xf32>
    %55 = tpu.matmul %51, %54, %cst_57 {dimension_numbers = #tpu.dot_dimension_numbers<[1], [0], [0], [1], [0, 0, 1, 1], [], []>} : vector<256x128xbf16>, vector<128x128xbf16>, vector<256x128xf32> -> vector<256x128xf32>
    %56 = arith.addf %52, %55 : vector<256x128xf32>
    %c0_58 = arith.constant 0 : index
    %c0_59 = arith.constant 0 : index
    %57 = vector.load %arg9[%c0_58, %c0_59] : memref<256x128xf32, #tpu.memory_space<vmem>>, vector<256x128xf32>
    tpu.vector_store %arg9[%c0_58, %c0_59], %56 {strides = array<i32>} : memref<256x128xf32, #tpu.memory_space<vmem>>, vector<256x128xf32>,
    %58 = vector.extract_strided_slice %41 {offsets = [0, 2, 0], sizes = [16, 16, 128], strides = [1, 1, 1]} : vector<16x18x128xbf16> to vector<16x16x128xbf16>
    %59 = vector.shape_cast %58 : vector<16x16x128xbf16> to vector<256x128xbf16>
    %c0_60 = arith.constant 0 : index
    %c0_61 = arith.constant 0 : index
    %60 = vector.load %arg9[%c0_60, %c0_61] : memref<256x128xf32, #tpu.memory_space<vmem>>, vector<256x128xf32>
    %c5 = arith.constant 5 : index
    %c0_62 = arith.constant 0 : index
    %c0_63 = arith.constant 0 : index
    %61 = vector.load %arg4[%c5, %c0_62, %c0_63] : memref<9x128x128xbf16, #tpu.memory_space<vmem>>, vector<1x128x128xbf16>
    %62 = vector.shape_cast %61 : vector<1x128x128xbf16> to vector<128x128xbf16>
    %cst_64 = arith.constant dense<0.000000e+00> : vector<256x128xf32>
    %63 = tpu.matmul %59, %62, %cst_64 {dimension_numbers = #tpu.dot_dimension_numbers<[1], [0], [0], [1], [0, 0, 1, 1], [], []>} : vector<256x128xbf16>, vector<128x128xbf16>, vector<256x128xf32> -> vector<256x128xf32>
    %64 = arith.addf %60, %63 : vector<256x128xf32>
    %c0_65 = arith.constant 0 : index
    %c0_66 = arith.constant 0 : index
    %65 = vector.load %arg9[%c0_65, %c0_66] : memref<256x128xf32, #tpu.memory_space<vmem>>, vector<256x128xf32>
    tpu.vector_store %arg9[%c0_65, %c0_66], %64 {strides = array<i32>} : memref<256x128xf32, #tpu.memory_space<vmem>>, vector<256x128xf32>,
    %c2_67 = arith.constant 2 : index
    %c0_68 = arith.constant 0 : index
    %c0_69 = arith.constant 0 : index
    %66 = vector.load %arg8[%c2_67, %c0_68, %c0_69] : memref<18x18x128xbf16, #tpu.memory_space<vmem>>, vector<16x18x128xbf16>
    %67 = vector.extract_strided_slice %66 {offsets = [0, 0, 0], sizes = [16, 16, 128], strides = [1, 1, 1]} : vector<16x18x128xbf16> to vector<16x16x128xbf16>
    %68 = vector.shape_cast %67 : vector<16x16x128xbf16> to vector<256x128xbf16>
    %c0_70 = arith.constant 0 : index
    %c0_71 = arith.constant 0 : index
    %69 = vector.load %arg9[%c0_70, %c0_71] : memref<256x128xf32, #tpu.memory_space<vmem>>, vector<256x128xf32>
    %c6 = arith.constant 6 : index
    %c0_72 = arith.constant 0 : index
    %c0_73 = arith.constant 0 : index
    %70 = vector.load %arg4[%c6, %c0_72, %c0_73] : memref<9x128x128xbf16, #tpu.memory_space<vmem>>, vector<1x128x128xbf16>
    %71 = vector.shape_cast %70 : vector<1x128x128xbf16> to vector<128x128xbf16>
    %cst_74 = arith.constant dense<0.000000e+00> : vector<256x128xf32>
    %72 = tpu.matmul %68, %71, %cst_74 {dimension_numbers = #tpu.dot_dimension_numbers<[1], [0], [0], [1], [0, 0, 1, 1], [], []>} : vector<256x128xbf16>, vector<128x128xbf16>, vector<256x128xf32> -> vector<256x128xf32>
    %73 = arith.addf %69, %72 : vector<256x128xf32>
    %c0_75 = arith.constant 0 : index
    %c0_76 = arith.constant 0 : index
    %74 = vector.load %arg9[%c0_75, %c0_76] : memref<256x128xf32, #tpu.memory_space<vmem>>, vector<256x128xf32>
    tpu.vector_store %arg9[%c0_75, %c0_76], %73 {strides = array<i32>} : memref<256x128xf32, #tpu.memory_space<vmem>>, vector<256x128xf32>,
    %75 = vector.extract_strided_slice %66 {offsets = [0, 1, 0], sizes = [16, 16, 128], strides = [1, 1, 1]} : vector<16x18x128xbf16> to vector<16x16x128xbf16>
    %76 = vector.shape_cast %75 : vector<16x16x128xbf16> to vector<256x128xbf16>
    %c0_77 = arith.constant 0 : index
    %c0_78 = arith.constant 0 : index
    %77 = vector.load %arg9[%c0_77, %c0_78] : memref<256x128xf32, #tpu.memory_space<vmem>>, vector<256x128xf32>
    %c7 = arith.constant 7 : index
    %c0_79 = arith.constant 0 : index
    %c0_80 = arith.constant 0 : index
    %78 = vector.load %arg4[%c7, %c0_79, %c0_80] : memref<9x128x128xbf16, #tpu.memory_space<vmem>>, vector<1x128x128xbf16>
    %79 = vector.shape_cast %78 : vector<1x128x128xbf16> to vector<128x128xbf16>
    %cst_81 = arith.constant dense<0.000000e+00> : vector<256x128xf32>
    %80 = tpu.matmul %76, %79, %cst_81 {dimension_numbers = #tpu.dot_dimension_numbers<[1], [0], [0], [1], [0, 0, 1, 1], [], []>} : vector<256x128xbf16>, vector<128x128xbf16>, vector<256x128xf32> -> vector<256x128xf32>
    %81 = arith.addf %77, %80 : vector<256x128xf32>
    %c0_82 = arith.constant 0 : index
    %c0_83 = arith.constant 0 : index
    %82 = vector.load %arg9[%c0_82, %c0_83] : memref<256x128xf32, #tpu.memory_space<vmem>>, vector<256x128xf32>
    tpu.vector_store %arg9[%c0_82, %c0_83], %81 {strides = array<i32>} : memref<256x128xf32, #tpu.memory_space<vmem>>, vector<256x128xf32>,
    %83 = vector.extract_strided_slice %66 {offsets = [0, 2, 0], sizes = [16, 16, 128], strides = [1, 1, 1]} : vector<16x18x128xbf16> to vector<16x16x128xbf16>
    %84 = vector.shape_cast %83 : vector<16x16x128xbf16> to vector<256x128xbf16>
    %c0_84 = arith.constant 0 : index
    %c0_85 = arith.constant 0 : index
    %85 = vector.load %arg9[%c0_84, %c0_85] : memref<256x128xf32, #tpu.memory_space<vmem>>, vector<256x128xf32>
    %c8 = arith.constant 8 : index
    %c0_86 = arith.constant 0 : index
    %c0_87 = arith.constant 0 : index
    %86 = vector.load %arg4[%c8, %c0_86, %c0_87] : memref<9x128x128xbf16, #tpu.memory_space<vmem>>, vector<1x128x128xbf16>
    %87 = vector.shape_cast %86 : vector<1x128x128xbf16> to vector<128x128xbf16>
    %cst_88 = arith.constant dense<0.000000e+00> : vector<256x128xf32>
    %88 = tpu.matmul %84, %87, %cst_88 {dimension_numbers = #tpu.dot_dimension_numbers<[1], [0], [0], [1], [0, 0, 1, 1], [], []>} : vector<256x128xbf16>, vector<128x128xbf16>, vector<256x128xf32> -> vector<256x128xf32>
    %89 = arith.addf %85, %88 : vector<256x128xf32>
    %c0_89 = arith.constant 0 : index
    %c0_90 = arith.constant 0 : index
    %90 = vector.load %arg9[%c0_89, %c0_90] : memref<256x128xf32, #tpu.memory_space<vmem>>, vector<256x128xf32>
    tpu.vector_store %arg9[%c0_89, %c0_90], %89 {strides = array<i32>} : memref<256x128xf32, #tpu.memory_space<vmem>>, vector<256x128xf32>,
    %c0_91 = arith.constant 0 : index
    %c0_92 = arith.constant 0 : index
    %91 = vector.load %arg9[%c0_91, %c0_92] : memref<256x128xf32, #tpu.memory_space<vmem>>, vector<256x128xf32>
    %92 = vector.shape_cast %91 : vector<256x128xf32> to vector<16x16x128xf32>
    %93 = arith.truncf %92 : vector<16x16x128xf32> to vector<16x16x128xbf16>
    %c0_93 = arith.constant 0 : index
    %c0_94 = arith.constant 0 : index
    %c0_95 = arith.constant 0 : index
    %94 = vector.load %arg5[%c0_93, %c0_94, %c0_95] : memref<16x16x128xbf16, #tpu.memory_space<vmem>>, vector<16x16x128xbf16>
    tpu.vector_store %arg5[%c0_93, %c0_94, %c0_95], %93 {strides = array<i32>} : memref<16x16x128xbf16, #tpu.memory_space<vmem>>, vector<16x16x128xbf16>,
    %cst_96 = arith.constant dense<0.000000e+00> : vector<128xf32>
    %95 = vector.multi_reduction <add>, %91, %cst_96 [0] : vector<256x128xf32> to vector<128xf32>
    %96 = vector.shape_cast %95 : vector<128xf32> to vector<1x128xf32>
    %97 = vector.shape_cast %96 : vector<1x128xf32> to vector<1x1x128xf32>
    %c0_97 = arith.constant 0 : index
    %c0_98 = arith.constant 0 : index
    %c0_99 = arith.constant 0 : index
    %98 = vector.load %arg6[%c0_97, %c0_98, %c0_99] : memref<1x1x128xf32, #tpu.memory_space<vmem>>, vector<1x1x128xf32>
    tpu.vector_store %arg6[%c0_97, %c0_98, %c0_99], %97 {strides = array<i32>} : memref<1x1x128xf32, #tpu.memory_space<vmem>>, vector<1x1x128xf32>,
    %99 = arith.mulf %91, %91 : vector<256x128xf32>
    %cst_100 = arith.constant dense<0.000000e+00> : vector<128xf32>
    %100 = vector.multi_reduction <add>, %99, %cst_100 [0] : vector<256x128xf32> to vector<128xf32>
    %101 = vector.shape_cast %100 : vector<128xf32> to vector<1x128xf32>
    %102 = vector.shape_cast %101 : vector<1x128xf32> to vector<1x1x128xf32>
    %c0_101 = arith.constant 0 : index
    %c0_102 = arith.constant 0 : index
    %c0_103 = arith.constant 0 : index
    %103 = vector.load %arg7[%c0_101, %c0_102, %c0_103] : memref<1x1x128xf32, #tpu.memory_space<vmem>>, vector<1x1x128xf32>
    tpu.vector_store %arg7[%c0_101, %c0_102, %c0_103], %102 {strides = array<i32>} : memref<1x1x128xf32, #tpu.memory_space<vmem>>, vector<1x1x128xf32>,
    return
  }
  func.func @transform_0(%arg0: i32) -> (i32, i32, i32) {
    %c0_i32 = arith.constant 0 : i32
    %c0_i32_0 = arith.constant 0 : i32
    %c0_i32_1 = arith.constant 0 : i32
    return %arg0, %c0_i32, %c0_i32_0 : i32, i32, i32
  }
  func.func @transform_1(%arg0: i32) -> (i32, i32, i32) {
    %c0_i32 = arith.constant 0 : i32
    %c0_i32_0 = arith.constant 0 : i32
    %c0_i32_1 = arith.constant 0 : i32
    %c0_i32_2 = arith.constant 0 : i32
    return %c0_i32, %c0_i32_0, %c0_i32_1 : i32, i32, i32
  }
  func.func @transform_2(%arg0: i32) -> (i32, i32, i32) {
    %c0_i32 = arith.constant 0 : i32
    %c0_i32_0 = arith.constant 0 : i32
    %c0_i32_1 = arith.constant 0 : i32
    %c0_i32_2 = arith.constant 0 : i32
    return %c0_i32, %c0_i32_0, %c0_i32_1 : i32, i32, i32
  }
  func.func @transform_3(%arg0: i32) -> (i32, i32, i32) {
    %c0_i32 = arith.constant 0 : i32
    %c0_i32_0 = arith.constant 0 : i32
    %c0_i32_1 = arith.constant 0 : i32
    %c0_i32_2 = arith.constant 0 : i32
    return %c0_i32, %c0_i32_0, %c0_i32_1 : i32, i32, i32
  }
  func.func @transform_4(%arg0: i32) -> (i32, i32, i32) {
    %c0_i32 = arith.constant 0 : i32
    %c0_i32_0 = arith.constant 0 : i32
    %c0_i32_1 = arith.constant 0 : i32
    return %arg0, %c0_i32, %c0_i32_0 : i32, i32, i32
  }
  func.func @transform_5(%arg0: i32) -> (i32, i32, i32) {
    %c0_i32 = arith.constant 0 : i32
    %c0_i32_0 = arith.constant 0 : i32
    %c0_i32_1 = arith.constant 0 : i32
    return %arg0, %c0_i32, %c0_i32_0 : i32, i32, i32
  }
  func.func @transform_6(%arg0: i32) -> (i32, i32, i32) {
    %c0_i32 = arith.constant 0 : i32
    %c0_i32_0 = arith.constant 0 : i32
    %c0_i32_1 = arith.constant 0 : i32
    return %arg0, %c0_i32, %c0_i32_0 : i32, i32, i32
  }
}

module attributes {stable_mosaic.version = 11 : i64} {
  func.func @_bn_relu_conv1x1_stats_kernel(%arg0: i32, %arg1: memref<32x16x128xbf16, #tpu.memory_space<vmem>>, %arg2: memref<1x1x128xf32, #tpu.memory_space<vmem>>, %arg3: memref<1x1x128xf32, #tpu.memory_space<vmem>>, %arg4: memref<128x128xbf16, #tpu.memory_space<vmem>>, %arg5: memref<32x16x128xbf16, #tpu.memory_space<vmem>>, %arg6: memref<1x1x128xf32, #tpu.memory_space<vmem>>, %arg7: memref<1x1x128xf32, #tpu.memory_space<vmem>>) attributes {dimension_semantics = [#tpu.dimension_semantics<parallel>], iteration_bounds = array<i64: 1>, scalar_prefetch = 0 : i64, scratch_operands = 0 : i64, tpu.core_type = #tpu.core_type<tc>, window_params = [{transform_indices = @transform_0, window_bounds = array<i64: 32, 16, 128>}, {pipeline_mode = #tpu.pipeline_mode<synchronous>, transform_indices = @transform_1, window_bounds = array<i64: 1, 1, 128>}, {pipeline_mode = #tpu.pipeline_mode<synchronous>, transform_indices = @transform_2, window_bounds = array<i64: 1, 1, 128>}, {pipeline_mode = #tpu.pipeline_mode<synchronous>, transform_indices = @transform_3, window_bounds = array<i64: 128, 128>}, {transform_indices = @transform_4, window_bounds = array<i64: 32, 16, 128>}, {transform_indices = @transform_5, window_bounds = array<i64: 1, 1, 128>}, {transform_indices = @transform_6, window_bounds = array<i64: 1, 1, 128>}]} {
    %c0 = arith.constant 0 : index
    %c0_0 = arith.constant 0 : index
    %c0_1 = arith.constant 0 : index
    %0 = vector.load %arg1[%c0, %c0_0, %c0_1] : memref<32x16x128xbf16, #tpu.memory_space<vmem>>, vector<32x16x128xbf16>
    %1 = arith.extf %0 : vector<32x16x128xbf16> to vector<32x16x128xf32>
    %c0_2 = arith.constant 0 : index
    %c0_3 = arith.constant 0 : index
    %c0_4 = arith.constant 0 : index
    %2 = vector.load %arg2[%c0_2, %c0_3, %c0_4] : memref<1x1x128xf32, #tpu.memory_space<vmem>>, vector<1x1x128xf32>
    %3 = vector.broadcast %2 : vector<1x1x128xf32> to vector<32x16x128xf32>
    %4 = arith.mulf %1, %3 : vector<32x16x128xf32>
    %c0_5 = arith.constant 0 : index
    %c0_6 = arith.constant 0 : index
    %c0_7 = arith.constant 0 : index
    %5 = vector.load %arg3[%c0_5, %c0_6, %c0_7] : memref<1x1x128xf32, #tpu.memory_space<vmem>>, vector<1x1x128xf32>
    %6 = vector.broadcast %5 : vector<1x1x128xf32> to vector<32x16x128xf32>
    %7 = arith.addf %4, %6 : vector<32x16x128xf32>
    %cst = arith.constant 0.000000e+00 : f32
    %8 = vector.broadcast %cst : f32 to vector<32x16x128xf32>
    %9 = arith.maximumf %7, %8 : vector<32x16x128xf32>
    %10 = arith.truncf %9 : vector<32x16x128xf32> to vector<32x16x128xbf16>
    %11 = vector.shape_cast %10 : vector<32x16x128xbf16> to vector<512x128xbf16>
    %c0_8 = arith.constant 0 : index
    %c0_9 = arith.constant 0 : index
    %12 = vector.load %arg4[%c0_8, %c0_9] : memref<128x128xbf16, #tpu.memory_space<vmem>>, vector<128x128xbf16>
    %cst_10 = arith.constant dense<0.000000e+00> : vector<512x128xf32>
    %13 = tpu.matmul %11, %12, %cst_10 {dimension_numbers = #tpu.dot_dimension_numbers<[1], [0], [0], [1], [0, 0, 1, 1], [], []>} : vector<512x128xbf16>, vector<128x128xbf16>, vector<512x128xf32> -> vector<512x128xf32>
    %14 = vector.shape_cast %13 : vector<512x128xf32> to vector<32x16x128xf32>
    %15 = arith.truncf %14 : vector<32x16x128xf32> to vector<32x16x128xbf16>
    %c0_11 = arith.constant 0 : index
    %c0_12 = arith.constant 0 : index
    %c0_13 = arith.constant 0 : index
    %16 = vector.load %arg5[%c0_11, %c0_12, %c0_13] : memref<32x16x128xbf16, #tpu.memory_space<vmem>>, vector<32x16x128xbf16>
    tpu.vector_store %arg5[%c0_11, %c0_12, %c0_13], %15 {strides = array<i32>} : memref<32x16x128xbf16, #tpu.memory_space<vmem>>, vector<32x16x128xbf16>,
    %cst_14 = arith.constant dense<0.000000e+00> : vector<128xf32>
    %17 = vector.multi_reduction <add>, %13, %cst_14 [0] : vector<512x128xf32> to vector<128xf32>
    %18 = vector.shape_cast %17 : vector<128xf32> to vector<1x128xf32>
    %19 = vector.shape_cast %18 : vector<1x128xf32> to vector<1x1x128xf32>
    %c0_15 = arith.constant 0 : index
    %c0_16 = arith.constant 0 : index
    %c0_17 = arith.constant 0 : index
    %20 = vector.load %arg6[%c0_15, %c0_16, %c0_17] : memref<1x1x128xf32, #tpu.memory_space<vmem>>, vector<1x1x128xf32>
    tpu.vector_store %arg6[%c0_15, %c0_16, %c0_17], %19 {strides = array<i32>} : memref<1x1x128xf32, #tpu.memory_space<vmem>>, vector<1x1x128xf32>,
    %21 = arith.mulf %13, %13 : vector<512x128xf32>
    %cst_18 = arith.constant dense<0.000000e+00> : vector<128xf32>
    %22 = vector.multi_reduction <add>, %21, %cst_18 [0] : vector<512x128xf32> to vector<128xf32>
    %23 = vector.shape_cast %22 : vector<128xf32> to vector<1x128xf32>
    %24 = vector.shape_cast %23 : vector<1x128xf32> to vector<1x1x128xf32>
    %c0_19 = arith.constant 0 : index
    %c0_20 = arith.constant 0 : index
    %c0_21 = arith.constant 0 : index
    %25 = vector.load %arg7[%c0_19, %c0_20, %c0_21] : memref<1x1x128xf32, #tpu.memory_space<vmem>>, vector<1x1x128xf32>
    tpu.vector_store %arg7[%c0_19, %c0_20, %c0_21], %24 {strides = array<i32>} : memref<1x1x128xf32, #tpu.memory_space<vmem>>, vector<1x1x128xf32>,
    return
  }
  func.func @transform_0(%arg0: i32) -> (i32, i32, i32) {
    %c0_i32 = arith.constant 0 : i32
    %c0_i32_0 = arith.constant 0 : i32
    %c0_i32_1 = arith.constant 0 : i32
    return %arg0, %c0_i32, %c0_i32_0 : i32, i32, i32
  }
  func.func @transform_1(%arg0: i32) -> (i32, i32, i32) {
    %c0_i32 = arith.constant 0 : i32
    %c0_i32_0 = arith.constant 0 : i32
    %c0_i32_1 = arith.constant 0 : i32
    %c0_i32_2 = arith.constant 0 : i32
    return %c0_i32, %c0_i32_0, %c0_i32_1 : i32, i32, i32
  }
  func.func @transform_2(%arg0: i32) -> (i32, i32, i32) {
    %c0_i32 = arith.constant 0 : i32
    %c0_i32_0 = arith.constant 0 : i32
    %c0_i32_1 = arith.constant 0 : i32
    %c0_i32_2 = arith.constant 0 : i32
    return %c0_i32, %c0_i32_0, %c0_i32_1 : i32, i32, i32
  }
  func.func @transform_3(%arg0: i32) -> (i32, i32) {
    %c0_i32 = arith.constant 0 : i32
    %c0_i32_0 = arith.constant 0 : i32
    %c0_i32_1 = arith.constant 0 : i32
    return %c0_i32, %c0_i32_0 : i32, i32
  }
  func.func @transform_4(%arg0: i32) -> (i32, i32, i32) {
    %c0_i32 = arith.constant 0 : i32
    %c0_i32_0 = arith.constant 0 : i32
    %c0_i32_1 = arith.constant 0 : i32
    return %arg0, %c0_i32, %c0_i32_0 : i32, i32, i32
  }
  func.func @transform_5(%arg0: i32) -> (i32, i32, i32) {
    %c0_i32 = arith.constant 0 : i32
    %c0_i32_0 = arith.constant 0 : i32
    %c0_i32_1 = arith.constant 0 : i32
    return %arg0, %c0_i32, %c0_i32_0 : i32, i32, i32
  }
  func.func @transform_6(%arg0: i32) -> (i32, i32, i32) {
    %c0_i32 = arith.constant 0 : i32
    %c0_i32_0 = arith.constant 0 : i32
    %c0_i32_1 = arith.constant 0 : i32
    return %arg0, %c0_i32, %c0_i32_0 : i32, i32, i32
  }
}

module attributes {stable_mosaic.version = 11 : i64} {
  func.func @_bn_add_relu_kernel(%arg0: i32, %arg1: memref<32x16x128xbf16, #tpu.memory_space<vmem>>, %arg2: memref<1x1x128xf32, #tpu.memory_space<vmem>>, %arg3: memref<1x1x128xf32, #tpu.memory_space<vmem>>, %arg4: memref<32x16x128xf32, #tpu.memory_space<vmem>>, %arg5: memref<32x16x128xf32, #tpu.memory_space<vmem>>) attributes {dimension_semantics = [#tpu.dimension_semantics<parallel>], iteration_bounds = array<i64: 1>, scalar_prefetch = 0 : i64, scratch_operands = 0 : i64, tpu.core_type = #tpu.core_type<tc>, window_params = [{transform_indices = @transform_0, window_bounds = array<i64: 32, 16, 128>}, {pipeline_mode = #tpu.pipeline_mode<synchronous>, transform_indices = @transform_1, window_bounds = array<i64: 1, 1, 128>}, {pipeline_mode = #tpu.pipeline_mode<synchronous>, transform_indices = @transform_2, window_bounds = array<i64: 1, 1, 128>}, {transform_indices = @transform_3, window_bounds = array<i64: 32, 16, 128>}, {transform_indices = @transform_4, window_bounds = array<i64: 32, 16, 128>}]} {
    %c0 = arith.constant 0 : index
    %c0_0 = arith.constant 0 : index
    %c0_1 = arith.constant 0 : index
    %0 = vector.load %arg1[%c0, %c0_0, %c0_1] : memref<32x16x128xbf16, #tpu.memory_space<vmem>>, vector<32x16x128xbf16>
    %1 = arith.extf %0 : vector<32x16x128xbf16> to vector<32x16x128xf32>
    %c0_2 = arith.constant 0 : index
    %c0_3 = arith.constant 0 : index
    %c0_4 = arith.constant 0 : index
    %2 = vector.load %arg2[%c0_2, %c0_3, %c0_4] : memref<1x1x128xf32, #tpu.memory_space<vmem>>, vector<1x1x128xf32>
    %3 = vector.broadcast %2 : vector<1x1x128xf32> to vector<32x16x128xf32>
    %4 = arith.mulf %1, %3 : vector<32x16x128xf32>
    %c0_5 = arith.constant 0 : index
    %c0_6 = arith.constant 0 : index
    %c0_7 = arith.constant 0 : index
    %5 = vector.load %arg3[%c0_5, %c0_6, %c0_7] : memref<1x1x128xf32, #tpu.memory_space<vmem>>, vector<1x1x128xf32>
    %6 = vector.broadcast %5 : vector<1x1x128xf32> to vector<32x16x128xf32>
    %7 = arith.addf %4, %6 : vector<32x16x128xf32>
    %c0_8 = arith.constant 0 : index
    %c0_9 = arith.constant 0 : index
    %c0_10 = arith.constant 0 : index
    %8 = vector.load %arg4[%c0_8, %c0_9, %c0_10] : memref<32x16x128xf32, #tpu.memory_space<vmem>>, vector<32x16x128xf32>
    %9 = arith.addf %7, %8 : vector<32x16x128xf32>
    %cst = arith.constant 0.000000e+00 : f32
    %10 = vector.broadcast %cst : f32 to vector<32x16x128xf32>
    %11 = arith.maximumf %9, %10 : vector<32x16x128xf32>
    %c0_11 = arith.constant 0 : index
    %c0_12 = arith.constant 0 : index
    %c0_13 = arith.constant 0 : index
    %12 = vector.load %arg5[%c0_11, %c0_12, %c0_13] : memref<32x16x128xf32, #tpu.memory_space<vmem>>, vector<32x16x128xf32>
    tpu.vector_store %arg5[%c0_11, %c0_12, %c0_13], %11 {strides = array<i32>} : memref<32x16x128xf32, #tpu.memory_space<vmem>>, vector<32x16x128xf32>,
    return
  }
  func.func @transform_0(%arg0: i32) -> (i32, i32, i32) {
    %c0_i32 = arith.constant 0 : i32
    %c0_i32_0 = arith.constant 0 : i32
    %c0_i32_1 = arith.constant 0 : i32
    return %arg0, %c0_i32, %c0_i32_0 : i32, i32, i32
  }
  func.func @transform_1(%arg0: i32) -> (i32, i32, i32) {
    %c0_i32 = arith.constant 0 : i32
    %c0_i32_0 = arith.constant 0 : i32
    %c0_i32_1 = arith.constant 0 : i32
    %c0_i32_2 = arith.constant 0 : i32
    return %c0_i32, %c0_i32_0, %c0_i32_1 : i32, i32, i32
  }
  func.func @transform_2(%arg0: i32) -> (i32, i32, i32) {
    %c0_i32 = arith.constant 0 : i32
    %c0_i32_0 = arith.constant 0 : i32
    %c0_i32_1 = arith.constant 0 : i32
    %c0_i32_2 = arith.constant 0 : i32
    return %c0_i32, %c0_i32_0, %c0_i32_1 : i32, i32, i32
  }
  func.func @transform_3(%arg0: i32) -> (i32, i32, i32) {
    %c0_i32 = arith.constant 0 : i32
    %c0_i32_0 = arith.constant 0 : i32
    %c0_i32_1 = arith.constant 0 : i32
    return %arg0, %c0_i32, %c0_i32_0 : i32, i32, i32
  }
  func.func @transform_4(%arg0: i32) -> (i32, i32, i32) {
    %c0_i32 = arith.constant 0 : i32
    %c0_i32_0 = arith.constant 0 : i32
    %c0_i32_1 = arith.constant 0 : i32
    return %arg0, %c0_i32, %c0_i32_0 : i32, i32, i32
  }
}

</mosaic_0001>

<bundles_post_ra>
// kernel: bottleneck_forward.4
= control target key start
LH: loop header
LB: loop body
LE: loop exit
PB: predicated region body
PF: predicated region fallthrough
CT: control target
= control target key end

     0   :  { %s2006_s1 = inlined_call_operand.vmem [shape: bf16[128,128], index: 1, kind: input, shape index: {}]   ;;  %s2007_s0 = inlined_call_operand.vmem [shape: f32[32,16,128], index: 0, kind: input, shape index: {}]   ;;  %s2008_s2 = inlined_call_operand.vmem [shape: bf16[32,16,128], index: 2, kind: output, shape index: {0}]   ;;  %s2009_s3 = inlined_call_operand.vmem [shape: f32[1,1,128], index: 3, kind: output, shape index: {1}]   ;;  %s2010_s4 = inlined_call_operand.vmem [shape: f32[1,1,128], index: 4, kind: output, shape index: {2}]  }
   0x1   :  { %v1463_v0 = vld [vmem:[%s2006_s1 + $0x38] sm:$0xff]   ;;  %v1464_v1 = vld [vmem:[%s2006_s1 + $0x30] sm:$0xff]   ;;  %v1465_v2 = vld [vmem:[%s2006_s1 + $0x28] sm:$0xff]  }
   0x2   :  { %1367 = vmatprep.subr.bf16.mxu0 %v1463_v0  ;;  %1447 = vmatprep.subr.bf16.mxu1 %v1463_v0  ;;  %v1466_v3 = vld [vmem:[%s2006_s1 + $0x20] sm:$0xff]   ;;  %v16_v5 = vld [vmem:[%s2007_s0 + $0x8] sm:$0xff]  ;;  %v1467_v7 = vld [vmem:[%s2006_s1 + $0x18] sm:$0xff]  }
   0x3   :  { %1368 = vmatpush3.bf16.msra.mxu0 %v1463_v0  ;;  %1455 = vmatpush3.bf16.msra.mxu1 %v1463_v0  ;;  %v15_v4 = vld [vmem:[%s2007_s0] sm:$0xff]  ;;  %v1468_v8 = vld [vmem:[%s2006_s1 + $0x10] sm:$0xff]   ;;  %v48_v10 = vld [vmem:[%s2007_s0 + $0x108] sm:$0xff] }
   0x4   :  { %1369 = vmatprep.subr.bf16.mxu0 %v1464_v1  ;;  %1448 = vmatprep.subr.bf16.mxu1 %v1464_v1  ;;  %v79_v6 = vpack.c.bf16 %v16_v5, %v15_v4  ;;  %v47_v9 = vld [vmem:[%s2007_s0 + $0x100] sm:$0xff]  ;;  %v1469_v11 = vld [vmem:[%s2006_s1 + $0x8] sm:$0xff]   ;;  %v17_v14 = vld [vmem:[%s2007_s0 + $0x10] sm:$0xff] }
   0x5   :  { %v95_v12 = vpack.c.bf16 %v48_v10, %v47_v9  ;;  %v1470_v13 = vld [vmem:[%s2006_s1] sm:$0xff]   ;;  %v18_v15 = vld [vmem:[%s2007_s0 + $0x18] sm:$0xff]  ;;  %v20_v17 = vld [vmem:[%s2007_s0 + $0x28] sm:$0xff] }
   0x6   :  { %1383 = vmatprep.mubr.bf16.mxu0 %v79_v6  ;;  %v19_v16 = vld [vmem:[%s2007_s0 + $0x20] sm:$0xff]  ;;  %v49_v18 = vld [vmem:[%s2007_s0 + $0x110] sm:$0xff]  ;;  %v50_v19 = vld [vmem:[%s2007_s0 + $0x118] sm:$0xff]  ;;  %v80_v22 = vpack.c.bf16 %v18_v15, %v17_v14 }
   0x7   :  { %1370 = vmatpush3.bf16.msra.mxu0 %v1464_v1  ;;  %1456 = vmatpush3.bf16.msra.mxu1 %v1464_v1  ;;  %v51_v20 = vld [vmem:[%s2007_s0 + $0x120] sm:$0xff]  ;;  %v52_v21 = vld [vmem:[%s2007_s0 + $0x128] sm:$0xff]  ;;  %v81_v23 = vpack.c.bf16 %v20_v17, %v19_v16  ;;  %v96_v24 = vpack.c.bf16 %v50_v19, %v49_v18  ;;  %v21_v26 = vld [vmem:[%s2007_s0 + $0x30] sm:$0xff] }
   0x8   :  { %1371 = vmatprep.subr.bf16.mxu0 %v1465_v2  ;;  %1449 = vmatprep.subr.bf16.mxu1 %v1465_v2  ;;  %v97_v25 = vpack.c.bf16 %v52_v21, %v51_v20  ;;  %v22_v27 = vld [vmem:[%s2007_s0 + $0x38] sm:$0xff]  ;;  %v23_v28 = vld [vmem:[%s2007_s0 + $0x40] sm:$0xff]  ;;  %v24_v29 = vld [vmem:[%s2007_s0 + $0x48] sm:$0xff] }
   0x9   :  { %1415 = vmatprep.mubr.bf16.mxu1 %v95_v12  ;;  %v53_v30 = vld [vmem:[%s2007_s0 + $0x130] sm:$0xff]  ;;  %v54_v31 = vld [vmem:[%s2007_s0 + $0x138] sm:$0xff]  ;;  %v55_v32 = vld [vmem:[%s2007_s0 + $0x140] sm:$0xff]  ;;  %v82_v34 = vpack.c.bf16 %v22_v27, %v21_v26  ;;  %v83_v35 = vpack.c.bf16 %v24_v29, %v23_v28 }
   0xa   :  { %v56_v33 = vld [vmem:[%s2007_s0 + $0x148] sm:$0xff]  ;;  %v98_v36 = vpack.c.bf16 %v54_v31, %v53_v30  ;;  %v25_v38 = vld [vmem:[%s2007_s0 + $0x50] sm:$0xff]  ;;  %v26_v39 = vld [vmem:[%s2007_s0 + $0x58] sm:$0xff] }
   0xb   :  { %1372 = vmatpush3.bf16.msra.mxu0 %v1465_v2  ;;  %1457 = vmatpush3.bf16.msra.mxu1 %v1465_v2  ;;  %v99_v37 = vpack.c.bf16 %v56_v33, %v55_v32  ;;  %v27_v40 = vld [vmem:[%s2007_s0 + $0x60] sm:$0xff]  ;;  %v28_v41 = vld [vmem:[%s2007_s0 + $0x68] sm:$0xff]  ;;  %v57_v42 = vld [vmem:[%s2007_s0 + $0x150] sm:$0xff]  ;;  %v84_v46 = vpack.c.bf16 %v26_v39, %v25_v38 }
   0xc   :  { %1373 = vmatprep.subr.bf16.mxu0 %v1466_v3  ;;  %1450 = vmatprep.subr.bf16.mxu1 %v1466_v3  ;;  %v58_v43 = vld [vmem:[%s2007_s0 + $0x158] sm:$0xff]  ;;  %v59_v44 = vld [vmem:[%s2007_s0 + $0x160] sm:$0xff]  ;;  %v60_v45 = vld [vmem:[%s2007_s0 + $0x168] sm:$0xff]  ;;  %v85_v47 = vpack.c.bf16 %v28_v41, %v27_v40 }
   0xd   :  { %v100_v48 = vpack.c.bf16 %v58_v43, %v57_v42  ;;  %v101_v49 = vpack.c.bf16 %v60_v45, %v59_v44  ;;  %v29_v50 = vld [vmem:[%s2007_s0 + $0x70] sm:$0xff]  ;;  %v30_v51 = vld [vmem:[%s2007_s0 + $0x78] sm:$0xff]  ;;  %v31_v52 = vld [vmem:[%s2007_s0 + $0x80] sm:$0xff] }
   0xe   :  { %v32_v53 = vld [vmem:[%s2007_s0 + $0x88] sm:$0xff]  ;;  %v61_v54 = vld [vmem:[%s2007_s0 + $0x170] sm:$0xff]  ;;  %v62_v55 = vld [vmem:[%s2007_s0 + $0x178] sm:$0xff]  ;;  %v86_v58 = vpack.c.bf16 %v30_v51, %v29_v50 }
   0xf   :  { %1374 = vmatpush3.bf16.msra.mxu0 %v1466_v3  ;;  %1458 = vmatpush3.bf16.msra.mxu1 %v1466_v3  ;;  %v63_v56 = vld [vmem:[%s2007_s0 + $0x180] sm:$0xff]  ;;  %v64_v57 = vld [vmem:[%s2007_s0 + $0x188] sm:$0xff]  ;;  %v87_v59 = vpack.c.bf16 %v32_v53, %v31_v52  ;;  %v102_v60 = vpack.c.bf16 %v62_v55, %v61_v54  ;;  %v33_v62 = vld [vmem:[%s2007_s0 + $0x90] sm:$0xff] }
  0x10   :  { %1375 = vmatprep.subr.bf16.mxu0 %v1467_v7  ;;  %1451 = vmatprep.subr.bf16.mxu1 %v1467_v7  ;;  %v103_v61 = vpack.c.bf16 %v64_v57, %v63_v56  ;;  %v34_v63 = vld [vmem:[%s2007_s0 + $0x98] sm:$0xff]  ;;  %v35_v0 = vld [vmem:[%s2007_s0 + $0xa0] sm:$0xff]  ;;  %v36_v1 = vld [vmem:[%s2007_s0 + $0xa8] sm:$0xff] }
  0x11   :  { %v65_v2 = vld [vmem:[%s2007_s0 + $0x190] sm:$0xff]  ;;  %v66_v3 = vld [vmem:[%s2007_s0 + $0x198] sm:$0xff]  ;;  %v67_v4 = vld [vmem:[%s2007_s0 + $0x1a0] sm:$0xff]  ;;  %v88_v6 = vpack.c.bf16 %v34_v63, %v33_v62 }
  0x12   :  { %v68_v5 = vld [vmem:[%s2007_s0 + $0x1a8] sm:$0xff]  ;;  %v37_v10 = vld [vmem:[%s2007_s0 + $0xb0] sm:$0xff]  ;;  %v39_v12 = vld [vmem:[%s2007_s0 + $0xc0] sm:$0xff] }
  0x13   :  { %1376 = vmatpush3.bf16.msra.mxu0 %v1467_v7  ;;  %1459 = vmatpush3.bf16.msra.mxu1 %v1467_v7  ;;  %v89_v7 = vpack.c.bf16 %v36_v1, %v35_v0  ;;  %v105_v9 = vpack.c.bf16 %v68_v5, %v67_v4  ;;  %v69_v14 = vld [vmem:[%s2007_s0 + $0x1b0] sm:$0xff]  ;;  %v70_v15 = vld [vmem:[%s2007_s0 + $0x1b8] sm:$0xff]  ;;  %v71_v16 = vld [vmem:[%s2007_s0 + $0x1c0] sm:$0xff] }
  0x14   :  { %1377 = vmatprep.subr.bf16.mxu0 %v1468_v8  ;;  %1452 = vmatprep.subr.bf16.mxu1 %v1468_v8  ;;  %v72_v17 = vld [vmem:[%s2007_s0 + $0x1c8] sm:$0xff]  ;;  %v106_v20 = vpack.c.bf16 %v70_v15, %v69_v14  ;;  %v73_v26 = vld [vmem:[%s2007_s0 + $0x1d0] sm:$0xff]  ;;  %v74_v27 = vld [vmem:[%s2007_s0 + $0x1d8] sm:$0xff] }
  0x15   :  { %v107_v21 = vpack.c.bf16 %v72_v17, %v71_v16  ;;  %v75_v28 = vld [vmem:[%s2007_s0 + $0x1e0] sm:$0xff]  ;;  %v76_v29 = vld [vmem:[%s2007_s0 + $0x1e8] sm:$0xff]  ;;  %v108_v32 = vpack.c.bf16 %v74_v27, %v73_v26 }
  0x16   :  { %v109_v33 = vpack.c.bf16 %v76_v29, %v75_v28 }
  0x17   :  { %1378 = vmatpush3.bf16.msra.mxu0 %v1468_v8  ;;  %1460 = vmatpush3.bf16.msra.mxu1 %v1468_v8  ;;  %v104_v8 = vpack.c.bf16 %v66_v3, %v65_v2 }
  0x18   :  { %1379 = vmatprep.subr.bf16.mxu0 %v1469_v11  ;;  %1453 = vmatprep.subr.bf16.mxu1 %v1469_v11 }
  0x1b   :  { %1380 = vmatpush3.bf16.msra.mxu0 %v1469_v11  ;;  %1461 = vmatpush3.bf16.msra.mxu1 %v1469_v11  ;;  %v38_v11 = vld [vmem:[%s2007_s0 + $0xb8] sm:$0xff] }
  0x1c   :  { %1381 = vmatprep.subr.bf16.mxu0 %v1470_v13  ;;  %1454 = vmatprep.subr.bf16.mxu1 %v1470_v13  ;;  %v90_v18 = vpack.c.bf16 %v38_v11, %v37_v10 }
  0x1f   :  { %1382 = vmatpush3.bf16.msra.mxu0 %v1470_v13  ;;  %1462 = vmatpush3.bf16.msra.mxu1 %v1470_v13  ;;  %v40_v13 = vld [vmem:[%s2007_s0 + $0xc8] sm:$0xff] }
  0x20   :  { %v91_v19 = vpack.c.bf16 %v40_v13, %v39_v12 }
  0x22   :  { %1384 = vmatmul.mubr.bf16.vlgmr.msra.gmra.mxu0 %v80_v22  ;;  %1416 = vmatmul.mubr.bf16.vlgmr.msra.gmra.mxu1 %v96_v24  ;;  %v41_v22 = vld [vmem:[%s2007_s0 + $0xd0] sm:$0xff]  ;;  %v43_v24 = vld [vmem:[%s2007_s0 + $0xe0] sm:$0xff] }
  0x23   :  { %1387 = vmatprep.mubr.bf16.mxu0 %v81_v23  ;;  %1419 = vmatprep.mubr.bf16.mxu1 %v97_v25  ;;  %v42_v23 = vld [vmem:[%s2007_s0 + $0xd8] sm:$0xff]  ;;  %v44_v25 = vld [vmem:[%s2007_s0 + $0xe8] sm:$0xff] }
  0x24   :  { %v92_v30 = vpack.c.bf16 %v42_v23, %v41_v22  ;;  %v93_v31 = vpack.c.bf16 %v44_v25, %v43_v24 }
  0x2a   :  { %1388 = vmatmul.mubr.bf16.gmra.mxu0 %v82_v34  ;;  %1420 = vmatmul.mubr.bf16.gmra.mxu1 %v98_v36  ;;  %v45_v34 = vld [vmem:[%s2007_s0 + $0xf0] sm:$0xff] }
  0x2b   :  { %1391 = vmatprep.mubr.bf16.mxu0 %v83_v35  ;;  %1423 = vmatprep.mubr.bf16.mxu1 %v99_v37  ;;  %v46_v35 = vld [vmem:[%s2007_s0 + $0xf8] sm:$0xff]  ;;  %v77_v36 = vld [vmem:[%s2007_s0 + $0x1f0] sm:$0xff] }
  0x2c   :  { %v78_v37 = vld [vmem:[%s2007_s0 + $0x1f8] sm:$0xff]  ;;  %v94_v38 = vpack.c.bf16 %v46_v35, %v45_v34 }
  0x2d   :  { %v110_v39 = vpack.c.bf16 %v78_v37, %v77_v36 }
  0x32   :  { %1392 = vmatmul.mubr.bf16.gmra.mxu0 %v84_v46  ;;  %1424 = vmatmul.mubr.bf16.gmra.mxu1 %v100_v48 }
  0x33   :  { %1395 = vmatprep.mubr.bf16.mxu0 %v85_v47  ;;  %1427 = vmatprep.mubr.bf16.mxu1 %v101_v49 }
  0x3a   :  { %1396 = vmatmul.mubr.bf16.gmra.mxu0 %v86_v58  ;;  %1428 = vmatmul.mubr.bf16.gmra.mxu1 %v102_v60 }
  0x3b   :  { %1399 = vmatprep.mubr.bf16.mxu0 %v87_v59  ;;  %1431 = vmatprep.mubr.bf16.mxu1 %v103_v61 }
  0x42   :  { %1400 = vmatmul.mubr.bf16.gmra.mxu0 %v88_v6  ;;  %1432 = vmatmul.mubr.bf16.gmra.mxu1 %v104_v8 }
  0x43   :  { %1403 = vmatprep.mubr.bf16.mxu0 %v89_v7  ;;  %1435 = vmatprep.mubr.bf16.mxu1 %v105_v9 }
  0x4a   :  { %1404 = vmatmul.mubr.bf16.gmra.mxu0 %v90_v18  ;;  %1436 = vmatmul.mubr.bf16.gmra.mxu1 %v106_v20 }
  0x4b   :  { %1407 = vmatprep.mubr.bf16.mxu0 %v91_v19  ;;  %1439 = vmatprep.mubr.bf16.mxu1 %v107_v21 }
  0x52   :  { %1408 = vmatmul.mubr.bf16.gmra.mxu0 %v92_v30  ;;  %1440 = vmatmul.mubr.bf16.gmra.mxu1 %v108_v32 }
  0x53   :  { %1411 = vmatprep.mubr.bf16.mxu0 %v93_v31  ;;  %1443 = vmatprep.mubr.bf16.mxu1 %v109_v33 }
  0x5a   :  { %1412 = vmatmul.mubr.bf16.gmra.mxu0 %v94_v38  ;;  %1444 = vmatmul.mubr.bf16.gmra.mxu1 %v110_v39 }
  0xe2   :  { %v1385_v40 = vpop.f32.mrf.mxu0  ;;  %v1712_v41 = vpop.f32.mrf.mxu1 }
  0xe3   :  { %v856_v56 = vmul.f32 %v1385_v40, %v1385_v40 }
  0xe4   :  { %v209_v42 = vpop.f32.mrf.mxu0  ;;  %v1714_v43 = vpop.f32.mrf.mxu1 }
  0xe5   :  { %v854_v49 = vmul.f32 %v209_v42, %v209_v42 }
  0xe6   :  { %v1386_v44 = vpop.f32.mrf.mxu0  ;;  %v1716_v46 = vpop.f32.mrf.mxu1 }
  0xe7   :  { %v1144_v45 = vpack.c.bf16 %v1386_v44, %v1385_v40  ;;  %v1224_v48 = vpack.c.bf16 %v1716_v46, %v1712_v41  ;;  %v857_v61 = vmul.f32 %v1386_v44, %v1386_v44 }
  0xe8   :  { %v212_v47 = vpop.f32.mrf.mxu0  ;;  %v1723_v53 = vpop.f32.mrf.mxu1 }
  0xe9   :  { %1296 = vst [vmem:[%s2008_s2 + $0x8] sm:$0xff] %v1144_v45   ;;  %v1139_v50 = vpack.c.bf16 %v212_v47, %v209_v42  ;;  %v784_v51 = vadd.f32 %v212_v47, %v209_v42  ;;  %v855_v52 = vmul.f32 %v212_v47, %v212_v47  ;;  %1312 = vst [vmem:[%s2008_s2 + $0x88] sm:$0xff] %v1224_v48  }
  0xea   :  { %v1389_v54 = vpop.f32.mrf.mxu0  ;;  %v1219_v55 = vpack.c.bf16 %v1723_v53, %v1714_v43  ;;  %v1733_v59 = vpop.f32.mrf.mxu1 }
  0xeb   :  { %1140 = vst [vmem:[%s2008_s2] sm:$0xff] %v1139_v50   ;;  %v785_v57 = vadd.f32 %v1385_v40, %v784_v51  ;;  %v918_v58 = vadd.f32 %v855_v52, %v854_v49  ;;  %v860_v16 = vmul.f32 %v1389_v54, %v1389_v54 }
  0xec   :  { %v225_v60 = vpop.f32.mrf.mxu0  ;;  %1311 = vst [vmem:[%s2008_s2 + $0x80] sm:$0xff] %v1219_v55   ;;  %v1738_v0 = vpop.f32.mrf.mxu1 }
  0xed   :  { %v919_v62 = vadd.f32 %v918_v58, %v856_v56  ;;  %v786_v63 = vadd.f32 %v1386_v44, %v785_v57  ;;  %v858_v3 = vmul.f32 %v225_v60, %v225_v60 }
  0xee   :  { %v1390_v1 = vpop.f32.mrf.mxu0  ;;  %v1740_v6 = vpop.f32.mrf.mxu1 }
  0xef   :  { %v787_v2 = vadd.f32 %v786_v63, %v225_v60  ;;  %v920_v4 = vadd.f32 %v919_v62, %v857_v61  ;;  %v1154_v5 = vpack.c.bf16 %v1390_v1, %v1389_v54  ;;  %v1234_v8 = vpack.c.bf16 %v1740_v6, %v1733_v59 }
  0xf0   :  { %v228_v7 = vpop.f32.mrf.mxu0  ;;  %v1747_v13 = vpop.f32.mrf.mxu1  ;;  %v861_v21 = vmul.f32 %v1390_v1, %v1390_v1 }
  0xf1   :  { %v921_v9 = vadd.f32 %v920_v4, %v858_v3  ;;  %1298 = vst [vmem:[%s2008_s2 + $0x18] sm:$0xff] %v1154_v5   ;;  %v1149_v10 = vpack.c.bf16 %v228_v7, %v225_v60  ;;  %v788_v11 = vadd.f32 %v787_v2, %v228_v7  ;;  %v859_v12 = vmul.f32 %v228_v7, %v228_v7 }
  0xf2   :  { %v1393_v14 = vpop.f32.mrf.mxu0  ;;  %1314 = vst [vmem:[%s2008_s2 + $0x98] sm:$0xff] %v1234_v8   ;;  %v1229_v15 = vpack.c.bf16 %v1747_v13, %v1738_v0  ;;  %v1757_v19 = vpop.f32.mrf.mxu1 }
  0xf3   :  { %1297 = vst [vmem:[%s2008_s2 + $0x10] sm:$0xff] %v1149_v10   ;;  %v789_v17 = vadd.f32 %v1389_v54, %v788_v11  ;;  %v922_v18 = vadd.f32 %v921_v9, %v859_v12  ;;  %v864_v40 = vmul.f32 %v1393_v14, %v1393_v14 }
  0xf4   :  { %v241_v20 = vpop.f32.mrf.mxu0  ;;  %1313 = vst [vmem:[%s2008_s2 + $0x90] sm:$0xff] %v1229_v15   ;;  %v1762_v24 = vpop.f32.mrf.mxu1 }
  0xf5   :  { %v923_v22 = vadd.f32 %v922_v18, %v860_v16  ;;  %v790_v23 = vadd.f32 %v1390_v1, %v789_v17  ;;  %v862_v27 = vmul.f32 %v241_v20, %v241_v20 }
  0xf6   :  { %v1394_v25 = vpop.f32.mrf.mxu0  ;;  %v1764_v30 = vpop.f32.mrf.mxu1 }
  0xf7   :  { %v791_v26 = vadd.f32 %v790_v23, %v241_v20  ;;  %v924_v28 = vadd.f32 %v923_v22, %v861_v21  ;;  %v1164_v29 = vpack.c.bf16 %v1394_v25, %v1393_v14  ;;  %v1244_v32 = vpack.c.bf16 %v1764_v30, %v1757_v19 }
  0xf8   :  { %v244_v31 = vpop.f32.mrf.mxu0  ;;  %v1771_v37 = vpop.f32.mrf.mxu1  ;;  %v865_v48 = vmul.f32 %v1394_v25, %v1394_v25 }
  0xf9   :  { %v925_v33 = vadd.f32 %v924_v28, %v862_v27  ;;  %1300 = vst [vmem:[%s2008_s2 + $0x28] sm:$0xff] %v1164_v29   ;;  %v1159_v34 = vpack.c.bf16 %v244_v31, %v241_v20  ;;  %v792_v35 = vadd.f32 %v791_v26, %v244_v31  ;;  %v863_v36 = vmul.f32 %v244_v31, %v244_v31 }
  0xfa   :  { %v1397_v38 = vpop.f32.mrf.mxu0  ;;  %1316 = vst [vmem:[%s2008_s2 + $0xa8] sm:$0xff] %v1244_v32   ;;  %v1239_v39 = vpack.c.bf16 %v1771_v37, %v1762_v24  ;;  %v1781_v45 = vpop.f32.mrf.mxu1 }
  0xfb   :  { %1299 = vst [vmem:[%s2008_s2 + $0x20] sm:$0xff] %v1159_v34   ;;  %v793_v42 = vadd.f32 %v1393_v14, %v792_v35  ;;  %v926_v44 = vadd.f32 %v925_v33, %v863_v36  ;;  %v868_v7 = vmul.f32 %v1397_v38, %v1397_v38 }
  0xfc   :  { %v257_v47 = vpop.f32.mrf.mxu0  ;;  %1315 = vst [vmem:[%s2008_s2 + $0xa0] sm:$0xff] %v1239_v39   ;;  %v1786_v51 = vpop.f32.mrf.mxu1 }
  0xfd   :  { %v927_v49 = vadd.f32 %v926_v44, %v864_v40  ;;  %v794_v50 = vadd.f32 %v1394_v25, %v793_v42  ;;  %v866_v55 = vmul.f32 %v257_v47, %v257_v47 }
  0xfe   :  { %v1398_v52 = vpop.f32.mrf.mxu0  ;;  %v1788_v58 = vpop.f32.mrf.mxu1 }
  0xff   :  { %v795_v54 = vadd.f32 %v794_v50, %v257_v47  ;;  %v928_v56 = vadd.f32 %v927_v49, %v865_v48  ;;  %v1174_v57 = vpack.c.bf16 %v1398_v52, %v1397_v38  ;;  %v1254_v61 = vpack.c.bf16 %v1788_v58, %v1781_v45 }
 0x100   :  { %v260_v60 = vpop.f32.mrf.mxu0  ;;  %v1795_v3 = vpop.f32.mrf.mxu1  ;;  %v869_v12 = vmul.f32 %v1398_v52, %v1398_v52 }
 0x101   :  { %v929_v62 = vadd.f32 %v928_v56, %v866_v55  ;;  %1302 = vst [vmem:[%s2008_s2 + $0x38] sm:$0xff] %v1174_v57   ;;  %v1169_v63 = vpack.c.bf16 %v260_v60, %v257_v47  ;;  %v796_v1 = vadd.f32 %v795_v54, %v260_v60  ;;  %v867_v2 = vmul.f32 %v260_v60, %v260_v60 }
 0x102   :  { %v1401_v4 = vpop.f32.mrf.mxu0  ;;  %1318 = vst [vmem:[%s2008_s2 + $0xb8] sm:$0xff] %v1254_v61   ;;  %v1249_v5 = vpack.c.bf16 %v1795_v3, %v1786_v51  ;;  %v1805_v10 = vpop.f32.mrf.mxu1 }
 0x103   :  { %1301 = vst [vmem:[%s2008_s2 + $0x30] sm:$0xff] %v1169_v63   ;;  %v797_v8 = vadd.f32 %v1397_v38, %v796_v1  ;;  %v930_v9 = vadd.f32 %v929_v62, %v867_v2  ;;  %v872_v35 = vmul.f32 %v1401_v4, %v1401_v4 }
 0x104   :  { %v273_v11 = vpop.f32.mrf.mxu0  ;;  %1317 = vst [vmem:[%s2008_s2 + $0xb0] sm:$0xff] %v1249_v5   ;;  %v1810_v16 = vpop.f32.mrf.mxu1 }
 0x105   :  { %v931_v14 = vadd.f32 %v930_v9, %v868_v7  ;;  %v798_v15 = vadd.f32 %v1398_v52, %v797_v8  ;;  %v870_v20 = vmul.f32 %v273_v11, %v273_v11 }
 0x106   :  { %v1402_v17 = vpop.f32.mrf.mxu0  ;;  %v1812_v23 = vpop.f32.mrf.mxu1 }
 0x107   :  { %v799_v18 = vadd.f32 %v798_v15, %v273_v11  ;;  %v932_v21 = vadd.f32 %v931_v14, %v869_v12  ;;  %v1184_v22 = vpack.c.bf16 %v1402_v17, %v1401_v4  ;;  %v1264_v26 = vpack.c.bf16 %v1812_v23, %v1805_v10 }
 0x108   :  { %v276_v25 = vpop.f32.mrf.mxu0  ;;  %v1819_v32 = vpop.f32.mrf.mxu1  ;;  %v873_v42 = vmul.f32 %v1402_v17, %v1402_v17 }
 0x109   :  { %v933_v27 = vadd.f32 %v932_v21, %v870_v20  ;;  %1304 = vst [vmem:[%s2008_s2 + $0x48] sm:$0xff] %v1184_v22   ;;  %v1179_v28 = vpack.c.bf16 %v276_v25, %v273_v11  ;;  %v800_v29 = vadd.f32 %v799_v18, %v276_v25  ;;  %v871_v31 = vmul.f32 %v276_v25, %v276_v25 }
 0x10a   :  { %v1405_v33 = vpop.f32.mrf.mxu0  ;;  %1320 = vst [vmem:[%s2008_s2 + $0xc8] sm:$0xff] %v1264_v26   ;;  %v1259_v34 = vpack.c.bf16 %v1819_v32, %v1810_v16  ;;  %v1829_v39 = vpop.f32.mrf.mxu1 }
 0x10b   :  { %1303 = vst [vmem:[%s2008_s2 + $0x40] sm:$0xff] %v1179_v28   ;;  %v801_v36 = vadd.f32 %v1401_v4, %v800_v29  ;;  %v934_v38 = vadd.f32 %v933_v27, %v871_v31  ;;  %v876_v7 = vmul.f32 %v1405_v33, %v1405_v33 }
 0x10c   :  { %v289_v40 = vpop.f32.mrf.mxu0  ;;  %1319 = vst [vmem:[%s2008_s2 + $0xc0] sm:$0xff] %v1259_v34   ;;  %v1834_v48 = vpop.f32.mrf.mxu1 }
 0x10d   :  { %v935_v44 = vadd.f32 %v934_v38, %v872_v35  ;;  %v802_v47 = vadd.f32 %v1402_v17, %v801_v36  ;;  %v874_v52 = vmul.f32 %v289_v40, %v289_v40 }
 0x10e   :  { %v1406_v49 = vpop.f32.mrf.mxu0  ;;  %v1836_v56 = vpop.f32.mrf.mxu1 }
 0x10f   :  { %v803_v50 = vadd.f32 %v802_v47, %v289_v40  ;;  %v936_v54 = vadd.f32 %v935_v44, %v873_v42  ;;  %v1194_v55 = vpack.c.bf16 %v1406_v49, %v1405_v33  ;;  %v1274_v60 = vpack.c.bf16 %v1836_v56, %v1829_v39 }
 0x110   :  { %v292_v57 = vpop.f32.mrf.mxu0  ;;  %v1843_v2 = vpop.f32.mrf.mxu1  ;;  %v877_v14 = vmul.f32 %v1406_v49, %v1406_v49 }
 0x111   :  { %v937_v61 = vadd.f32 %v936_v54, %v874_v52  ;;  %1306 = vst [vmem:[%s2008_s2 + $0x58] sm:$0xff] %v1194_v55   ;;  %v1189_v62 = vpack.c.bf16 %v292_v57, %v289_v40  ;;  %v804_v63 = vadd.f32 %v803_v50, %v292_v57  ;;  %v875_v1 = vmul.f32 %v292_v57, %v292_v57 }
 0x112   :  { %v1409_v4 = vpop.f32.mrf.mxu0  ;;  %1322 = vst [vmem:[%s2008_s2 + $0xd8] sm:$0xff] %v1274_v60   ;;  %v1269_v5 = vpack.c.bf16 %v1843_v2, %v1834_v48  ;;  %v1853_v11 = vpop.f32.mrf.mxu1 }
 0x113   :  { %1305 = vst [vmem:[%s2008_s2 + $0x50] sm:$0xff] %v1189_v62   ;;  %v805_v8 = vadd.f32 %v1405_v33, %v804_v63  ;;  %v938_v9 = vadd.f32 %v937_v61, %v875_v1  ;;  %v880_v42 = vmul.f32 %v1409_v4, %v1409_v4 }
 0x114   :  { %v305_v12 = vpop.f32.mrf.mxu0  ;;  %1321 = vst [vmem:[%s2008_s2 + $0xd0] sm:$0xff] %v1269_v5   ;;  %v1858_v18 = vpop.f32.mrf.mxu1 }
 0x115   :  { %v939_v15 = vadd.f32 %v938_v9, %v876_v7  ;;  %v806_v17 = vadd.f32 %v1406_v49, %v805_v8  ;;  %v878_v22 = vmul.f32 %v305_v12, %v305_v12 }
 0x116   :  { %v1410_v20 = vpop.f32.mrf.mxu0  ;;  %v1860_v27 = vpop.f32.mrf.mxu1 }
 0x117   :  { %v807_v21 = vadd.f32 %v806_v17, %v305_v12  ;;  %v940_v25 = vadd.f32 %v939_v15, %v877_v14  ;;  %v1204_v26 = vpack.c.bf16 %v1410_v20, %v1409_v4  ;;  %v1284_v29 = vpack.c.bf16 %v1860_v27, %v1853_v11 }
 0x118   :  { %v308_v28 = vpop.f32.mrf.mxu0  ;;  %v1867_v36 = vpop.f32.mrf.mxu1  ;;  %v881_v52 = vmul.f32 %v1410_v20, %v1410_v20 }
 0x119   :  { %v941_v31 = vadd.f32 %v940_v25, %v878_v22  ;;  %1308 = vst [vmem:[%s2008_s2 + $0x68] sm:$0xff] %v1204_v26   ;;  %v1199_v33 = vpack.c.bf16 %v308_v28, %v305_v12  ;;  %v808_v34 = vadd.f32 %v807_v21, %v308_v28  ;;  %v879_v35 = vmul.f32 %v308_v28, %v308_v28 }
 0x11a   :  { %v1413_v38 = vpop.f32.mrf.mxu0  ;;  %1324 = vst [vmem:[%s2008_s2 + $0xe8] sm:$0xff] %v1284_v29   ;;  %v1279_v40 = vpack.c.bf16 %v1867_v36, %v1858_v18  ;;  %v1877_v49 = vpop.f32.mrf.mxu1  ;;  %v886_v29 = vmul.f32 %v1714_v43, %v1714_v43 }
 0x11b   :  { %1307 = vst [vmem:[%s2008_s2 + $0x60] sm:$0xff] %v1199_v33   ;;  %v809_v44 = vadd.f32 %v1409_v4, %v808_v34  ;;  %v942_v47 = vadd.f32 %v941_v31, %v879_v35  ;;  %v887_v35 = vmul.f32 %v1723_v53, %v1723_v53 }
 0x11c   :  { %v321_v50 = vpop.f32.mrf.mxu0  ;;  %1323 = vst [vmem:[%s2008_s2 + $0xe0] sm:$0xff] %v1279_v40   ;;  %v1882_v57 = vpop.f32.mrf.mxu1  ;;  %v888_v40 = vmul.f32 %v1712_v41, %v1712_v41 }
 0x11d   :  { %v943_v54 = vadd.f32 %v942_v47, %v880_v42  ;;  %v810_v55 = vadd.f32 %v1410_v20, %v809_v44  ;;  %v882_v62 = vmul.f32 %v321_v50, %v321_v50  ;;  %v884_v20 = vmul.f32 %v1413_v38, %v1413_v38 }
 0x11e   :  { %v1414_v60 = vpop.f32.mrf.mxu0  ;;  %v1884_v5 = vpop.f32.mrf.mxu1  ;;  %v889_v47 = vmul.f32 %v1716_v46, %v1716_v46 }
 0x11f   :  { %v811_v61 = vadd.f32 %v810_v55, %v321_v50  ;;  %v944_v63 = vadd.f32 %v943_v54, %v881_v52  ;;  %v1214_v1 = vpack.c.bf16 %v1414_v60, %v1413_v38  ;;  %v1294_v7 = vpack.c.bf16 %v1884_v5, %v1877_v49 }
 0x120   :  { %v324_v4 = vpop.f32.mrf.mxu0  ;;  %v1891_v15 = vpop.f32.mrf.mxu1  ;;  %v885_v25 = vmul.f32 %v1414_v60, %v1414_v60  ;;  %v890_v54 = vmul.f32 %v1738_v0, %v1738_v0 }
 0x121   :  { %v945_v8 = vadd.f32 %v944_v63, %v882_v62  ;;  %1310 = vst [vmem:[%s2008_s2 + $0x78] sm:$0xff] %v1214_v1   ;;  %v1209_v9 = vpack.c.bf16 %v324_v4, %v321_v50  ;;  %v812_v12 = vadd.f32 %v811_v61, %v324_v4  ;;  %v883_v14 = vmul.f32 %v324_v4, %v324_v4 }
 0x122   :  { %1326 = vst [vmem:[%s2008_s2 + $0xf8] sm:$0xff] %v1294_v7   ;;  %v1289_v17 = vpack.c.bf16 %v1891_v15, %v1882_v57  ;;  %v891_v61 = vmul.f32 %v1747_v13, %v1747_v13  ;;  %v894_v7 = vmul.f32 %v1762_v24, %v1762_v24 }
 0x123   :  { %1309 = vst [vmem:[%s2008_s2 + $0x70] sm:$0xff] %v1209_v9   ;;  %v813_v21 = vadd.f32 %v1413_v38, %v812_v12  ;;  %v946_v22 = vadd.f32 %v945_v8, %v883_v14  ;;  %v895_v12 = vmul.f32 %v1771_v37, %v1771_v37 }
 0x124   :  { %1325 = vst [vmem:[%s2008_s2 + $0xf0] sm:$0xff] %v1289_v17  }
 0x125   :  { %v814_v26 = vadd.f32 %v1414_v60, %v813_v21  ;;  %v947_v28 = vadd.f32 %v946_v22, %v884_v20  ;;  %v898_v22 = vmul.f32 %v1786_v51, %v1786_v51 }
 0x127   :  { %v948_v31 = vadd.f32 %v947_v28, %v885_v25  ;;  %v815_v33 = vadd.f32 %v814_v26, %v1714_v43  ;;  %v899_v28 = vmul.f32 %v1795_v3, %v1795_v3 }
 0x129   :  { %v816_v34 = vadd.f32 %v815_v33, %v1723_v53  ;;  %v949_v38 = vadd.f32 %v948_v31, %v886_v29 }
 0x12b   :  { %v817_v42 = vadd.f32 %v1712_v41, %v816_v34  ;;  %v950_v44 = vadd.f32 %v949_v38, %v887_v35  ;;  %v892_v41 = vmul.f32 %v1733_v59, %v1733_v59  ;;  %v902_v35 = vmul.f32 %v1810_v16, %v1810_v16 }
 0x12d   :  { %v951_v50 = vadd.f32 %v950_v44, %v888_v40  ;;  %v818_v52 = vadd.f32 %v1716_v46, %v817_v42  ;;  %v893_v46 = vmul.f32 %v1740_v6, %v1740_v6  ;;  %v903_v42 = vmul.f32 %v1819_v32, %v1819_v32 }
 0x12f   :  { %v819_v43 = vadd.f32 %v818_v52, %v1738_v0  ;;  %v952_v55 = vadd.f32 %v951_v50, %v889_v47 }
 0x131   :  { %v953_v53 = vadd.f32 %v952_v55, %v890_v54  ;;  %v820_v60 = vadd.f32 %v819_v43, %v1747_v13  ;;  %v906_v43 = vmul.f32 %v1834_v48, %v1834_v48 }
 0x133   :  { %v821_v62 = vadd.f32 %v1733_v59, %v820_v60  ;;  %v954_v63 = vadd.f32 %v953_v53, %v891_v61  ;;  %v896_v59 = vmul.f32 %v1757_v19, %v1757_v19  ;;  %v907_v53 = vmul.f32 %v1843_v2, %v1843_v2 }
 0x135   :  { %v955_v1 = vadd.f32 %v954_v63, %v892_v41  ;;  %v822_v4 = vadd.f32 %v1740_v6, %v821_v62  ;;  %v897_v6 = vmul.f32 %v1764_v30, %v1764_v30  ;;  %v910_v63 = vmul.f32 %v1858_v18, %v1858_v18 }
 0x137   :  { %v823_v0 = vadd.f32 %v822_v4, %v1762_v24  ;;  %v956_v8 = vadd.f32 %v955_v1, %v893_v46  ;;  %v911_v4 = vmul.f32 %v1867_v36, %v1867_v36 }
 0x139   :  { %v957_v9 = vadd.f32 %v956_v8, %v894_v7  ;;  %v824_v13 = vadd.f32 %v823_v0, %v1771_v37 }
 0x13b   :  { %v825_v14 = vadd.f32 %v1757_v19, %v824_v13  ;;  %v958_v17 = vadd.f32 %v957_v9, %v895_v12  ;;  %v900_v19 = vmul.f32 %v1781_v45, %v1781_v45  ;;  %v914_v13 = vmul.f32 %v1882_v57, %v1882_v57 }
 0x13d   :  { %v959_v20 = vadd.f32 %v958_v17, %v896_v59  ;;  %v826_v21 = vadd.f32 %v1764_v30, %v825_v14  ;;  %v901_v30 = vmul.f32 %v1788_v58, %v1788_v58  ;;  %v915_v14 = vmul.f32 %v1891_v15, %v1891_v15 }
 0x13f   :  { %v827_v24 = vadd.f32 %v826_v21, %v1786_v51  ;;  %v960_v25 = vadd.f32 %v959_v20, %v897_v6 }
 0x141   :  { %v961_v26 = vadd.f32 %v960_v25, %v898_v22  ;;  %v828_v37 = vadd.f32 %v827_v24, %v1795_v3 }
 0x143   :  { %v829_v29 = vadd.f32 %v1781_v45, %v828_v37  ;;  %v962_v31 = vadd.f32 %v961_v26, %v899_v28  ;;  %v904_v45 = vmul.f32 %v1805_v10, %v1805_v10 }
 0x145   :  { %v963_v33 = vadd.f32 %v962_v31, %v900_v19  ;;  %v830_v34 = vadd.f32 %v1788_v58, %v829_v29  ;;  %v905_v58 = vmul.f32 %v1812_v23, %v1812_v23 }
 0x147   :  { %v831_v51 = vadd.f32 %v830_v34, %v1810_v16  ;;  %v964_v38 = vadd.f32 %v963_v33, %v901_v30 }
 0x149   :  { %v965_v40 = vadd.f32 %v964_v38, %v902_v35  ;;  %v832_v3 = vadd.f32 %v831_v51, %v1819_v32 }
 0x14b   :  { %v833_v44 = vadd.f32 %v1805_v10, %v832_v3  ;;  %v966_v47 = vadd.f32 %v965_v40, %v903_v42  ;;  %v908_v10 = vmul.f32 %v1829_v39, %v1829_v39 }
 0x14d   :  { %v967_v50 = vadd.f32 %v966_v47, %v904_v45  ;;  %v834_v52 = vadd.f32 %v1812_v23, %v833_v44  ;;  %v909_v23 = vmul.f32 %v1836_v56, %v1836_v56 }
 0x14f   :  { %v835_v16 = vadd.f32 %v834_v52, %v1834_v48  ;;  %v968_v54 = vadd.f32 %v967_v50, %v905_v58 }
 0x151   :  { %v969_v55 = vadd.f32 %v968_v54, %v906_v43  ;;  %v836_v32 = vadd.f32 %v835_v16, %v1843_v2 }
 0x153   :  { %v837_v60 = vadd.f32 %v1829_v39, %v836_v32  ;;  %v970_v61 = vadd.f32 %v969_v55, %v907_v53  ;;  %v912_v39 = vmul.f32 %v1853_v11, %v1853_v11 }
 0x155   :  { %v971_v41 = vadd.f32 %v970_v61, %v908_v10  ;;  %v838_v62 = vadd.f32 %v1836_v56, %v837_v60  ;;  %v913_v56 = vmul.f32 %v1860_v27, %v1860_v27 }
 0x157   :  { %v839_v48 = vadd.f32 %v838_v62, %v1858_v18  ;;  %v972_v46 = vadd.f32 %v971_v41, %v909_v23 }
 0x159   :  { %v973_v1 = vadd.f32 %v972_v46, %v910_v63  ;;  %v840_v2 = vadd.f32 %v839_v48, %v1867_v36 }
 0x15b   :  { %v841_v0 = vadd.f32 %v1853_v11, %v840_v2  ;;  %v974_v7 = vadd.f32 %v973_v1, %v911_v4  ;;  %v916_v11 = vmul.f32 %v1877_v49, %v1877_v49 }
 0x15d   :  { %v975_v8 = vadd.f32 %v974_v7, %v912_v39  ;;  %v842_v9 = vadd.f32 %v1860_v27, %v841_v0  ;;  %v917_v27 = vmul.f32 %v1884_v5, %v1884_v5 }
 0x15f   :  { %v843_v18 = vadd.f32 %v842_v9, %v1882_v57  ;;  %v976_v12 = vadd.f32 %v975_v8, %v913_v56 }
 0x161   :  { %v977_v59 = vadd.f32 %v976_v12, %v914_v13  ;;  %v844_v36 = vadd.f32 %v843_v18, %v1891_v15 }
 0x163   :  { %v845_v17 = vadd.f32 %v1877_v49, %v844_v36  ;;  %v978_v6 = vadd.f32 %v977_v59, %v915_v14 }
 0x165   :  { %v846_v20 = vadd.f32 %v1884_v5, %v845_v17  ;;  %v979_v21 = vadd.f32 %v978_v6, %v916_v11 }
 0x167   :  { %v847_v57 = vrot.slane %v846_v20, 4  ;;  %v980_v24 = vadd.f32 %v979_v21, %v917_v27 }
 0x169   :  { %v848_v22 = vadd.f32 %v847_v57, %v846_v20  ;;  %v981_v25 = vrot.slane %v980_v24, 4 }
 0x16b   :  { %v849_v26 = vrot.slane %v848_v22, 2  ;;  %v982_v37 = vadd.f32 %v981_v25, %v980_v24 }
 0x16d   :  { %v850_v28 = vadd.f32 %v849_v26, %v848_v22  ;;  %v983_v15 = vrot.slane %v982_v37, 2 }
 0x16f   :  { %v851_v19 = vrot.slane %v850_v28, 1  ;;  %v984_v29 = vadd.f32 %v983_v15, %v982_v37 }
 0x171   :  { %v852_v31 = vadd.f32 %v851_v19, %v850_v28  ;;  %v985_v30 = vrot.slane %v984_v29, 1 }
 0x173   :  { %853 = vst [vmem:[%s2009_s3] sm:$0x1] %v852_v31  ;;  %v986_v49 = vadd.f32 %v985_v30, %v984_v29 }
 0x175   :  { %987 = vst [vmem:[%s2010_s4] sm:$0x1] %v986_v49 }

// kernel: bottleneck_forward.6
= control target key start
LH: loop header
LB: loop body
LE: loop exit
PB: predicated region body
PF: predicated region fallthrough
CT: control target
= control target key end

     0   :  { %s2529_s3 = inlined_call_operand.vmem [shape: bf16[128,128], index: 3, kind: input, shape index: {}]   ;;  %s2530_s0 = inlined_call_operand.vmem [shape: bf16[32,16,128], index: 0, kind: input, shape index: {}]   ;;  %s2531_s1 = inlined_call_operand.vmem [shape: f32[1,1,128], index: 1, kind: input, shape index: {}]   ;;  %s2532_s2 = inlined_call_operand.vmem [shape: f32[1,1,128], index: 2, kind: input, shape index: {}]   ;;  %s2533_s4 = inlined_call_operand.vmem [shape: bf16[32,16,128], index: 4, kind: output, shape index: {0}]   ;;  %s2534_s5 = inlined_call_operand.vmem [shape: f32[1,1,128], index: 5, kind: output, shape index: {1}]   ;;  %s2535_s6 = inlined_call_operand.vmem [shape: f32[1,1,128], index: 6, kind: output, shape index: {2}]  }
   0x1   :  { %v1900_v0 = vld [vmem:[%s2529_s3 + $0x38] sm:$0xff]   ;;  %v1901_v1 = vld [vmem:[%s2529_s3 + $0x30] sm:$0xff]   ;;  %v1902_v2 = vld [vmem:[%s2529_s3 + $0x28] sm:$0xff]  }
   0x2   :  { %1804 = vmatprep.subr.bf16.mxu0 %v1900_v0  ;;  %1884 = vmatprep.subr.bf16.mxu1 %v1900_v0  ;;  %v1903_v3 = vld [vmem:[%s2529_s3 + $0x20] sm:$0xff]   ;;  %v1702_v8 = vld [vmem:[%s2530_s0 + $0x8] sm:$0xff]   ;;  %v1703_v9 = vld [vmem:[%s2530_s0 + $0x10] sm:$0xff]  }
   0x3   :  { %1805 = vmatpush3.bf16.msra.mxu0 %v1900_v0  ;;  %1892 = vmatpush3.bf16.msra.mxu1 %v1900_v0  ;;  %v1415_v4 = vld [vmem:[%s2530_s0] sm:$0xff]   ;;  %v1904_v13 = vld [vmem:[%s2529_s3 + $0x18] sm:$0xff]   ;;  %v1420_v14 = vunpack.c.l.bf16 %v1702_v8  ;;  %v1421_v15 = vunpack.c.h.bf16 %v1702_v8  ;;  %v1424_v16 = vunpack.c.l.bf16 %v1703_v9  ;;  %v1425_v19 = vunpack.c.h.bf16 %v1703_v9  ;;  %v1905_v22 = vld [vmem:[%s2529_s3 + $0x10] sm:$0xff]  }
   0x4   :  { %1806 = vmatprep.subr.bf16.mxu0 %v1901_v1  ;;  %1885 = vmatprep.subr.bf16.mxu1 %v1901_v1  ;;  %v1961_v5 = vld [vmem:[%s2531_s1] ss:$0 sm:$0xff]  ;;  %v1416_v6 = vunpack.c.l.bf16 %v1415_v4  ;;  %v1417_v7 = vunpack.c.h.bf16 %v1415_v4  ;;  %v1704_v26 = vld [vmem:[%s2530_s0 + $0x18] sm:$0xff]   ;;  %v1906_v31 = vld [vmem:[%s2529_s3 + $0x8] sm:$0xff]  }
   0x5   :  { %v1972_v10 = vld [vmem:[%s2532_s2] ss:$0 sm:$0xff]  ;;  %v158_v23 = vmul.f32 %v1420_v14, %v1961_v5  ;;  %v159_v24 = vmul.f32 %v1421_v15, %v1961_v5  ;;  %v160_v25 = vmul.f32 %v1424_v16, %v1961_v5  ;;  %v161_v28 = vmul.f32 %v1425_v19, %v1961_v5  ;;  %v1706_v38 = vld [vmem:[%s2530_s0 + $0x28] sm:$0xff]   ;;  %v1707_v41 = vld [vmem:[%s2530_s0 + $0x30] sm:$0xff]  }
   0x6   :  { %v156_v11 = vmul.f32 %v1416_v6, %v1961_v5  ;;  %v157_v12 = vmul.f32 %v1417_v7, %v1961_v5  ;;  %v1705_v29 = vld [vmem:[%s2530_s0 + $0x20] sm:$0xff]   ;;  %v1428_v30 = vunpack.c.l.bf16 %v1704_v26  ;;  %v1429_v35 = vunpack.c.h.bf16 %v1704_v26  ;;  %v1708_v42 = vld [vmem:[%s2530_s0 + $0x38] sm:$0xff]   ;;  %v1710_v63 = vld [vmem:[%s2530_s0 + $0x48] sm:$0xff]  }
   0x7   :  { %1807 = vmatpush3.bf16.msra.mxu0 %v1901_v1  ;;  %1893 = vmatpush3.bf16.msra.mxu1 %v1901_v1  ;;  %v229_v32 = vadd.f32 %v1972_v10, %v158_v23  ;;  %v230_v33 = vadd.f32 %v1972_v10, %v159_v24  ;;  %v231_v34 = vadd.f32 %v1972_v10, %v160_v25  ;;  %v1432_v37 = vunpack.c.l.bf16 %v1705_v29  ;;  %v1907_v43 = vld [vmem:[%s2529_s3] sm:$0xff]   ;;  %v1711_v4 = vld [vmem:[%s2530_s0 + $0x50] sm:$0xff]   ;;  %v1712_v23 = vld [vmem:[%s2530_s0 + $0x58] sm:$0xff]  }
   0x8   :  { %1808 = vmatprep.subr.bf16.mxu0 %v1902_v2  ;;  %1886 = vmatprep.subr.bf16.mxu1 %v1902_v2  ;;  %v227_v17 = vadd.f32 %v1972_v10, %v156_v11  ;;  %v228_v18 = vadd.f32 %v1972_v10, %v157_v12  ;;  %v232_v36 = vadd.f32 %v1972_v10, %v161_v28  ;;  %v1433_v40 = vunpack.c.h.bf16 %v1705_v29  ;;  %v1709_v48 = vld [vmem:[%s2530_s0 + $0x40] sm:$0xff]  }
   0x9   :  { %v162_v39 = vmul.f32 %v1428_v30, %v1961_v5  ;;  %v293_v44 = vmax.f32 %v229_v32, 0.0  ;;  %v294_v45 = vmax.f32 %v230_v33, 0.0  ;;  %v295_v46 = vmax.f32 %v231_v34, 0.0 }
   0xa   :  { %v291_v20 = vmax.f32 %v227_v17, 0.0  ;;  %v292_v21 = vmax.f32 %v228_v18, 0.0  ;;  %v163_v47 = vmul.f32 %v1429_v35, %v1961_v5  ;;  %v296_v49 = vmax.f32 %v232_v36, 0.0 }
   0xb   :  { %1809 = vmatpush3.bf16.msra.mxu0 %v1902_v2  ;;  %1894 = vmatpush3.bf16.msra.mxu1 %v1902_v2  ;;  %v164_v50 = vmul.f32 %v1432_v37, %v1961_v5  ;;  %v1436_v51 = vunpack.c.l.bf16 %v1706_v38  ;;  %v1437_v52 = vunpack.c.h.bf16 %v1706_v38  ;;  %v1440_v53 = vunpack.c.l.bf16 %v1707_v41 }
   0xc   :  { %1810 = vmatprep.subr.bf16.mxu0 %v1903_v3  ;;  %1887 = vmatprep.subr.bf16.mxu1 %v1903_v3  ;;  %v355_v27 = vpack.c.bf16 %v292_v21, %v291_v20  ;;  %v1441_v54 = vunpack.c.h.bf16 %v1707_v41  ;;  %v1444_v55 = vunpack.c.l.bf16 %v1708_v42  ;;  %v1445_v56 = vunpack.c.h.bf16 %v1708_v42 }
   0xd   :  { %v165_v57 = vmul.f32 %v1433_v40, %v1961_v5  ;;  %v1448_v58 = vunpack.c.l.bf16 %v1709_v48  ;;  %v1449_v59 = vunpack.c.h.bf16 %v1709_v48  ;;  %v356_v60 = vpack.c.bf16 %v294_v45, %v293_v44  ;;  %v1717_v44 = vld [vmem:[%s2530_s0 + $0x80] sm:$0xff]  }
   0xe   :  { %1820 = vmatprep.mubr.bf16.mxu0 %v355_v27  ;;  %v233_v61 = vadd.f32 %v1972_v10, %v162_v39  ;;  %v234_v62 = vadd.f32 %v1972_v10, %v163_v47  ;;  %v357_v0 = vpack.c.bf16 %v296_v49, %v295_v46  ;;  %v235_v1 = vadd.f32 %v1972_v10, %v164_v50 }
   0xf   :  { %1811 = vmatpush3.bf16.msra.mxu0 %v1903_v3  ;;  %1895 = vmatpush3.bf16.msra.mxu1 %v1903_v3  ;;  %v166_v2 = vmul.f32 %v1436_v51, %v1961_v5  ;;  %v167_v3 = vmul.f32 %v1437_v52, %v1961_v5  ;;  %v168_v6 = vmul.f32 %v1440_v53, %v1961_v5  ;;  %v1452_v14 = vunpack.c.l.bf16 %v1710_v63  ;;  %v2065_v52 = vld [vmem:[%s2530_s0 + $0x60] sm:$0xff]  }
  0x10   :  { %1812 = vmatprep.subr.bf16.mxu0 %v1904_v13  ;;  %1888 = vmatprep.subr.bf16.mxu1 %v1904_v13  ;;  %v169_v7 = vmul.f32 %v1441_v54, %v1961_v5  ;;  %v170_v8 = vmul.f32 %v1444_v55, %v1961_v5  ;;  %v171_v9 = vmul.f32 %v1445_v56, %v1961_v5  ;;  %v297_v15 = vmax.f32 %v233_v61, 0.0 }
  0x11   :  { %v236_v11 = vadd.f32 %v1972_v10, %v165_v57  ;;  %v172_v12 = vmul.f32 %v1448_v58, %v1961_v5  ;;  %v298_v16 = vmax.f32 %v234_v62, 0.0  ;;  %v1453_v17 = vunpack.c.h.bf16 %v1710_v63 }
  0x12   :  { %v1456_v18 = vunpack.c.l.bf16 %v1711_v4  ;;  %v299_v19 = vmax.f32 %v235_v1, 0.0  ;;  %v237_v20 = vadd.f32 %v1972_v10, %v166_v2  ;;  %v238_v21 = vadd.f32 %v1972_v10, %v167_v3 }
  0x13   :  { %1813 = vmatpush3.bf16.msra.mxu0 %v1904_v13  ;;  %1896 = vmatpush3.bf16.msra.mxu1 %v1904_v13  ;;  %v173_v13 = vmul.f32 %v1449_v59, %v1961_v5  ;;  %v239_v24 = vadd.f32 %v1972_v10, %v168_v6  ;;  %v240_v25 = vadd.f32 %v1972_v10, %v169_v7  ;;  %v300_v28 = vmax.f32 %v236_v11, 0.0  ;;  %v1718_v59 = vld [vmem:[%s2530_s0 + $0x88] sm:$0xff]   ;;  %v1720_v11 = vld [vmem:[%s2530_s0 + $0x98] sm:$0xff]  }
  0x14   :  { %1814 = vmatprep.subr.bf16.mxu0 %v1905_v22  ;;  %1889 = vmatprep.subr.bf16.mxu1 %v1905_v22  ;;  %v241_v26 = vadd.f32 %v1972_v10, %v170_v8  ;;  %v242_v27 = vadd.f32 %v1972_v10, %v171_v9  ;;  %v243_v29 = vadd.f32 %v1972_v10, %v172_v12  ;;  %v1460_v35 = vunpack.c.l.bf16 %v1712_v23 }
  0x15   :  { %v244_v30 = vadd.f32 %v1972_v10, %v173_v13  ;;  %v358_v32 = vpack.c.bf16 %v298_v16, %v297_v15  ;;  %v175_v33 = vmul.f32 %v1453_v17, %v1961_v5  ;;  %v176_v34 = vmul.f32 %v1456_v18, %v1961_v5 }
  0x16   :  { %v301_v36 = vmax.f32 %v237_v20, 0.0  ;;  %v302_v37 = vmax.f32 %v238_v21, 0.0  ;;  %v1461_v39 = vunpack.c.h.bf16 %v1712_v23  ;;  %v303_v40 = vmax.f32 %v239_v24, 0.0  ;;  %v1721_v24 = vld [vmem:[%s2530_s0 + $0xa0] sm:$0xff]  }
  0x17   :  { %1815 = vmatpush3.bf16.msra.mxu0 %v1905_v22  ;;  %1897 = vmatpush3.bf16.msra.mxu1 %v1905_v22  ;;  %v1457_v22 = vunpack.c.h.bf16 %v1711_v4  ;;  %v304_v41 = vmax.f32 %v240_v25, 0.0  ;;  %v305_v42 = vmax.f32 %v241_v26, 0.0  ;;  %v359_v45 = vpack.c.bf16 %v300_v28, %v299_v19 }
  0x18   :  { %1816 = vmatprep.subr.bf16.mxu0 %v1906_v31  ;;  %1890 = vmatprep.subr.bf16.mxu1 %v1906_v31  ;;  %v307_v46 = vmax.f32 %v243_v29, 0.0  ;;  %v308_v47 = vmax.f32 %v244_v30, 0.0  ;;  %v246_v49 = vadd.f32 %v1972_v10, %v175_v33  ;;  %v2059_v50 = vadd.f32 %v1972_v10, %v176_v34  ;;  %v1722_v33 = vld [vmem:[%s2530_s0 + $0xa8] sm:$0xff]  }
  0x19   :  { %v177_v38 = vmul.f32 %v1457_v22, %v1961_v5  ;;  %v178_v51 = vmul.f32 %v1460_v35, %v1961_v5  ;;  %v179_v54 = vmul.f32 %v1461_v39, %v1961_v5  ;;  %v1480_v55 = vunpack.c.l.bf16 %v1717_v44 }
  0x1a   :  { %v360_v56 = vpack.c.bf16 %v302_v37, %v301_v36  ;;  %v361_v57 = vpack.c.bf16 %v304_v41, %v303_v40  ;;  %v1464_v62 = vunpack.c.l.bf16 %v2065_v52  ;;  %v1481_v63 = vunpack.c.h.bf16 %v1717_v44 }
  0x1b   :  { %1817 = vmatpush3.bf16.msra.mxu0 %v1906_v31  ;;  %1898 = vmatpush3.bf16.msra.mxu1 %v1906_v31  ;;  %v174_v31 = vmul.f32 %v1452_v14, %v1961_v5  ;;  %v2068_v53 = vadd.f32 %v1972_v10, %v177_v38  ;;  %v310_v1 = vmax.f32 %v246_v49, 0.0  ;;  %v311_v2 = vmax.f32 %v2059_v50, 0.0 }
  0x1c   :  { %1818 = vmatprep.subr.bf16.mxu0 %v1907_v43  ;;  %1891 = vmatprep.subr.bf16.mxu1 %v1907_v43  ;;  %v2084_v3 = vadd.f32 %v1972_v10, %v178_v51  ;;  %v188_v4 = vmul.f32 %v1480_v55, %v1961_v5  ;;  %v2089_v7 = vadd.f32 %v1972_v10, %v179_v54  ;;  %v1484_v9 = vunpack.c.l.bf16 %v1718_v59 }
  0x1d   :  { %v245_v48 = vadd.f32 %v1972_v10, %v174_v31  ;;  %v312_v6 = vmax.f32 %v2068_v53, 0.0  ;;  %v189_v8 = vmul.f32 %v1481_v63, %v1961_v5  ;;  %v1465_v12 = vunpack.c.h.bf16 %v2065_v52 }
  0x1e   :  { %v259_v13 = vadd.f32 %v1972_v10, %v188_v4  ;;  %v1485_v14 = vunpack.c.h.bf16 %v1718_v59  ;;  %v2098_v16 = vmul.f32 %v1464_v62, %v1961_v5  ;;  %v190_v18 = vmul.f32 %v1484_v9, %v1961_v5 }
  0x1f   :  { %1819 = vmatpush3.bf16.msra.mxu0 %v1907_v43  ;;  %1899 = vmatpush3.bf16.msra.mxu1 %v1907_v43  ;;  %v306_v43 = vmax.f32 %v242_v27, 0.0  ;;  %v309_v61 = vmax.f32 %v245_v48, 0.0  ;;  %v260_v17 = vadd.f32 %v1972_v10, %v189_v8  ;;  %v1492_v23 = vunpack.c.l.bf16 %v1720_v11 }
  0x20   :  { %v323_v20 = vmax.f32 %v259_v13, 0.0  ;;  %v191_v21 = vmul.f32 %v1485_v14, %v1961_v5  ;;  %v261_v27 = vadd.f32 %v1972_v10, %v190_v18  ;;  %v1493_v31 = vunpack.c.h.bf16 %v1720_v11  ;;  %v1725_v18 = vld [vmem:[%s2530_s0 + $0xc0] sm:$0xff]  }
  0x21   :  { %v2071_v58 = vpack.c.bf16 %v306_v43, %v305_v42  ;;  %v2107_v25 = vpack.c.bf16 %v310_v1, %v309_v61  ;;  %v324_v26 = vmax.f32 %v260_v17, 0.0  ;;  %v1496_v37 = vunpack.c.l.bf16 %v1721_v24  ;;  %v1724_v1 = vld [vmem:[%s2530_s0 + $0xb8] sm:$0xff]  }
  0x22   :  { %1821 = vmatmul.mubr.bf16.vlgmr.msra.gmra.mxu0 %v356_v60  ;;  %v2076_v60 = vpack.c.bf16 %v308_v47, %v307_v46  ;;  %v262_v29 = vadd.f32 %v1972_v10, %v191_v21  ;;  %v325_v35 = vmax.f32 %v261_v27, 0.0  ;;  %v195_v40 = vmul.f32 %v1493_v31, %v1961_v5  ;;  %v1723_v46 = vld [vmem:[%s2530_s0 + $0xb0] sm:$0xff]   ;;  %v1714_v47 = vld [vmem:[%s2530_s0 + $0x68] sm:$0xff]  }
  0x23   :  { %1824 = vmatprep.mubr.bf16.mxu0 %v357_v0  ;;  %v1719_v0 = vld [vmem:[%s2530_s0 + $0x90] sm:$0xff]   ;;  %v371_v34 = vpack.c.bf16 %v324_v26, %v323_v20  ;;  %v1497_v43 = vunpack.c.h.bf16 %v1721_v24  ;;  %v196_v44 = vmul.f32 %v1496_v37, %v1961_v5  ;;  %v1501_v54 = vunpack.c.h.bf16 %v1722_v33 }
  0x24   :  { %v1488_v15 = vunpack.c.l.bf16 %v1719_v0  ;;  %v1489_v19 = vunpack.c.h.bf16 %v1719_v0  ;;  %v326_v38 = vmax.f32 %v262_v29, 0.0  ;;  %v266_v49 = vadd.f32 %v1972_v10, %v195_v40  ;;  %v1727_v40 = vld [vmem:[%s2530_s0 + $0xd0] sm:$0xff]  }
  0x25   :  { %1852 = vmatprep.mubr.bf16.mxu1 %v371_v34  ;;  %v199_v62 = vmul.f32 %v1501_v54, %v1961_v5  ;;  %v1504_v63 = vunpack.c.l.bf16 %v1723_v46  ;;  %v1505_v0 = vunpack.c.h.bf16 %v1723_v46  ;;  %v313_v4 = vmax.f32 %v2084_v3, 0.0 }
  0x26   :  { %v192_v22 = vmul.f32 %v1488_v15, %v1961_v5  ;;  %v193_v28 = vmul.f32 %v1489_v19, %v1961_v5  ;;  %v372_v48 = vpack.c.bf16 %v326_v38, %v325_v35  ;;  %v330_v61 = vmax.f32 %v266_v49, 0.0 }
  0x27   :  { %v1468_v8 = vunpack.c.l.bf16 %v1714_v47  ;;  %v314_v13 = vmax.f32 %v2089_v7, 0.0  ;;  %v1469_v14 = vunpack.c.h.bf16 %v1714_v47  ;;  %v200_v15 = vmul.f32 %v1504_v63, %v1961_v5 }
  0x28   :  { %v263_v30 = vadd.f32 %v1972_v10, %v192_v22  ;;  %v264_v36 = vadd.f32 %v1972_v10, %v193_v28  ;;  %1853 = vmatmul.mubr.bf16.vlgmr.msra.gmra.mxu1 %v372_v48  ;;  %v201_v17 = vmul.f32 %v1505_v0, %v1961_v5  ;;  %v181_v3 = vmul.f32 %v1465_v12, %v1961_v5 }
  0x29   :  { %v1508_v19 = vunpack.c.l.bf16 %v1724_v1  ;;  %v1509_v20 = vunpack.c.h.bf16 %v1724_v1  ;;  %v271_v24 = vadd.f32 %v1972_v10, %v200_v15  ;;  %v1512_v27 = vunpack.c.l.bf16 %v1725_v18  ;;  %v1728_v15 = vld [vmem:[%s2530_s0 + $0xd8] sm:$0xff]  }
  0x2a   :  { %1825 = vmatmul.mubr.bf16.gmra.mxu0 %v358_v32  ;;  %v194_v32 = vmul.f32 %v1492_v23, %v1961_v5  ;;  %v327_v39 = vmax.f32 %v263_v30, 0.0  ;;  %v328_v42 = vmax.f32 %v264_v36, 0.0  ;;  %v270_v23 = vadd.f32 %v1972_v10, %v199_v62 }
  0x2b   :  { %1828 = vmatprep.mubr.bf16.mxu0 %v359_v45  ;;  %v1500_v45 = vunpack.c.l.bf16 %v1722_v33  ;;  %v1513_v52 = vunpack.c.h.bf16 %v1725_v18  ;;  %v365_v12 = vpack.c.bf16 %v312_v6, %v311_v2  ;;  %v251_v28 = vadd.f32 %v1972_v10, %v2098_v16  ;;  %v1716_v33 = vld [vmem:[%s2530_s0 + $0x78] sm:$0xff]   ;;  %v1726_v16 = vld [vmem:[%s2530_s0 + $0xc8] sm:$0xff]  }
  0x2c   :  { %v265_v41 = vadd.f32 %v1972_v10, %v194_v32  ;;  %v373_v55 = vpack.c.bf16 %v328_v42, %v327_v39  ;;  %v252_v31 = vadd.f32 %v1972_v10, %v181_v3  ;;  %v182_v32 = vmul.f32 %v1468_v8, %v1961_v5 }
  0x2d   :  { %v198_v59 = vmul.f32 %v1500_v45, %v1961_v5  ;;  %v202_v34 = vmul.f32 %v1508_v19, %v1961_v5  ;;  %v203_v50 = vmul.f32 %v1509_v20, %v1961_v5  ;;  %v366_v35 = vpack.c.bf16 %v314_v13, %v313_v4 }
  0x2e   :  { %v329_v51 = vmax.f32 %v265_v41, 0.0  ;;  %1856 = vmatprep.mubr.bf16.mxu1 %v373_v55  ;;  %v183_v53 = vmul.f32 %v1469_v14, %v1961_v5  ;;  %v334_v6 = vmax.f32 %v270_v23, 0.0  ;;  %v335_v36 = vmax.f32 %v271_v24, 0.0 }
  0x2f   :  { %v269_v22 = vadd.f32 %v1972_v10, %v198_v59  ;;  %v204_v38 = vmul.f32 %v1512_v27, %v1961_v5  ;;  %v205_v39 = vmul.f32 %v1513_v52, %v1961_v5  ;;  %v315_v41 = vmax.f32 %v251_v28, 0.0 }
  0x30   :  { %v374_v21 = vpack.c.bf16 %v330_v61, %v329_v51  ;;  %v316_v45 = vmax.f32 %v252_v31, 0.0  ;;  %v273_v46 = vadd.f32 %v1972_v10, %v202_v34  ;;  %v274_v47 = vadd.f32 %v1972_v10, %v203_v50 }
  0x31   :  { %v333_v2 = vmax.f32 %v269_v22, 0.0  ;;  %v1516_v48 = vunpack.c.l.bf16 %v1726_v16  ;;  %v1517_v51 = vunpack.c.h.bf16 %v1726_v16  ;;  %v1520_v54 = vunpack.c.l.bf16 %v1727_v40 }
  0x32   :  { %1829 = vmatmul.mubr.bf16.gmra.mxu0 %v360_v56  ;;  %v197_v56 = vmul.f32 %v1497_v43, %v1961_v5  ;;  %1857 = vmatmul.mubr.bf16.gmra.mxu1 %v374_v21  ;;  %v1521_v55 = vunpack.c.h.bf16 %v1727_v40  ;;  %v276_v59 = vadd.f32 %v1972_v10, %v205_v39  ;;  %v254_v61 = vadd.f32 %v1972_v10, %v183_v53  ;;  %v1729_v21 = vld [vmem:[%s2530_s0 + $0xe0] sm:$0xff]  }
  0x33   :  { %1832 = vmatprep.mubr.bf16.mxu0 %v361_v57  ;;  %v267_v57 = vadd.f32 %v1972_v10, %v196_v44  ;;  %v1476_v44 = vunpack.c.l.bf16 %v1716_v33  ;;  %v376_v49 = vpack.c.bf16 %v334_v6, %v333_v2  ;;  %v1477_v0 = vunpack.c.h.bf16 %v1716_v33 }
  0x34   :  { %v268_v9 = vadd.f32 %v1972_v10, %v197_v56  ;;  %v253_v56 = vadd.f32 %v1972_v10, %v182_v32  ;;  %v367_v1 = vpack.c.bf16 %v316_v45, %v315_v41  ;;  %v337_v4 = vmax.f32 %v273_v46, 0.0  ;;  %v1731_v41 = vld [vmem:[%s2530_s0 + $0xf0] sm:$0xff]  }
  0x35   :  { %v331_v11 = vmax.f32 %v267_v57, 0.0  ;;  %v275_v57 = vadd.f32 %v1972_v10, %v204_v38  ;;  %v338_v8 = vmax.f32 %v274_v47, 0.0  ;;  %v208_v13 = vmul.f32 %v1520_v54, %v1961_v5 }
  0x36   :  { %v332_v7 = vmax.f32 %v268_v9, 0.0  ;;  %v206_v9 = vmul.f32 %v1516_v48, %v1961_v5  ;;  %v209_v14 = vmul.f32 %v1521_v55, %v1961_v5  ;;  %v340_v3 = vmax.f32 %v276_v59, 0.0 }
  0x37   :  { %v339_v18 = vmax.f32 %v275_v57, 0.0  ;;  %v187_v20 = vmul.f32 %v1477_v0, %v1961_v5  ;;  %v378_v23 = vpack.c.bf16 %v338_v8, %v337_v4  ;;  %v279_v27 = vadd.f32 %v1972_v10, %v208_v13 }
  0x38   :  { %v375_v26 = vpack.c.bf16 %v332_v7, %v331_v11  ;;  %v207_v11 = vmul.f32 %v1517_v51, %v1961_v5  ;;  %v318_v7 = vmax.f32 %v254_v61, 0.0  ;;  %v277_v24 = vadd.f32 %v1972_v10, %v206_v9 }
  0x39   :  { %v280_v52 = vadd.f32 %v1972_v10, %v209_v14  ;;  %v379_v28 = vpack.c.bf16 %v340_v3, %v339_v18  ;;  %v258_v33 = vadd.f32 %v1972_v10, %v187_v20  ;;  %v343_v2 = vmax.f32 %v279_v27, 0.0 }
  0x3a   :  { %1833 = vmatmul.mubr.bf16.gmra.mxu0 %v2071_v58  ;;  %v1715_v58 = vld [vmem:[%s2530_s0 + $0x70] sm:$0xff]   ;;  %1860 = vmatprep.mubr.bf16.mxu1 %v375_v26  ;;  %v1524_v26 = vunpack.c.l.bf16 %v1728_v15  ;;  %v341_v50 = vmax.f32 %v277_v24, 0.0  ;;  %v1536_v51 = vunpack.c.l.bf16 %v1731_v41  ;;  %v1537_v54 = vunpack.c.h.bf16 %v1731_v41 }
  0x3b   :  { %1836 = vmatprep.mubr.bf16.mxu0 %v2076_v60  ;;  %v272_v60 = vadd.f32 %v1972_v10, %v201_v17  ;;  %v1472_v29 = vunpack.c.l.bf16 %v1715_v58  ;;  %v1473_v30 = vunpack.c.h.bf16 %v1715_v58  ;;  %1861 = vmatmul.mubr.bf16.gmra.mxu1 %v376_v49  ;;  %v186_v17 = vmul.f32 %v1476_v44, %v1961_v5 }
  0x3c   :  { %v317_v58 = vmax.f32 %v253_v56, 0.0  ;;  %v344_v6 = vmax.f32 %v280_v52, 0.0  ;;  %v322_v40 = vmax.f32 %v258_v33, 0.0  ;;  %v217_v0 = vmul.f32 %v1537_v54, %v1961_v5 }
  0x3d   :  { %v336_v37 = vmax.f32 %v272_v60, 0.0  ;;  %v184_v42 = vmul.f32 %v1472_v29, %v1961_v5  ;;  %v185_v43 = vmul.f32 %v1473_v30, %v1961_v5  ;;  %v278_v60 = vadd.f32 %v1972_v10, %v207_v11 }
  0x3e   :  { %v1528_v29 = vunpack.c.l.bf16 %v1729_v21  ;;  %v1529_v30 = vunpack.c.h.bf16 %v1729_v21  ;;  %v368_v31 = vpack.c.bf16 %v318_v7, %v317_v58  ;;  %v257_v32 = vadd.f32 %v1972_v10, %v186_v17 }
  0x3f   :  { %v255_v62 = vadd.f32 %v1972_v10, %v184_v42  ;;  %v256_v63 = vadd.f32 %v1972_v10, %v185_v43  ;;  %v342_v53 = vmax.f32 %v278_v60, 0.0  ;;  %v381_v45 = vpack.c.bf16 %v344_v6, %v343_v2 }
  0x40   :  { %v213_v38 = vmul.f32 %v1529_v30, %v1961_v5  ;;  %v321_v39 = vmax.f32 %v257_v32, 0.0  ;;  %v288_v17 = vadd.f32 %v1972_v10, %v217_v0 }
  0x41   :  { %v319_v19 = vmax.f32 %v255_v62, 0.0  ;;  %v320_v22 = vmax.f32 %v256_v63, 0.0  ;;  %v380_v44 = vpack.c.bf16 %v342_v53, %v341_v50  ;;  %v216_v63 = vmul.f32 %v1536_v51, %v1961_v5 }
  0x42   :  { %1837 = vmatmul.mubr.bf16.gmra.mxu0 %v2107_v25  ;;  %v377_v25 = vpack.c.bf16 %v336_v37, %v335_v36  ;;  %v1730_v36 = vld [vmem:[%s2530_s0 + $0xe8] sm:$0xff]   ;;  %v212_v37 = vmul.f32 %v1528_v29, %v1961_v5  ;;  %v284_v49 = vadd.f32 %v1972_v10, %v213_v38  ;;  %v370_v55 = vpack.c.bf16 %v322_v40, %v321_v39 }
  0x43   :  { %1840 = vmatprep.mubr.bf16.mxu0 %v365_v12  ;;  %v1525_v12 = vunpack.c.h.bf16 %v1728_v15  ;;  %v369_v34 = vpack.c.bf16 %v320_v22, %v319_v19  ;;  %v1532_v43 = vunpack.c.l.bf16 %v1730_v36  ;;  %v1533_v47 = vunpack.c.h.bf16 %v1730_v36 }
  0x44   :  { %1864 = vmatprep.mubr.bf16.mxu1 %v377_v25  ;;  %v283_v48 = vadd.f32 %v1972_v10, %v212_v37  ;;  %v348_v62 = vmax.f32 %v284_v49, 0.0  ;;  %v287_v15 = vadd.f32 %v1972_v10, %v216_v63  ;;  %v352_v20 = vmax.f32 %v288_v17, 0.0 }
  0x45   :  { %1865 = vmatmul.mubr.bf16.gmra.mxu1 %v378_v23  ;;  %v211_v16 = vmul.f32 %v1525_v12, %v1961_v5  ;;  %v214_v56 = vmul.f32 %v1532_v43, %v1961_v5  ;;  %v215_v59 = vmul.f32 %v1533_v47, %v1961_v5 }
  0x46   :  { %1868 = vmatprep.mubr.bf16.mxu1 %v379_v28  ;;  %v347_v61 = vmax.f32 %v283_v48, 0.0  ;;  %v351_v19 = vmax.f32 %v287_v15, 0.0 }
  0x47   :  { %v282_v46 = vadd.f32 %v1972_v10, %v211_v16  ;;  %v285_v4 = vadd.f32 %v1972_v10, %v214_v56  ;;  %v286_v9 = vadd.f32 %v1972_v10, %v215_v59 }
  0x48   :  { %v383_v14 = vpack.c.bf16 %v348_v62, %v347_v61  ;;  %v385_v24 = vpack.c.bf16 %v352_v20, %v351_v19 }
  0x49   :  { %v346_v57 = vmax.f32 %v282_v46, 0.0  ;;  %v349_v18 = vmax.f32 %v285_v4, 0.0  ;;  %v350_v3 = vmax.f32 %v286_v9, 0.0 }
  0x4a   :  { %1841 = vmatmul.mubr.bf16.gmra.mxu0 %v366_v35  ;;  %v210_v35 = vmul.f32 %v1524_v26, %v1961_v5 }
  0x4b   :  { %1844 = vmatprep.mubr.bf16.mxu0 %v367_v1  ;;  %v1732_v1 = vld [vmem:[%s2530_s0 + $0xf8] sm:$0xff]   ;;  %v384_v21 = vpack.c.bf16 %v350_v3, %v349_v18 }
  0x4c   :  { %v281_v42 = vadd.f32 %v1972_v10, %v210_v35  ;;  %v1540_v11 = vunpack.c.l.bf16 %v1732_v1  ;;  %v1541_v13 = vunpack.c.h.bf16 %v1732_v1 }
  0x4d   :  { %1869 = vmatmul.mubr.bf16.gmra.mxu1 %v380_v44 }
  0x4e   :  { %v345_v25 = vmax.f32 %v281_v42, 0.0  ;;  %1872 = vmatprep.mubr.bf16.mxu1 %v381_v45  ;;  %v218_v58 = vmul.f32 %v1540_v11, %v1961_v5  ;;  %v219_v7 = vmul.f32 %v1541_v13, %v1961_v5 }
  0x50   :  { %v382_v8 = vpack.c.bf16 %v346_v57, %v345_v25  ;;  %v289_v22 = vadd.f32 %v1972_v10, %v218_v58  ;;  %v290_v23 = vadd.f32 %v1972_v10, %v219_v7 }
  0x52   :  { %1845 = vmatmul.mubr.bf16.gmra.mxu0 %v368_v31  ;;  %v353_v26 = vmax.f32 %v289_v22, 0.0  ;;  %v354_v60 = vmax.f32 %v290_v23, 0.0 }
  0x53   :  { %1848 = vmatprep.mubr.bf16.mxu0 %v369_v34 }
  0x54   :  { %v386_v27 = vpack.c.bf16 %v354_v60, %v353_v26 }
  0x55   :  { %1873 = vmatmul.mubr.bf16.gmra.mxu1 %v382_v8 }
  0x56   :  { %1876 = vmatprep.mubr.bf16.mxu1 %v383_v14 }
  0x5a   :  { %1849 = vmatmul.mubr.bf16.gmra.mxu0 %v370_v55 }
  0x5d   :  { %1877 = vmatmul.mubr.bf16.gmra.mxu1 %v384_v21 }
  0x5e   :  { %1880 = vmatprep.mubr.bf16.mxu1 %v385_v24 }
  0x65   :  { %1881 = vmatmul.mubr.bf16.gmra.mxu1 %v386_v27 }
  0xe2   :  { %v1822_v52 = vpop.f32.mrf.mxu0 }
  0xe3   :  { %v1132_v34 = vmul.f32 %v1822_v52, %v1822_v52 }
  0xe4   :  { %v485_v12 = vpop.f32.mrf.mxu0 }
  0xe5   :  { %v1130_v30 = vmul.f32 %v485_v12, %v485_v12 }
  0xe6   :  { %v1823_v28 = vpop.f32.mrf.mxu0 }
  0xe7   :  { %v1550_v29 = vpack.c.bf16 %v1823_v28, %v1822_v52  ;;  %v1133_v2 = vmul.f32 %v1823_v28, %v1823_v28 }
  0xe8   :  { %v488_v5 = vpop.f32.mrf.mxu0  ;;  %v2247_v0 = vpop.f32.mrf.mxu1 }
  0xe9   :  { %1733 = vst [vmem:[%s2533_s4 + $0x8] sm:$0xff] %v1550_v29   ;;  %v1545_v31 = vpack.c.bf16 %v488_v5, %v485_v12  ;;  %v1060_v32 = vadd.f32 %v488_v5, %v485_v12  ;;  %v1131_v10 = vmul.f32 %v488_v5, %v488_v5 }
  0xea   :  { %v1826_v33 = vpop.f32.mrf.mxu0  ;;  %v2252_v13 = vpop.f32.mrf.mxu1 }
  0xeb   :  { %1546 = vst [vmem:[%s2533_s4] sm:$0xff] %v1545_v31   ;;  %v1061_v50 = vadd.f32 %v1822_v52, %v1060_v32  ;;  %v1194_v35 = vadd.f32 %v1131_v10, %v1130_v30  ;;  %v1136_v47 = vmul.f32 %v1826_v33, %v1826_v33 }
  0xec   :  { %v501_v53 = vpop.f32.mrf.mxu0  ;;  %v2257_v3 = vpop.f32.mrf.mxu1 }
  0xed   :  { %v1195_v6 = vadd.f32 %v1194_v35, %v1132_v34  ;;  %v1062_v16 = vadd.f32 %v1823_v28, %v1061_v50  ;;  %v1134_v38 = vmul.f32 %v501_v53, %v501_v53  ;;  %v1630_v20 = vpack.c.bf16 %v2257_v3, %v2247_v0 }
  0xee   :  { %v1827_v36 = vpop.f32.mrf.mxu0  ;;  %v2261_v22 = vpop.f32.mrf.mxu1 }
  0xef   :  { %v1063_v37 = vadd.f32 %v1062_v16, %v501_v53  ;;  %v1196_v39 = vadd.f32 %v1195_v6, %v1133_v2  ;;  %v1560_v40 = vpack.c.bf16 %v1827_v36, %v1826_v33  ;;  %v1137_v54 = vmul.f32 %v1827_v36, %v1827_v36  ;;  %1749 = vst [vmem:[%s2533_s4 + $0x88] sm:$0xff] %v1630_v20  }
  0xf0   :  { %v504_v41 = vpop.f32.mrf.mxu0  ;;  %v1625_v52 = vpack.c.bf16 %v2261_v22, %v2252_v13 }
  0xf1   :  { %v1197_v42 = vadd.f32 %v1196_v39, %v1134_v38  ;;  %1735 = vst [vmem:[%s2533_s4 + $0x18] sm:$0xff] %v1560_v40   ;;  %v1555_v43 = vpack.c.bf16 %v504_v41, %v501_v53  ;;  %v1064_v44 = vadd.f32 %v1063_v37, %v504_v41  ;;  %v1135_v45 = vmul.f32 %v504_v41, %v504_v41 }
  0xf2   :  { %v1830_v46 = vpop.f32.mrf.mxu0  ;;  %v2268_v12 = vpop.f32.mrf.mxu1  ;;  %1748 = vst [vmem:[%s2533_s4 + $0x80] sm:$0xff] %v1625_v52  }
  0xf3   :  { %1734 = vst [vmem:[%s2533_s4 + $0x10] sm:$0xff] %v1555_v43   ;;  %v1065_v48 = vadd.f32 %v1826_v33, %v1064_v44  ;;  %v1198_v49 = vadd.f32 %v1197_v42, %v1135_v45  ;;  %v1140_v14 = vmul.f32 %v1830_v46, %v1830_v46 }
  0xf4   :  { %v517_v51 = vpop.f32.mrf.mxu0  ;;  %v2276_v32 = vpop.f32.mrf.mxu1 }
  0xf5   :  { %v1199_v55 = vadd.f32 %v1198_v49, %v1136_v47  ;;  %v1066_v56 = vadd.f32 %v1827_v36, %v1065_v48  ;;  %v1138_v59 = vmul.f32 %v517_v51, %v517_v51 }
  0xf6   :  { %v1831_v25 = vpop.f32.mrf.mxu0  ;;  %v2281_v35 = vpop.f32.mrf.mxu1 }
  0xf7   :  { %v1067_v57 = vadd.f32 %v1066_v56, %v517_v51  ;;  %v1200_v61 = vadd.f32 %v1199_v55, %v1137_v54  ;;  %v1570_v62 = vpack.c.bf16 %v1831_v25, %v1830_v46  ;;  %v1141_v58 = vmul.f32 %v1831_v25, %v1831_v25 }
  0xf8   :  { %v520_v63 = vpop.f32.mrf.mxu0  ;;  %v1640_v16 = vpack.c.bf16 %v2281_v35, %v2268_v12  ;;  %v2285_v37 = vpop.f32.mrf.mxu1 }
  0xf9   :  { %v1201_v1 = vadd.f32 %v1200_v61, %v1138_v59  ;;  %1737 = vst [vmem:[%s2533_s4 + $0x28] sm:$0xff] %v1570_v62   ;;  %v1565_v4 = vpack.c.bf16 %v520_v63, %v517_v51  ;;  %v1068_v8 = vadd.f32 %v1067_v57, %v520_v63  ;;  %v1139_v9 = vmul.f32 %v520_v63, %v520_v63 }
  0xfa   :  { %v1834_v11 = vpop.f32.mrf.mxu0  ;;  %1751 = vst [vmem:[%s2533_s4 + $0x98] sm:$0xff] %v1640_v16   ;;  %v1635_v43 = vpack.c.bf16 %v2285_v37, %v2276_v32 }
  0xfb   :  { %1736 = vst [vmem:[%s2533_s4 + $0x20] sm:$0xff] %v1565_v4   ;;  %v1069_v15 = vadd.f32 %v1830_v46, %v1068_v8  ;;  %v1202_v17 = vadd.f32 %v1201_v1, %v1139_v9  ;;  %v1144_v10 = vmul.f32 %v1834_v11, %v1834_v11  ;;  %v2292_v44 = vpop.f32.mrf.mxu1 }
  0xfc   :  { %v533_v18 = vpop.f32.mrf.mxu0  ;;  %1750 = vst [vmem:[%s2533_s4 + $0x90] sm:$0xff] %v1635_v43  }
  0xfd   :  { %v1203_v7 = vadd.f32 %v1202_v17, %v1140_v14  ;;  %v1070_v19 = vadd.f32 %v1831_v25, %v1069_v15  ;;  %v1142_v24 = vmul.f32 %v533_v18, %v533_v18  ;;  %v2300_v51 = vpop.f32.mrf.mxu1 }
  0xfe   :  { %v1835_v21 = vpop.f32.mrf.mxu0 }
  0xff   :  { %v1071_v23 = vadd.f32 %v1070_v19, %v533_v18  ;;  %v1204_v26 = vadd.f32 %v1203_v7, %v1141_v58  ;;  %v1580_v60 = vpack.c.bf16 %v1835_v21, %v1834_v11  ;;  %v1145_v53 = vmul.f32 %v1835_v21, %v1835_v21  ;;  %v2305_v57 = vpop.f32.mrf.mxu1 }
 0x100   :  { %v536_v27 = vpop.f32.mrf.mxu0  ;;  %v1650_v63 = vpack.c.bf16 %v2305_v57, %v2292_v44 }
 0x101   :  { %v1205_v28 = vadd.f32 %v1204_v26, %v1142_v24  ;;  %1739 = vst [vmem:[%s2533_s4 + $0x38] sm:$0xff] %v1580_v60   ;;  %v1575_v29 = vpack.c.bf16 %v536_v27, %v533_v18  ;;  %v1072_v5 = vadd.f32 %v1071_v23, %v536_v27  ;;  %v1143_v30 = vmul.f32 %v536_v27, %v536_v27  ;;  %v2309_v4 = vpop.f32.mrf.mxu1 }
 0x102   :  { %v1838_v31 = vpop.f32.mrf.mxu0  ;;  %1753 = vst [vmem:[%s2533_s4 + $0xa8] sm:$0xff] %v1650_v63   ;;  %v1645_v17 = vpack.c.bf16 %v2309_v4, %v2300_v51 }
 0x103   :  { %1738 = vst [vmem:[%s2533_s4 + $0x30] sm:$0xff] %v1575_v29   ;;  %v1073_v33 = vadd.f32 %v1834_v11, %v1072_v5  ;;  %v1206_v34 = vadd.f32 %v1205_v28, %v1143_v30  ;;  %v1148_v54 = vmul.f32 %v1838_v31, %v1838_v31 }
 0x104   :  { %v549_v50 = vpop.f32.mrf.mxu0  ;;  %1752 = vst [vmem:[%s2533_s4 + $0xa0] sm:$0xff] %v1645_v17  }
 0x105   :  { %v1207_v2 = vadd.f32 %v1206_v34, %v1144_v10  ;;  %v1074_v6 = vadd.f32 %v1835_v21, %v1073_v33  ;;  %v1146_v39 = vmul.f32 %v549_v50, %v549_v50  ;;  %v2316_v18 = vpop.f32.mrf.mxu1 }
 0x106   :  { %v1839_v36 = vpop.f32.mrf.mxu0 }
 0x107   :  { %v1075_v38 = vadd.f32 %v1074_v6, %v549_v50  ;;  %v1208_v40 = vadd.f32 %v1207_v2, %v1145_v53  ;;  %v1590_v41 = vpack.c.bf16 %v1839_v36, %v1838_v31  ;;  %v1149_v59 = vmul.f32 %v1839_v36, %v1839_v36  ;;  %v2324_v23 = vpop.f32.mrf.mxu1 }
 0x108   :  { %v552_v42 = vpop.f32.mrf.mxu0 }
 0x109   :  { %v1209_v45 = vadd.f32 %v1208_v40, %v1146_v39  ;;  %1741 = vst [vmem:[%s2533_s4 + $0x48] sm:$0xff] %v1590_v41   ;;  %v1585_v46 = vpack.c.bf16 %v552_v42, %v549_v50  ;;  %v1076_v47 = vadd.f32 %v1075_v38, %v552_v42  ;;  %v1147_v48 = vmul.f32 %v552_v42, %v552_v42  ;;  %v2329_v52 = vpop.f32.mrf.mxu1 }
 0x10a   :  { %v1842_v49 = vpop.f32.mrf.mxu0  ;;  %v1660_v30 = vpack.c.bf16 %v2329_v52, %v2316_v18 }
 0x10b   :  { %1740 = vst [vmem:[%s2533_s4 + $0x40] sm:$0xff] %v1585_v46   ;;  %v1077_v55 = vadd.f32 %v1838_v31, %v1076_v47  ;;  %v1210_v56 = vadd.f32 %v1209_v45, %v1147_v48  ;;  %v1152_v24 = vmul.f32 %v1842_v49, %v1842_v49  ;;  %v2333_v10 = vpop.f32.mrf.mxu1 }
 0x10c   :  { %v565_v25 = vpop.f32.mrf.mxu0  ;;  %1755 = vst [vmem:[%s2533_s4 + $0xb8] sm:$0xff] %v1660_v30   ;;  %v1655_v6 = vpack.c.bf16 %v2333_v10, %v2324_v23 }
 0x10d   :  { %v1211_v61 = vadd.f32 %v1210_v56, %v1148_v54  ;;  %v1078_v62 = vadd.f32 %v1839_v36, %v1077_v55  ;;  %v1150_v9 = vmul.f32 %v565_v25, %v565_v25  ;;  %v2340_v16 = vpop.f32.mrf.mxu1 }
 0x10e   :  { %v1843_v1 = vpop.f32.mrf.mxu0  ;;  %1754 = vst [vmem:[%s2533_s4 + $0xb0] sm:$0xff] %v1655_v6   ;;  %v1164_v6 = vmul.f32 %v2247_v0, %v2247_v0 }
 0x10f   :  { %v1079_v8 = vadd.f32 %v1078_v62, %v565_v25  ;;  %v1212_v11 = vadd.f32 %v1211_v61, %v1149_v59  ;;  %v1600_v14 = vpack.c.bf16 %v1843_v1, %v1842_v49  ;;  %v1153_v28 = vmul.f32 %v1843_v1, %v1843_v1  ;;  %v2348_v42 = vpop.f32.mrf.mxu1 }
 0x110   :  { %v568_v15 = vpop.f32.mrf.mxu0 }
 0x111   :  { %v1213_v58 = vadd.f32 %v1212_v11, %v1150_v9  ;;  %1743 = vst [vmem:[%s2533_s4 + $0x58] sm:$0xff] %v1600_v14   ;;  %v1595_v7 = vpack.c.bf16 %v568_v15, %v565_v25  ;;  %v1080_v19 = vadd.f32 %v1079_v8, %v568_v15  ;;  %v1151_v20 = vmul.f32 %v568_v15, %v568_v15  ;;  %v2353_v48 = vpop.f32.mrf.mxu1 }
 0x112   :  { %v1846_v21 = vpop.f32.mrf.mxu0  ;;  %v1670_v56 = vpack.c.bf16 %v2353_v48, %v2340_v16 }
 0x113   :  { %1742 = vst [vmem:[%s2533_s4 + $0x50] sm:$0xff] %v1595_v7   ;;  %v1081_v26 = vadd.f32 %v1842_v49, %v1080_v19  ;;  %v1214_v60 = vadd.f32 %v1213_v58, %v1151_v20  ;;  %v1156_v43 = vmul.f32 %v1846_v21, %v1846_v21  ;;  %v2357_v59 = vpop.f32.mrf.mxu1 }
 0x114   :  { %v581_v27 = vpop.f32.mrf.mxu0  ;;  %1757 = vst [vmem:[%s2533_s4 + $0xc8] sm:$0xff] %v1670_v56   ;;  %v1665_v9 = vpack.c.bf16 %v2357_v59, %v2348_v42  ;;  %v1167_v56 = vmul.f32 %v2285_v37, %v2285_v37 }
 0x115   :  { %v1215_v29 = vadd.f32 %v1214_v60, %v1152_v24  ;;  %v1082_v5 = vadd.f32 %v1843_v1, %v1081_v26  ;;  %v1154_v34 = vmul.f32 %v581_v27, %v581_v27  ;;  %v2364_v11 = vpop.f32.mrf.mxu1 }
 0x116   :  { %v1847_v31 = vpop.f32.mrf.mxu0  ;;  %1756 = vst [vmem:[%s2533_s4 + $0xc0] sm:$0xff] %v1665_v9  }
 0x117   :  { %v1083_v33 = vadd.f32 %v1082_v5, %v581_v27  ;;  %v1216_v50 = vadd.f32 %v1215_v29, %v1153_v28  ;;  %v1610_v53 = vpack.c.bf16 %v1847_v31, %v1846_v21  ;;  %v1157_v49 = vmul.f32 %v1847_v31, %v1847_v31  ;;  %v2372_v7 = vpop.f32.mrf.mxu1 }
 0x118   :  { %v584_v2 = vpop.f32.mrf.mxu0  ;;  %v1162_v5 = vmul.f32 %v2252_v13, %v2252_v13 }
 0x119   :  { %v1217_v36 = vadd.f32 %v1216_v50, %v1154_v34  ;;  %1745 = vst [vmem:[%s2533_s4 + $0x68] sm:$0xff] %v1610_v53   ;;  %v1605_v38 = vpack.c.bf16 %v584_v2, %v581_v27  ;;  %v1084_v39 = vadd.f32 %v1083_v33, %v584_v2  ;;  %v1155_v40 = vmul.f32 %v584_v2, %v584_v2  ;;  %v2377_v24 = vpop.f32.mrf.mxu1 }
 0x11a   :  { %v1850_v41 = vpop.f32.mrf.mxu0  ;;  %v1680_v28 = vpack.c.bf16 %v2377_v24, %v2364_v11  ;;  %v1163_v53 = vmul.f32 %v2261_v22, %v2261_v22 }
 0x11b   :  { %1744 = vst [vmem:[%s2533_s4 + $0x60] sm:$0xff] %v1605_v38   ;;  %v1085_v45 = vadd.f32 %v1846_v21, %v1084_v39  ;;  %v1218_v46 = vadd.f32 %v1217_v36, %v1155_v40  ;;  %v1160_v19 = vmul.f32 %v1850_v41, %v1850_v41  ;;  %v2381_v29 = vpop.f32.mrf.mxu1  ;;  %v1165_v40 = vmul.f32 %v2257_v3, %v2257_v3 }
 0x11c   :  { %v597_v47 = vpop.f32.mrf.mxu0  ;;  %1759 = vst [vmem:[%s2533_s4 + $0xd8] sm:$0xff] %v1680_v28   ;;  %v1675_v33 = vpack.c.bf16 %v2381_v29, %v2372_v7 }
 0x11d   :  { %v1219_v54 = vadd.f32 %v1218_v46, %v1156_v43  ;;  %v1086_v55 = vadd.f32 %v1847_v31, %v1085_v45  ;;  %v1158_v62 = vmul.f32 %v597_v47, %v597_v47  ;;  %v2391_v34 = vpop.f32.mrf.mxu1 }
 0x11e   :  { %v1851_v25 = vpop.f32.mrf.mxu0  ;;  %1758 = vst [vmem:[%s2533_s4 + $0xd0] sm:$0xff] %v1675_v33  }
 0x11f   :  { %v1087_v61 = vadd.f32 %v1086_v55, %v597_v47  ;;  %v1220_v63 = vadd.f32 %v1219_v54, %v1157_v49  ;;  %v1620_v1 = vpack.c.bf16 %v1851_v25, %v1850_v41  ;;  %v1161_v26 = vmul.f32 %v1851_v25, %v1851_v25 }
 0x120   :  { %v600_v8 = vpop.f32.mrf.mxu0 }
 0x121   :  { %v1221_v14 = vadd.f32 %v1220_v63, %v1158_v62  ;;  %1747 = vst [vmem:[%s2533_s4 + $0x78] sm:$0xff] %v1620_v1   ;;  %v1615_v15 = vpack.c.bf16 %v600_v8, %v597_v47  ;;  %v1088_v17 = vadd.f32 %v1087_v61, %v600_v8  ;;  %v1159_v58 = vmul.f32 %v600_v8, %v600_v8 }
 0x122   :  { %v1166_v47 = vmul.f32 %v2276_v32, %v2276_v32  ;;  %v1169_v1 = vmul.f32 %v2281_v35, %v2281_v35 }
 0x123   :  { %1746 = vst [vmem:[%s2533_s4 + $0x70] sm:$0xff] %v1615_v15   ;;  %v1089_v20 = vadd.f32 %v1850_v41, %v1088_v17  ;;  %v1222_v21 = vadd.f32 %v1221_v14, %v1159_v58  ;;  %v1170_v17 = vmul.f32 %v2300_v51, %v2300_v51 }
 0x125   :  { %v1090_v60 = vadd.f32 %v1851_v25, %v1089_v20  ;;  %v1223_v27 = vadd.f32 %v1222_v21, %v1160_v19  ;;  %v1168_v25 = vmul.f32 %v2268_v12, %v2268_v12  ;;  %v1171_v20 = vmul.f32 %v2309_v4, %v2309_v4 }
 0x127   :  { %v1224_v30 = vadd.f32 %v1223_v27, %v1161_v26  ;;  %v1091_v31 = vadd.f32 %v1090_v60, %v2252_v13  ;;  %v2399_v13 = vpop.f32.mrf.mxu1  ;;  %v1173_v60 = vmul.f32 %v2305_v57, %v2305_v57 }
 0x129   :  { %v1092_v50 = vadd.f32 %v1091_v31, %v2261_v22  ;;  %v1225_v2 = vadd.f32 %v1224_v30, %v1162_v5  ;;  %v2404_v39 = vpop.f32.mrf.mxu1 }
 0x12a   :  { %v1690_v43 = vpack.c.bf16 %v2404_v39, %v2391_v34 }
 0x12b   :  { %v1093_v36 = vadd.f32 %v2247_v0, %v1092_v50  ;;  %v1226_v38 = vadd.f32 %v1225_v2, %v1163_v53  ;;  %v2411_v45 = vpop.f32.mrf.mxu1  ;;  %v1175_v50 = vmul.f32 %v2333_v10, %v2333_v10 }
 0x12c   :  { %1761 = vst [vmem:[%s2533_s4 + $0xe8] sm:$0xff] %v1690_v43   ;;  %v1685_v49 = vpack.c.bf16 %v2411_v45, %v2399_v13 }
 0x12d   :  { %v1227_v41 = vadd.f32 %v1226_v38, %v1164_v6  ;;  %v1094_v22 = vadd.f32 %v2257_v3, %v1093_v36  ;;  %v2421_v54 = vpop.f32.mrf.mxu1  ;;  %v1178_v38 = vmul.f32 %v2348_v42, %v2348_v42 }
 0x12e   :  { %1760 = vst [vmem:[%s2533_s4 + $0xe0] sm:$0xff] %v1685_v49   ;;  %v1182_v49 = vmul.f32 %v2372_v7, %v2372_v7 }
 0x12f   :  { %v1095_v46 = vadd.f32 %v1094_v22, %v2276_v32  ;;  %v1228_v0 = vadd.f32 %v1227_v41, %v1165_v40  ;;  %v2429_v32 = vpop.f32.mrf.mxu1  ;;  %v1179_v22 = vmul.f32 %v2357_v59, %v2357_v59 }
 0x131   :  { %v1229_v3 = vadd.f32 %v1228_v0, %v1166_v47  ;;  %v1096_v55 = vadd.f32 %v1095_v46, %v2285_v37  ;;  %v2434_v63 = vpop.f32.mrf.mxu1 }
 0x132   :  { %v1700_v9 = vpack.c.bf16 %v2434_v63, %v2421_v54 }
 0x133   :  { %v1097_v61 = vadd.f32 %v2268_v12, %v1096_v55  ;;  %v1230_v62 = vadd.f32 %v1229_v3, %v1167_v56  ;;  %v2441_v14 = vpop.f32.mrf.mxu1  ;;  %v1183_v56 = vmul.f32 %v2381_v29, %v2381_v29 }
 0x134   :  { %1763 = vst [vmem:[%s2533_s4 + $0xf8] sm:$0xff] %v1700_v9   ;;  %v1695_v58 = vpack.c.bf16 %v2441_v14, %v2429_v32 }
 0x135   :  { %v1231_v8 = vadd.f32 %v1230_v62, %v1168_v25  ;;  %v1098_v37 = vadd.f32 %v2281_v35, %v1097_v61 }
 0x136   :  { %1762 = vst [vmem:[%s2533_s4 + $0xf0] sm:$0xff] %v1695_v58  }
 0x137   :  { %v1099_v15 = vadd.f32 %v1098_v37, %v2300_v51  ;;  %v1232_v12 = vadd.f32 %v1231_v8, %v1169_v1  ;;  %v1172_v51 = vmul.f32 %v2292_v44, %v2292_v44  ;;  %v1186_v8 = vmul.f32 %v2399_v13, %v2399_v13 }
 0x139   :  { %v1233_v19 = vadd.f32 %v1232_v12, %v1170_v17  ;;  %v1100_v35 = vadd.f32 %v1099_v15, %v2309_v4  ;;  %v1174_v4 = vmul.f32 %v2324_v23, %v2324_v23  ;;  %v1187_v15 = vmul.f32 %v2411_v45, %v2411_v45 }
 0x13b   :  { %v1101_v21 = vadd.f32 %v2292_v44, %v1100_v35  ;;  %v1234_v26 = vadd.f32 %v1233_v19, %v1171_v20  ;;  %v1176_v44 = vmul.f32 %v2316_v18, %v2316_v18  ;;  %v1190_v35 = vmul.f32 %v2429_v32, %v2429_v32 }
 0x13d   :  { %v1235_v27 = vadd.f32 %v1234_v26, %v1172_v51  ;;  %v1102_v28 = vadd.f32 %v2305_v57, %v1101_v21  ;;  %v1177_v57 = vmul.f32 %v2329_v52, %v2329_v52  ;;  %v1191_v21 = vmul.f32 %v2441_v14, %v2441_v14 }
 0x13f   :  { %v1103_v5 = vadd.f32 %v1102_v28, %v2324_v23  ;;  %v1236_v30 = vadd.f32 %v1235_v27, %v1173_v60 }
 0x141   :  { %v1237_v31 = vadd.f32 %v1236_v30, %v1174_v4  ;;  %v1104_v33 = vadd.f32 %v1103_v5, %v2333_v10 }
 0x143   :  { %v1105_v53 = vadd.f32 %v2316_v18, %v1104_v33  ;;  %v1238_v2 = vadd.f32 %v1237_v31, %v1175_v50  ;;  %v1180_v18 = vmul.f32 %v2340_v16, %v2340_v16 }
 0x145   :  { %v1239_v6 = vadd.f32 %v1238_v2, %v1176_v44  ;;  %v1106_v36 = vadd.f32 %v2329_v52, %v1105_v53  ;;  %v1181_v52 = vmul.f32 %v2353_v48, %v2353_v48 }
 0x147   :  { %v1107_v23 = vadd.f32 %v1106_v36, %v2348_v42  ;;  %v1240_v40 = vadd.f32 %v1239_v6, %v1177_v57 }
 0x149   :  { %v1241_v41 = vadd.f32 %v1240_v40, %v1178_v38  ;;  %v1108_v10 = vadd.f32 %v1107_v23, %v2357_v59 }
 0x14b   :  { %v1109_v43 = vadd.f32 %v2340_v16, %v1108_v10  ;;  %v1242_v46 = vadd.f32 %v1241_v41, %v1179_v22  ;;  %v1184_v16 = vmul.f32 %v2364_v11, %v2364_v11 }
 0x14d   :  { %v1243_v47 = vadd.f32 %v1242_v46, %v1180_v18  ;;  %v1110_v0 = vadd.f32 %v2353_v48, %v1109_v43  ;;  %v1185_v48 = vmul.f32 %v2377_v24, %v2377_v24 }
 0x14f   :  { %v1111_v42 = vadd.f32 %v1110_v0, %v2372_v7  ;;  %v1244_v3 = vadd.f32 %v1243_v47, %v1181_v52 }
 0x151   :  { %v1245_v55 = vadd.f32 %v1244_v3, %v1182_v49  ;;  %v1112_v59 = vadd.f32 %v1111_v42, %v2381_v29 }
 0x153   :  { %v1113_v25 = vadd.f32 %v2364_v11, %v1112_v59  ;;  %v1246_v61 = vadd.f32 %v1245_v55, %v1183_v56  ;;  %v1188_v11 = vmul.f32 %v2391_v34, %v2391_v34 }
 0x155   :  { %v1247_v62 = vadd.f32 %v1246_v61, %v1184_v16  ;;  %v1114_v1 = vadd.f32 %v2377_v24, %v1113_v25  ;;  %v1189_v24 = vmul.f32 %v2404_v39, %v2404_v39 }
 0x157   :  { %v1115_v7 = vadd.f32 %v1114_v1, %v2399_v13  ;;  %v1248_v37 = vadd.f32 %v1247_v62, %v1185_v48 }
 0x159   :  { %v1249_v9 = vadd.f32 %v1248_v37, %v1186_v8  ;;  %v1116_v29 = vadd.f32 %v1115_v7, %v2411_v45 }
 0x15b   :  { %v1117_v17 = vadd.f32 %v2391_v34, %v1116_v29  ;;  %v1250_v12 = vadd.f32 %v1249_v9, %v1187_v15  ;;  %v1192_v34 = vmul.f32 %v2421_v54, %v2421_v54 }
 0x15d   :  { %v1251_v58 = vadd.f32 %v1250_v12, %v1188_v11  ;;  %v1118_v19 = vadd.f32 %v2404_v39, %v1117_v17  ;;  %v1193_v39 = vmul.f32 %v2434_v63, %v2434_v63 }
 0x15f   :  { %v1119_v13 = vadd.f32 %v1118_v19, %v2429_v32  ;;  %v1252_v20 = vadd.f32 %v1251_v58, %v1189_v24 }
 0x161   :  { %v1253_v51 = vadd.f32 %v1252_v20, %v1190_v35  ;;  %v1120_v45 = vadd.f32 %v1119_v13, %v2441_v14 }
 0x163   :  { %v1121_v26 = vadd.f32 %v2421_v54, %v1120_v45  ;;  %v1254_v60 = vadd.f32 %v1253_v51, %v1191_v21 }
 0x165   :  { %v1122_v27 = vadd.f32 %v2434_v63, %v1121_v26  ;;  %v1255_v28 = vadd.f32 %v1254_v60, %v1192_v34 }
 0x167   :  { %v1123_v32 = vrot.slane %v1122_v27, 4  ;;  %v1256_v5 = vadd.f32 %v1255_v28, %v1193_v39 }
 0x169   :  { %v1124_v4 = vadd.f32 %v1123_v32, %v1122_v27  ;;  %v1257_v30 = vrot.slane %v1256_v5, 4 }
 0x16b   :  { %v1125_v31 = vrot.slane %v1124_v4, 2  ;;  %v1258_v33 = vadd.f32 %v1257_v30, %v1256_v5 }
 0x16d   :  { %v1126_v50 = vadd.f32 %v1125_v31, %v1124_v4  ;;  %v1259_v14 = vrot.slane %v1258_v33, 2 }
 0x16f   :  { %v1127_v44 = vrot.slane %v1126_v50, 1  ;;  %v1260_v53 = vadd.f32 %v1259_v14, %v1258_v33 }
 0x171   :  { %v1128_v2 = vadd.f32 %v1127_v44, %v1126_v50  ;;  %v1261_v57 = vrot.slane %v1260_v53, 1 }
 0x173   :  { %1129 = vst [vmem:[%s2534_s5] sm:$0x1] %v1128_v2  ;;  %v1262_v54 = vadd.f32 %v1261_v57, %v1260_v53 }
 0x175   :  { %1263 = vst [vmem:[%s2535_s6] sm:$0x1] %v1262_v54 }

// kernel: bottleneck_forward.7
= control target key start
LH: loop header
LB: loop body
LE: loop exit
PB: predicated region body
PF: predicated region fallthrough
CT: control target
= control target key end

     0   :  { %s1351_s0 = inlined_call_operand.vmem [shape: bf16[32,16,128], index: 0, kind: input, shape index: {}]   ;;  %s1352_s1 = inlined_call_operand.vmem [shape: f32[1,1,128], index: 1, kind: input, shape index: {}]   ;;  %s1353_s2 = inlined_call_operand.vmem [shape: f32[1,1,128], index: 2, kind: input, shape index: {}]   ;;  %s1354_s3 = inlined_call_operand.vmem [shape: f32[32,16,128], index: 3, kind: input, shape index: {}]   ;;  %s1355_s4 = inlined_call_operand.vmem [shape: f32[32,16,128], index: 4, kind: output, shape index: {}]  }
   0x1   :  { %v550_v0 = vld [vmem:[%s1351_s0] sm:$0xff]   ;;  %v677_v4 = vld [vmem:[%s1351_s0 + $0x8] sm:$0xff]   ;;  %v678_v8 = vld [vmem:[%s1351_s0 + $0x10] sm:$0xff]  }
   0x2   :  { %v739_v1 = vld [vmem:[%s1352_s1] ss:$0 sm:$0xff]  ;;  %v551_v2 = vunpack.c.l.bf16 %v550_v0  ;;  %v552_v3 = vunpack.c.h.bf16 %v550_v0  ;;  %v555_v6 = vunpack.c.l.bf16 %v677_v4  ;;  %v556_v7 = vunpack.c.h.bf16 %v677_v4  ;;  %v679_v13 = vld [vmem:[%s1351_s0 + $0x18] sm:$0xff]   ;;  %v288_v15 = vld [vmem:[%s1354_s3 + $0x8] sm:$0xff] }
   0x3   :  { %v747_v5 = vld [vmem:[%s1353_s2] ss:$0 sm:$0xff]  ;;  %v559_v11 = vunpack.c.l.bf16 %v678_v8  ;;  %v560_v12 = vunpack.c.h.bf16 %v678_v8  ;;  %v563_v18 = vunpack.c.l.bf16 %v679_v13  ;;  %v564_v19 = vunpack.c.h.bf16 %v679_v13  ;;  %v289_v22 = vld [vmem:[%s1354_s3 + $0x10] sm:$0xff]  ;;  %v290_v23 = vld [vmem:[%s1354_s3 + $0x18] sm:$0xff] }
   0x4   :  { %v152_v9 = vmul.f32 %v551_v2, %v739_v1  ;;  %v153_v10 = vmul.f32 %v552_v3, %v739_v1  ;;  %v287_v14 = vld [vmem:[%s1354_s3] sm:$0xff]  ;;  %v154_v16 = vmul.f32 %v555_v6, %v739_v1  ;;  %v155_v17 = vmul.f32 %v556_v7, %v739_v1  ;;  %v292_v29 = vld [vmem:[%s1354_s3 + $0x28] sm:$0xff]  ;;  %v293_v36 = vld [vmem:[%s1354_s3 + $0x30] sm:$0xff] }
   0x5   :  { %v156_v24 = vmul.f32 %v559_v11, %v739_v1  ;;  %v157_v25 = vmul.f32 %v560_v12, %v739_v1  ;;  %v291_v28 = vld [vmem:[%s1354_s3 + $0x20] sm:$0xff]  ;;  %v158_v30 = vmul.f32 %v563_v18, %v739_v1  ;;  %v159_v31 = vmul.f32 %v564_v19, %v739_v1  ;;  %v294_v37 = vld [vmem:[%s1354_s3 + $0x38] sm:$0xff]  ;;  %v681_v47 = vld [vmem:[%s1351_s0 + $0x28] sm:$0xff]  }
   0x6   :  { %v223_v20 = vadd.f32 %v747_v5, %v152_v9  ;;  %v224_v21 = vadd.f32 %v747_v5, %v153_v10  ;;  %v225_v26 = vadd.f32 %v747_v5, %v154_v16  ;;  %v226_v27 = vadd.f32 %v747_v5, %v155_v17  ;;  %v680_v42 = vld [vmem:[%s1351_s0 + $0x20] sm:$0xff]   ;;  %v682_v52 = vld [vmem:[%s1351_s0 + $0x30] sm:$0xff]   ;;  %v683_v57 = vld [vmem:[%s1351_s0 + $0x38] sm:$0xff]  }
   0x7   :  { %v227_v34 = vadd.f32 %v747_v5, %v156_v24  ;;  %v228_v35 = vadd.f32 %v747_v5, %v157_v25  ;;  %v229_v40 = vadd.f32 %v747_v5, %v158_v30  ;;  %v230_v41 = vadd.f32 %v747_v5, %v159_v31  ;;  %v295_v3 = vld [vmem:[%s1354_s3 + $0x40] sm:$0xff]  ;;  %v296_v4 = vld [vmem:[%s1354_s3 + $0x48] sm:$0xff]  ;;  %v297_v12 = vld [vmem:[%s1354_s3 + $0x50] sm:$0xff] }
   0x8   :  { %v351_v32 = vadd.f32 %v287_v14, %v223_v20  ;;  %v352_v33 = vadd.f32 %v288_v15, %v224_v21  ;;  %v353_v38 = vadd.f32 %v289_v22, %v225_v26  ;;  %v354_v39 = vadd.f32 %v290_v23, %v226_v27  ;;  %v298_v13 = vld [vmem:[%s1354_s3 + $0x58] sm:$0xff]  ;;  %v299_v18 = vld [vmem:[%s1354_s3 + $0x60] sm:$0xff]  ;;  %v300_v19 = vld [vmem:[%s1354_s3 + $0x68] sm:$0xff] }
   0x9   :  { %v355_v45 = vadd.f32 %v291_v28, %v227_v34  ;;  %v356_v46 = vadd.f32 %v292_v29, %v228_v35  ;;  %v357_v50 = vadd.f32 %v293_v36, %v229_v40  ;;  %v358_v51 = vadd.f32 %v294_v37, %v230_v41  ;;  %v301_v26 = vld [vmem:[%s1354_s3 + $0x70] sm:$0xff]  ;;  %v302_v27 = vld [vmem:[%s1354_s3 + $0x78] sm:$0xff]  ;;  %v685_v37 = vld [vmem:[%s1351_s0 + $0x48] sm:$0xff]  }
   0xa   :  { %v415_v43 = vmax.f32 %v351_v32, 0.0  ;;  %v416_v44 = vmax.f32 %v352_v33, 0.0  ;;  %v417_v48 = vmax.f32 %v353_v38, 0.0  ;;  %v418_v49 = vmax.f32 %v354_v39, 0.0  ;;  %v684_v32 = vld [vmem:[%s1351_s0 + $0x40] sm:$0xff]  }
   0xb   :  { %v419_v53 = vmax.f32 %v355_v45, 0.0  ;;  %v420_v54 = vmax.f32 %v356_v46, 0.0  ;;  %v567_v55 = vunpack.c.l.bf16 %v680_v42  ;;  %v568_v56 = vunpack.c.h.bf16 %v680_v42  ;;  %v686_v42 = vld [vmem:[%s1351_s0 + $0x50] sm:$0xff]  }
   0xc   :  { %479 = vst [vmem:[%s1355_s4] sm:$0xff] %v415_v43  ;;  %480 = vst [vmem:[%s1355_s4 + $0x8] sm:$0xff] %v416_v44  ;;  %v421_v58 = vmax.f32 %v357_v50, 0.0  ;;  %v422_v59 = vmax.f32 %v358_v51, 0.0  ;;  %v571_v60 = vunpack.c.l.bf16 %v681_v47  ;;  %v572_v61 = vunpack.c.h.bf16 %v681_v47  ;;  %v687_v47 = vld [vmem:[%s1351_s0 + $0x58] sm:$0xff]  }
   0xd   :  { %481 = vst [vmem:[%s1355_s4 + $0x10] sm:$0xff] %v417_v48  ;;  %482 = vst [vmem:[%s1355_s4 + $0x18] sm:$0xff] %v418_v49  ;;  %v160_v62 = vmul.f32 %v567_v55, %v739_v1  ;;  %v161_v63 = vmul.f32 %v568_v56, %v739_v1  ;;  %v575_v0 = vunpack.c.l.bf16 %v682_v52  ;;  %v576_v2 = vunpack.c.h.bf16 %v682_v52  ;;  %v303_v56 = vld [vmem:[%s1354_s3 + $0x80] sm:$0xff] }
   0xe   :  { %483 = vst [vmem:[%s1355_s4 + $0x20] sm:$0xff] %v419_v53  ;;  %484 = vst [vmem:[%s1355_s4 + $0x28] sm:$0xff] %v420_v54  ;;  %v162_v6 = vmul.f32 %v571_v60, %v739_v1  ;;  %v163_v7 = vmul.f32 %v572_v61, %v739_v1  ;;  %v579_v8 = vunpack.c.l.bf16 %v683_v57  ;;  %v580_v9 = vunpack.c.h.bf16 %v683_v57  ;;  %v304_v57 = vld [vmem:[%s1354_s3 + $0x88] sm:$0xff] }
   0xf   :  { %485 = vst [vmem:[%s1355_s4 + $0x30] sm:$0xff] %v421_v58  ;;  %486 = vst [vmem:[%s1355_s4 + $0x38] sm:$0xff] %v422_v59  ;;  %v231_v10 = vadd.f32 %v747_v5, %v160_v62  ;;  %v232_v11 = vadd.f32 %v747_v5, %v161_v63  ;;  %v164_v14 = vmul.f32 %v575_v0, %v739_v1  ;;  %v583_v45 = vunpack.c.l.bf16 %v684_v32  ;;  %v305_v0 = vld [vmem:[%s1354_s3 + $0x90] sm:$0xff] }
  0x10   :  { %v165_v15 = vmul.f32 %v576_v2, %v739_v1  ;;  %v233_v16 = vadd.f32 %v747_v5, %v162_v6  ;;  %v234_v17 = vadd.f32 %v747_v5, %v163_v7  ;;  %v166_v20 = vmul.f32 %v579_v8, %v739_v1  ;;  %v306_v2 = vld [vmem:[%s1354_s3 + $0x98] sm:$0xff]  ;;  %v307_v8 = vld [vmem:[%s1354_s3 + $0xa0] sm:$0xff] }
  0x11   :  { %v167_v21 = vmul.f32 %v580_v9, %v739_v1  ;;  %v359_v22 = vadd.f32 %v295_v3, %v231_v10  ;;  %v360_v23 = vadd.f32 %v296_v4, %v232_v11  ;;  %v235_v24 = vadd.f32 %v747_v5, %v164_v14  ;;  %v308_v9 = vld [vmem:[%s1354_s3 + $0xa8] sm:$0xff] }
  0x12   :  { %v236_v25 = vadd.f32 %v747_v5, %v165_v15  ;;  %v361_v28 = vadd.f32 %v297_v12, %v233_v16  ;;  %v362_v29 = vadd.f32 %v298_v13, %v234_v17  ;;  %v237_v30 = vadd.f32 %v747_v5, %v166_v20  ;;  %v309_v16 = vld [vmem:[%s1354_s3 + $0xb0] sm:$0xff]  ;;  %v310_v17 = vld [vmem:[%s1354_s3 + $0xb8] sm:$0xff] }
  0x13   :  { %v238_v31 = vadd.f32 %v747_v5, %v167_v21  ;;  %v423_v33 = vmax.f32 %v359_v22, 0.0  ;;  %v424_v34 = vmax.f32 %v360_v23, 0.0  ;;  %v363_v35 = vadd.f32 %v299_v18, %v235_v24  ;;  %v688_v22 = vld [vmem:[%s1351_s0 + $0x60] sm:$0xff]  }
  0x14   :  { %v364_v36 = vadd.f32 %v300_v19, %v236_v25  ;;  %v425_v38 = vmax.f32 %v361_v28, 0.0  ;;  %v426_v39 = vmax.f32 %v362_v29, 0.0  ;;  %v365_v40 = vadd.f32 %v301_v26, %v237_v30 }
  0x15   :  { %v366_v41 = vadd.f32 %v302_v27, %v238_v31  ;;  %487 = vst [vmem:[%s1355_s4 + $0x40] sm:$0xff] %v423_v33  ;;  %488 = vst [vmem:[%s1355_s4 + $0x48] sm:$0xff] %v424_v34  ;;  %v427_v43 = vmax.f32 %v363_v35, 0.0  ;;  %v584_v46 = vunpack.c.h.bf16 %v684_v32  ;;  %v587_v50 = vunpack.c.l.bf16 %v685_v37  ;;  %v689_v27 = vld [vmem:[%s1351_s0 + $0x68] sm:$0xff]   ;;  %v690_v32 = vld [vmem:[%s1351_s0 + $0x70] sm:$0xff]  }
  0x16   :  { %v428_v44 = vmax.f32 %v364_v36, 0.0  ;;  %489 = vst [vmem:[%s1355_s4 + $0x50] sm:$0xff] %v425_v38  ;;  %490 = vst [vmem:[%s1355_s4 + $0x58] sm:$0xff] %v426_v39  ;;  %v429_v48 = vmax.f32 %v365_v40, 0.0  ;;  %v588_v51 = vunpack.c.h.bf16 %v685_v37  ;;  %v168_v52 = vmul.f32 %v583_v45, %v739_v1  ;;  %v691_v37 = vld [vmem:[%s1351_s0 + $0x78] sm:$0xff]  }
  0x17   :  { %v430_v49 = vmax.f32 %v366_v41, 0.0  ;;  %491 = vst [vmem:[%s1355_s4 + $0x60] sm:$0xff] %v427_v43  ;;  %v169_v53 = vmul.f32 %v584_v46, %v739_v1  ;;  %v591_v54 = vunpack.c.l.bf16 %v686_v42  ;;  %v592_v55 = vunpack.c.h.bf16 %v686_v42  ;;  %v311_v46 = vld [vmem:[%s1354_s3 + $0xc0] sm:$0xff] }
  0x18   :  { %492 = vst [vmem:[%s1355_s4 + $0x68] sm:$0xff] %v428_v44  ;;  %493 = vst [vmem:[%s1355_s4 + $0x70] sm:$0xff] %v429_v48  ;;  %v170_v58 = vmul.f32 %v587_v50, %v739_v1  ;;  %v171_v59 = vmul.f32 %v588_v51, %v739_v1  ;;  %v595_v60 = vunpack.c.l.bf16 %v687_v47  ;;  %v596_v61 = vunpack.c.h.bf16 %v687_v47  ;;  %v312_v47 = vld [vmem:[%s1354_s3 + $0xc8] sm:$0xff] }
  0x19   :  { %494 = vst [vmem:[%s1355_s4 + $0x78] sm:$0xff] %v430_v49  ;;  %v239_v62 = vadd.f32 %v747_v5, %v168_v52  ;;  %v240_v63 = vadd.f32 %v747_v5, %v169_v53  ;;  %v172_v3 = vmul.f32 %v591_v54, %v739_v1  ;;  %v173_v4 = vmul.f32 %v592_v55, %v739_v1  ;;  %v313_v54 = vld [vmem:[%s1354_s3 + $0xd0] sm:$0xff]  ;;  %v314_v55 = vld [vmem:[%s1354_s3 + $0xd8] sm:$0xff] }
  0x1a   :  { %v241_v6 = vadd.f32 %v747_v5, %v170_v58  ;;  %v242_v7 = vadd.f32 %v747_v5, %v171_v59  ;;  %v174_v10 = vmul.f32 %v595_v60, %v739_v1  ;;  %v175_v11 = vmul.f32 %v596_v61, %v739_v1  ;;  %v315_v60 = vld [vmem:[%s1354_s3 + $0xe0] sm:$0xff]  ;;  %v316_v61 = vld [vmem:[%s1354_s3 + $0xe8] sm:$0xff] }
  0x1b   :  { %v367_v12 = vadd.f32 %v303_v56, %v239_v62  ;;  %v368_v13 = vadd.f32 %v304_v57, %v240_v63  ;;  %v243_v14 = vadd.f32 %v747_v5, %v172_v3  ;;  %v244_v15 = vadd.f32 %v747_v5, %v173_v4 }
  0x1c   :  { %v369_v18 = vadd.f32 %v305_v0, %v241_v6  ;;  %v370_v19 = vadd.f32 %v306_v2, %v242_v7  ;;  %v245_v20 = vadd.f32 %v747_v5, %v174_v10  ;;  %v246_v21 = vadd.f32 %v747_v5, %v175_v11  ;;  %v317_v6 = vld [vmem:[%s1354_s3 + $0xf0] sm:$0xff]  ;;  %v318_v7 = vld [vmem:[%s1354_s3 + $0xf8] sm:$0xff] }
  0x1d   :  { %v431_v23 = vmax.f32 %v367_v12, 0.0  ;;  %v432_v24 = vmax.f32 %v368_v13, 0.0  ;;  %v371_v25 = vadd.f32 %v307_v8, %v243_v14  ;;  %v372_v26 = vadd.f32 %v308_v9, %v244_v15  ;;  %v692_v12 = vld [vmem:[%s1351_s0 + $0x80] sm:$0xff]  }
  0x1e   :  { %v433_v28 = vmax.f32 %v369_v18, 0.0  ;;  %v434_v29 = vmax.f32 %v370_v19, 0.0  ;;  %v373_v30 = vadd.f32 %v309_v16, %v245_v20  ;;  %v374_v31 = vadd.f32 %v310_v17, %v246_v21  ;;  %v693_v17 = vld [vmem:[%s1351_s0 + $0x88] sm:$0xff]  }
  0x1f   :  { %495 = vst [vmem:[%s1355_s4 + $0x80] sm:$0xff] %v431_v23  ;;  %496 = vst [vmem:[%s1355_s4 + $0x88] sm:$0xff] %v432_v24  ;;  %v435_v33 = vmax.f32 %v371_v25, 0.0  ;;  %v436_v34 = vmax.f32 %v372_v26, 0.0  ;;  %v599_v35 = vunpack.c.l.bf16 %v688_v22  ;;  %v600_v36 = vunpack.c.h.bf16 %v688_v22  ;;  %v694_v22 = vld [vmem:[%s1351_s0 + $0x90] sm:$0xff]  }
  0x20   :  { %497 = vst [vmem:[%s1355_s4 + $0x90] sm:$0xff] %v433_v28  ;;  %498 = vst [vmem:[%s1355_s4 + $0x98] sm:$0xff] %v434_v29  ;;  %v437_v38 = vmax.f32 %v373_v30, 0.0  ;;  %v438_v39 = vmax.f32 %v374_v31, 0.0  ;;  %v603_v40 = vunpack.c.l.bf16 %v689_v27  ;;  %v604_v41 = vunpack.c.h.bf16 %v689_v27  ;;  %v695_v27 = vld [vmem:[%s1351_s0 + $0x98] sm:$0xff]  }
  0x21   :  { %499 = vst [vmem:[%s1355_s4 + $0xa0] sm:$0xff] %v435_v33  ;;  %500 = vst [vmem:[%s1355_s4 + $0xa8] sm:$0xff] %v436_v34  ;;  %v176_v42 = vmul.f32 %v599_v35, %v739_v1  ;;  %v177_v43 = vmul.f32 %v600_v36, %v739_v1  ;;  %v607_v44 = vunpack.c.l.bf16 %v690_v32  ;;  %v608_v45 = vunpack.c.h.bf16 %v690_v32  ;;  %v319_v36 = vld [vmem:[%s1354_s3 + $0x100] sm:$0xff] }
  0x22   :  { %501 = vst [vmem:[%s1355_s4 + $0xb0] sm:$0xff] %v437_v38  ;;  %502 = vst [vmem:[%s1355_s4 + $0xb8] sm:$0xff] %v438_v39  ;;  %v178_v48 = vmul.f32 %v603_v40, %v739_v1  ;;  %v179_v49 = vmul.f32 %v604_v41, %v739_v1  ;;  %v611_v50 = vunpack.c.l.bf16 %v691_v37  ;;  %v612_v51 = vunpack.c.h.bf16 %v691_v37  ;;  %v320_v37 = vld [vmem:[%s1354_s3 + $0x108] sm:$0xff] }
  0x23   :  { %v247_v52 = vadd.f32 %v747_v5, %v176_v42  ;;  %v248_v53 = vadd.f32 %v747_v5, %v177_v43  ;;  %v180_v56 = vmul.f32 %v607_v44, %v739_v1  ;;  %v181_v57 = vmul.f32 %v608_v45, %v739_v1  ;;  %v321_v44 = vld [vmem:[%s1354_s3 + $0x110] sm:$0xff]  ;;  %v322_v45 = vld [vmem:[%s1354_s3 + $0x118] sm:$0xff] }
  0x24   :  { %v249_v58 = vadd.f32 %v747_v5, %v178_v48  ;;  %v250_v59 = vadd.f32 %v747_v5, %v179_v49  ;;  %v182_v62 = vmul.f32 %v611_v50, %v739_v1  ;;  %v183_v63 = vmul.f32 %v612_v51, %v739_v1  ;;  %v323_v50 = vld [vmem:[%s1354_s3 + $0x120] sm:$0xff]  ;;  %v324_v51 = vld [vmem:[%s1354_s3 + $0x128] sm:$0xff] }
  0x25   :  { %v375_v0 = vadd.f32 %v311_v46, %v247_v52  ;;  %v376_v2 = vadd.f32 %v312_v47, %v248_v53  ;;  %v251_v3 = vadd.f32 %v747_v5, %v180_v56  ;;  %v252_v4 = vadd.f32 %v747_v5, %v181_v57 }
  0x26   :  { %v377_v8 = vadd.f32 %v313_v54, %v249_v58  ;;  %v378_v9 = vadd.f32 %v314_v55, %v250_v59  ;;  %v253_v10 = vadd.f32 %v747_v5, %v182_v62  ;;  %v254_v11 = vadd.f32 %v747_v5, %v183_v63  ;;  %v325_v58 = vld [vmem:[%s1354_s3 + $0x130] sm:$0xff]  ;;  %v326_v59 = vld [vmem:[%s1354_s3 + $0x138] sm:$0xff] }
  0x27   :  { %v439_v13 = vmax.f32 %v375_v0, 0.0  ;;  %v440_v14 = vmax.f32 %v376_v2, 0.0  ;;  %v379_v15 = vadd.f32 %v315_v60, %v251_v3  ;;  %v380_v16 = vadd.f32 %v316_v61, %v252_v4  ;;  %v696_v0 = vld [vmem:[%s1351_s0 + $0xa0] sm:$0xff]  }
  0x28   :  { %v441_v18 = vmax.f32 %v377_v8, 0.0  ;;  %v442_v19 = vmax.f32 %v378_v9, 0.0  ;;  %v381_v20 = vadd.f32 %v317_v6, %v253_v10  ;;  %v382_v21 = vadd.f32 %v318_v7, %v254_v11  ;;  %v697_v7 = vld [vmem:[%s1351_s0 + $0xa8] sm:$0xff]  }
  0x29   :  { %503 = vst [vmem:[%s1355_s4 + $0xc0] sm:$0xff] %v439_v13  ;;  %504 = vst [vmem:[%s1355_s4 + $0xc8] sm:$0xff] %v440_v14  ;;  %v443_v23 = vmax.f32 %v379_v15, 0.0  ;;  %v444_v24 = vmax.f32 %v380_v16, 0.0  ;;  %v615_v25 = vunpack.c.l.bf16 %v692_v12  ;;  %v616_v26 = vunpack.c.h.bf16 %v692_v12  ;;  %v698_v12 = vld [vmem:[%s1351_s0 + $0xb0] sm:$0xff]  }
  0x2a   :  { %505 = vst [vmem:[%s1355_s4 + $0xd0] sm:$0xff] %v441_v18  ;;  %506 = vst [vmem:[%s1355_s4 + $0xd8] sm:$0xff] %v442_v19  ;;  %v445_v28 = vmax.f32 %v381_v20, 0.0  ;;  %v446_v29 = vmax.f32 %v382_v21, 0.0  ;;  %v619_v30 = vunpack.c.l.bf16 %v693_v17  ;;  %v620_v31 = vunpack.c.h.bf16 %v693_v17  ;;  %v699_v17 = vld [vmem:[%s1351_s0 + $0xb8] sm:$0xff]  }
  0x2b   :  { %507 = vst [vmem:[%s1355_s4 + $0xe0] sm:$0xff] %v443_v23  ;;  %508 = vst [vmem:[%s1355_s4 + $0xe8] sm:$0xff] %v444_v24  ;;  %v184_v32 = vmul.f32 %v615_v25, %v739_v1  ;;  %v185_v33 = vmul.f32 %v616_v26, %v739_v1  ;;  %v623_v34 = vunpack.c.l.bf16 %v694_v22  ;;  %v624_v35 = vunpack.c.h.bf16 %v694_v22  ;;  %v327_v26 = vld [vmem:[%s1354_s3 + $0x140] sm:$0xff] }
  0x2c   :  { %509 = vst [vmem:[%s1355_s4 + $0xf0] sm:$0xff] %v445_v28  ;;  %510 = vst [vmem:[%s1355_s4 + $0xf8] sm:$0xff] %v446_v29  ;;  %v186_v38 = vmul.f32 %v619_v30, %v739_v1  ;;  %v187_v39 = vmul.f32 %v620_v31, %v739_v1  ;;  %v627_v40 = vunpack.c.l.bf16 %v695_v27  ;;  %v628_v41 = vunpack.c.h.bf16 %v695_v27  ;;  %v328_v27 = vld [vmem:[%s1354_s3 + $0x148] sm:$0xff] }
  0x2d   :  { %v255_v42 = vadd.f32 %v747_v5, %v184_v32  ;;  %v256_v43 = vadd.f32 %v747_v5, %v185_v33  ;;  %v188_v46 = vmul.f32 %v623_v34, %v739_v1  ;;  %v189_v47 = vmul.f32 %v624_v35, %v739_v1  ;;  %v329_v34 = vld [vmem:[%s1354_s3 + $0x150] sm:$0xff]  ;;  %v330_v35 = vld [vmem:[%s1354_s3 + $0x158] sm:$0xff] }
  0x2e   :  { %v257_v48 = vadd.f32 %v747_v5, %v186_v38  ;;  %v258_v49 = vadd.f32 %v747_v5, %v187_v39  ;;  %v190_v52 = vmul.f32 %v627_v40, %v739_v1  ;;  %v191_v53 = vmul.f32 %v628_v41, %v739_v1  ;;  %v331_v40 = vld [vmem:[%s1354_s3 + $0x160] sm:$0xff]  ;;  %v332_v41 = vld [vmem:[%s1354_s3 + $0x168] sm:$0xff] }
  0x2f   :  { %v383_v54 = vadd.f32 %v319_v36, %v255_v42  ;;  %v384_v55 = vadd.f32 %v320_v37, %v256_v43  ;;  %v259_v56 = vadd.f32 %v747_v5, %v188_v46  ;;  %v260_v57 = vadd.f32 %v747_v5, %v189_v47 }
  0x30   :  { %v385_v60 = vadd.f32 %v321_v44, %v257_v48  ;;  %v386_v61 = vadd.f32 %v322_v45, %v258_v49  ;;  %v261_v62 = vadd.f32 %v747_v5, %v190_v52  ;;  %v262_v63 = vadd.f32 %v747_v5, %v191_v53  ;;  %v333_v48 = vld [vmem:[%s1354_s3 + $0x170] sm:$0xff]  ;;  %v334_v49 = vld [vmem:[%s1354_s3 + $0x178] sm:$0xff] }
  0x31   :  { %v447_v2 = vmax.f32 %v383_v54, 0.0  ;;  %v448_v3 = vmax.f32 %v384_v55, 0.0  ;;  %v387_v4 = vadd.f32 %v323_v50, %v259_v56  ;;  %v388_v6 = vadd.f32 %v324_v51, %v260_v57  ;;  %v700_v54 = vld [vmem:[%s1351_s0 + $0xc0] sm:$0xff]  }
  0x32   :  { %v449_v8 = vmax.f32 %v385_v60, 0.0  ;;  %v450_v9 = vmax.f32 %v386_v61, 0.0  ;;  %v389_v10 = vadd.f32 %v325_v58, %v261_v62  ;;  %v390_v11 = vadd.f32 %v326_v59, %v262_v63  ;;  %v701_v59 = vld [vmem:[%s1351_s0 + $0xc8] sm:$0xff]  }
  0x33   :  { %511 = vst [vmem:[%s1355_s4 + $0x100] sm:$0xff] %v447_v2  ;;  %512 = vst [vmem:[%s1355_s4 + $0x108] sm:$0xff] %v448_v3  ;;  %v451_v13 = vmax.f32 %v387_v4, 0.0  ;;  %v452_v14 = vmax.f32 %v388_v6, 0.0  ;;  %v631_v15 = vunpack.c.l.bf16 %v696_v0  ;;  %v632_v16 = vunpack.c.h.bf16 %v696_v0  ;;  %v702_v0 = vld [vmem:[%s1351_s0 + $0xd0] sm:$0xff]  }
  0x34   :  { %513 = vst [vmem:[%s1355_s4 + $0x110] sm:$0xff] %v449_v8  ;;  %514 = vst [vmem:[%s1355_s4 + $0x118] sm:$0xff] %v450_v9  ;;  %v453_v18 = vmax.f32 %v389_v10, 0.0  ;;  %v454_v19 = vmax.f32 %v390_v11, 0.0  ;;  %v635_v20 = vunpack.c.l.bf16 %v697_v7  ;;  %v636_v21 = vunpack.c.h.bf16 %v697_v7  ;;  %v703_v7 = vld [vmem:[%s1351_s0 + $0xd8] sm:$0xff]  }
  0x35   :  { %515 = vst [vmem:[%s1355_s4 + $0x120] sm:$0xff] %v451_v13  ;;  %516 = vst [vmem:[%s1355_s4 + $0x128] sm:$0xff] %v452_v14  ;;  %v192_v22 = vmul.f32 %v631_v15, %v739_v1  ;;  %v193_v23 = vmul.f32 %v632_v16, %v739_v1  ;;  %v639_v24 = vunpack.c.l.bf16 %v698_v12  ;;  %v640_v25 = vunpack.c.h.bf16 %v698_v12  ;;  %v335_v16 = vld [vmem:[%s1354_s3 + $0x180] sm:$0xff] }
  0x36   :  { %517 = vst [vmem:[%s1355_s4 + $0x130] sm:$0xff] %v453_v18  ;;  %518 = vst [vmem:[%s1355_s4 + $0x138] sm:$0xff] %v454_v19  ;;  %v194_v28 = vmul.f32 %v635_v20, %v739_v1  ;;  %v195_v29 = vmul.f32 %v636_v21, %v739_v1  ;;  %v643_v30 = vunpack.c.l.bf16 %v699_v17  ;;  %v644_v31 = vunpack.c.h.bf16 %v699_v17  ;;  %v336_v17 = vld [vmem:[%s1354_s3 + $0x188] sm:$0xff] }
  0x37   :  { %v263_v32 = vadd.f32 %v747_v5, %v192_v22  ;;  %v264_v33 = vadd.f32 %v747_v5, %v193_v23  ;;  %v196_v36 = vmul.f32 %v639_v24, %v739_v1  ;;  %v197_v37 = vmul.f32 %v640_v25, %v739_v1  ;;  %v337_v24 = vld [vmem:[%s1354_s3 + $0x190] sm:$0xff]  ;;  %v338_v25 = vld [vmem:[%s1354_s3 + $0x198] sm:$0xff] }
  0x38   :  { %v265_v38 = vadd.f32 %v747_v5, %v194_v28  ;;  %v266_v39 = vadd.f32 %v747_v5, %v195_v29  ;;  %v198_v42 = vmul.f32 %v643_v30, %v739_v1  ;;  %v199_v43 = vmul.f32 %v644_v31, %v739_v1  ;;  %v339_v30 = vld [vmem:[%s1354_s3 + $0x1a0] sm:$0xff]  ;;  %v340_v31 = vld [vmem:[%s1354_s3 + $0x1a8] sm:$0xff] }
  0x39   :  { %v391_v44 = vadd.f32 %v327_v26, %v263_v32  ;;  %v392_v45 = vadd.f32 %v328_v27, %v264_v33  ;;  %v267_v46 = vadd.f32 %v747_v5, %v196_v36  ;;  %v268_v47 = vadd.f32 %v747_v5, %v197_v37 }
  0x3a   :  { %v393_v50 = vadd.f32 %v329_v34, %v265_v38  ;;  %v394_v51 = vadd.f32 %v330_v35, %v266_v39  ;;  %v269_v52 = vadd.f32 %v747_v5, %v198_v42  ;;  %v270_v53 = vadd.f32 %v747_v5, %v199_v43  ;;  %v341_v38 = vld [vmem:[%s1354_s3 + $0x1b0] sm:$0xff]  ;;  %v342_v39 = vld [vmem:[%s1354_s3 + $0x1b8] sm:$0xff] }
  0x3b   :  { %v455_v55 = vmax.f32 %v391_v44, 0.0  ;;  %v456_v56 = vmax.f32 %v392_v45, 0.0  ;;  %v395_v57 = vadd.f32 %v331_v40, %v267_v46  ;;  %v396_v58 = vadd.f32 %v332_v41, %v268_v47  ;;  %v704_v44 = vld [vmem:[%s1351_s0 + $0xe0] sm:$0xff]  }
  0x3c   :  { %v457_v60 = vmax.f32 %v393_v50, 0.0  ;;  %v458_v61 = vmax.f32 %v394_v51, 0.0  ;;  %v397_v62 = vadd.f32 %v333_v48, %v269_v52  ;;  %v398_v63 = vadd.f32 %v334_v49, %v270_v53  ;;  %v705_v49 = vld [vmem:[%s1351_s0 + $0xe8] sm:$0xff]  }
  0x3d   :  { %519 = vst [vmem:[%s1355_s4 + $0x140] sm:$0xff] %v455_v55  ;;  %520 = vst [vmem:[%s1355_s4 + $0x148] sm:$0xff] %v456_v56  ;;  %v459_v2 = vmax.f32 %v395_v57, 0.0  ;;  %v460_v3 = vmax.f32 %v396_v58, 0.0  ;;  %v647_v4 = vunpack.c.l.bf16 %v700_v54  ;;  %v648_v6 = vunpack.c.h.bf16 %v700_v54  ;;  %v706_v54 = vld [vmem:[%s1351_s0 + $0xf0] sm:$0xff]  }
  0x3e   :  { %521 = vst [vmem:[%s1355_s4 + $0x150] sm:$0xff] %v457_v60  ;;  %522 = vst [vmem:[%s1355_s4 + $0x158] sm:$0xff] %v458_v61  ;;  %v461_v8 = vmax.f32 %v397_v62, 0.0  ;;  %v462_v9 = vmax.f32 %v398_v63, 0.0  ;;  %v651_v10 = vunpack.c.l.bf16 %v701_v59  ;;  %v652_v11 = vunpack.c.h.bf16 %v701_v59  ;;  %v707_v59 = vld [vmem:[%s1351_s0 + $0xf8] sm:$0xff]  }
  0x3f   :  { %523 = vst [vmem:[%s1355_s4 + $0x160] sm:$0xff] %v459_v2  ;;  %524 = vst [vmem:[%s1355_s4 + $0x168] sm:$0xff] %v460_v3  ;;  %v200_v12 = vmul.f32 %v647_v4, %v739_v1  ;;  %v201_v13 = vmul.f32 %v648_v6, %v739_v1  ;;  %v655_v14 = vunpack.c.l.bf16 %v702_v0  ;;  %v656_v15 = vunpack.c.h.bf16 %v702_v0  ;;  %v343_v6 = vld [vmem:[%s1354_s3 + $0x1c0] sm:$0xff] }
  0x40   :  { %525 = vst [vmem:[%s1355_s4 + $0x170] sm:$0xff] %v461_v8  ;;  %526 = vst [vmem:[%s1355_s4 + $0x178] sm:$0xff] %v462_v9  ;;  %v202_v18 = vmul.f32 %v651_v10, %v739_v1  ;;  %v203_v19 = vmul.f32 %v652_v11, %v739_v1  ;;  %v659_v20 = vunpack.c.l.bf16 %v703_v7  ;;  %v660_v21 = vunpack.c.h.bf16 %v703_v7  ;;  %v344_v7 = vld [vmem:[%s1354_s3 + $0x1c8] sm:$0xff] }
  0x41   :  { %v271_v22 = vadd.f32 %v747_v5, %v200_v12  ;;  %v272_v23 = vadd.f32 %v747_v5, %v201_v13  ;;  %v204_v26 = vmul.f32 %v655_v14, %v739_v1  ;;  %v205_v27 = vmul.f32 %v656_v15, %v739_v1  ;;  %v345_v14 = vld [vmem:[%s1354_s3 + $0x1d0] sm:$0xff]  ;;  %v346_v15 = vld [vmem:[%s1354_s3 + $0x1d8] sm:$0xff] }
  0x42   :  { %v273_v28 = vadd.f32 %v747_v5, %v202_v18  ;;  %v274_v29 = vadd.f32 %v747_v5, %v203_v19  ;;  %v206_v32 = vmul.f32 %v659_v20, %v739_v1  ;;  %v207_v33 = vmul.f32 %v660_v21, %v739_v1  ;;  %v347_v20 = vld [vmem:[%s1354_s3 + $0x1e0] sm:$0xff]  ;;  %v348_v21 = vld [vmem:[%s1354_s3 + $0x1e8] sm:$0xff] }
  0x43   :  { %v399_v34 = vadd.f32 %v335_v16, %v271_v22  ;;  %v400_v35 = vadd.f32 %v336_v17, %v272_v23  ;;  %v275_v36 = vadd.f32 %v747_v5, %v204_v26  ;;  %v276_v37 = vadd.f32 %v747_v5, %v205_v27 }
  0x44   :  { %v401_v40 = vadd.f32 %v337_v24, %v273_v28  ;;  %v402_v41 = vadd.f32 %v338_v25, %v274_v29  ;;  %v277_v42 = vadd.f32 %v747_v5, %v206_v32  ;;  %v278_v43 = vadd.f32 %v747_v5, %v207_v33  ;;  %v349_v28 = vld [vmem:[%s1354_s3 + $0x1f0] sm:$0xff]  ;;  %v350_v29 = vld [vmem:[%s1354_s3 + $0x1f8] sm:$0xff] }
  0x45   :  { %v463_v45 = vmax.f32 %v399_v34, 0.0  ;;  %v464_v46 = vmax.f32 %v400_v35, 0.0  ;;  %v403_v47 = vadd.f32 %v339_v30, %v275_v36  ;;  %v404_v48 = vadd.f32 %v340_v31, %v276_v37 }
  0x46   :  { %v465_v50 = vmax.f32 %v401_v40, 0.0  ;;  %v466_v51 = vmax.f32 %v402_v41, 0.0  ;;  %v405_v52 = vadd.f32 %v341_v38, %v277_v42  ;;  %v406_v53 = vadd.f32 %v342_v39, %v278_v43 }
  0x47   :  { %527 = vst [vmem:[%s1355_s4 + $0x180] sm:$0xff] %v463_v45  ;;  %528 = vst [vmem:[%s1355_s4 + $0x188] sm:$0xff] %v464_v46  ;;  %v467_v55 = vmax.f32 %v403_v47, 0.0  ;;  %v468_v56 = vmax.f32 %v404_v48, 0.0  ;;  %v663_v57 = vunpack.c.l.bf16 %v704_v44  ;;  %v664_v58 = vunpack.c.h.bf16 %v704_v44 }
  0x48   :  { %529 = vst [vmem:[%s1355_s4 + $0x190] sm:$0xff] %v465_v50  ;;  %530 = vst [vmem:[%s1355_s4 + $0x198] sm:$0xff] %v466_v51  ;;  %v469_v60 = vmax.f32 %v405_v52, 0.0  ;;  %v470_v61 = vmax.f32 %v406_v53, 0.0  ;;  %v667_v62 = vunpack.c.l.bf16 %v705_v49  ;;  %v668_v63 = vunpack.c.h.bf16 %v705_v49 }
  0x49   :  { %531 = vst [vmem:[%s1355_s4 + $0x1a0] sm:$0xff] %v467_v55  ;;  %532 = vst [vmem:[%s1355_s4 + $0x1a8] sm:$0xff] %v468_v56  ;;  %v208_v0 = vmul.f32 %v663_v57, %v739_v1  ;;  %v209_v2 = vmul.f32 %v664_v58, %v739_v1  ;;  %v671_v3 = vunpack.c.l.bf16 %v706_v54  ;;  %v672_v4 = vunpack.c.h.bf16 %v706_v54 }
  0x4a   :  { %533 = vst [vmem:[%s1355_s4 + $0x1b0] sm:$0xff] %v469_v60  ;;  %534 = vst [vmem:[%s1355_s4 + $0x1b8] sm:$0xff] %v470_v61  ;;  %v210_v8 = vmul.f32 %v667_v62, %v739_v1  ;;  %v211_v9 = vmul.f32 %v668_v63, %v739_v1  ;;  %v675_v10 = vunpack.c.l.bf16 %v707_v59  ;;  %v676_v11 = vunpack.c.h.bf16 %v707_v59 }
  0x4b   :  { %v279_v12 = vadd.f32 %v747_v5, %v208_v0  ;;  %v280_v13 = vadd.f32 %v747_v5, %v209_v2  ;;  %v212_v16 = vmul.f32 %v671_v3, %v739_v1  ;;  %v213_v17 = vmul.f32 %v672_v4, %v739_v1 }
  0x4c   :  { %v281_v18 = vadd.f32 %v747_v5, %v210_v8  ;;  %v282_v19 = vadd.f32 %v747_v5, %v211_v9  ;;  %v214_v22 = vmul.f32 %v675_v10, %v739_v1  ;;  %v215_v23 = vmul.f32 %v676_v11, %v739_v1 }
  0x4d   :  { %v407_v24 = vadd.f32 %v343_v6, %v279_v12  ;;  %v408_v25 = vadd.f32 %v344_v7, %v280_v13  ;;  %v283_v26 = vadd.f32 %v747_v5, %v212_v16  ;;  %v284_v27 = vadd.f32 %v747_v5, %v213_v17 }
  0x4e   :  { %v409_v30 = vadd.f32 %v345_v14, %v281_v18  ;;  %v410_v31 = vadd.f32 %v346_v15, %v282_v19  ;;  %v285_v32 = vadd.f32 %v747_v5, %v214_v22  ;;  %v286_v1 = vadd.f32 %v747_v5, %v215_v23 }
  0x4f   :  { %v471_v33 = vmax.f32 %v407_v24, 0.0  ;;  %v472_v34 = vmax.f32 %v408_v25, 0.0  ;;  %v411_v35 = vadd.f32 %v347_v20, %v283_v26  ;;  %v412_v36 = vadd.f32 %v348_v21, %v284_v27 }
  0x50   :  { %v473_v37 = vmax.f32 %v409_v30, 0.0  ;;  %v474_v38 = vmax.f32 %v410_v31, 0.0  ;;  %v413_v39 = vadd.f32 %v349_v28, %v285_v32  ;;  %v414_v40 = vadd.f32 %v350_v29, %v286_v1 }
  0x51   :  { %535 = vst [vmem:[%s1355_s4 + $0x1c0] sm:$0xff] %v471_v33  ;;  %536 = vst [vmem:[%s1355_s4 + $0x1c8] sm:$0xff] %v472_v34  ;;  %v475_v41 = vmax.f32 %v411_v35, 0.0  ;;  %v476_v42 = vmax.f32 %v412_v36, 0.0 }
  0x52   :  { %537 = vst [vmem:[%s1355_s4 + $0x1d0] sm:$0xff] %v473_v37  ;;  %538 = vst [vmem:[%s1355_s4 + $0x1d8] sm:$0xff] %v474_v38  ;;  %v477_v5 = vmax.f32 %v413_v39, 0.0  ;;  %v478_v43 = vmax.f32 %v414_v40, 0.0 }
  0x53   :  { %539 = vst [vmem:[%s1355_s4 + $0x1e0] sm:$0xff] %v475_v41  ;;  %540 = vst [vmem:[%s1355_s4 + $0x1e8] sm:$0xff] %v476_v42 }
  0x54   :  { %541 = vst [vmem:[%s1355_s4 + $0x1f0] sm:$0xff] %v477_v5  ;;  %542 = vst [vmem:[%s1355_s4 + $0x1f8] sm:$0xff] %v478_v43 }

// kernel: bottleneck_forward.5
= control target key start
LH: loop header
LB: loop body
LE: loop exit
PB: predicated region body
PF: predicated region fallthrough
CT: control target
= control target key end

     0   :  { %s8297_s21 = smov 0   ;;  %s11347_s0 = inlined_call_operand.vmem [shape: bf16[32,16,128], index: 0, kind: input, shape index: {}]   ;;  %s11348_s1 = inlined_call_operand.vmem [shape: f32[1,1,128], index: 1, kind: input, shape index: {}]   ;;  %s11349_s2 = inlined_call_operand.vmem [shape: f32[1,1,128], index: 2, kind: input, shape index: {}]   ;;  %s11350_s3 = inlined_call_operand.vmem [shape: bf16[9,128,128], index: 3, kind: input, shape index: {}]   ;;  %s11351_s4 = inlined_call_operand.vmem [shape: bf16[32,16,128], index: 4, kind: output, shape index: {0}]   ;;  %s11352_s5 = inlined_call_operand.vmem [shape: f32[2,1,128], index: 5, kind: output, shape index: {1}]   ;;  %s11353_s6 = inlined_call_operand.vmem [shape: f32[2,1,128], index: 6, kind: output, shape index: {2}]  }
   0x1 LB: > { %s8303_s22 = sadd.s32 4294967295, %s8259_s21   ;;  %p6743_p0 = scmp.ge.s32.totalorder %s8259_s21, 1  ;;  %s8259_s21 = sphi %s8297_s21, %s17_s21  }
   0x2   : > { %p219_p1 = scmp.lt.s32.totalorder %s8259_s21, 3 }
   0x4   : > { %p220_p2 = pnand %p6743_p0, %p219_p1 }
   0x6   : > { %223 = sbr.rel (%p220_p2) target bundleno = 681 (0x2a9), region = 36 }
   0xb   : > { %v8123_v0 = vld [vmem:[%s11350_s3 + $0x38] sm:$0xff]   ;;  %v8313_v1 = vld [vmem:[%s11350_s3 + $0x30] sm:$0xff]   ;;  %v8261_v2 = vmov 0   ;;  %s6744_s27 = sshll.u32 %s8303_s22, 4  ;;  %v8125_v3 = vld [vmem:[%s11350_s3 + $0x28] sm:$0xff]   ;;  %vm2329_vm0 = vcmask 1042432  }
   0xc   : > { %452 = vst [vmem:[#allocation2] sm:$0xf] %v8261_v2  ;;  %453 = vst [vmem:[#allocation2 + $0x4] sm:$0xf] %v8261_v2  ;;  %7666 = vmatprep.subr.bf16.mxu0 %v8123_v0  ;;  %8098 = vmatprep.subr.bf16.mxu1 %v8123_v0  ;;  %p258_p3 = scmp.lt.s32.totalorder %s6744_s27, 31  ;;  %v8126_v4 = vld [vmem:[%s11350_s3 + $0x20] sm:$0xff]  }
   0xd   : > { %454 = vst [vmem:[#allocation2 + $0x8] sm:$0x1] %v8261_v2  ;;  %455 = vst [vmem:[#allocation2 + $0xc] sm:$0xf] %v8261_v2  ;;  %7667 = vmatpush3.bf16.msra.mxu0 %v8123_v0  ;;  %8106 = vmatpush3.bf16.msra.mxu1 %v8123_v0  ;;  %vm2330_vm1 = vcmask 1046532   ;;  %v8127_v22 = vld [vmem:[%s11350_s3 + $0x18] sm:$0xff]  }
   0xe   : > { %456 = vst [vmem:[#allocation2 + $0x10] sm:$0xf] %v8261_v2  ;;  %457 = vst [vmem:[#allocation2 + $0x14] sm:$0x1] %v8261_v2  ;;  %7668 = vmatprep.subr.bf16.mxu0 %v8313_v1  ;;  %8099 = vmatprep.subr.bf16.mxu1 %v8313_v1  ;;  %s11892_s27 = smov (!%p258_p3, %s6744_s27), 31  ;;  %vm926_vm3 = vcmask 1043456  }
   0xf   : > { %458 = vst [vmem:[#allocation2 + $0x18] sm:$0xf] %v8261_v2  ;;  %459 = vst [vmem:[#allocation2 + $0x1c] sm:$0xf] %v8261_v2  ;;  %s7210_s30 = sshll.u32 %s11892_s27, 3  ;;  %v8128_v35 = vld [vmem:[%s11350_s3 + $0x10] sm:$0xff]  }
  0x10   : > { %460 = vst [vmem:[#allocation2 + $0x20] sm:$0x1] %v8261_v2  ;;  %461 = vst [vmem:[#allocation2 + $0x24] sm:$0xf] %v8261_v2  ;;  %s8334_s11 = scalar_lea.vmem %s11347_s0, %s7210_s30  ;;  %v8340_v12 = vld [vmem:[%s11348_s1] ss:$0 sm:$0xff]  ;;  %s11255_s7 = scalar_lea.vmem %s11351_s4, %s7210_s30 }
  0x11   : > { %462 = vst [vmem:[#allocation2 + $0x28] sm:$0xf] %v8261_v2  ;;  %463 = vst [vmem:[#allocation2 + $0x2c] sm:$0x1] %v8261_v2  ;;  %7669 = vmatpush3.bf16.msra.mxu0 %v8313_v1  ;;  %8107 = vmatpush3.bf16.msra.mxu1 %v8313_v1  ;;  %v7277_v7 = vld [vmem:[%s8334_s11] sm:$0xff]   ;;  %v7426_v16 = vld [vmem:[%s8334_s11 + $0x38] sm:$0xff]  }
  0x12   : > { %464 = vst [vmem:[#allocation2 + $0x30] sm:$0xf] %v8261_v2  ;;  %465 = vst [vmem:[#allocation2 + $0x34] sm:$0xf] %v8261_v2  ;;  %7670 = vmatprep.subr.bf16.mxu0 %v8125_v3  ;;  %8100 = vmatprep.subr.bf16.mxu1 %v8125_v3  ;;  %v7278_v15 = vunpack.c.l.bf16 %v7277_v7  ;;  %v7279_v19 = vunpack.c.h.bf16 %v7277_v7  ;;  %v8348_v20 = vld [vmem:[%s11349_s2] ss:$0 sm:$0xff]  ;;  %v7306_v29 = vunpack.c.l.bf16 %v7426_v16  ;;  %v7307_v30 = vunpack.c.h.bf16 %v7426_v16 }
  0x13   : > { %466 = vst [vmem:[#allocation2 + $0x38] sm:$0x1] %v8261_v2  ;;  %467 = vst [vmem:[#allocation2 + $0x3c] sm:$0xf] %v8261_v2  ;;  %v1075_v5 = vld [vmem:[#allocation2] sm:$0xf] }
  0x14   : > { %468 = vst [vmem:[#allocation2 + $0x40] sm:$0xf] %v8261_v2  ;;  %469 = vst [vmem:[#allocation2 + $0x44] sm:$0x1] %v8261_v2  ;;  %v1076_v6 = vld [vmem:[#allocation2 + $0x4] sm:$0xf]  ;;  %v349_v26 = vmul.f32 %v7278_v15, %v8340_v12  ;;  %v350_v28 = vmul.f32 %v7279_v19, %v8340_v12  ;;  %v363_v37 = vmul.f32 %v7306_v29, %v8340_v12 }
  0x15   : > { %470 = vst [vmem:[#allocation2 + $0x48] sm:$0xf] %v8261_v2  ;;  %471 = vst [vmem:[#allocation2 + $0x4c] sm:$0xf] %v8261_v2  ;;  %v6784_v8 = vcombine.low %v1075_v5, %v1076_v6  ;;  %v1544_v9 = vshrl.u32 %v1075_v5, 16  ;;  %v1547_v10 = vshll.u32 %v1075_v5, 16  ;;  %7671 = vmatpush3.bf16.msra.mxu0 %v8125_v3  ;;  %8108 = vmatpush3.bf16.msra.mxu1 %v8125_v3 }
  0x16   : > { %472 = vst [vmem:[#allocation2 + $0x50] sm:$0x1] %v8261_v2  ;;  %473 = vst [vmem:[#allocation2 + $0x54] sm:$0xf] %v8261_v2  ;;  %v1553_v11 = vshll.u32 %v1076_v6, 16  ;;  %v1557_v13 = vshrl.u32 %v1076_v6, 16  ;;  %7672 = vmatprep.subr.bf16.mxu0 %v8126_v4  ;;  %8101 = vmatprep.subr.bf16.mxu1 %v8126_v4  ;;  %v388_v31 = vadd.f32 %v8348_v20, %v349_v26 }
  0x17   : > { %474 = vst [vmem:[#allocation2 + $0x58] sm:$0xf] %v8261_v2  ;;  %475 = vst [vmem:[#allocation2 + $0x5c] sm:$0x1] %v8261_v2  ;;  %v6848_v14 = vrot.slane %v1075_v5, 9  ;;  %v8343_v17 = vrot.slane %v1544_v9, 4  ;;  %7682 = vmatprep.mubr.bf16.mxu0 %v6784_v8  ;;  %v389_v36 = vadd.f32 %v8348_v20, %v350_v28  ;;  %v364_v38 = vmul.f32 %v7307_v30, %v8340_v12 }
  0x18   : > { %476 = vst [vmem:[#allocation2 + $0x60] sm:$0xf] %v8261_v2  ;;  %477 = vst [vmem:[#allocation2 + $0x64] sm:$0xf] %v8261_v2  ;;  %v2334_v18 = vrot.slane %v1076_v6, 5  ;;  %v8359_v23 = vrot.slane %v1547_v10, 5  ;;  %v402_v44 = vadd.f32 %v8348_v20, %v363_v37 }
  0x19   : > { %478 = vst [vmem:[#allocation2 + $0x68] sm:$0x1] %v8261_v2  ;;  %479 = vst [vmem:[#allocation2 + $0x6c] sm:$0xf] %v8261_v2  ;;  %v8361_v24 = vrot.slane %v1553_v11, 5  ;;  %v8363_v25 = vrot.slane %v1557_v13, 4  ;;  %7673 = vmatpush3.bf16.msra.mxu0 %v8126_v4  ;;  %8109 = vmatpush3.bf16.msra.mxu1 %v8126_v4  ;;  %v403_v45 = vadd.f32 %v8348_v20, %v364_v38 }
  0x1a   : > { %480 = vst [vmem:[#allocation2 + $0x70] sm:$0xf] %v8261_v2  ;;  %481 = vst [vmem:[#allocation2 + $0x74] sm:$0x1] %v8261_v2  ;;  %v7427_v27 = vld [vmem:[%s8334_s11 + $0x40] sm:$0xff]   ;;  %7674 = vmatprep.subr.bf16.mxu0 %v8127_v22  ;;  %8102 = vmatprep.subr.bf16.mxu1 %v8127_v22  ;;  %v420_v39 = vmax.f32 %v388_v31, 0.0 }
  0x1b   : > { %482 = vst [vmem:[#allocation2 + $0x78] sm:$0xf] %v8261_v2  ;;  %483 = vst [vmem:[#allocation2 + $0x7c] sm:$0xf] %v8261_v2  ;;  %vm602_vm4 = vsmask.f32 256  ;;  %v7310_v32 = vunpack.c.l.bf16 %v7427_v27  ;;  %v7311_v33 = vunpack.c.h.bf16 %v7427_v27 }
  0x1c   : > { %484 = vst [vmem:[#allocation2 + $0x80] sm:$0x1] %v8261_v2  ;;  %485 = vst [vmem:[#allocation2 + $0x84] sm:$0xf] %v8261_v2  ;;  %vm603_vm5 = vsmask.f32 4368  ;;  %v7212_v47 = vpack.c.bf16 %v420_v39, %v420_v39 }
  0x1d   : > { %486 = vst [vmem:[#allocation2 + $0x88] sm:$0xf] %v8261_v2  ;;  %487 = vst [vmem:[#allocation2 + $0x8c] sm:$0x1] %v8261_v2  ;;  %vm927_vm6 = vsmask.f32 7938  ;;  %v365_v40 = vmul.f32 %v7310_v32, %v8340_v12  ;;  %v366_v41 = vmul.f32 %v7311_v33, %v8340_v12  ;;  %7675 = vmatpush3.bf16.msra.mxu0 %v8127_v22  ;;  %8110 = vmatpush3.bf16.msra.mxu1 %v8127_v22 }
  0x1e   : > { %488 = vst [vmem:[#allocation2 + $0x90] sm:$0xf] %v8261_v2  ;;  %489 = vst [vmem:[#allocation2 + $0x94] sm:$0xf] %v8261_v2  ;;  %v8381_v42 = vrot.slane %v2334_v18, 4  ;;  %v421_v43 = vmax.f32 %v389_v36, 0.0  ;;  %7676 = vmatprep.subr.bf16.mxu0 %v8128_v35  ;;  %8103 = vmatprep.subr.bf16.mxu1 %v8128_v35 }
  0x1f   : > { %490 = vst [vmem:[#allocation2 + $0x98] sm:$0x1] %v8261_v2  ;;  %491 = vst [vmem:[#allocation2 + $0x9c] sm:$0xf] %v8261_v2  ;;  %v404_v48 = vadd.f32 %v8348_v20, %v365_v40  ;;  %v405_v49 = vadd.f32 %v8348_v20, %v366_v41  ;;  %v8390_v50 = vld [vmem:[%s8334_s11 + $0x8] sm:$0xff]   ;;  %v434_v53 = vmax.f32 %v402_v44, 0.0 }
  0x20   : > { %492 = vst [vmem:[#allocation2 + $0xa0] sm:$0xf] %v8261_v2  ;;  %493 = vst [vmem:[#allocation2 + $0xa4] sm:$0x1] %v8261_v2  ;;  %v7213_v52 = vpack.c.bf16 %v421_v43, %v421_v43  ;;  %v435_v54 = vmax.f32 %v403_v45, 0.0  ;;  %v7282_v55 = vunpack.c.l.bf16 %v8390_v50  ;;  %v8129_v56 = vld [vmem:[%s11350_s3 + $0x8] sm:$0xff]   ;;  %v7283_v4 = vunpack.c.h.bf16 %v8390_v50 }
  0x21   : > { %494 = vst [vmem:[#allocation2 + $0xa8] sm:$0xf] %v8261_v2  ;;  %495 = vst [vmem:[#allocation2 + $0xac] sm:$0xf] %v8261_v2  ;;  %v606_v57 = vshrl.u32 %v7212_v47, 16  ;;  %v609_v58 = vshll.u32 %v7212_v47, 16  ;;  %v7226_v63 = vpack.c.bf16 %v434_v53, %v434_v53  ;;  %7677 = vmatpush3.bf16.msra.mxu0 %v8128_v35  ;;  %8111 = vmatpush3.bf16.msra.mxu1 %v8128_v35 }
  0x22   : > { %496 = vst [vmem:[#allocation2 + $0xb0] sm:$0x1] %v8261_v2  ;;  %497 = vst [vmem:[#allocation2 + $0xb4] sm:$0xf] %v8261_v2  ;;  %v436_v59 = vmax.f32 %v404_v48, 0.0  ;;  %v437_v60 = vmax.f32 %v405_v49, 0.0  ;;  %v7227_v0 = vpack.c.bf16 %v435_v54, %v435_v54  ;;  %7678 = vmatprep.subr.bf16.mxu0 %v8129_v56  ;;  %8104 = vmatprep.subr.bf16.mxu1 %v8129_v56 }
  0x23   : > { %498 = vst [vmem:[#allocation2 + $0xb8] sm:$0xf] %v8261_v2  ;;  %499 = vst [vmem:[#allocation2 + $0xbc] sm:$0x1] %v8261_v2  ;;  %v614_v61 = vshrl.u32 %v7213_v52, 16  ;;  %v617_v62 = vshll.u32 %v7213_v52, 16  ;;  %v351_v54 = vmul.f32 %v7282_v55, %v8340_v12 }
  0x24   : > { %500 = vst [vmem:[#allocation2 + $0xc0] sm:$0xf] %v8261_v2  ;;  %501 = vst [vmem:[#allocation2 + $0xc4] sm:$0xf] %v8261_v2  ;;  %v608_v1 = vrot.slane %v606_v57, 7  ;;  %v7229_v3 = vpack.c.bf16 %v437_v60, %v437_v60  ;;  %v725_v8 = vshrl.u32 %v7226_v63, 16 }
  0x25   : > { %502 = vst [vmem:[#allocation2 + $0xc8] sm:$0x1] %v8261_v2  ;;  %503 = vst [vmem:[#allocation2 + $0xcc] sm:$0xf] %v8261_v2  ;;  %v8399_v5 = vrot.slane %v614_v61, 7  ;;  %v728_v9 = vshll.u32 %v7226_v63, 16  ;;  %7679 = vmatpush3.bf16.msra.mxu0 %v8129_v56  ;;  %8112 = vmatpush3.bf16.msra.mxu1 %v8129_v56 }
  0x26   : > { %504 = vst [vmem:[#allocation2 + $0xd0] sm:$0xf] %v8261_v2  ;;  %505 = vst [vmem:[#allocation2 + $0xd4] sm:$0x1] %v8261_v2  ;;  %v7228_v2 = vpack.c.bf16 %v436_v59, %v436_v59  ;;  %v929_v7 = vld [vmem:[#allocation2 + $0xc] sm:$0xf] }
  0x27   : > { %vm8352_vm2 = vmor %vm2329_vm0, %vm2330_vm1  ;;  %v733_v10 = vshrl.u32 %v7227_v0, 16  ;;  %v8130_v11 = vld [vmem:[%s11350_s3] sm:$0xff]   ;;  %v612_v15 = vrot.slane %v608_v1, 4  ;;  %v736_v16 = vshll.u32 %v7227_v0, 16  ;;  %v619_v22 = vor.u32 %v617_v62, %v8399_v5  ;;  %v987_v29 = vld [vmem:[#allocation2 + $0x6c] sm:$0xf] }
  0x28   : > { %v8371_v34 = vsel %vm8352_vm2, %v6848_v14, %v2334_v18  ;;  %vm8403_vm7 = vmand %vm926_vm3, %vm927_vm6  ;;  %v611_v14 = vor.u32 %v609_v58, %v608_v1  ;;  %v980_v18 = vld [vmem:[#allocation2 + $0x60] sm:$0xf]  ;;  %v742_v19 = vshrl.u32 %v7228_v2, 16  ;;  %v727_v27 = vrot.slane %v725_v8, 7  ;;  %v7421_v39 = vld [vmem:[%s8334_s11 + $0x10] sm:$0xff]   ;;  %7680 = vmatprep.subr.bf16.mxu0 %v8130_v11  ;;  %8105 = vmatprep.subr.bf16.mxu1 %v8130_v11  ;;  %p271_p4 = scmp.lt.s32.totalorder %s8303_s22, 1 }
  0x29   : > { %vm8412_vm8 = vmor %vm602_vm4, %vm603_vm5  ;;  %v8418_v28 = vrot.slane %v733_v10, 7  ;;  %v745_v32 = vshll.u32 %v7228_v2, 16  ;;  %v750_v33 = vshrl.u32 %v7229_v3, 16  ;;  %v8430_v41 = vld [vmem:[%s11350_s3 + $0x78] sm:$0xff]   ;;  %v7428_v48 = vld [vmem:[%s8334_s11 + $0x48] sm:$0xff]   ;;  %v753_v53 = vshll.u32 %v7229_v3, 16  ;;  %7681 = vmatpush3.bf16.msra.mxu0 %v8130_v11  ;;  %8113 = vmatpush3.bf16.msra.mxu1 %v8130_v11 }
  0x2a   : > { %v930_v30 = vsel %vm8403_vm7, %v611_v14, %v929_v7  ;;  %v744_v31 = vrot.slane %v742_v19, 7  ;;  %v620_v35 = vsel %vm8412_vm8, %v612_v15, %v619_v22  ;;  %v730_v36 = vor.u32 %v728_v9, %v727_v27  ;;  %v8435_v43 = vld [vmem:[%s11350_s3 + $0xb8] sm:$0xff]   ;;  %v8448_v56 = vld [vmem:[%s8334_s11 + $0x50] sm:$0xff]   ;;  %7714 = vmatprep.subr.bf16.mxu1 %v8430_v41  ;;  %v7431_v22 = vld [vmem:[%s8334_s11 + $0x60] sm:$0xff]   ;;  %s11894_s22 = smov (!%p271_p4, %s8303_s22), 1 }
  0x2b   : > { %931 = vst [vmem:[#allocation2 + $0xc] sm:$0xf] %v930_v30  ;;  %v731_v37 = vrot.slane %v727_v27, 4  ;;  %v738_v38 = vor.u32 %v736_v16, %v8418_v28  ;;  %932 = vst [vmem:[#allocation2 + $0x10] sm:$0xf] %v620_v35  ;;  %v8437_v47 = vrot.slane %v750_v33, 7  ;;  %v352_v58 = vmul.f32 %v7283_v4, %v8340_v12  ;;  %7762 = vmatprep.subr.bf16.mxu0 %v8435_v43  ;;  %s273_s8 = scalar_lea.vmem %s11352_s5, %s11894_s22  ;;  %s276_s12 = scalar_lea.vmem %s11353_s6, %s11894_s22 }
  0x2c   : > { %v747_v44 = vor.u32 %v745_v32, %v744_v31  ;;  %v748_v45 = vrot.slane %v744_v31, 4  ;;  %v981_v52 = vsel %vm8403_vm7, %v730_v36, %v980_v18  ;;  %v7286_v59 = vunpack.c.l.bf16 %v7421_v39  ;;  %v8138_v33 = vld [vmem:[%s11350_s3 + $0xb0] sm:$0xff]  }
  0x2d   : > { %11412 = vst [vmem:[#allocation4_spill] sm:$0xff] %v8437_v47  ;;  %v739_v49 = vsel %vm8412_vm8, %v731_v37, %v738_v38  ;;  %982 = vst [vmem:[#allocation2 + $0x60] sm:$0xf] %v981_v52  ;;  %v7287_v60 = vunpack.c.h.bf16 %v7421_v39  ;;  %v755_v61 = vor.u32 %v753_v53, %v8437_v47  ;;  %v390_v62 = vadd.f32 %v8348_v20, %v351_v54 }
  0x2e   : > { %983 = vst [vmem:[#allocation2 + $0x64] sm:$0xf] %v739_v49  ;;  %v988_v57 = vsel %vm8403_vm7, %v747_v44, %v987_v29  ;;  %v7314_v50 = vunpack.c.l.bf16 %v7428_v48  ;;  %v7315_v55 = vunpack.c.h.bf16 %v7428_v48  ;;  %v391_v63 = vadd.f32 %v8348_v20, %v352_v58 }
  0x2f   : > { %989 = vst [vmem:[#allocation2 + $0x6c] sm:$0xf] %v988_v57  ;;  %v353_v0 = vmul.f32 %v7286_v59, %v8340_v12  ;;  %v354_v1 = vmul.f32 %v7287_v60, %v8340_v12  ;;  %v7318_v2 = vunpack.c.l.bf16 %v8448_v56  ;;  %v756_v3 = vsel %vm8412_vm8, %v748_v45, %v755_v61 }
  0x30   : > { %v422_v4 = vmax.f32 %v390_v62, 0.0  ;;  %v367_v7 = vmul.f32 %v7314_v50, %v8340_v12  ;;  %v8465_v8 = vmul.f32 %v7315_v55, %v8340_v12  ;;  %990 = vst [vmem:[#allocation2 + $0x70] sm:$0xf] %v756_v3  ;;  %v423_v10 = vmax.f32 %v391_v63, 0.0  ;;  %v8137_v55 = vld [vmem:[%s11350_s3 + $0x70] sm:$0xff]   ;;  %v8143_v63 = vld [vmem:[%s11350_s3 + $0xa8] sm:$0xff]  }
  0x31   : > { %v8470_v11 = vadd.f32 %v8348_v20, %v353_v0  ;;  %v8473_v14 = vadd.f32 %v8348_v20, %v354_v1  ;;  %v7319_v15 = vunpack.c.h.bf16 %v8448_v56  ;;  %v7327_v26 = vunpack.c.h.bf16 %v7431_v22 }
  0x32   : > { %v8467_v9 = vld [vmem:[#allocation2 + $0xc] sm:$0xf]  ;;  %v8476_v16 = vld [vmem:[#allocation2 + $0x10] sm:$0xf]  ;;  %v8481_v27 = vpack.c.bf16 %v422_v4, %v422_v4  ;;  %v7215_v39 = vpack.c.bf16 %v423_v10, %v423_v10  ;;  %v406_v44 = vadd.f32 %v8348_v20, %v367_v7  ;;  %vm1540_vm9 = vsmask.f32 3328 }
  0x33   : > { %v1568_v18 = vshrl.u32 %v8467_v9, 16  ;;  %v1571_v19 = vshll.u32 %v8467_v9, 16  ;;  %v6785_v29 = vcombine.low %v8467_v9, %v8476_v16  ;;  %v1577_v30 = vshll.u32 %v8476_v16, 16 }
  0x34   : > { %v1581_v31 = vshrl.u32 %v8476_v16, 16  ;;  %v11354_v32 = vrot.slane %v8476_v16, 5  ;;  %v8491_v37 = vld [vmem:[#allocation2 + $0x60] sm:$0xf]  ;;  %vm933_vm10 = vcmask 1040384  }
  0x35   : > { %v1570_v35 = vrot.slane %v1568_v18, 4  ;;  %v1573_v36 = vrot.slane %v1571_v19, 5  ;;  %v8493_v38 = vld [vmem:[#allocation2 + $0x64] sm:$0xf]  ;;  %7683 = vmatmul.mubr.bf16.vlgmr.msra.gmra.mxu0 %v6785_v29  ;;  %v8496_v45 = vrot.slane %v1577_v30, 5  ;;  %v1736_v54 = vshrl.u32 %v8491_v37, 16  ;;  %vm8828_vm13 = vmand %vm933_vm10, %vm602_vm4 }
  0x36   : > { %v1583_v48 = vrot.slane %v1581_v31, 4  ;;  %v8500_v49 = vrot.slane %v11354_v32, 4  ;;  %v6792_v52 = vcombine.low %v8491_v37, %v8493_v38  ;;  %v1739_v57 = vshll.u32 %v8491_v37, 16  ;;  %v8507_v59 = vld [vmem:[#allocation2 + $0x6c] sm:$0xf]  ;;  %7763 = vmatpush3.bf16.msra.mxu0 %v8435_v43  ;;  %v8146_v29 = vld [vmem:[%s11350_s3 + $0xa0] sm:$0xff]  }
  0x37   : > { %v1574_v53 = vor.u32 %v1573_v36, %v1570_v35  ;;  %v1745_v58 = vshll.u32 %v8493_v38, 16  ;;  %11413 = vst [vmem:[#allocation5_spill] sm:$0xff] %v8507_v59  ;;  %v1749_v61 = vshrl.u32 %v8493_v38, 16  ;;  %7764 = vmatprep.subr.bf16.mxu0 %v8138_v33  ;;  %v8522_v43 = vrot.slane %v1736_v54, 4  ;;  %v8528_v4 = vld [vmem:[#allocation2 + $0x70] sm:$0xf] }
  0x38   : > { %v1584_v60 = vor.u32 %v1583_v48, %v8496_v45  ;;  %7698 = vmatprep.mubr.bf16.mxu1 %v6792_v52  ;;  %v8524_v1 = vrot.slane %v1739_v57, 5  ;;  %11416 = vst [vmem:[#allocation8_spill] sm:$0xff] %v8528_v4  ;;  %v6793_v18 = vcombine.low %v8507_v59, %v8528_v4  ;;  %v623_v35 = vshrl.u32 %v8481_v27, 16 }
  0x39   : > { %v8520_v0 = vrot.slane %v1574_v53, 4  ;;  %v8526_v3 = vrot.slane %v1745_v58, 5  ;;  %v8532_v10 = vrot.slane %v1749_v61, 4  ;;  %v626_v36 = vshll.u32 %v8481_v27, 16  ;;  %v938_v58 = vld [vmem:[#allocation2 + $0x18] sm:$0xf] }
  0x3a   : > { %11414 = vst [vmem:[#allocation6_spill] sm:$0xff] %v8524_v1  ;;  %v8530_v7 = vrot.slane %v1584_v60, 4  ;;  %7765 = vmatpush3.bf16.msra.mxu0 %v8138_v33  ;;  %7699 = vmatmul.mubr.bf16.vlgmr.msra.gmra.mxu1 %v6793_v18  ;;  %v631_v48 = vshrl.u32 %v7215_v39, 16  ;;  %v634_v52 = vshll.u32 %v7215_v39, 16  ;;  %v424_v53 = vmax.f32 %v8470_v11, 0.0 }
  0x3b   : > { %11415 = vst [vmem:[#allocation7_spill] sm:$0xff] %v8526_v3  ;;  %11417 = vst [vmem:[#allocation9_spill] sm:$0xff] %v8532_v10  ;;  %v425_v54 = vmax.f32 %v8473_v14, 0.0  ;;  %7766 = vmatprep.subr.bf16.mxu0 %v8143_v63  ;;  %7715 = vmatpush3.bf16.msra.mxu1 %v8430_v41  ;;  %v625_v57 = vrot.slane %v623_v35, 7  ;;  %v407_v60 = vadd.f32 %v8348_v20, %v8465_v8  ;;  %v438_v33 = vmax.f32 %v406_v44, 0.0  ;;  %v8142_v14 = vld [vmem:[%s11350_s3 + $0x68] sm:$0xff]  }
  0x3c   : > { %v369_v27 = vmul.f32 %v7318_v2, %v8340_v12  ;;  %7716 = vmatprep.subr.bf16.mxu1 %v8137_v55  ;;  %v8552_v61 = vrot.slane %v631_v48, 7  ;;  %v7216_v39 = vpack.c.bf16 %v424_v53, %v424_v53  ;;  %v370_v41 = vmul.f32 %v7319_v15, %v8340_v12  ;;  %v8151_v53 = vld [vmem:[%s11350_s3 + $0x98] sm:$0xff]  }
  0x3d   : > { %v7217_v11 = vpack.c.bf16 %v425_v54, %v425_v54  ;;  %v628_v18 = vor.u32 %v626_v36, %v625_v57  ;;  %v629_v8 = vrot.slane %v625_v57, 4  ;;  %v439_v44 = vmax.f32 %v407_v60, 0.0  ;;  %v945_v36 = vld [vmem:[#allocation2 + $0x24] sm:$0xf] }
  0x3e   : > { %v7230_v35 = vpack.c.bf16 %v438_v33, %v438_v33  ;;  %7767 = vmatpush3.bf16.msra.mxu0 %v8143_v63  ;;  %v636_v2 = vor.u32 %v634_v52, %v8552_v61  ;;  %v640_v31 = vshrl.u32 %v7216_v39, 16  ;;  %v643_v48 = vshll.u32 %v7216_v39, 16 }
  0x3f   : > { %v648_v30 = vshrl.u32 %v7217_v11, 16  ;;  %7768 = vmatprep.subr.bf16.mxu0 %v8146_v29  ;;  %7717 = vmatpush3.bf16.msra.mxu1 %v8137_v55  ;;  %v939_v56 = vsel %vm8403_vm7, %v628_v18, %v938_v58  ;;  %v651_v15 = vshll.u32 %v7217_v11, 16  ;;  %v7231_v54 = vpack.c.bf16 %v439_v44, %v439_v44  ;;  %v8145_v55 = vld [vmem:[%s11350_s3 + $0x60] sm:$0xff]   ;;  %v7422_v44 = vld [vmem:[%s8334_s11 + $0x18] sm:$0xff]  }
  0x40   : > { %v759_v57 = vshrl.u32 %v7230_v35, 16  ;;  %v637_v63 = vsel %vm8412_vm8, %v629_v8, %v636_v2  ;;  %940 = vst [vmem:[#allocation2 + $0x18] sm:$0xf] %v939_v56  ;;  %v642_v52 = vrot.slane %v640_v31, 7  ;;  %v762_v33 = vshll.u32 %v7230_v35, 16  ;;  %7718 = vmatprep.subr.bf16.mxu1 %v8142_v14  ;;  %v8154_v56 = vld [vmem:[%s11350_s3 + $0x90] sm:$0xff]  }
  0x41   : > { %v8568_v60 = vrot.slane %v648_v30, 7  ;;  %941 = vst [vmem:[#allocation2 + $0x1c] sm:$0xf] %v637_v63  ;;  %v767_v39 = vshrl.u32 %v7231_v54, 16  ;;  %v770_v11 = vshll.u32 %v7231_v54, 16  ;;  %v408_v18 = vadd.f32 %v8348_v20, %v369_v27 }
  0x42   : > { %v761_v58 = vrot.slane %v759_v57, 7  ;;  %7769 = vmatpush3.bf16.msra.mxu0 %v8146_v29  ;;  %v645_v8 = vor.u32 %v643_v48, %v642_v52  ;;  %v646_v2 = vrot.slane %v642_v52, 4  ;;  %v994_v31 = vld [vmem:[#allocation2 + $0x78] sm:$0xf]  ;;  %v409_v35 = vadd.f32 %v8348_v20, %v370_v41  ;;  %v7423_v29 = vld [vmem:[%s8334_s11 + $0x20] sm:$0xff]  }
  0x43   : > { %v653_v30 = vor.u32 %v651_v15, %v8568_v60  ;;  %7770 = vmatprep.subr.bf16.mxu0 %v8151_v53  ;;  %v8580_v54 = vrot.slane %v767_v39, 7  ;;  %v440_v19 = vmax.f32 %v408_v18, 0.0  ;;  %7719 = vmatpush3.bf16.msra.mxu1 %v8142_v14  ;;  %v7290_v41 = vunpack.c.l.bf16 %v7422_v44  ;;  %v8150_v52 = vld [vmem:[%s11350_s3 + $0x58] sm:$0xff]  }
  0x44   : > { %v764_v57 = vor.u32 %v762_v33, %v761_v58  ;;  %v765_v63 = vrot.slane %v761_v58, 4  ;;  %v946_v48 = vsel %vm8403_vm7, %v645_v8, %v945_v36  ;;  %v441_v15 = vmax.f32 %v409_v35, 0.0  ;;  %7720 = vmatprep.subr.bf16.mxu1 %v8145_v55  ;;  %v8159_v36 = vld [vmem:[%s11350_s3 + $0x88] sm:$0xff]   ;;  %v8598_v35 = vld [vmem:[%s8334_s11 + $0x58] sm:$0xff]  }
  0x45   : > { %11418 = vst [vmem:[#allocation10_spill] sm:$0xff] %v8580_v54  ;;  %v654_v27 = vsel %vm8412_vm8, %v646_v2, %v653_v30  ;;  %947 = vst [vmem:[#allocation2 + $0x24] sm:$0xf] %v946_v48  ;;  %v772_v33 = vor.u32 %v770_v11, %v8580_v54  ;;  %v7232_v58 = vpack.c.bf16 %v440_v19, %v440_v19  ;;  %v7291_v39 = vunpack.c.h.bf16 %v7422_v44  ;;  %v8153_v11 = vld [vmem:[%s11350_s3 + $0x50] sm:$0xff]  }
  0x46   : > { %948 = vst [vmem:[#allocation2 + $0x28] sm:$0xf] %v654_v27  ;;  %v995_v14 = vsel %vm8403_vm7, %v764_v57, %v994_v31  ;;  %7771 = vmatpush3.bf16.msra.mxu0 %v8151_v53  ;;  %v7233_v18 = vpack.c.bf16 %v441_v15, %v441_v15  ;;  %v355_v8 = vmul.f32 %v7290_v41, %v8340_v12  ;;  %v7294_v2 = vunpack.c.l.bf16 %v7423_v29 }
  0x47   : > { %996 = vst [vmem:[#allocation2 + $0x78] sm:$0xf] %v995_v14  ;;  %v7295_v30 = vunpack.c.h.bf16 %v7423_v29  ;;  %7772 = vmatprep.subr.bf16.mxu0 %v8154_v56  ;;  %v8603_v19 = vld [vmem:[#allocation2 + $0x18] sm:$0xf]  ;;  %v773_v53 = vsel %vm8412_vm8, %v765_v63, %v772_v33  ;;  %v776_v44 = vshrl.u32 %v7232_v58, 16  ;;  %v779_v31 = vshll.u32 %v7232_v58, 16  ;;  %7721 = vmatpush3.bf16.msra.mxu1 %v8145_v55 }
  0x48   : > { %v356_v57 = vmul.f32 %v7291_v39, %v8340_v12  ;;  %v8608_v27 = vld [vmem:[#allocation2 + $0x1c] sm:$0xf]  ;;  %997 = vst [vmem:[#allocation2 + $0x7c] sm:$0xf] %v773_v53  ;;  %v784_v15 = vshrl.u32 %v7233_v18, 16  ;;  %v787_v41 = vshll.u32 %v7233_v18, 16  ;;  %7722 = vmatprep.subr.bf16.mxu1 %v8150_v52  ;;  %v394_v55 = vadd.f32 %v8348_v20, %v355_v8 }
  0x49   : > { %v6786_v14 = vcombine.low %v8603_v19, %v8608_v27  ;;  %v778_v33 = vrot.slane %v776_v44, 7  ;;  %v1001_v58 = vld [vmem:[#allocation2 + $0x84] sm:$0xf]  ;;  %v357_v50 = vmul.f32 %v7294_v2, %v8340_v12  ;;  %v358_v53 = vmul.f32 %v7295_v30, %v8340_v12 }
  0x4a   : > { %7773 = vmatpush3.bf16.msra.mxu0 %v8154_v56  ;;  %v8616_v39 = vrot.slane %v784_v15, 7  ;;  %v395_v62 = vadd.f32 %v8348_v20, %v356_v57  ;;  %v8162_v18 = vld [vmem:[%s11350_s3 + $0x80] sm:$0xff]   ;;  %v426_v63 = vmax.f32 %v394_v55, 0.0  ;;  %v7322_v8 = vunpack.c.l.bf16 %v8598_v35 }
  0x4b   : > { %7774 = vmatprep.subr.bf16.mxu0 %v8159_v36  ;;  %7686 = vmatprep.mubr.bf16.mxu0 %v6786_v14  ;;  %v781_v40 = vor.u32 %v779_v31, %v778_v33  ;;  %v782_v44 = vrot.slane %v778_v33, 4  ;;  %v396_v57 = vadd.f32 %v8348_v20, %v357_v50  ;;  %v397_v48 = vadd.f32 %v8348_v20, %v358_v53  ;;  %v8158_v31 = vld [vmem:[%s11350_s3 + $0x48] sm:$0xff]   ;;  %v8652_v33 = vld [vmem:[%s11350_s3 + $0x138] sm:$0xff]  }
  0x4c   : > { %11419 = vst [vmem:[#allocation11_spill] sm:$0xff] %v8616_v39  ;;  %7723 = vmatpush3.bf16.msra.mxu1 %v8150_v52  ;;  %v8625_v56 = vld [vmem:[#allocation2 + $0x24] sm:$0xf]  ;;  %v789_v2 = vor.u32 %v787_v41, %v8616_v39  ;;  %v427_v30 = vmax.f32 %v395_v62, 0.0  ;;  %v959_v39 = vld [vmem:[#allocation2 + $0x3c] sm:$0xf] }
  0x4d   : > { %v8627_v15 = vld [vmem:[#allocation2 + $0x28] sm:$0xf]  ;;  %7724 = vmatprep.subr.bf16.mxu1 %v8153_v11  ;;  %v1002_v29 = vsel %vm8403_vm7, %v781_v40, %v1001_v58  ;;  %v428_v62 = vmax.f32 %v396_v57, 0.0  ;;  %v429_v14 = vmax.f32 %v397_v48, 0.0  ;;  %vm1541_vm11 = vsmask.f32 7440 }
  0x4e   : > { %v6787_v52 = vcombine.low %v8625_v56, %v8627_v15  ;;  %v8640_v55 = vld [vmem:[#allocation2 + $0x78] sm:$0xf]  ;;  %7775 = vmatpush3.bf16.msra.mxu0 %v8159_v36  ;;  %v790_v53 = vsel %vm8412_vm8, %v782_v44, %v789_v2  ;;  %1003 = vst [vmem:[#allocation2 + $0x84] sm:$0xf] %v1002_v29  ;;  %v7218_v36 = vpack.c.bf16 %v426_v63, %v426_v63  ;;  %v7323_v44 = vunpack.c.h.bf16 %v8598_v35  ;;  %v8161_v29 = vld [vmem:[%s11350_s3 + $0x40] sm:$0xff]   ;;  %vm8812_vm12 = vmor %vm1540_vm9, %vm1541_vm11 }
  0x4f   : > { %11420 = vst [vmem:[#allocation12_spill] sm:$0xff] %v8640_v55  ;;  %7776 = vmatprep.subr.bf16.mxu0 %v8162_v18  ;;  %v8654_v41 = vld [vmem:[#allocation2 + $0x7c] sm:$0xf]  ;;  %1004 = vst [vmem:[#allocation2 + $0x88] sm:$0xf] %v790_v53  ;;  %v7219_v50 = vpack.c.bf16 %v427_v30, %v427_v30  ;;  %v371_v2 = vmul.f32 %v7322_v8, %v8340_v12  ;;  %v7221_v48 = vpack.c.bf16 %v429_v14, %v429_v14 }
  0x50   : > { %7687 = vmatmul.mubr.bf16.gmra.mxu0 %v6787_v52  ;;  %11421 = vst [vmem:[#allocation13_spill] sm:$0xff] %v8654_v41  ;;  %7725 = vmatpush3.bf16.msra.mxu1 %v8153_v11  ;;  %v6794_v40 = vcombine.low %v8640_v55, %v8654_v41  ;;  %v657_v52 = vshrl.u32 %v7218_v36, 16  ;;  %v660_v63 = vshll.u32 %v7218_v36, 16  ;;  %v7220_v11 = vpack.c.bf16 %v428_v62, %v428_v62  ;;  %v8671_v36 = vld [vmem:[%s11350_s3 + $0xf8] sm:$0xff]   ;;  %v7424_v41 = vld [vmem:[%s8334_s11 + $0x28] sm:$0xff]   ;;  %v8695_v55 = vld [vmem:[%s8334_s11 + $0x30] sm:$0xff]  }
  0x51   : > { %7726 = vmatprep.subr.bf16.mxu1 %v8158_v31  ;;  %v665_v30 = vshrl.u32 %v7219_v50, 16  ;;  %v668_v57 = vshll.u32 %v7219_v50, 16  ;;  %v372_v53 = vmul.f32 %v7323_v44, %v8340_v12  ;;  %v410_v58 = vadd.f32 %v8348_v20, %v371_v2 }
  0x52   : > { %7777 = vmatpush3.bf16.msra.mxu0 %v8162_v18  ;;  %7702 = vmatprep.mubr.bf16.mxu1 %v6794_v40  ;;  %v659_v35 = vrot.slane %v657_v52, 7  ;;  %v7326_v8 = vunpack.c.l.bf16 %v7431_v22  ;;  %v674_v18 = vshrl.u32 %v7220_v11, 16  ;;  %v677_v62 = vshll.u32 %v7220_v11, 16  ;;  %v952_v52 = vld [vmem:[#allocation2 + $0x30] sm:$0xf] }
  0x53   : > { %v8666_v32 = vrot.slane %v665_v30, 7  ;;  %7858 = vmatprep.subr.bf16.mxu0 %v8652_v33  ;;  %v682_v14 = vshrl.u32 %v7221_v48, 16  ;;  %v685_v50 = vshll.u32 %v7221_v48, 16  ;;  %v411_v22 = vadd.f32 %v8348_v20, %v372_v53 }
  0x54   : > { %7727 = vmatpush3.bf16.msra.mxu1 %v8158_v31  ;;  %v662_v40 = vor.u32 %v660_v63, %v659_v35  ;;  %v663_v44 = vrot.slane %v659_v35, 4  ;;  %v676_v51 = vrot.slane %v674_v18, 7  ;;  %v373_v11 = vmul.f32 %v7326_v8, %v8340_v12 }
  0x55   : > { %7728 = vmatprep.subr.bf16.mxu1 %v8161_v29  ;;  %v670_v2 = vor.u32 %v668_v57, %v8666_v32  ;;  %v8676_v31 = vld [vmem:[#allocation2 + $0x84] sm:$0xf]  ;;  %v8680_v46 = vrot.slane %v682_v14, 7  ;;  %v374_v48 = vmul.f32 %v7327_v26, %v8340_v12  ;;  %v442_v35 = vmax.f32 %v410_v58, 0.0 }
  0x56   : > { %11422 = vst [vmem:[#allocation14_spill] sm:$0xff] %v8676_v31  ;;  %v8678_v30 = vld [vmem:[#allocation2 + $0x88] sm:$0xf]  ;;  %v953_v8 = vsel %vm8403_vm7, %v662_v40, %v952_v52  ;;  %v679_v14 = vor.u32 %v677_v62, %v676_v51  ;;  %v680_v26 = vrot.slane %v676_v51, 4  ;;  %v443_v57 = vmax.f32 %v411_v22, 0.0 }
  0x57   : > { %11423 = vst [vmem:[#allocation15_spill] sm:$0xff] %v8678_v30  ;;  %v6795_v63 = vcombine.low %v8676_v31, %v8678_v30  ;;  %v671_v18 = vsel %vm8412_vm8, %v663_v44, %v670_v2  ;;  %954 = vst [vmem:[#allocation2 + $0x30] sm:$0xf] %v953_v8  ;;  %v687_v53 = vor.u32 %v685_v50, %v8680_v46  ;;  %v7298_v62 = vunpack.c.l.bf16 %v7424_v41 }
  0x58   : > { %7729 = vmatpush3.bf16.msra.mxu1 %v8161_v29  ;;  %955 = vst [vmem:[#allocation2 + $0x34] sm:$0xf] %v671_v18  ;;  %v412_v29 = vadd.f32 %v8348_v20, %v373_v11  ;;  %v960_v44 = vsel %vm8403_vm7, %v679_v14, %v959_v39  ;;  %v413_v40 = vadd.f32 %v8348_v20, %v374_v48  ;;  %v7299_v51 = vunpack.c.h.bf16 %v7424_v41  ;;  %v7432_v41 = vld [vmem:[%s8334_s11 + $0x68] sm:$0xff]  }
  0x59   : > { %7810 = vmatprep.subr.bf16.mxu1 %v8671_v36  ;;  %7703 = vmatmul.mubr.bf16.gmra.mxu1 %v6795_v63  ;;  %v688_v2 = vsel %vm8412_vm8, %v680_v26, %v687_v53  ;;  %961 = vst [vmem:[#allocation2 + $0x3c] sm:$0xf] %v960_v44  ;;  %v7234_v52 = vpack.c.bf16 %v442_v35, %v442_v35  ;;  %v7302_v39 = vunpack.c.l.bf16 %v8695_v55  ;;  %v7303_v44 = vunpack.c.h.bf16 %v8695_v55 }
  0x5a   : > { %v7235_v63 = vpack.c.bf16 %v443_v57, %v443_v57  ;;  %v444_v18 = vmax.f32 %v412_v29, 0.0  ;;  %962 = vst [vmem:[#allocation2 + $0x40] sm:$0xf] %v688_v2  ;;  %v445_v58 = vmax.f32 %v413_v40, 0.0  ;;  %v359_v50 = vmul.f32 %v7298_v62, %v8340_v12  ;;  %v1008_v29 = vld [vmem:[#allocation2 + $0x90] sm:$0xf] }
  0x5b   : > { %v360_v22 = vmul.f32 %v7299_v51, %v8340_v12  ;;  %v793_v11 = vshrl.u32 %v7234_v52, 16  ;;  %v796_v48 = vshll.u32 %v7234_v52, 16  ;;  %v361_v40 = vmul.f32 %v7302_v39, %v8340_v12 }
  0x5c   : > { %v801_v8 = vshrl.u32 %v7235_v63, 16  ;;  %v804_v14 = vshll.u32 %v7235_v63, 16  ;;  %v7236_v30 = vpack.c.bf16 %v444_v18, %v444_v18  ;;  %v7237_v31 = vpack.c.bf16 %v445_v58, %v445_v58 }
  0x5d   : > { %v398_v53 = vadd.f32 %v8348_v20, %v359_v50  ;;  %v399_v57 = vadd.f32 %v8348_v20, %v360_v22  ;;  %v795_v35 = vrot.slane %v793_v11, 7  ;;  %v7330_v63 = vunpack.c.l.bf16 %v7432_v41  ;;  %v8743_v22 = vld [vmem:[%s11348_s1] ss:$0 sm:$0xff] }
  0x5e   : > { %v8711_v26 = vrot.slane %v801_v8, 7  ;;  %v8715_v62 = vld [vmem:[#allocation2 + $0x30] sm:$0xf]  ;;  %v810_v2 = vshrl.u32 %v7236_v30, 16  ;;  %v813_v52 = vshll.u32 %v7236_v30, 16  ;;  %v7331_v18 = vunpack.c.h.bf16 %v7432_v41 }
  0x5f   : > { %v8717_v51 = vld [vmem:[#allocation2 + $0x34] sm:$0xf]  ;;  %v798_v12 = vor.u32 %v796_v48, %v795_v35  ;;  %v799_v39 = vrot.slane %v795_v35, 4  ;;  %v818_v4 = vshrl.u32 %v7237_v31, 16  ;;  %v821_v20 = vshll.u32 %v7237_v31, 16 }
  0x60   : > { %11424 = vst [vmem:[#allocation16_spill] sm:$0xff] %v8711_v26  ;;  %v6788_v58 = vcombine.low %v8715_v62, %v8717_v51  ;;  %v8724_v55 = vld [vmem:[#allocation2 + $0x3c] sm:$0xf]  ;;  %v806_v11 = vor.u32 %v804_v14, %v8711_v26  ;;  %v812_v8 = vrot.slane %v810_v2, 7  ;;  %v430_v54 = vmax.f32 %v398_v53, 0.0 }
  0x61   : > { %v8727_v30 = vld [vmem:[#allocation2 + $0x40] sm:$0xf]  ;;  %v1009_v14 = vsel %vm8403_vm7, %v798_v12, %v1008_v29  ;;  %v1015_v35 = vld [vmem:[#allocation2 + $0x9c] sm:$0xf]  ;;  %v8738_v41 = vrot.slane %v818_v4, 7  ;;  %v431_v31 = vmax.f32 %v399_v57, 0.0  ;;  %v375_v4 = vmul.f32 %v8743_v22, %v7330_v63 }
  0x62   : > { %7690 = vmatprep.mubr.bf16.mxu0 %v6788_v58  ;;  %v6789_v50 = vcombine.low %v8724_v55, %v8727_v30  ;;  %v807_v48 = vsel %vm8412_vm8, %v799_v39, %v806_v11  ;;  %1010 = vst [vmem:[#allocation2 + $0x90] sm:$0xf] %v1009_v14  ;;  %v815_v2 = vor.u32 %v813_v52, %v812_v8  ;;  %v816_v58 = vrot.slane %v812_v8, 4  ;;  %v8749_v29 = vld [vmem:[%s11349_s2] ss:$0 sm:$0xff]  ;;  %v8760_v14 = vld [vmem:[%s8334_s11 + $0x70] sm:$0xff]  }
  0x63   : > { %1011 = vst [vmem:[#allocation2 + $0x94] sm:$0xf] %v807_v48  ;;  %11425 = vst [vmem:[#allocation17_spill] sm:$0xff] %v8738_v41  ;;  %v362_v39 = vmul.f32 %v8743_v22, %v7303_v44  ;;  %v400_v52 = vadd.f32 %v8749_v29, %v361_v40  ;;  %v823_v53 = vor.u32 %v821_v20, %v8738_v41 }
  0x64   : > { %7691 = vmatmul.mubr.bf16.gmra.mxu0 %v6789_v50  ;;  %v1016_v57 = vsel %vm8403_vm7, %v815_v2, %v1015_v35  ;;  %v7222_v50 = vpack.c.bf16 %v430_v54, %v430_v54  ;;  %v376_v12 = vmul.f32 %v8743_v22, %v7331_v18  ;;  %v7223_v11 = vpack.c.bf16 %v431_v31, %v431_v31 }
  0x65   : > { %1017 = vst [vmem:[#allocation2 + $0x9c] sm:$0xf] %v1016_v57  ;;  %v401_v44 = vadd.f32 %v8749_v29, %v362_v39  ;;  %v432_v8 = vmax.f32 %v400_v52, 0.0  ;;  %v414_v48 = vadd.f32 %v8749_v29, %v375_v4  ;;  %v824_v40 = vsel %vm8412_vm8, %v816_v58, %v823_v53  ;;  %v966_v57 = vld [vmem:[#allocation2 + $0x48] sm:$0xf] }
  0x66   : > { %v691_v63 = vshrl.u32 %v7222_v50, 16  ;;  %v694_v20 = vshll.u32 %v7222_v50, 16  ;;  %v415_v41 = vadd.f32 %v8749_v29, %v376_v12  ;;  %1018 = vst [vmem:[#allocation2 + $0xa0] sm:$0xf] %v824_v40  ;;  %v699_v54 = vshrl.u32 %v7223_v11, 16 }
  0x67   : > { %v702_v35 = vshll.u32 %v7223_v11, 16  ;;  %v433_v18 = vmax.f32 %v401_v44, 0.0  ;;  %v7224_v2 = vpack.c.bf16 %v432_v8, %v432_v8  ;;  %v446_v39 = vmax.f32 %v414_v48, 0.0 }
  0x68   : > { %v693_v31 = vrot.slane %v691_v63, 7  ;;  %v447_v52 = vmax.f32 %v415_v41, 0.0  ;;  %v7334_v4 = vunpack.c.l.bf16 %v8760_v14  ;;  %v8770_v58 = vrot.slane %v699_v54, 7 }
  0x69   : > { %v8766_v26 = vld [vmem:[#allocation2 + $0x90] sm:$0xf]  ;;  %v7225_v53 = vpack.c.bf16 %v433_v18, %v433_v18  ;;  %v708_v50 = vshrl.u32 %v7224_v2, 16  ;;  %v7335_v12 = vunpack.c.h.bf16 %v8760_v14  ;;  %v711_v47 = vshll.u32 %v7224_v2, 16 }
  0x6a   : > { %v8768_v59 = vld [vmem:[#allocation2 + $0x94] sm:$0xf]  ;;  %v696_v48 = vor.u32 %v694_v20, %v693_v31  ;;  %v697_v40 = vrot.slane %v693_v31, 4  ;;  %v704_v63 = vor.u32 %v702_v35, %v8770_v58  ;;  %v7238_v3 = vpack.c.bf16 %v446_v39, %v446_v39  ;;  %v8787_v35 = vld [vmem:[#allocation2 + $0x8] sm:$0x1] }
  0x6b   : > { %v6796_v11 = vcombine.low %v8766_v26, %v8768_v59  ;;  %v710_v54 = vrot.slane %v708_v50, 7  ;;  %v716_v14 = vshrl.u32 %v7225_v53, 16  ;;  %v719_v10 = vshll.u32 %v7225_v53, 16  ;;  %v973_v31 = vld [vmem:[#allocation2 + $0x54] sm:$0xf] }
  0x6c   : > { %v8779_v18 = vld [vmem:[#allocation2 + $0x9c] sm:$0xf]  ;;  %v705_v41 = vsel %vm8412_vm8, %v697_v40, %v704_v63  ;;  %v967_v20 = vsel %vm8403_vm7, %v696_v48, %v966_v57  ;;  %v827_v63 = vshrl.u32 %v7238_v3, 16  ;;  %v830_v1 = vshll.u32 %v7238_v3, 16 }
  0x6d   : > { %7706 = vmatprep.mubr.bf16.mxu1 %v6796_v11  ;;  %v8789_v50 = vld [vmem:[#allocation2 + $0xa0] sm:$0xf]  ;;  %968 = vst [vmem:[#allocation2 + $0x48] sm:$0xf] %v967_v20  ;;  %969 = vst [vmem:[#allocation2 + $0x4c] sm:$0xf] %v705_v41  ;;  %v713_v2 = vor.u32 %v711_v47, %v710_v54  ;;  %v7239_v11 = vpack.c.bf16 %v447_v52, %v447_v52  ;;  %v377_v52 = vmul.f32 %v8743_v22, %v7334_v4 }
  0x6e   : > { %v714_v53 = vrot.slane %v710_v54, 4  ;;  %v8791_v39 = vrot.slane %v716_v14, 7  ;;  %v6797_v44 = vcombine.low %v8779_v18, %v8789_v50  ;;  %v1022_v41 = vld [vmem:[#allocation2 + $0xa8] sm:$0xf]  ;;  %v829_v47 = vrot.slane %v827_v63, 7 }
  0x6f   : > { %v974_v48 = vsel %vm8403_vm7, %v713_v2, %v973_v31  ;;  %v835_v8 = vshrl.u32 %v7239_v11, 16  ;;  %v838_v20 = vshll.u32 %v7239_v11, 16  ;;  %v378_v54 = vmul.f32 %v8743_v22, %v7335_v12  ;;  %v935_v12 = vld [vmem:[#allocation2 + $0x14] sm:$0x1] }
  0x70   : > { %v721_v57 = vor.u32 %v719_v10, %v8791_v39  ;;  %7707 = vmatmul.mubr.bf16.gmra.mxu1 %v6797_v44  ;;  %975 = vst [vmem:[#allocation2 + $0x54] sm:$0xf] %v974_v48  ;;  %v2337_v14 = vrot.slane %v8787_v35, 5  ;;  %v11426_v10 = vor.u32 %v8359_v23, %v8343_v17  ;;  %v832_v44 = vor.u32 %v830_v1, %v829_v47 }
  0x71   : > { %v8804_v40 = vrot.slane %v835_v8, 7  ;;  %v833_v2 = vrot.slane %v829_v47, 4  ;;  %v416_v11 = vadd.f32 %v8749_v29, %v377_v52  ;;  %v417_v4 = vadd.f32 %v8749_v29, %v378_v54 }
  0x72   : > { %v722_v3 = vsel %vm8412_vm8, %v714_v53, %v721_v57  ;;  %v1551_v31 = vrot.slane %v11426_v10, 4  ;;  %v2338_v17 = vsel %vm8352_vm2, %v8381_v42, %v2337_v14  ;;  %v11429_v1 = vor.u32 %v8363_v25, %v8361_v24 }
  0x73   : > { %976 = vst [vmem:[#allocation2 + $0x58] sm:$0xf] %v722_v3  ;;  %v840_v8 = vor.u32 %v838_v20, %v8804_v40  ;;  %v1023_v42 = vsel %vm8403_vm7, %v832_v44, %v1022_v41  ;;  %v448_v48 = vmax.f32 %v416_v11, 0.0  ;;  %v449_v20 = vmax.f32 %v417_v4, 0.0 }
  0x74   : > { %v1556_v23 = vsel %vm8812_vm12, %v1551_v31, %v8361_v24  ;;  %v1561_v29 = vrot.slane %v11429_v1, 4  ;;  %v8832_v63 = vld [vmem:[#allocation2 + $0x48] sm:$0xf]  ;;  %v8834_v57 = vld [vmem:[#allocation2 + $0x4c] sm:$0xf]  ;;  %v6880_v47 = vcombine.low %v8371_v34, %v2338_v17  ;;  %v1563_v41 = vshll.u32 %v8787_v35, 16 }
  0x75   : > { %v6790_v24 = vcombine.low %v8832_v63, %v8834_v57  ;;  %v1688_v25 = vshrl.u32 %v8832_v63, 16  ;;  %1024 = vst [vmem:[#allocation2 + $0xa8] sm:$0xf] %v1023_v42  ;;  %v841_v14 = vsel %vm8412_vm8, %v833_v2, %v840_v8  ;;  %v7240_v3 = vpack.c.bf16 %v448_v48, %v448_v48  ;;  %v942_v31 = vld [vmem:[#allocation2 + $0x20] sm:$0x1] }
  0x76   : > { %v7241_v10 = vpack.c.bf16 %v449_v20, %v449_v20  ;;  %1025 = vst [vmem:[#allocation2 + $0xac] sm:$0xf] %v841_v14  ;;  %v11432_v44 = vrot.slane %v8399_v5, 4  ;;  %v11433_v4 = vrot.slane %v8476_v16, 5  ;;  %v11434_v17 = vrot.slane %v8467_v9, 9 }
  0x77   : > { %7694 = vmatprep.mubr.bf16.mxu0 %v6790_v24  ;;  %v8847_v34 = vld [vmem:[#allocation2 + $0x54] sm:$0xf]  ;;  %v1580_v35 = vsel %vm8812_vm12, %v8520_v0, %v8496_v45  ;;  %v638_v8 = vrot.slane %v8552_v61, 4  ;;  %v847_v42 = vshll.u32 %v7240_v3, 16  ;;  %v1565_v20 = vrot.slane %v1563_v41, 5 }
  0x78   : > { %v936_v11 = vsel %vm8828_vm13, %v11432_v44, %v935_v12  ;;  %v8859_v2 = vsel %vm8352_vm2, %v11434_v17, %v11433_v4  ;;  %v844_v12 = vshrl.u32 %v7240_v3, 16  ;;  %v852_v9 = vshrl.u32 %v7241_v10, 16  ;;  %v1029_v3 = vld [vmem:[#allocation2 + $0xb4] sm:$0xf] }
  0x79   : > { %937 = vst [vmem:[#allocation2 + $0x14] sm:$0x1] %v936_v11  ;;  %v855_v48 = vshll.u32 %v7241_v10, 16  ;;  %v943_v24 = vsel %vm8828_vm13, %v638_v8, %v942_v31  ;;  %v6850_v4 = vrot.slane %v8603_v19, 9  ;;  %v1566_v11 = vsel %vm8812_vm12, %v1561_v29, %v1565_v20 }
  0x7a   : > { %v8868_v16 = vld [vmem:[#allocation2 + $0x58] sm:$0xf]  ;;  %v846_v44 = vrot.slane %v844_v12, 7  ;;  %944 = vst [vmem:[#allocation2 + $0x20] sm:$0x1] %v943_v24  ;;  %v8876_v17 = vrot.slane %v852_v9, 7  ;;  %v8885_v12 = vcombine.low %v1556_v23, %v1566_v11 }
  0x7b   : > { %v6791_v14 = vcombine.low %v8847_v34, %v8868_v16  ;;  %v2348_v10 = vrot.slane %v8608_v27, 5  ;;  %v11435_v41 = vshrl.u32 %v8603_v19, 16  ;;  %v11436_v24 = vshll.u32 %v8603_v19, 16 }
  0x7c   : > { %v8883_v8 = vld [vmem:[#allocation2 + $0xa8] sm:$0xf]  ;;  %v849_v1 = vor.u32 %v847_v42, %v846_v44  ;;  %v850_v61 = vrot.slane %v846_v44, 4  ;;  %v857_v29 = vor.u32 %v855_v48, %v8876_v17  ;;  %v1601_v19 = vshll.u32 %v8608_v27, 16 }
  0x7d   : > { %v1594_v31 = vrot.slane %v11435_v41, 4  ;;  %7695 = vmatmul.mubr.bf16.gmra.mxu0 %v6791_v14  ;;  %v1597_v9 = vrot.slane %v11436_v24, 5  ;;  %v2349_v20 = vsel %vm8352_vm2, %v6850_v4, %v2348_v10  ;;  %v8894_v14 = vld [vmem:[#allocation2 + $0xac] sm:$0xf]  ;;  %v2350_v23 = vrot.slane %v2348_v10, 4 }
  0x7e   : > { %7778 = vmatprep.mubr.bf16.mxu0 %v6880_v47  ;;  %v1030_v42 = vsel %vm8403_vm7, %v849_v1, %v1029_v3  ;;  %v6798_v11 = vcombine.low %v8883_v8, %v8894_v14  ;;  %v858_v47 = vsel %vm8412_vm8, %v850_v61, %v857_v29  ;;  %v11437_v4 = vshrl.u32 %v8608_v27, 16 }
  0x7f   : > { %v1598_v44 = vor.u32 %v1597_v9, %v1594_v31  ;;  %1031 = vst [vmem:[#allocation2 + $0xb4] sm:$0xf] %v1030_v42  ;;  %1032 = vst [vmem:[#allocation2 + $0xb8] sm:$0xf] %v858_v47  ;;  %v1603_v10 = vrot.slane %v1601_v19, 5  ;;  %v655_v5 = vrot.slane %v8568_v60, 4 }
  0x80   : > { %v1080_v48 = vld [vmem:[#allocation2 + $0x14] sm:$0x1]  ;;  %v1607_v24 = vrot.slane %v11437_v4, 4  ;;  %v949_v31 = vld [vmem:[#allocation2 + $0x2c] sm:$0x1]  ;;  %7710 = vmatprep.mubr.bf16.mxu1 %v6798_v11  ;;  %v6851_v41 = vrot.slane %v8625_v56, 9 }
  0x81   : > { %v2344_v54 = vrot.slane %v1080_v48, 5  ;;  %v1587_v1 = vshll.u32 %v1080_v48, 16  ;;  %v1599_v3 = vrot.slane %v1598_v44, 4  ;;  %v1083_v9 = vld [vmem:[#allocation2 + $0x20] sm:$0x1]  ;;  %v2355_v52 = vrot.slane %v8627_v15, 5 }
  0x82   : > { %v11438_v61 = vshrl.u32 %v8625_v56, 16  ;;  %v2351_v47 = vrot.slane %v1083_v9, 5  ;;  %v1608_v11 = vor.u32 %v1607_v24, %v1603_v10  ;;  %v1611_v60 = vshll.u32 %v1083_v9, 16  ;;  %v8166_v4 = vld [vmem:[%s11350_s3 + $0x130] sm:$0xff]  }
  0x83   : > { %v2345_v27 = vsel %vm8352_vm2, %v8500_v49, %v2344_v54  ;;  %v1589_v42 = vrot.slane %v1587_v1, 5  ;;  %v1604_v44 = vsel %vm8812_vm12, %v1599_v3, %v1603_v10  ;;  %v950_v48 = vsel %vm8828_vm13, %v655_v5, %v949_v31  ;;  %v956_v1 = vld [vmem:[#allocation2 + $0x38] sm:$0x1] }
  0x84   : > { %v1618_v29 = vrot.slane %v11438_v61, 4  ;;  %v6881_v19 = vcombine.low %v8859_v2, %v2345_v27  ;;  %v2352_v54 = vsel %vm8352_vm2, %v2350_v23, %v2351_v47  ;;  %951 = vst [vmem:[#allocation2 + $0x2c] sm:$0x1] %v950_v48  ;;  %v8929_v2 = vsel %vm8352_vm2, %v6851_v41, %v2355_v52 }
  0x85   : > { %v1590_v49 = vsel %vm8812_vm12, %v8530_v7, %v1589_v42  ;;  %v2357_v24 = vrot.slane %v2355_v52, 4  ;;  %v6882_v3 = vcombine.low %v2349_v20, %v2352_v54  ;;  %v1609_v7 = vrot.slane %v1608_v11, 4 }
  0x86   : > { %7779 = vmatmul.mubr.bf16.vlgmr.msra.gmra.mxu0 %v6881_v19  ;;  %v8936_v5 = vcombine.low %v1580_v35, %v1590_v49  ;;  %v1613_v10 = vrot.slane %v1611_v60, 5  ;;  %v8938_v31 = vld [vmem:[#allocation2 + $0xb4] sm:$0xf]  ;;  %v11439_v23 = vshll.u32 %v8625_v56, 16  ;;  %v1625_v52 = vshll.u32 %v8627_v15, 16 }
  0x87   : > { %7859 = vmatpush3.bf16.msra.mxu0 %v8652_v33  ;;  %v11440_v9 = vshrl.u32 %v8627_v15, 16  ;;  %v672_v27 = vrot.slane %v8666_v32, 4  ;;  %v8947_v45 = vld [vmem:[#allocation2 + $0xb8] sm:$0xf]  ;;  %v1904_v0 = vshrl.u32 %v8938_v31, 16  ;;  %v1907_v35 = vshll.u32 %v8938_v31, 16  ;;  %7782 = vmatprep.mubr.bf16.mxu0 %v6882_v3 }
  0x88   : > { %v1621_v41 = vrot.slane %v11439_v23, 5  ;;  %v1614_v33 = vsel %vm8812_vm12, %v1609_v7, %v1613_v10  ;;  %7860 = vmatprep.subr.bf16.mxu0 %v8166_v4  ;;  %v6852_v56 = vrot.slane %v8715_v62, 9  ;;  %v8168_v15 = vld [vmem:[%s11350_s3 + $0x128] sm:$0xff]   ;;  %v6799_v32 = vcombine.low %v8938_v31, %v8947_v45  ;;  %v963_v23 = vld [vmem:[#allocation2 + $0x44] sm:$0x1] }
  0x89   : > { %v1631_v61 = vrot.slane %v11440_v9, 4  ;;  %v1917_v20 = vshrl.u32 %v8947_v45, 16  ;;  %v6826_v42 = vcombine.low %v1604_v44, %v1614_v33  ;;  %v1627_v19 = vrot.slane %v1625_v52, 5 }
  0x8a   : > { %v1622_v47 = vor.u32 %v1621_v41, %v1618_v29  ;;  %v957_v11 = vsel %vm8828_vm13, %v672_v27, %v956_v1  ;;  %v2362_v60 = vrot.slane %v8717_v51, 5  ;;  %v11441_v48 = vshrl.u32 %v8715_v62, 16  ;;  %7711 = vmatmul.mubr.bf16.gmra.mxu1 %v6799_v32 }
  0x8b   : > { %7861 = vmatpush3.bf16.msra.mxu0 %v8166_v4  ;;  %958 = vst [vmem:[#allocation2 + $0x38] sm:$0x1] %v957_v11  ;;  %v11442_v3 = vshll.u32 %v8715_v62, 16  ;;  %v1649_v10 = vshll.u32 %v8717_v51, 16  ;;  %v11443_v29 = vshrl.u32 %v8717_v51, 16  ;;  %7730 = vmatprep.mubr.bf16.mxu1 %v8885_v12  ;;  %v1632_v41 = vor.u32 %v1631_v61, %v1627_v19  ;;  %v8170_v62 = vld [vmem:[%s11350_s3 + $0x120] sm:$0xff]  }
  0x8c   : > { %v1642_v49 = vrot.slane %v11441_v48, 4  ;;  %v1623_v54 = vrot.slane %v1622_v47, 4  ;;  %v1086_v1 = vld [vmem:[#allocation2 + $0x2c] sm:$0x1]  ;;  %v8973_v52 = vsel %vm8352_vm2, %v6852_v56, %v2362_v60  ;;  %v2364_v9 = vrot.slane %v2362_v60, 4  ;;  %7862 = vmatprep.subr.bf16.mxu0 %v8168_v15 }
  0x8d   : > { %v1645_v7 = vrot.slane %v11442_v3, 5  ;;  %v1655_v44 = vrot.slane %v11443_v29, 4  ;;  %v689_v4 = vrot.slane %v8680_v46, 4  ;;  %v2358_v27 = vrot.slane %v1086_v1, 5 }
  0x8e   : > { %v1628_v51 = vsel %vm8812_vm12, %v1623_v54, %v1627_v19  ;;  %v1635_v33 = vshll.u32 %v1086_v1, 16  ;;  %v1633_v32 = vrot.slane %v1632_v41, 4  ;;  %v1651_v61 = vrot.slane %v1649_v10, 5 }
  0x8f   : > { %v1646_v12 = vor.u32 %v1645_v7, %v1642_v49  ;;  %v964_v56 = vsel %vm8828_vm13, %v689_v4, %v963_v23  ;;  %v6853_v47 = vrot.slane %v8724_v55, 9  ;;  %v2359_v46 = vsel %vm8352_vm2, %v2357_v24, %v2358_v27  ;;  %7863 = vmatpush3.bf16.msra.mxu0 %v8168_v15  ;;  %v8165_v49 = vld [vmem:[%s11350_s3 + $0xf0] sm:$0xff]  }
  0x90   : > { %v1637_v11 = vrot.slane %v1635_v33, 5  ;;  %965 = vst [vmem:[#allocation2 + $0x44] sm:$0x1] %v964_v56  ;;  %v2369_v48 = vrot.slane %v8727_v30, 5  ;;  %v6883_v19 = vcombine.low %v8929_v2, %v2359_v46  ;;  %v1656_v54 = vor.u32 %v1655_v44, %v1651_v61  ;;  %7864 = vmatprep.subr.bf16.mxu0 %v8170_v62  ;;  %v8172_v44 = vld [vmem:[%s11350_s3 + $0x118] sm:$0xff]  }
  0x91   : > { %v1647_v60 = vrot.slane %v1646_v12, 4  ;;  %v11444_v3 = vshrl.u32 %v8724_v55, 16  ;;  %v11445_v10 = vshll.u32 %v8724_v55, 16  ;;  %v1673_v27 = vshll.u32 %v8727_v30, 16  ;;  %v970_v33 = vld [vmem:[#allocation2 + $0x50] sm:$0x1] }
  0x92   : > { %v1638_v24 = vsel %vm8812_vm12, %v1633_v32, %v1637_v11  ;;  %v9001_v2 = vsel %vm8352_vm2, %v6853_v47, %v2369_v48  ;;  %v2371_v23 = vrot.slane %v2369_v48, 4  ;;  %7783 = vmatmul.mubr.bf16.gmra.mxu0 %v6883_v19  ;;  %v1089_v55 = vld [vmem:[#allocation2 + $0x38] sm:$0x1]  ;;  %v1657_v41 = vrot.slane %v1656_v54, 4  ;;  %7731 = vmatmul.mubr.bf16.vlgmr.msra.gmra.mxu1 %v8936_v5 }
  0x93   : > { %v1666_v7 = vrot.slane %v11444_v3, 4  ;;  %v1669_v29 = vrot.slane %v11445_v10, 5  ;;  %v1652_v15 = vsel %vm8812_vm12, %v1647_v60, %v1651_v61  ;;  %v6827_v1 = vcombine.low %v1628_v51, %v1638_v24  ;;  %7865 = vmatpush3.bf16.msra.mxu0 %v8170_v62  ;;  %7811 = vmatpush3.bf16.msra.mxu1 %v8671_v36  ;;  %v8167_v51 = vld [vmem:[%s11350_s3 + $0xe8] sm:$0xff]  }
  0x94   : > { %v2365_v12 = vrot.slane %v1089_v55, 5  ;;  %v1659_v32 = vshll.u32 %v1089_v55, 16  ;;  %v11446_v61 = vshrl.u32 %v8727_v30, 16  ;;  %v706_v47 = vrot.slane %v8770_v58, 4  ;;  %7734 = vmatprep.mubr.bf16.mxu1 %v6826_v42  ;;  %v8174_v30 = vld [vmem:[%s11350_s3 + $0x110] sm:$0xff]   ;;  %7812 = vmatprep.subr.bf16.mxu1 %v8165_v49 }
  0x95   : > { %v1670_v4 = vor.u32 %v1669_v29, %v1666_v7  ;;  %v1675_v11 = vrot.slane %v1673_v27, 5  ;;  %v6854_v60 = vrot.slane %v8832_v63, 9  ;;  %v2376_v5 = vrot.slane %v8834_v57, 5  ;;  %7866 = vmatprep.subr.bf16.mxu0 %v8172_v44 }
  0x96   : > { %v1679_v56 = vrot.slane %v11446_v61, 4  ;;  %v2366_v58 = vsel %vm8352_vm2, %v2364_v9, %v2365_v12  ;;  %v1661_v36 = vrot.slane %v1659_v32, 5  ;;  %v971_v42 = vsel %vm8828_vm13, %v706_v47, %v970_v33  ;;  %v977_v9 = vld [vmem:[#allocation2 + $0x5c] sm:$0x1]  ;;  %v8169_v12 = vld [vmem:[%s11350_s3 + $0xe0] sm:$0xff]  }
  0x97   : > { %v1671_v46 = vrot.slane %v1670_v4, 4  ;;  %v1690_v62 = vrot.slane %v1688_v25, 4  ;;  %v6884_v48 = vcombine.low %v8973_v52, %v2366_v58  ;;  %v1092_v19 = vld [vmem:[#allocation2 + $0x44] sm:$0x1]  ;;  %972 = vst [vmem:[#allocation2 + $0x50] sm:$0x1] %v971_v42  ;;  %v9031_v7 = vsel %vm8352_vm2, %v6854_v60, %v2376_v5  ;;  %7867 = vmatpush3.bf16.msra.mxu0 %v8172_v44  ;;  %7813 = vmatpush3.bf16.msra.mxu1 %v8165_v49 }
  0x98   : > { %v1680_v3 = vor.u32 %v1679_v56, %v1675_v11  ;;  %v1662_v10 = vsel %vm8812_vm12, %v1657_v41, %v1661_v36  ;;  %v2372_v29 = vrot.slane %v1092_v19, 5  ;;  %v1683_v24 = vshll.u32 %v1092_v19, 16  ;;  %7814 = vmatprep.subr.bf16.mxu1 %v8167_v51  ;;  %7868 = vmatprep.subr.bf16.mxu0 %v8174_v30 }
  0x99   : > { %v1676_v54 = vsel %vm8812_vm12, %v1671_v46, %v1675_v11  ;;  %v2378_v25 = vrot.slane %v2376_v5, 4  ;;  %7786 = vmatprep.mubr.bf16.mxu0 %v6884_v48  ;;  %v6828_v52 = vcombine.low %v1652_v15, %v1662_v10  ;;  %v11447_v4 = vshll.u32 %v8832_v63, 16  ;;  %v8176_v63 = vld [vmem:[%s11350_s3 + $0x108] sm:$0xff]  }
  0x9a   : > { %v1681_v55 = vrot.slane %v1680_v3, 4  ;;  %v1697_v33 = vshll.u32 %v8834_v57, 16  ;;  %v2373_v41 = vsel %vm8352_vm2, %v2371_v23, %v2372_v29  ;;  %v1685_v32 = vrot.slane %v1683_v24, 5  ;;  %v984_v11 = vld [vmem:[#allocation2 + $0x68] sm:$0x1]  ;;  %v9054_v23 = vld [vmem:[%s11350_s3 + $0x100] sm:$0xff]   ;;  %7735 = vmatmul.mubr.bf16.gmra.mxu1 %v6827_v1 }
  0x9b   : > { %v1693_v27 = vrot.slane %v11447_v4, 5  ;;  %v11448_v44 = vshrl.u32 %v8834_v57, 16  ;;  %v723_v15 = vrot.slane %v8791_v39, 4  ;;  %v6885_v61 = vcombine.low %v9001_v2, %v2373_v41  ;;  %7869 = vmatpush3.bf16.msra.mxu0 %v8174_v30  ;;  %7738 = vmatprep.mubr.bf16.mxu1 %v6828_v52 }
  0x9c   : > { %v1699_v47 = vrot.slane %v1697_v33, 5  ;;  %v6855_v46 = vrot.slane %v8847_v34, 9  ;;  %v1686_v39 = vsel %vm8812_vm12, %v1681_v55, %v1685_v32  ;;  %v2383_v60 = vrot.slane %v8868_v16, 5  ;;  %7815 = vmatpush3.bf16.msra.mxu1 %v8167_v51  ;;  %7870 = vmatprep.subr.bf16.mxu0 %v8176_v63  ;;  %v8171_v51 = vld [vmem:[%s11350_s3 + $0xd8] sm:$0xff]  }
  0x9d   : > { %v1703_v49 = vrot.slane %v11448_v44, 4  ;;  %v1694_v56 = vor.u32 %v1693_v27, %v1690_v62  ;;  %v978_v57 = vsel %vm8828_vm13, %v723_v15, %v977_v9  ;;  %v11449_v2 = vshrl.u32 %v8847_v34, 16  ;;  %7787 = vmatmul.mubr.bf16.gmra.mxu0 %v6885_v61  ;;  %7816 = vmatprep.subr.bf16.mxu1 %v8169_v12  ;;  %v11456_v15 = vld [vmem:[#allocation6_spill] sm:$0xff] }
  0x9e   : > { %v6829_v58 = vcombine.low %v1676_v54, %v1686_v39  ;;  %979 = vst [vmem:[#allocation2 + $0x5c] sm:$0x1] %v978_v57  ;;  %v11450_v1 = vshll.u32 %v8847_v34, 16  ;;  %v1095_v48 = vld [vmem:[#allocation2 + $0x50] sm:$0x1]  ;;  %v9067_v19 = vsel %vm8352_vm2, %v6855_v46, %v2383_v60  ;;  %v2385_v3 = vrot.slane %v2383_v60, 4 }
  0x9f   : > { %v1714_v5 = vrot.slane %v11449_v2, 4  ;;  %v1695_v36 = vrot.slane %v1694_v56, 4  ;;  %v1704_v42 = vor.u32 %v1703_v49, %v1699_v47  ;;  %v1721_v9 = vshll.u32 %v8868_v16, 16  ;;  %7871 = vmatpush3.bf16.msra.mxu0 %v8176_v63  ;;  %v991_v56 = vld [vmem:[#allocation2 + $0x74] sm:$0x1]  ;;  %v11459_v57 = vld [vmem:[#allocation4_spill] sm:$0xff] }
  0xa0   : > { %v1717_v62 = vrot.slane %v11450_v1, 5  ;;  %v11451_v30 = vshrl.u32 %v8868_v16, 16  ;;  %v2379_v54 = vrot.slane %v1095_v48, 5  ;;  %v1707_v34 = vshll.u32 %v1095_v48, 16  ;;  %7872 = vmatprep.subr.bf16.mxu0 %v9054_v23  ;;  %7817 = vmatpush3.bf16.msra.mxu1 %v8169_v12  ;;  %v11457_v46 = vld [vmem:[#allocation7_spill] sm:$0xff]  ;;  %v9115_v12 = vld [vmem:[%s11350_s3 + $0x1b8] sm:$0xff]  }
  0xa1   : > { %v1700_v29 = vsel %vm8812_vm12, %v1695_v36, %v1699_v47  ;;  %v1705_v24 = vrot.slane %v1704_v42, 4  ;;  %v9077_v55 = vrot.slane %v1721_v9, 5  ;;  %v11452_v4 = vrot.slane %v8418_v28, 4  ;;  %7818 = vmatprep.subr.bf16.mxu1 %v8171_v51 }
  0xa2   : > { %v1727_v10 = vrot.slane %v11451_v30, 4  ;;  %v1718_v52 = vor.u32 %v1717_v62, %v1714_v5  ;;  %v11453_v27 = vrot.slane %v8493_v38, 5  ;;  %v11454_v33 = vrot.slane %v8491_v37, 9  ;;  %7739 = vmatmul.mubr.bf16.gmra.mxu1 %v6829_v58  ;;  %v998_v58 = vld [vmem:[#allocation2 + $0x80] sm:$0x1] }
  0xa3   : > { %v985_v16 = vsel %vm8828_vm13, %v11452_v4, %v984_v11  ;;  %v2380_v32 = vsel %vm8352_vm2, %v2378_v25, %v2379_v54  ;;  %v1709_v44 = vrot.slane %v1707_v34, 5  ;;  %v1742_v61 = vor.u32 %v11456_v15, %v8522_v43  ;;  %v11458_v25 = vld [vmem:[#allocation9_spill] sm:$0xff]  ;;  %v8245_v43 = vld [vmem:[#allocation2 + $0x6c] sm:$0xf]  ;;  %7873 = vmatpush3.bf16.msra.mxu0 %v9054_v23  ;;  %v8246_v54 = vld [vmem:[#allocation2 + $0x70] sm:$0xf] }
  0xa4   : > { %v9089_v41 = vsel %vm8352_vm2, %v11454_v33, %v11453_v27  ;;  %986 = vst [vmem:[#allocation2 + $0x68] sm:$0x1] %v985_v16  ;;  %v11455_v49 = vmov %v11453_v27  ;;  %v6886_v37 = vcombine.low %v9031_v7, %v2380_v32  ;;  %v1719_v47 = vrot.slane %v1718_v52, 4  ;;  %v8173_v7 = vld [vmem:[%s11350_s3 + $0xd0] sm:$0xff]   ;;  %7819 = vmatpush3.bf16.msra.mxu1 %v8171_v51  ;;  %v11463_v32 = vld [vmem:[#allocation8_spill] sm:$0xff]  ;;  %v11465_v23 = vld [vmem:[#allocation10_spill] sm:$0xff]  ;;  %7954 = vmatprep.subr.bf16.mxu0 %v9115_v12 }
  0xa5   : > { %v9095_v28 = vrot.slane %v11455_v49, 4  ;;  %v1728_v63 = vor.u32 %v1727_v10, %v9077_v55  ;;  %v1752_v11 = vor.u32 %v11458_v25, %v11457_v46  ;;  %v1710_v38 = vsel %vm8812_vm12, %v1705_v24, %v1709_v44  ;;  %v1098_v36 = vld [vmem:[#allocation2 + $0x5c] sm:$0x1]  ;;  %v11460_v24 = vld [vmem:[#allocation5_spill] sm:$0xff]  ;;  %7820 = vmatprep.subr.bf16.mxu1 %v8173_v7 }
  0xa6   : > { %v9106_v39 = vrot.slane %v1742_v61, 4  ;;  %v757_v60 = vrot.slane %v11459_v57, 4  ;;  %v6857_v2 = vrot.slane %v8245_v43, 9  ;;  %7790 = vmatprep.mubr.bf16.mxu0 %v6886_v37  ;;  %v6830_v5 = vcombine.low %v1700_v29, %v1710_v38  ;;  %v8175_v61 = vld [vmem:[%s11350_s3 + $0xc8] sm:$0xff]   ;;  %v8177_v38 = vld [vmem:[%s11350_s3 + $0xc0] sm:$0xff]  }
  0xa7   : > { %v1724_v42 = vsel %vm8812_vm12, %v1719_v47, %v9077_v55  ;;  %v1729_v1 = vrot.slane %v1728_v63, 4  ;;  %v1753_v62 = vrot.slane %v1752_v11, 4  ;;  %v2386_v48 = vrot.slane %v1098_v36, 5 }
  0xa8   : > { %v1731_v9 = vshll.u32 %v1098_v36, 16  ;;  %v1748_v30 = vsel %vm8812_vm12, %v9106_v39, %v11457_v46  ;;  %v992_v10 = vsel %vm8828_vm13, %v757_v60, %v991_v56  ;;  %7742 = vmatprep.mubr.bf16.mxu1 %v6830_v5  ;;  %v2397_v29 = vrot.slane %v8246_v54, 5  ;;  %v8247_v60 = vld [vmem:[#allocation2 + $0x78] sm:$0xf]  ;;  %7821 = vmatpush3.bf16.msra.mxu1 %v8173_v7 }
  0xa9   : > { %993 = vst [vmem:[#allocation2 + $0x74] sm:$0x1] %v992_v10  ;;  %v11461_v34 = vshrl.u32 %v11460_v24, 16  ;;  %v11462_v55 = vshll.u32 %v11460_v24, 16  ;;  %v1769_v16 = vshll.u32 %v8246_v54, 16  ;;  %v2387_v27 = vsel %vm8352_vm2, %v2385_v3, %v2386_v48  ;;  %7822 = vmatprep.subr.bf16.mxu1 %v8175_v61  ;;  %v11466_v10 = vld [vmem:[#allocation12_spill] sm:$0xff] }
  0xaa   : > { %v1733_v33 = vrot.slane %v1731_v9, 5  ;;  %v11464_v44 = vshrl.u32 %v11463_v32, 16  ;;  %v774_v15 = vrot.slane %v11465_v23, 4  ;;  %v6887_v56 = vcombine.low %v9067_v19, %v2387_v27 }
  0xab   : > { %v1762_v52 = vrot.slane %v11461_v34, 4  ;;  %v1765_v4 = vrot.slane %v11462_v55, 5  ;;  %v1101_v37 = vld [vmem:[#allocation2 + $0x68] sm:$0x1]  ;;  %v9143_v51 = vsel %vm8352_vm2, %v6857_v2, %v2397_v29  ;;  %v2399_v3 = vrot.slane %v2397_v29, 4 }
  0xac   : > { %v1775_v49 = vrot.slane %v11464_v44, 4  ;;  %v1734_v63 = vsel %vm8812_vm12, %v1729_v1, %v1733_v33  ;;  %v2393_v46 = vrot.slane %v1101_v37, 5  ;;  %v1755_v25 = vshll.u32 %v1101_v37, 16  ;;  %7791 = vmatmul.mubr.bf16.gmra.mxu0 %v6887_v56  ;;  %v8248_v1 = vld [vmem:[#allocation2 + $0x7c] sm:$0xf]  ;;  %7823 = vmatpush3.bf16.msra.mxu1 %v8175_v61  ;;  %v11469_v44 = vld [vmem:[#allocation13_spill] sm:$0xff] }
  0xad   : > { %v1766_v47 = vor.u32 %v1765_v4, %v1762_v52  ;;  %v1771_v11 = vrot.slane %v1769_v16, 5  ;;  %v6831_v39 = vcombine.low %v1724_v42, %v1734_v63  ;;  %v999_v57 = vsel %vm8828_vm13, %v774_v15, %v998_v58  ;;  %v1005_v33 = vld [vmem:[#allocation2 + $0x8c] sm:$0x1]  ;;  %v11471_v15 = vld [vmem:[#allocation11_spill] sm:$0xff]  ;;  %7824 = vmatprep.subr.bf16.mxu1 %v8177_v38 }
  0xae   : > { %v6858_v43 = vrot.slane %v8247_v60, 9  ;;  %v2394_v2 = vsel %vm8352_vm2, %v9095_v28, %v2393_v46  ;;  %v1757_v5 = vrot.slane %v1755_v25, 5  ;;  %1000 = vst [vmem:[#allocation2 + $0x80] sm:$0x1] %v999_v57  ;;  %v2404_v48 = vrot.slane %v8248_v1, 5  ;;  %v11472_v57 = vld [vmem:[#allocation14_spill] sm:$0xff] }
  0xaf   : > { %v1767_v19 = vrot.slane %v1766_v47, 4  ;;  %v1776_v36 = vor.u32 %v1775_v49, %v1771_v11  ;;  %7743 = vmatmul.mubr.bf16.gmra.mxu1 %v6831_v39  ;;  %v6888_v42 = vcombine.low %v9089_v41, %v2394_v2  ;;  %v11467_v58 = vshrl.u32 %v11466_v10, 16  ;;  %v9172_v47 = vld [vmem:[%s11350_s3 + $0x178] sm:$0xff]   ;;  %v8250_v46 = vld [vmem:[#allocation2 + $0x88] sm:$0xf] }
  0xb0   : > { %v11468_v7 = vshll.u32 %v11466_v10, 16  ;;  %v1758_v28 = vsel %vm8812_vm12, %v1753_v62, %v1757_v5  ;;  %v1104_v24 = vld [vmem:[#allocation2 + $0x74] sm:$0x1]  ;;  %v2405_v52 = vsel %vm8352_vm2, %v6858_v43, %v2404_v48  ;;  %v2406_v55 = vrot.slane %v2404_v48, 4  ;;  %v8249_v62 = vld [vmem:[#allocation2 + $0x84] sm:$0xf]  ;;  %7825 = vmatpush3.bf16.msra.mxu1 %v8177_v38 }
  0xb1   : > { %v1772_v9 = vsel %vm8812_vm12, %v1767_v19, %v1771_v11  ;;  %v1786_v54 = vrot.slane %v11467_v58, 4  ;;  %v1777_v34 = vrot.slane %v1776_v36, 4  ;;  %7794 = vmatprep.mubr.bf16.mxu0 %v6888_v42  ;;  %v6832_v41 = vcombine.low %v1748_v30, %v1758_v28  ;;  %7906 = vmatprep.subr.bf16.mxu1 %v9172_v47  ;;  %v11475_v28 = vld [vmem:[#allocation15_spill] sm:$0xff] }
  0xb2   : > { %v1789_v29 = vrot.slane %v11468_v7, 5  ;;  %v2400_v4 = vrot.slane %v1104_v24, 5  ;;  %v1779_v16 = vshll.u32 %v1104_v24, 16  ;;  %v1793_v32 = vshll.u32 %v8248_v1, 16 }
  0xb3   : > { %v11470_v49 = vshrl.u32 %v11469_v44, 16  ;;  %v791_v56 = vrot.slane %v11471_v15, 4  ;;  %v6859_v37 = vrot.slane %v8249_v62, 9  ;;  %7746 = vmatprep.mubr.bf16.mxu1 %v6832_v41  ;;  %v2411_v25 = vrot.slane %v8250_v46, 5  ;;  %v1012_v41 = vld [vmem:[#allocation2 + $0x98] sm:$0x1] }
  0xb4   : > { %v1790_v27 = vor.u32 %v1789_v29, %v1786_v54  ;;  %v2401_v30 = vsel %vm8352_vm2, %v2399_v3, %v2400_v4  ;;  %v1781_v63 = vrot.slane %v1779_v16, 5  ;;  %v1795_v39 = vrot.slane %v1793_v32, 5 }
  0xb5   : > { %v1799_v23 = vrot.slane %v11470_v49, 4  ;;  %v6889_v11 = vcombine.low %v9143_v51, %v2401_v30  ;;  %v1006_v19 = vsel %vm8828_vm13, %v791_v56, %v1005_v33  ;;  %v11473_v60 = vshrl.u32 %v11472_v57, 16  ;;  %v1107_v5 = vld [vmem:[#allocation2 + $0x80] sm:$0x1] }
  0xb6   : > { %v1791_v61 = vrot.slane %v1790_v27, 4  ;;  %v1782_v2 = vsel %vm8812_vm12, %v1777_v34, %v1781_v63  ;;  %1007 = vst [vmem:[#allocation2 + $0x8c] sm:$0x1] %v1006_v19  ;;  %v9185_v3 = vsel %vm8352_vm2, %v6859_v37, %v2411_v25  ;;  %v2413_v36 = vrot.slane %v2411_v25, 4 }
  0xb7   : > { %v1810_v43 = vrot.slane %v11473_v60, 4  ;;  %v11474_v1 = vshll.u32 %v11472_v57, 16  ;;  %7795 = vmatmul.mubr.bf16.gmra.mxu0 %v6889_v11  ;;  %v6833_v48 = vcombine.low %v1772_v9, %v1782_v2  ;;  %v2407_v42 = vrot.slane %v1107_v5, 5  ;;  %v11477_v9 = vld [vmem:[#allocation16_spill] sm:$0xff]  ;;  %v1019_v2 = vld [vmem:[#allocation2 + $0xa4] sm:$0x1] }
  0xb8   : > { %v1796_v10 = vsel %vm8812_vm12, %v1791_v61, %v1795_v39  ;;  %v1800_v58 = vor.u32 %v1799_v23, %v1795_v39  ;;  %v1803_v54 = vshll.u32 %v1107_v5, 16  ;;  %v1817_v29 = vshll.u32 %v8250_v46, 16 }
  0xb9   : > { %v1813_v51 = vrot.slane %v11474_v1, 5  ;;  %v11476_v24 = vshrl.u32 %v11475_v28, 16  ;;  %7747 = vmatmul.mubr.bf16.gmra.mxu1 %v6833_v48  ;;  %v2408_v38 = vsel %vm8352_vm2, %v2406_v55, %v2407_v42  ;;  %v808_v16 = vrot.slane %v11477_v9, 4  ;;  %v11481_v48 = vld [vmem:[#allocation17_spill] sm:$0xff] }
  0xba   : > { %v1801_v4 = vrot.slane %v1800_v58, 4  ;;  %v6860_v27 = vrot.slane %v8766_v26, 9  ;;  %v6890_v33 = vcombine.low %v2405_v52, %v2408_v38  ;;  %v1805_v32 = vrot.slane %v1803_v54, 5 }
  0xbb   : > { %v1814_v7 = vor.u32 %v1813_v51, %v1810_v43  ;;  %v1823_v34 = vrot.slane %v11476_v24, 4  ;;  %v1819_v49 = vrot.slane %v1817_v29, 5  ;;  %v1013_v23 = vsel %vm8828_vm13, %v808_v16, %v1012_v41 }
  0xbc   : > { %v2418_v15 = vrot.slane %v8768_v59, 5  ;;  %v11478_v56 = vshrl.u32 %v8766_v26, 16  ;;  %v11479_v37 = vshll.u32 %v8766_v26, 16  ;;  %7798 = vmatprep.mubr.bf16.mxu0 %v6890_v33  ;;  %v1806_v30 = vsel %vm8812_vm12, %v1801_v4, %v1805_v32  ;;  %1014 = vst [vmem:[#allocation2 + $0x98] sm:$0x1] %v1013_v23 }
  0xbd   : > { %v1815_v44 = vrot.slane %v1814_v7, 4  ;;  %v1824_v63 = vor.u32 %v1823_v34, %v1819_v49  ;;  %v1841_v61 = vshll.u32 %v8768_v59, 16  ;;  %v6834_v46 = vcombine.low %v1796_v10, %v1806_v30  ;;  %v1110_v25 = vld [vmem:[#allocation2 + $0x8c] sm:$0x1] }
  0xbe   : > { %v1834_v62 = vrot.slane %v11478_v56, 4  ;;  %v1837_v55 = vrot.slane %v11479_v37, 5  ;;  %v2419_v11 = vsel %vm8352_vm2, %v6860_v27, %v2418_v15  ;;  %v2420_v39 = vrot.slane %v2418_v15, 4 }
  0xbf   : > { %v1820_v52 = vsel %vm8812_vm12, %v1815_v44, %v1819_v49  ;;  %v2414_v26 = vrot.slane %v1110_v25, 5  ;;  %v1825_v57 = vrot.slane %v1824_v63, 4  ;;  %v1827_v60 = vshll.u32 %v1110_v25, 16  ;;  %7750 = vmatprep.mubr.bf16.mxu1 %v6834_v46 }
  0xc0   : > { %v1838_v19 = vor.u32 %v1837_v55, %v1834_v62  ;;  %v1843_v43 = vrot.slane %v1841_v61, 5  ;;  %v11480_v1 = vshrl.u32 %v8768_v59, 16  ;;  %v825_v42 = vrot.slane %v11481_v48, 4 }
  0xc1   : > { %v6861_v10 = vrot.slane %v8779_v18, 9  ;;  %v2415_v58 = vsel %vm8352_vm2, %v2413_v36, %v2414_v26  ;;  %v1829_v54 = vrot.slane %v1827_v60, 5  ;;  %v2425_v7 = vrot.slane %v8789_v50, 5 }
  0xc2   : > { %v1839_v5 = vrot.slane %v1838_v19, 4  ;;  %v1847_v51 = vrot.slane %v11480_v1, 4  ;;  %v11482_v29 = vshrl.u32 %v8779_v18, 16  ;;  %v6891_v24 = vcombine.low %v9185_v3, %v2415_v58  ;;  %v1026_v3 = vld [vmem:[#allocation2 + $0xb0] sm:$0x1] }
  0xc3   : > { %v1020_v41 = vsel %vm8828_vm13, %v825_v42, %v1019_v2  ;;  %v1830_v38 = vsel %vm8812_vm12, %v1825_v57, %v1829_v54  ;;  %v9230_v36 = vsel %vm8352_vm2, %v6861_v10, %v2425_v7  ;;  %v2427_v4 = vrot.slane %v2425_v7, 4  ;;  %v1113_v33 = vld [vmem:[#allocation2 + $0x98] sm:$0x1]  ;;  %v1033_v1 = vld [vmem:[#allocation2 + $0xbc] sm:$0x1] }
  0xc4   : > { %v1858_v28 = vrot.slane %v11482_v29, 4  ;;  %v1844_v34 = vsel %vm8812_vm12, %v1839_v5, %v1843_v43  ;;  %v1848_v59 = vor.u32 %v1847_v51, %v1843_v43  ;;  %1021 = vst [vmem:[#allocation2 + $0xa4] sm:$0x1] %v1020_v41  ;;  %v11483_v9 = vshll.u32 %v8779_v18, 16  ;;  %7799 = vmatmul.mubr.bf16.gmra.mxu0 %v6891_v24 }
  0xc5   : > { %v6835_v27 = vcombine.low %v1820_v52, %v1830_v38  ;;  %v1865_v44 = vshll.u32 %v8789_v50, 16  ;;  %v11484_v49 = vshrl.u32 %v8789_v50, 16  ;;  %v2421_v15 = vrot.slane %v1113_v33, 5 }
  0xc6   : > { %v1861_v16 = vrot.slane %v11483_v9, 5  ;;  %v1849_v32 = vrot.slane %v1848_v59, 4  ;;  %v1851_v56 = vshll.u32 %v1113_v33, 16  ;;  %v842_v37 = vrot.slane %v8804_v40, 4  ;;  %v9273_v33 = vld [vmem:[#allocation2 + $0xc] sm:$0xf] }
  0xc7   : > { %v1871_v23 = vrot.slane %v11484_v49, 4  ;;  %7751 = vmatmul.mubr.bf16.gmra.mxu1 %v6835_v27  ;;  %v1867_v55 = vrot.slane %v1865_v44, 5  ;;  %v6862_v18 = vrot.slane %v8883_v8, 9  ;;  %v2432_v30 = vrot.slane %v8894_v14, 5 }
  0xc8   : > { %v1862_v62 = vor.u32 %v1861_v16, %v1858_v28  ;;  %v11485_v52 = vshrl.u32 %v8883_v8, 16  ;;  %v2422_v61 = vsel %vm8352_vm2, %v2420_v39, %v2421_v15  ;;  %v1853_v46 = vrot.slane %v1851_v56, 5 }
  0xc9   : > { %v1027_v25 = vsel %vm8828_vm13, %v842_v37, %v1026_v3  ;;  %v6892_v19 = vcombine.low %v2419_v11, %v2422_v61  ;;  %v1872_v26 = vor.u32 %v1871_v23, %v1867_v55  ;;  %v9248_v40 = vsel %vm8352_vm2, %v6862_v18, %v2432_v30 }
  0xca   : > { %v1882_v63 = vrot.slane %v11485_v52, 4  ;;  %v1863_v50 = vrot.slane %v1862_v62, 4  ;;  %1028 = vst [vmem:[#allocation2 + $0xb0] sm:$0x1] %v1027_v25  ;;  %v2434_v57 = vrot.slane %v2432_v30, 4  ;;  %v1854_v60 = vsel %vm8812_vm12, %v1849_v32, %v1853_v46 }
  0xcb   : > { %v11486_v39 = vshll.u32 %v8883_v8, 16  ;;  %v1889_v5 = vshll.u32 %v8894_v14, 16  ;;  %7802 = vmatprep.mubr.bf16.mxu0 %v6892_v19  ;;  %v6836_v11 = vcombine.low %v1844_v34, %v1854_v60  ;;  %v1116_v51 = vld [vmem:[#allocation2 + $0xa4] sm:$0x1]  ;;  %v1873_v48 = vrot.slane %v1872_v26, 4 }
  0xcc   : > { %v1868_v43 = vsel %vm8812_vm12, %v1863_v50, %v1867_v55  ;;  %v11487_v42 = vshrl.u32 %v8894_v14, 16  ;;  %v859_v58 = vrot.slane %v8876_v17, 4  ;;  %v2428_v54 = vrot.slane %v1116_v51, 5  ;;  %v9290_v50 = vld [vmem:[#allocation2 + $0x14] sm:$0x1] }
  0xcd   : > { %v1885_v2 = vrot.slane %v11486_v39, 5  ;;  %v1875_v7 = vshll.u32 %v1116_v51, 16  ;;  %v1891_v28 = vrot.slane %v1889_v5, 5  ;;  %7754 = vmatprep.mubr.bf16.mxu1 %v6836_v11  ;;  %v6863_v24 = vrot.slane %v8938_v31, 9 }
  0xce   : > { %v1895_v10 = vrot.slane %v11487_v42, 4  ;;  %v1034_v8 = vsel %vm8828_vm13, %v859_v58, %v1033_v1  ;;  %v2439_v59 = vrot.slane %v8947_v45, 5  ;;  %v1906_v34 = vrot.slane %v1904_v0, 4  ;;  %v9302_v42 = vld [vmem:[#allocation2 + $0x1c] sm:$0xf] }
  0xcf   : > { %v1886_v29 = vor.u32 %v1885_v2, %v1882_v63  ;;  %v2429_v14 = vsel %vm8352_vm2, %v2427_v4, %v2428_v54  ;;  %v1877_v41 = vrot.slane %v1875_v7, 5  ;;  %1035 = vst [vmem:[#allocation2 + $0xbc] sm:$0x1] %v1034_v8  ;;  %v1909_v27 = vrot.slane %v1907_v35, 5 }
  0xd0   : > { %v1896_v38 = vor.u32 %v1895_v10, %v1891_v28  ;;  %v6893_v9 = vcombine.low %v9230_v36, %v2429_v14  ;;  %v2440_v16 = vsel %vm8352_vm2, %v6863_v24, %v2439_v59  ;;  %v2441_v3 = vrot.slane %v2439_v59, 4  ;;  %v9280_v36 = vld [vmem:[#allocation2 + $0x10] sm:$0xf]  ;;  %v9308_v59 = vld [vmem:[#allocation2 + $0x20] sm:$0x1] }
  0xd1   : > { %v1887_v17 = vrot.slane %v1886_v29, 4  ;;  %v1878_v0 = vsel %vm8812_vm12, %v1873_v48, %v1877_v41  ;;  %v1119_v32 = vld [vmem:[#allocation2 + $0xb0] sm:$0x1]  ;;  %v1913_v49 = vshll.u32 %v8947_v45, 16  ;;  %v1910_v31 = vor.u32 %v1909_v27, %v1906_v34 }
  0xd2   : > { %v1897_v44 = vrot.slane %v1896_v38, 4  ;;  %7803 = vmatmul.mubr.bf16.gmra.mxu0 %v6893_v9  ;;  %v6837_v23 = vcombine.low %v1868_v43, %v1878_v0  ;;  %v2435_v15 = vrot.slane %v1119_v32, 5  ;;  %v1899_v56 = vshll.u32 %v1119_v32, 16  ;;  %v9297_v43 = vld [vmem:[#allocation2 + $0x18] sm:$0xf] }
  0xd3   : > { %v1892_v4 = vsel %vm8812_vm12, %v1887_v17, %v1891_v28  ;;  %v1915_v35 = vrot.slane %v1913_v49, 5  ;;  %v1919_v62 = vrot.slane %v1917_v20, 4  ;;  %v3297_v37 = vshrl.u32 %v9273_v33, 16  ;;  %v9313_v38 = vld [vmem:[#allocation2 + $0x24] sm:$0xf] }
  0xd4   : > { %v3300_v55 = vshll.u32 %v9273_v33, 16  ;;  %7755 = vmatmul.mubr.bf16.gmra.mxu1 %v6837_v23  ;;  %v2436_v18 = vsel %vm8352_vm2, %v2434_v57, %v2435_v15  ;;  %v1901_v30 = vrot.slane %v1899_v56, 5  ;;  %v1911_v52 = vrot.slane %v1910_v31, 4  ;;  %v9318_v0 = vld [vmem:[#allocation2 + $0x28] sm:$0xf] }
  0xd5   : > { %v3306_v63 = vshll.u32 %v9280_v36, 16  ;;  %v6894_v61 = vcombine.low %v9248_v40, %v2436_v18  ;;  %v1920_v46 = vor.u32 %v1919_v62, %v1915_v35  ;;  %v3299_v25 = vrot.slane %v3297_v37, 4  ;;  %v9325_v56 = vld [vmem:[#allocation2 + $0x2c] sm:$0x1] }
  0xd6   : > { %v3302_v45 = vrot.slane %v3300_v55, 5  ;;  %v1902_v20 = vsel %vm8812_vm12, %v1897_v44, %v1901_v30  ;;  %v1122_v19 = vld [vmem:[#allocation2 + $0xbc] sm:$0x1]  ;;  %v1916_v26 = vsel %vm8812_vm12, %v1911_v52, %v1915_v35  ;;  %v3310_v57 = vshrl.u32 %v9280_v36, 16  ;;  %v9330_v30 = vld [vmem:[#allocation2 + $0x30] sm:$0xf] }
  0xd7   : > { %v3308_v60 = vrot.slane %v3306_v63, 5  ;;  %7806 = vmatprep.mubr.bf16.mxu0 %v6894_v61  ;;  %v6838_v39 = vcombine.low %v1892_v4, %v1902_v20  ;;  %v2442_v40 = vrot.slane %v1122_v19, 5  ;;  %v1921_v2 = vrot.slane %v1920_v46, 4 }
  0xd8   : > { %v1923_v5 = vshll.u32 %v1122_v19, 16  ;;  %v3303_v1 = vor.u32 %v3302_v45, %v3299_v25  ;;  %v3312_v11 = vrot.slane %v3310_v57, 4  ;;  %v3316_v51 = vshll.u32 %v9290_v50, 16  ;;  %v9333_v25 = vld [vmem:[#allocation2 + $0x34] sm:$0xf] }
  0xd9   : > { %v6920_v48 = vcombine.low %v9273_v33, %v9280_v36  ;;  %7758 = vmatprep.mubr.bf16.mxu1 %v6838_v39  ;;  %v2443_v10 = vsel %vm8352_vm2, %v2441_v3, %v2442_v40  ;;  %v3321_v54 = vshrl.u32 %v9297_v43, 16  ;;  %v3324_v7 = vshll.u32 %v9297_v43, 16 }
  0xda   : > { %v1925_v58 = vrot.slane %v1923_v5, 5  ;;  %v6895_v29 = vcombine.low %v2440_v16, %v2443_v10  ;;  %v3304_v28 = vrot.slane %v3303_v1, 4  ;;  %v3313_v8 = vor.u32 %v3312_v11, %v3308_v60  ;;  %v9341_v5 = vld [vmem:[#allocation2 + $0x38] sm:$0x1] }
  0xdb   : > { %v3318_v24 = vrot.slane %v3316_v51, 5  ;;  %v3323_v14 = vrot.slane %v3321_v54, 4  ;;  %v3326_v41 = vrot.slane %v3324_v7, 5  ;;  %v3330_v17 = vshll.u32 %v9302_v42, 16  ;;  %v9348_v7 = vld [vmem:[#allocation2 + $0x3c] sm:$0xf] }
  0xdc   : > { %v1926_v34 = vsel %vm8812_vm12, %v1921_v2, %v1925_v58  ;;  %7807 = vmatmul.mubr.bf16.gmra.mxu0 %v6895_v29  ;;  %v3309_v3 = vsel %vm8812_vm12, %v3304_v28, %v3308_v60  ;;  %v3314_v16 = vrot.slane %v3313_v8, 4  ;;  %v3334_v27 = vshrl.u32 %v9302_v42, 16  ;;  %v9350_v29 = vld [vmem:[#allocation2 + $0x40] sm:$0xf] }
  0xdd   : > { %v6839_v9 = vcombine.low %v1916_v26, %v1926_v34  ;;  %v3327_v32 = vor.u32 %v3326_v41, %v3323_v14  ;;  %v3332_v4 = vrot.slane %v3330_v17, 5  ;;  %v3340_v44 = vshll.u32 %v9308_v59, 16  ;;  %v8184_v14 = vld [vmem:[%s11350_s3 + $0x170] sm:$0xff]  }
  0xde   : > { %v6921_v49 = vcombine.low %v9297_v43, %v9302_v42  ;;  %v3319_v23 = vsel %vm8812_vm12, %v3314_v16, %v3318_v24  ;;  %v3336_v15 = vrot.slane %v3334_v27, 4  ;;  %v3345_v31 = vshrl.u32 %v9313_v38, 16  ;;  %v8186_v41 = vld [vmem:[%s11350_s3 + $0x1b0] sm:$0xff]  }
  0xdf   : > { %7759 = vmatmul.mubr.bf16.gmra.mxu1 %v6839_v9  ;;  %v3348_v35 = vshll.u32 %v9313_v38, 16  ;;  %v6960_v62 = vcombine.low %v3309_v3, %v3319_v23  ;;  %v3328_v37 = vrot.slane %v3327_v32, 4  ;;  %v3342_v55 = vrot.slane %v3340_v44, 5 }
  0xe0   : > { %7826 = vmatprep.mubr.bf16.mxu1 %v6920_v48  ;;  %v3354_v18 = vshll.u32 %v9318_v0, 16  ;;  %v3337_v52 = vor.u32 %v3336_v15, %v3332_v4  ;;  %v3347_v63 = vrot.slane %v3345_v31, 4  ;;  %v3358_v46 = vshrl.u32 %v9318_v0, 16 }
  0xe1   : > { %v3350_v61 = vrot.slane %v3348_v35, 5  ;;  %7874 = vmatprep.mubr.bf16.mxu0 %v6960_v62  ;;  %v3333_v45 = vsel %vm8812_vm12, %v3328_v37, %v3332_v4  ;;  %v3364_v19 = vshll.u32 %v9325_v56, 16  ;;  %v6922_v26 = vcombine.low %v9313_v38, %v9318_v0  ;;  %v9364_v4 = vld [vmem:[#allocation2 + $0x44] sm:$0x1]  ;;  %v8188_v62 = vld [vmem:[%s11350_s3 + $0x168] sm:$0xff]  }
  0xe2   : > { %v3356_v20 = vrot.slane %v3354_v18, 5  ;;  %v3338_v60 = vrot.slane %v3337_v52, 4  ;;  %v3360_v39 = vrot.slane %v3358_v46, 4  ;;  %v3369_v40 = vshrl.u32 %v9330_v30, 16  ;;  %v8190_v52 = vld [vmem:[%s11350_s3 + $0x1a8] sm:$0xff]  }
  0xe3   : > { %v3351_v57 = vor.u32 %v3350_v61, %v3347_v63  ;;  %v3366_v2 = vrot.slane %v3364_v19, 5  ;;  %v3372_v1 = vshll.u32 %v9330_v30, 16  ;;  %v3378_v11 = vshll.u32 %v9333_v25, 16 }
  0xe4   : > { %v3382_v51 = vshrl.u32 %v9333_v25, 16  ;;  %v3343_v48 = vsel %vm8812_vm12, %v3338_v60, %v3342_v55  ;;  %v3361_v58 = vor.u32 %v3360_v39, %v3356_v20  ;;  %v3371_v54 = vrot.slane %v3369_v40, 4 }
  0xe5   : > { %v3352_v10 = vrot.slane %v3351_v57, 4  ;;  %v6961_v28 = vcombine.low %v3333_v45, %v3343_v48  ;;  %v3374_v8 = vrot.slane %v3372_v1, 5  ;;  %v3380_v24 = vrot.slane %v3378_v11, 5  ;;  %v9390_v57 = vld [vmem:[#allocation2 + $0x50] sm:$0x1] }
  0xe6   : > { %v3384_v34 = vrot.slane %v3382_v51, 4  ;;  %v3362_v9 = vrot.slane %v3361_v58, 4  ;;  %v3388_v3 = vshll.u32 %v9341_v5, 16  ;;  %v6923_v16 = vcombine.low %v9330_v30, %v9333_v25  ;;  %v9393_v51 = vld [vmem:[#allocation2 + $0x54] sm:$0xf] }
  0xe7   : > { %7827 = vmatmul.mubr.bf16.vlgmr.msra.gmra.mxu1 %v6921_v49  ;;  %v3357_v17 = vsel %vm8812_vm12, %v3352_v10, %v3356_v20  ;;  %7875 = vmatmul.mubr.bf16.vlgmr.msra.gmra.mxu0 %v6961_v28  ;;  %v3375_v27 = vor.u32 %v3374_v8, %v3371_v54  ;;  %v3393_v44 = vshrl.u32 %v9348_v7, 16  ;;  %v3396_v49 = vshll.u32 %v9348_v7, 16  ;;  %v9382_v20 = vld [vmem:[#allocation2 + $0x4c] sm:$0xf]  ;;  %v8192_v28 = vld [vmem:[%s11350_s3 + $0x160] sm:$0xff]  }
  0xe8   : > { %7907 = vmatpush3.bf16.msra.mxu1 %v9172_v47  ;;  %v3385_v32 = vor.u32 %v3384_v34, %v3380_v24  ;;  %7955 = vmatpush3.bf16.msra.mxu0 %v9115_v12  ;;  %v3367_v23 = vsel %vm8812_vm12, %v3362_v9, %v3366_v2  ;;  %v3390_v15 = vrot.slane %v3388_v3, 5  ;;  %v3402_v31 = vshll.u32 %v9350_v29, 16  ;;  %v9373_v47 = vld [vmem:[#allocation2 + $0x48] sm:$0xf]  ;;  %v8194_v8 = vld [vmem:[%s11350_s3 + $0x1a0] sm:$0xff]  }
  0xe9   : > { %7830 = vmatprep.mubr.bf16.mxu1 %v6922_v26  ;;  %v3406_v35 = vshrl.u32 %v9350_v29, 16  ;;  %v6962_v37 = vcombine.low %v3357_v17, %v3367_v23  ;;  %v3376_v55 = vrot.slane %v3375_v27, 4  ;;  %7908 = vmatprep.subr.bf16.mxu1 %v8184_v14  ;;  %v3395_v12 = vrot.slane %v3393_v44, 4  ;;  %v9407_v17 = vld [vmem:[#allocation2 + $0x58] sm:$0xf] }
  0xea   : > { %v3386_v18 = vrot.slane %v3385_v32, 4  ;;  %7956 = vmatprep.subr.bf16.mxu0 %v8186_v41  ;;  %v3398_v63 = vrot.slane %v3396_v49, 5  ;;  %v3404_v61 = vrot.slane %v3402_v31, 5  ;;  %v3412_v45 = vshll.u32 %v9364_v4, 16  ;;  %v9409_v32 = vld [vmem:[#allocation2 + $0x5c] sm:$0x1] }
  0xeb   : > { %v3408_v46 = vrot.slane %v3406_v35, 4  ;;  %7878 = vmatprep.mubr.bf16.mxu0 %v6962_v37  ;;  %v3381_v19 = vsel %vm8812_vm12, %v3376_v55, %v3380_v24  ;;  %v6924_v60 = vcombine.low %v9348_v7, %v9350_v29  ;;  %v3417_v39 = vshrl.u32 %v9373_v47, 16  ;;  %v9417_v31 = vld [vmem:[#allocation2 + $0x60] sm:$0xf] }
  0xec   : > { %v3391_v26 = vsel %vm8812_vm12, %v3386_v18, %v3390_v15  ;;  %7909 = vmatpush3.bf16.msra.mxu1 %v8184_v14  ;;  %7957 = vmatpush3.bf16.msra.mxu0 %v8186_v41  ;;  %v3399_v2 = vor.u32 %v3398_v63, %v3395_v12  ;;  %v3414_v11 = vrot.slane %v3412_v45, 5  ;;  %v3420_v10 = vshll.u32 %v9373_v47, 16  ;;  %v8196_v12 = vld [vmem:[%s11350_s3 + $0x158] sm:$0xff]  }
  0xed   : > { %v6963_v40 = vcombine.low %v3381_v19, %v3391_v26  ;;  %v3409_v1 = vor.u32 %v3408_v46, %v3404_v61  ;;  %7910 = vmatprep.subr.bf16.mxu1 %v8188_v62  ;;  %v3419_v48 = vrot.slane %v3417_v39, 4  ;;  %v3426_v58 = vshll.u32 %v9382_v20, 16  ;;  %7958 = vmatprep.subr.bf16.mxu0 %v8190_v52  ;;  %v8198_v63 = vld [vmem:[%s11350_s3 + $0x198] sm:$0xff]  }
  0xee   : > { %v3430_v54 = vshrl.u32 %v9382_v20, 16  ;;  %v3400_v24 = vrot.slane %v3399_v2, 4  ;;  %v3436_v14 = vshll.u32 %v9390_v57, 16  ;;  %v6925_v41 = vcombine.low %v9373_v47, %v9382_v20 }
  0xef   : > { %7831 = vmatmul.mubr.bf16.gmra.mxu1 %v6923_v16  ;;  %v3410_v34 = vrot.slane %v3409_v1, 4  ;;  %7879 = vmatmul.mubr.bf16.gmra.mxu0 %v6963_v40  ;;  %v3422_v9 = vrot.slane %v3420_v10, 5  ;;  %v3428_v3 = vrot.slane %v3426_v58, 5  ;;  %v3441_v44 = vshrl.u32 %v9393_v51, 16 }
  0xf0   : > { %7834 = vmatprep.mubr.bf16.mxu1 %v6924_v60  ;;  %v3432_v27 = vrot.slane %v3430_v54, 4  ;;  %v3405_v16 = vsel %vm8812_vm12, %v3400_v24, %v3404_v61  ;;  %v3438_v23 = vrot.slane %v3436_v14, 5  ;;  %7911 = vmatpush3.bf16.msra.mxu1 %v8188_v62  ;;  %v3444_v15 = vshll.u32 %v9393_v51, 16  ;;  %v9430_v60 = vld [vmem:[#allocation2 + $0x64] sm:$0xf]  ;;  %v8200_v14 = vld [vmem:[%s11350_s3 + $0x150] sm:$0xff]  }
  0xf1   : > { %v3415_v49 = vsel %vm8812_vm12, %v3410_v34, %v3414_v11  ;;  %7959 = vmatpush3.bf16.msra.mxu0 %v8190_v52  ;;  %v3423_v37 = vor.u32 %v3422_v9, %v3419_v48  ;;  %v3443_v18 = vrot.slane %v3441_v44, 4  ;;  %7912 = vmatprep.subr.bf16.mxu1 %v8192_v28  ;;  %v3450_v52 = vshll.u32 %v9407_v17, 16  ;;  %v9433_v48 = vld [vmem:[#allocation2 + $0x68] sm:$0x1]  ;;  %v9440_v34 = vld [vmem:[#allocation2 + $0x6c] sm:$0xf] }
  0xf2   : > { %v6964_v35 = vcombine.low %v3405_v16, %v3415_v49  ;;  %v3433_v55 = vor.u32 %v3432_v27, %v3428_v3  ;;  %7960 = vmatprep.subr.bf16.mxu0 %v8194_v8  ;;  %v3446_v62 = vrot.slane %v3444_v15, 5  ;;  %v3454_v61 = vshrl.u32 %v9407_v17, 16  ;;  %v8202_v27 = vld [vmem:[%s11350_s3 + $0x190] sm:$0xff]  }
  0xf3   : > { %v3460_v46 = vshll.u32 %v9409_v32, 16  ;;  %v3424_v45 = vrot.slane %v3423_v37, 4  ;;  %v6926_v26 = vcombine.low %v9393_v51, %v9407_v17  ;;  %v3465_v39 = vshrl.u32 %v9417_v31, 16  ;;  %v9453_v15 = vld [vmem:[#allocation2 + $0x70] sm:$0xf] }
  0xf4   : > { %7882 = vmatprep.mubr.bf16.mxu0 %v6964_v35  ;;  %v3434_v19 = vrot.slane %v3433_v55, 4  ;;  %v3447_v40 = vor.u32 %v3446_v62, %v3443_v18  ;;  %v3452_v2 = vrot.slane %v3450_v52, 5  ;;  %v3456_v1 = vrot.slane %v3454_v61, 4  ;;  %7913 = vmatpush3.bf16.msra.mxu1 %v8192_v28  ;;  %v9458_v61 = vld [vmem:[#allocation2 + $0x74] sm:$0x1] }
  0xf5   : > { %v3462_v11 = vrot.slane %v3460_v46, 5  ;;  %7961 = vmatpush3.bf16.msra.mxu0 %v8194_v8  ;;  %v3429_v10 = vsel %vm8812_vm12, %v3424_v45, %v3428_v3  ;;  %v3467_v54 = vrot.slane %v3465_v39, 4  ;;  %v3468_v24 = vshll.u32 %v9417_v31, 16  ;;  %7914 = vmatprep.subr.bf16.mxu1 %v8196_v12 }
  0xf6   : > { %v3439_v58 = vsel %vm8812_vm12, %v3434_v19, %v3438_v23  ;;  %7962 = vmatprep.subr.bf16.mxu0 %v8198_v63  ;;  %v3448_v28 = vrot.slane %v3447_v40, 4  ;;  %v3457_v8 = vor.u32 %v3456_v1, %v3452_v2  ;;  %v3474_v3 = vshll.u32 %v9430_v60, 16  ;;  %v9465_v40 = vld [vmem:[#allocation2 + $0x78] sm:$0xf] }
  0xf7   : > { %v6965_v9 = vcombine.low %v3429_v10, %v3439_v58  ;;  %7835 = vmatmul.mubr.bf16.gmra.mxu1 %v6925_v41  ;;  %v3470_v44 = vrot.slane %v3468_v24, 5  ;;  %v3478_v16 = vshrl.u32 %v9430_v60, 16  ;;  %v3484_v49 = vshll.u32 %v9433_v48, 16  ;;  %v9470_v58 = vld [vmem:[#allocation2 + $0x7c] sm:$0xf] }
  0xf8   : > { %7838 = vmatprep.mubr.bf16.mxu1 %v6926_v26  ;;  %v6927_v23 = vcombine.low %v9417_v31, %v9430_v60  ;;  %v3453_v41 = vsel %vm8812_vm12, %v3448_v28, %v3452_v2  ;;  %v3458_v35 = vrot.slane %v3457_v8, 4  ;;  %v3476_v37 = vrot.slane %v3474_v3, 5  ;;  %7915 = vmatpush3.bf16.msra.mxu1 %v8196_v12  ;;  %v8204_v12 = vld [vmem:[%s11350_s3 + $0x148] sm:$0xff]  }
  0xf9   : > { %7883 = vmatmul.mubr.bf16.gmra.mxu0 %v6965_v9  ;;  %v3489_v55 = vshrl.u32 %v9440_v34, 16  ;;  %v3471_v18 = vor.u32 %v3470_v44, %v3467_v54  ;;  %v3480_v62 = vrot.slane %v3478_v16, 4  ;;  %v3486_v52 = vrot.slane %v3484_v49, 5  ;;  %7916 = vmatprep.subr.bf16.mxu1 %v8200_v14  ;;  %v8208_v49 = vld [vmem:[%s11350_s3 + $0x140] sm:$0xff]  }
  0xfa   : > { %v3492_v46 = vshll.u32 %v9440_v34, 16  ;;  %7963 = vmatpush3.bf16.msra.mxu0 %v8198_v63  ;;  %v3463_v45 = vsel %vm8812_vm12, %v3458_v35, %v3462_v11  ;;  %v3498_v26 = vshll.u32 %v9453_v15, 16  ;;  %v3502_v39 = vshrl.u32 %v9453_v15, 16  ;;  %v8206_v11 = vld [vmem:[%s11350_s3 + $0x188] sm:$0xff]  }
  0xfb   : > { %v3491_v19 = vrot.slane %v3489_v55, 4  ;;  %7964 = vmatprep.subr.bf16.mxu0 %v8202_v27  ;;  %v6966_v2 = vcombine.low %v3453_v41, %v3463_v45  ;;  %v3472_v1 = vrot.slane %v3471_v18, 4  ;;  %v3481_v10 = vor.u32 %v3480_v62, %v3476_v37  ;;  %v9484_v55 = vld [vmem:[#allocation2 + $0x80] sm:$0x1]  ;;  %v9494_v45 = vld [vmem:[#allocation2 + $0x84] sm:$0xf] }
  0xfc   : > { %v3494_v63 = vrot.slane %v3492_v46, 5  ;;  %v3500_v54 = vrot.slane %v3498_v26, 5  ;;  %v3504_v24 = vrot.slane %v3502_v39, 4  ;;  %v3508_v9 = vshll.u32 %v9458_v61, 16  ;;  %7917 = vmatpush3.bf16.msra.mxu1 %v8200_v14  ;;  %11488 = vst [vmem:[#allocation6_spill] sm:$0xff] %v9494_v45 }
  0xfd   : > { %v6928_v28 = vcombine.low %v9440_v34, %v9453_v15  ;;  %7886 = vmatprep.mubr.bf16.mxu0 %v6966_v2  ;;  %v3477_v8 = vsel %vm8812_vm12, %v3472_v1, %v3476_v37  ;;  %v3482_v3 = vrot.slane %v3481_v10, 4  ;;  %v3513_v16 = vshrl.u32 %v9465_v40, 16  ;;  %7918 = vmatprep.subr.bf16.mxu1 %v8204_v12  ;;  %v8210_v37 = vld [vmem:[%s11350_s3 + $0x180] sm:$0xff]   ;;  %v9496_v1 = vld [vmem:[#allocation2 + $0x88] sm:$0xf] }
  0xfe   : > { %v3495_v44 = vor.u32 %v3494_v63, %v3491_v19  ;;  %7965 = vmatpush3.bf16.msra.mxu0 %v8202_v27  ;;  %v3505_v41 = vor.u32 %v3504_v24, %v3500_v54  ;;  %v3510_v35 = vrot.slane %v3508_v9, 5  ;;  %v3516_v14 = vshll.u32 %v9465_v40, 16  ;;  %11489 = vst [vmem:[#allocation7_spill] sm:$0xff] %v9496_v1 }
  0xff   : > { %7839 = vmatmul.mubr.bf16.gmra.mxu1 %v6927_v23  ;;  %v3522_v18 = vshll.u32 %v9470_v58, 16  ;;  %v3487_v27 = vsel %vm8812_vm12, %v3482_v3, %v3486_v52  ;;  %v3515_v46 = vrot.slane %v3513_v16, 4  ;;  %v3526_v23 = vshrl.u32 %v9470_v58, 16  ;;  %7966 = vmatprep.subr.bf16.mxu0 %v8206_v11 }
 0x100   : > { %v3496_v62 = vrot.slane %v3495_v44, 4  ;;  %7842 = vmatprep.mubr.bf16.mxu1 %v6928_v28  ;;  %v6967_v19 = vcombine.low %v3477_v8, %v3487_v27  ;;  %v3506_v26 = vrot.slane %v3505_v41, 4  ;;  %v3518_v39 = vrot.slane %v3516_v14, 5  ;;  %7919 = vmatpush3.bf16.msra.mxu1 %v8204_v12  ;;  %v9505_v8 = vld [vmem:[#allocation2 + $0x8c] sm:$0x1] }
 0x101   : > { %v3524_v2 = vrot.slane %v3522_v18, 5  ;;  %v3528_v63 = vrot.slane %v3526_v23, 4  ;;  %v3532_v52 = vshll.u32 %v9484_v55, 16  ;;  %v6929_v24 = vcombine.low %v9465_v40, %v9470_v58  ;;  %7920 = vmatprep.subr.bf16.mxu1 %v8208_v49  ;;  %11490 = vst [vmem:[#allocation9_spill] sm:$0xff] %v9505_v8  ;;  %v9515_v14 = vld [vmem:[#allocation2 + $0x90] sm:$0xf] }
 0x102   : > { %v3501_v10 = vsel %vm8812_vm12, %v3496_v62, %v3500_v54  ;;  %7967 = vmatpush3.bf16.msra.mxu0 %v8206_v11  ;;  %v3511_v9 = vsel %vm8812_vm12, %v3506_v26, %v3510_v35  ;;  %v3519_v28 = vor.u32 %v3518_v39, %v3515_v46  ;;  %v3537_v12 = vshrl.u32 %v9494_v45, 16  ;;  %v9512_v54 = vld [vmem:[%s11350_s3 + $0x1f8] sm:$0xff]   ;;  %11491 = vst [vmem:[#allocation4_spill] sm:$0xff] %v9515_v14  ;;  %v9523_v23 = vld [vmem:[#allocation2 + $0x94] sm:$0xf] }
 0x103   : > { %7887 = vmatmul.mubr.bf16.gmra.mxu0 %v6967_v19  ;;  %v3540_v3 = vshll.u32 %v9494_v45, 16  ;;  %7968 = vmatprep.subr.bf16.mxu0 %v8210_v37  ;;  %v6968_v44 = vcombine.low %v3501_v10, %v3511_v9  ;;  %v3529_v11 = vor.u32 %v3528_v63, %v3524_v2  ;;  %v3534_v16 = vrot.slane %v3532_v52, 5  ;;  %v9520_v35 = vld [vmem:[%s11350_s3 + $0x238] sm:$0xff]   ;;  %11492 = vst [vmem:[#allocation5_spill] sm:$0xff] %v9523_v23 }
 0x104   : > { %v3546_v41 = vshll.u32 %v9496_v1, 16  ;;  %v3520_v18 = vrot.slane %v3519_v28, 4  ;;  %v3539_v27 = vrot.slane %v3537_v12, 4  ;;  %v3550_v46 = vshrl.u32 %v9496_v1, 16  ;;  %7921 = vmatpush3.bf16.msra.mxu1 %v8208_v49  ;;  %v9530_v28 = vld [vmem:[#allocation2 + $0x98] sm:$0x1] }
 0x105   : > { %v3542_v62 = vrot.slane %v3540_v3, 5  ;;  %7890 = vmatprep.mubr.bf16.mxu0 %v6968_v44  ;;  %v3530_v19 = vrot.slane %v3529_v11, 4  ;;  %v3556_v39 = vshll.u32 %v9505_v8, 16  ;;  %v6930_v10 = vcombine.low %v9494_v45, %v9496_v1  ;;  %11493 = vst [vmem:[#allocation8_spill] sm:$0xff] %v9530_v28  ;;  %8002 = vmatprep.subr.bf16.mxu1 %v9512_v54  ;;  %v9538_v11 = vld [vmem:[#allocation2 + $0x9c] sm:$0xf] }
 0x106   : > { %v3548_v26 = vrot.slane %v3546_v41, 5  ;;  %7969 = vmatpush3.bf16.msra.mxu0 %v8210_v37  ;;  %v3525_v63 = vsel %vm8812_vm12, %v3520_v18, %v3524_v2  ;;  %v3552_v9 = vrot.slane %v3550_v46, 4  ;;  %v3561_v12 = vshrl.u32 %v9515_v14, 16 }
 0x107   : > { %7843 = vmatmul.mubr.bf16.gmra.mxu1 %v6929_v24  ;;  %v3543_v52 = vor.u32 %v3542_v62, %v3539_v27  ;;  %v3535_v49 = vsel %vm8812_vm12, %v3530_v19, %v3534_v16  ;;  %v3558_v3 = vrot.slane %v3556_v39, 5  ;;  %v3564_v44 = vshll.u32 %v9515_v14, 16  ;;  %8050 = vmatprep.subr.bf16.mxu0 %v9520_v35  ;;  %v9543_v19 = vld [vmem:[#allocation2 + $0xa0] sm:$0xf] }
 0x108   : > { %7846 = vmatprep.mubr.bf16.mxu1 %v6930_v10  ;;  %v3570_v37 = vshll.u32 %v9523_v23, 16  ;;  %v6969_v2 = vcombine.low %v3525_v63, %v3535_v49  ;;  %v3553_v41 = vor.u32 %v3552_v9, %v3548_v26  ;;  %v3563_v18 = vrot.slane %v3561_v12, 4  ;;  %11494 = vst [vmem:[#allocation10_spill] sm:$0xff] %v9543_v19  ;;  %v9550_v49 = vld [vmem:[#allocation2 + $0xa4] sm:$0x1] }
 0x109   : > { %v3544_v24 = vrot.slane %v3543_v52, 4  ;;  %v3566_v27 = vrot.slane %v3564_v44, 5  ;;  %v3574_v46 = vshrl.u32 %v9523_v23, 16  ;;  %v3580_v16 = vshll.u32 %v9530_v28, 16  ;;  %11495 = vst [vmem:[#allocation12_spill] sm:$0xff] %v9550_v49 }
 0x10a   : > { %v3572_v62 = vrot.slane %v3570_v37, 5  ;;  %v3554_v10 = vrot.slane %v3553_v41, 4  ;;  %v6931_v8 = vcombine.low %v9515_v14, %v9523_v23  ;;  %v3585_v63 = vshrl.u32 %v9538_v11, 16 }
 0x10b   : > { %7891 = vmatmul.mubr.bf16.gmra.mxu0 %v6969_v2  ;;  %v3549_v39 = vsel %vm8812_vm12, %v3544_v24, %v3548_v26  ;;  %v3567_v52 = vor.u32 %v3566_v27, %v3563_v18  ;;  %v3576_v9 = vrot.slane %v3574_v46, 4  ;;  %v3582_v12 = vrot.slane %v3580_v16, 5  ;;  %v9557_v24 = vld [vmem:[#allocation2 + $0xa8] sm:$0xf]  ;;  %v9559_v27 = vld [vmem:[#allocation2 + $0xac] sm:$0xf] }
 0x10c   : > { %v3588_v44 = vshll.u32 %v9538_v11, 16  ;;  %v3559_v37 = vsel %vm8812_vm12, %v3554_v10, %v3558_v3  ;;  %v3587_v2 = vrot.slane %v3585_v63, 4  ;;  %v3594_v28 = vshll.u32 %v9543_v19, 16  ;;  %11496 = vst [vmem:[#allocation13_spill] sm:$0xff] %v9557_v24  ;;  %11497 = vst [vmem:[#allocation11_spill] sm:$0xff] %v9559_v27 }
 0x10d   : > { %v3598_v26 = vshrl.u32 %v9543_v19, 16  ;;  %v6970_v41 = vcombine.low %v3549_v39, %v3559_v37  ;;  %v3568_v23 = vrot.slane %v3567_v52, 4  ;;  %v3577_v14 = vor.u32 %v3576_v9, %v3572_v62 }
 0x10e   : > { %v3590_v18 = vrot.slane %v3588_v44, 5  ;;  %v3596_v46 = vrot.slane %v3594_v28, 5  ;;  %v3604_v1 = vshll.u32 %v9550_v49, 16  ;;  %v6932_v3 = vcombine.low %v9538_v11, %v9543_v19  ;;  %v9567_v44 = vld [vmem:[#allocation2 + $0xb0] sm:$0x1] }
 0x10f   : > { %7847 = vmatmul.mubr.bf16.gmra.mxu1 %v6931_v8  ;;  %v3600_v16 = vrot.slane %v3598_v26, 4  ;;  %7894 = vmatprep.mubr.bf16.mxu0 %v6970_v41  ;;  %v3573_v10 = vsel %vm8812_vm12, %v3568_v23, %v3572_v62  ;;  %v3578_v63 = vrot.slane %v3577_v14, 4  ;;  %v3609_v39 = vshrl.u32 %v9557_v24, 16  ;;  %11498 = vst [vmem:[#allocation14_spill] sm:$0xff] %v9567_v44  ;;  %v9574_v14 = vld [vmem:[#allocation2 + $0xb4] sm:$0xf] }
 0x110   : > { %v3591_v45 = vor.u32 %v3590_v18, %v3587_v2  ;;  %v3606_v9 = vrot.slane %v3604_v1, 5  ;;  %7850 = vmatprep.mubr.bf16.mxu1 %v6932_v3  ;;  %v3612_v8 = vshll.u32 %v9557_v24, 16  ;;  %v3618_v28 = vshll.u32 %v9559_v27, 16  ;;  %11499 = vst [vmem:[#allocation15_spill] sm:$0xff] %v9574_v14 }
 0x111   : > { %v3601_v52 = vor.u32 %v3600_v16, %v3596_v46  ;;  %v3583_v37 = vsel %vm8812_vm12, %v3578_v63, %v3582_v12  ;;  %v3611_v41 = vrot.slane %v3609_v39, 4  ;;  %v3622_v23 = vshrl.u32 %v9559_v27, 16  ;;  %v9576_v16 = vld [vmem:[#allocation2 + $0xb8] sm:$0xf]  ;;  %v9585_v63 = vld [vmem:[#allocation2 + $0xbc] sm:$0x1] }
 0x112   : > { %v3592_v26 = vrot.slane %v3591_v45, 4  ;;  %v6971_v62 = vcombine.low %v3573_v10, %v3583_v37  ;;  %v3614_v18 = vrot.slane %v3612_v8, 5  ;;  %v3620_v1 = vrot.slane %v3618_v28, 5  ;;  %11500 = vst [vmem:[#allocation16_spill] sm:$0xff] %v9576_v16  ;;  %11501 = vst [vmem:[#allocation17_spill] sm:$0xff] %v9585_v63 }
 0x113   : > { %v3602_v2 = vrot.slane %v3601_v52, 4  ;;  %v3624_v49 = vrot.slane %v3622_v23, 4  ;;  %v3628_v19 = vshll.u32 %v9567_v44, 16  ;;  %v6933_v45 = vcombine.low %v9557_v24, %v9559_v27  ;;  %v9591_v23 = vpop.f32.mrf.mxu0 }
 0x114   : > { %v3597_v3 = vsel %vm8812_vm12, %v3592_v26, %v3596_v46  ;;  %7895 = vmatmul.mubr.bf16.gmra.mxu0 %v6971_v62  ;;  %v3615_v10 = vor.u32 %v3614_v18, %v3611_v41  ;;  %v3633_v39 = vshrl.u32 %v9574_v14, 16  ;;  %v3636_v52 = vshll.u32 %v9574_v14, 16  ;;  %v7434_v26 = vld [vmem:[%s8334_s11 + $0x78] sm:$0xff]   ;;  %11502 = vst [vmem:[#allocation18_spill] sm:$0xff] %v9591_v23 }
 0x115   : > { %v3607_v12 = vsel %vm8812_vm12, %v3602_v2, %v3606_v9  ;;  %v3625_v28 = vor.u32 %v3624_v49, %v3620_v1  ;;  %v3630_v46 = vrot.slane %v3628_v19, 5  ;;  %v3642_v37 = vshll.u32 %v9576_v16, 16 }
 0x116   : > { %v6972_v8 = vcombine.low %v3597_v3, %v3607_v12  ;;  %v3616_v44 = vrot.slane %v3615_v10, 4  ;;  %v3635_v62 = vrot.slane %v3633_v39, 4  ;;  %v3638_v27 = vrot.slane %v3636_v52, 5  ;;  %v9599_v10 = vld [vmem:[#allocation2 + $0x18] sm:$0xf] }
 0x117   : > { %7851 = vmatmul.mubr.bf16.gmra.mxu1 %v6933_v45  ;;  %v3646_v9 = vshrl.u32 %v9576_v16, 16  ;;  %v3626_v41 = vrot.slane %v3625_v28, 4  ;;  %v3644_v2 = vrot.slane %v3642_v37, 5  ;;  %v3652_v18 = vshll.u32 %v9585_v63, 16  ;;  %v9601_v45 = vld [vmem:[#allocation2 + $0x1c] sm:$0xf]  ;;  %v9605_v28 = vpop.f32.mrf.mxu0 }
 0x118   : > { %7898 = vmatprep.mubr.bf16.mxu0 %v6972_v8  ;;  %v6934_v49 = vcombine.low %v9574_v14, %v9576_v16  ;;  %v3621_v19 = vsel %vm8812_vm12, %v3616_v44, %v3620_v1  ;;  %v3639_v3 = vor.u32 %v3638_v27, %v3635_v62  ;;  %v7338_v23 = vunpack.c.l.bf16 %v7434_v26  ;;  %11503 = vst [vmem:[#allocation19_spill] sm:$0xff] %v9605_v28  ;;  %v8251_v27 = vld [vmem:[%s11348_s1] ss:$0 sm:$0xff] }
 0x119   : > { %v3648_v12 = vrot.slane %v3646_v9, 4  ;;  %v3631_v39 = vsel %vm8812_vm12, %v3626_v41, %v3630_v46  ;;  %v3654_v52 = vrot.slane %v3652_v18, 5  ;;  %v7339_v8 = vunpack.c.h.bf16 %v7434_v26  ;;  %v8252_v26 = vld [vmem:[%s11349_s2] ss:$0 sm:$0xff] }
 0x11a   : > { %7854 = vmatprep.mubr.bf16.mxu1 %v6934_v49  ;;  %v6973_v37 = vcombine.low %v3621_v19, %v3631_v39  ;;  %v3640_v63 = vrot.slane %v3639_v3, 4  ;;  %v379_v44 = vmul.f32 %v8251_v27, %v7338_v23  ;;  %v9618_v49 = vld [vmem:[#allocation2 + $0x24] sm:$0xf]  ;;  %v6984_v23 = vrot.slane %v9273_v33, 9  ;;  %v9623_v39 = vld [vmem:[#allocation2 + $0x28] sm:$0xf] }
 0x11b   : > { %v3649_v16 = vor.u32 %v3648_v12, %v3644_v2  ;;  %v380_v1 = vmul.f32 %v8251_v27, %v7339_v8  ;;  %v4084_v3 = vrot.slane %v9280_v36, 5  ;;  %v4087_v12 = vrot.slane %v9290_v50, 5 }
 0x11c   : > { %7899 = vmatmul.mubr.bf16.gmra.mxu0 %v6973_v37  ;;  %v3645_v46 = vsel %vm8812_vm12, %v3640_v63, %v3644_v2  ;;  %v418_v41 = vadd.f32 %v8252_v26, %v379_v44  ;;  %v9625_v63 = vpop.f32.mrf.mxu0  ;;  %v5072_v8 = vshrl.u32 %v9618_v49, 16  ;;  %v5075_v37 = vshll.u32 %v9618_v49, 16 }
 0x11d   : > { %v3650_v9 = vrot.slane %v3649_v16, 4  ;;  %v419_v19 = vadd.f32 %v8252_v26, %v380_v1  ;;  %11504 = vst [vmem:[#allocation20_spill] sm:$0xff] %v9625_v63  ;;  %v4086_v1 = vrot.slane %v4084_v3, 4  ;;  %v5081_v18 = vshll.u32 %v9623_v39, 16  ;;  %v1036_v63 = vld [vmem:[#allocation2 + $0xc0] sm:$0xf] }
 0x11e   : > { %v450_v2 = vmax.f32 %v418_v41, 0.0  ;;  %v9640_v41 = vrot.slane %v5072_v8, 4  ;;  %v9649_v33 = vrot.slane %v5075_v37, 5  ;;  %v9657_v8 = vpop.f32.mrf.mxu1  ;;  %v4101_v53 = vrot.slane %v9325_v56, 5 }
 0x11f   : > { %v3655_v16 = vsel %vm8812_vm12, %v3650_v9, %v3654_v52  ;;  %v451_v44 = vmax.f32 %v419_v19, 0.0  ;;  %v9638_v9 = vsel %vm8352_vm2, %v6984_v23, %v4084_v3  ;;  %v9643_v19 = vpop.f32.mrf.mxu0  ;;  %v9647_v50 = vsel %vm8352_vm2, %v4086_v1, %v4087_v12  ;;  %v9655_v3 = vld [vmem:[#allocation2 + $0x30] sm:$0xf]  ;;  %11510 = vst [vmem:[#allocation26_spill] sm:$0xff] %v9657_v8  ;;  %v9662_v1 = vld [vmem:[#allocation2 + $0x34] sm:$0xf] }
 0x120   : > { %v6974_v27 = vcombine.low %v3645_v46, %v3655_v16  ;;  %v7242_v36 = vpack.c.bf16 %v450_v2, %v450_v2  ;;  %11505 = vst [vmem:[#allocation21_spill] sm:$0xff] %v9640_v41  ;;  %v5085_v46 = vshrl.u32 %v9623_v39, 16  ;;  %11506 = vst [vmem:[#allocation22_spill] sm:$0xff] %v9643_v19  ;;  %v9651_v26 = vrot.slane %v5081_v18, 5  ;;  %v1040_v19 = vld [vmem:[#allocation2 + $0xc8] sm:$0x1] }
 0x121   : > { %v7243_v52 = vpack.c.bf16 %v451_v44, %v451_v44  ;;  %11507 = vst [vmem:[#allocation23_spill] sm:$0xff] %v9649_v33  ;;  %v4091_v12 = vrot.slane %v9302_v42, 5  ;;  %v9668_v28 = vpop.f32.mrf.mxu0  ;;  %v9732_v18 = vld [vmem:[#allocation2 + $0x4c] sm:$0xf] }
 0x122   : > { %7902 = vmatprep.mubr.bf16.mxu0 %v6974_v27  ;;  %v861_v16 = vshrl.u32 %v7242_v36, 16  ;;  %v864_v2 = vshll.u32 %v7242_v36, 16  ;;  %11508 = vst [vmem:[#allocation24_spill] sm:$0xff] %v9651_v26  ;;  %v9653_v23 = vrot.slane %v5085_v46, 4  ;;  %v6985_v36 = vrot.slane %v9297_v43, 9  ;;  %11511 = vst [vmem:[#allocation27_spill] sm:$0xff] %v9668_v28 }
 0x123   : > { %v869_v27 = vshrl.u32 %v7243_v52, 16  ;;  %v872_v44 = vshll.u32 %v7243_v52, 16  ;;  %v4094_v46 = vrot.slane %v9308_v59, 5  ;;  %v4093_v24 = vrot.slane %v4091_v12, 4  ;;  %v9676_v52 = vpop.f32.mrf.mxu1 }
 0x124   : > { %11509 = vst [vmem:[#allocation25_spill] sm:$0xff] %v9653_v23  ;;  %v863_v62 = vrot.slane %v861_v16, 7  ;;  %11512 = vst [vmem:[#allocation28_spill] sm:$0xff] %v9676_v52  ;;  %v9686_v43 = vsel %vm8352_vm2, %v6985_v36, %v4091_v12  ;;  %v9702_v36 = vpop.f32.mrf.mxu0  ;;  %v9749_v52 = vld [vmem:[#allocation2 + $0x58] sm:$0xf]  ;;  %v11527_v28 = vcombine.low %v9638_v9, %v9647_v50 }
 0x125   : > { %v871_v37 = vrot.slane %v869_v27, 7  ;;  %v9695_v6 = vsel %vm8352_vm2, %v4093_v24, %v4094_v46  ;;  %11515 = vst [vmem:[#allocation30_spill] sm:$0xff] %v9702_v36  ;;  %v9711_v12 = vpop.f32.mrf.mxu1  ;;  %v6987_v46 = vrot.slane %v9330_v30, 9  ;;  %v5177_v33 = vshll.u32 %v9749_v52, 16 }
 0x126   : > { %v866_v16 = vor.u32 %v864_v2, %v863_v62  ;;  %v867_v8 = vrot.slane %v863_v62, 4  ;;  %v11513_v62 = vrot.slane %v9623_v39, 5  ;;  %11516 = vst [vmem:[#allocation31_spill] sm:$0xff] %v9711_v12  ;;  %v4105_v12 = vrot.slane %v9333_v25, 5 }
 0x127   : > { %v874_v27 = vor.u32 %v872_v44, %v871_v37  ;;  %v876_v14 = vrot.slane %v871_v37, 4  ;;  %v6986_v44 = vrot.slane %v9313_v38, 9  ;;  %v6988_v25 = vrot.slane %v9348_v7, 9 }
 0x128   : > { %v1037_v59 = vsel %vm8403_vm7, %v866_v16, %v1036_v63  ;;  %v9682_v2 = vrot.slane %v11513_v62, 4  ;;  %v4098_v63 = vrot.slane %v9318_v0, 5  ;;  %v9698_v16 = vld [vmem:[#allocation2 + $0x3c] sm:$0xf]  ;;  %v9700_v62 = vld [vmem:[#allocation2 + $0x40] sm:$0xf]  ;;  %v9777_v26 = vsel %vm8352_vm2, %v6987_v46, %v4105_v12 }
 0x129   : > { %v875_v37 = vsel %vm8412_vm8, %v867_v8, %v874_v27  ;;  %1038 = vst [vmem:[#allocation2 + $0xc0] sm:$0xf] %v1037_v59  ;;  %v1041_v42 = vsel %vm8828_vm13, %v876_v14, %v1040_v19  ;;  %v5120_v14 = vshrl.u32 %v9698_v16, 16  ;;  %v5123_v0 = vshll.u32 %v9698_v16, 16  ;;  %v9722_v59 = vld [vmem:[#allocation2 + $0x48] sm:$0xf] }
 0x12a   : > { %11514 = vst [vmem:[#allocation29_spill] sm:$0xff] %v9682_v2  ;;  %1039 = vst [vmem:[#allocation2 + $0xc4] sm:$0xf] %v875_v37  ;;  %v4100_v19 = vrot.slane %v4098_v63, 4  ;;  %v5129_v8 = vshll.u32 %v9700_v62, 16  ;;  %v5133_v27 = vshrl.u32 %v9700_v62, 16 }
 0x12b   : > { %1042 = vst [vmem:[#allocation2 + $0xc8] sm:$0x1] %v1041_v42  ;;  %v9717_v42 = vsel %vm8352_vm2, %v6986_v44, %v4098_v63  ;;  %v9728_v24 = vrot.slane %v5120_v14, 4  ;;  %v9734_v44 = vpop.f32.mrf.mxu0  ;;  %v9736_v63 = vrot.slane %v5123_v0, 5  ;;  %v9751_v0 = vpop.f32.mrf.mxu1 }
 0x12c   : > { %v9726_v37 = vsel %vm8352_vm2, %v4100_v19, %v4101_v53  ;;  %11518 = vst [vmem:[#allocation33_spill] sm:$0xff] %v9734_v44  ;;  %v9738_v56 = vrot.slane %v5129_v8, 5  ;;  %v9742_v53 = vld [vmem:[#allocation2 + $0x54] sm:$0xf]  ;;  %v9744_v14 = vrot.slane %v5133_v27, 4  ;;  %v4108_v19 = vrot.slane %v9341_v5, 5 }
 0x12d   : > { %11517 = vst [vmem:[#allocation32_spill] sm:$0xff] %v9728_v24  ;;  %11519 = vst [vmem:[#allocation34_spill] sm:$0xff] %v9736_v63  ;;  %v4107_v44 = vrot.slane %v4105_v12, 4  ;;  %v4112_v27 = vrot.slane %v9350_v29, 5  ;;  %v9793_v12 = vld [vmem:[#allocation2 + $0x64] sm:$0xf] }
 0x12e   : > { %11520 = vst [vmem:[#allocation35_spill] sm:$0xff] %v9738_v56  ;;  %11521 = vst [vmem:[#allocation36_spill] sm:$0xff] %v9744_v14  ;;  %v9768_v14 = vpop.f32.mrf.mxu0 }
 0x12f   : > { %11522 = vst [vmem:[#allocation37_spill] sm:$0xff] %v9751_v0  ;;  %11523 = vst [vmem:[#allocation38_spill] sm:$0xff] %v9768_v14  ;;  %v9781_v0 = vpop.f32.mrf.mxu1  ;;  %v9785_v41 = vsel %vm8352_vm2, %v4107_v44, %v4108_v19 }
 0x130   : > { %v9753_v8 = vld [vmem:[#allocation2 + $0xc0] sm:$0xf]  ;;  %11524 = vst [vmem:[#allocation39_spill] sm:$0xff] %v9781_v0  ;;  %11526 = vst [vmem:[#allocation41_spill] sm:$0xff] %v9793_v12  ;;  %v9800_v44 = vpop.f32.mrf.mxu0 }
 0x131   : > { %v9758_v36 = vld [vmem:[#allocation2 + $0xc4] sm:$0xf]  ;;  %v3657_v38 = vshrl.u32 %v9753_v8, 16  ;;  %v3660_v13 = vshll.u32 %v9753_v8, 16  ;;  %11528 = vst [vmem:[#allocation42_spill] sm:$0xff] %v9800_v44  ;;  %v9811_v50 = vpop.f32.mrf.mxu1  ;;  %v11585_v44 = vcombine.low %v9742_v53, %v9749_v52 }
 0x132   : > { %v9760_v5 = vld [vmem:[#allocation2 + $0xc8] sm:$0x1]  ;;  %v3666_v7 = vshll.u32 %v9758_v36, 16  ;;  %v3670_v29 = vshrl.u32 %v9758_v36, 16  ;;  %v6935_v56 = vcombine.low %v9753_v8, %v9758_v36  ;;  %11529 = vst [vmem:[#allocation43_spill] sm:$0xff] %v9811_v50 }
 0x133   : > { %v3676_v30 = vshll.u32 %v9760_v5, 16  ;;  %v3659_v63 = vrot.slane %v3657_v38, 4  ;;  %v3662_v24 = vrot.slane %v3660_v13, 5  ;;  %v9789_v38 = vsel %vm8352_vm2, %v6988_v25, %v4112_v27  ;;  %v9791_v13 = vld [vmem:[#allocation2 + $0x60] sm:$0xf] }
 0x134   : > { %v3668_v14 = vrot.slane %v3666_v7, 5  ;;  %v3672_v23 = vrot.slane %v3670_v29, 4  ;;  %7855 = vmatmul.mubr.bf16.gmra.mxu1 %v6935_v56  ;;  %11525 = vst [vmem:[#allocation40_spill] sm:$0xff] %v9791_v13  ;;  %v4114_v7 = vrot.slane %v4112_v27, 4  ;;  %v4115_v56 = vrot.slane %v9364_v4, 5  ;;  %v9825_v4 = vpop.f32.mrf.mxu0 }
 0x135   : > { %v3663_v46 = vor.u32 %v3662_v24, %v3659_v63  ;;  %7922 = vmatprep.mubr.bf16.mxu1 %v11527_v28  ;;  %v5168_v29 = vshrl.u32 %v9742_v53, 16  ;;  %v3678_v0 = vrot.slane %v3676_v30, 5  ;;  %v5171_v25 = vshll.u32 %v9742_v53, 16  ;;  %11532 = vst [vmem:[#allocation46_spill] sm:$0xff] %v9825_v4 }
 0x136   : > { %v3673_v19 = vor.u32 %v3672_v23, %v3668_v14  ;;  %v9806_v24 = vsel %vm8352_vm2, %v4114_v7, %v4115_v56  ;;  %v5181_v28 = vshrl.u32 %v9749_v52, 16  ;;  %v6989_v56 = vrot.slane %v9373_v47, 9 }
 0x137   : > { %v3664_v2 = vrot.slane %v3663_v46, 4  ;;  %v9815_v63 = vrot.slane %v5168_v29, 4  ;;  %v9822_v7 = vrot.slane %v5171_v25, 5  ;;  %v9829_v23 = vrot.slane %v5177_v33, 5  ;;  %v9840_v46 = vld [vmem:[#allocation2 + $0x6c] sm:$0xf] }
 0x138   : > { %v3674_v9 = vrot.slane %v3673_v19, 4  ;;  %v4119_v29 = vrot.slane %v9382_v20, 5  ;;  %v4122_v30 = vrot.slane %v9390_v57, 5  ;;  %v6990_v25 = vrot.slane %v9393_v51, 9 }
 0x139   : > { %11530 = vst [vmem:[#allocation44_spill] sm:$0xff] %v9815_v63  ;;  %v3669_v27 = vsel %vm8812_vm12, %v3664_v2, %v3668_v14  ;;  %11531 = vst [vmem:[#allocation45_spill] sm:$0xff] %v9822_v7  ;;  %v8217_v2 = vld [vmem:[%s11350_s3 + $0x1f0] sm:$0xff]   ;;  %v9836_v14 = vrot.slane %v5181_v28, 4  ;;  %v11536_v20 = vcombine.low %v9686_v43, %v9695_v6  ;;  %v4126_v28 = vrot.slane %v9407_v17, 5 }
 0x13a   : > { %v3679_v19 = vsel %vm8812_vm12, %v3674_v9, %v3678_v0  ;;  %11533 = vst [vmem:[#allocation47_spill] sm:$0xff] %v9829_v23  ;;  %v9842_v0 = vpop.f32.mrf.mxu1  ;;  %v9849_v57 = vsel %vm8352_vm2, %v6989_v56, %v4119_v29  ;;  %v4121_v33 = vrot.slane %v4119_v29, 4  ;;  %v4129_v9 = vrot.slane %v9409_v32, 5  ;;  %v9860_v56 = vpop.f32.mrf.mxu0  ;;  %v4583_v23 = vld [vmem:[#allocation2 + $0x20] sm:$0x1] }
 0x13b   : > { %v6975_v50 = vcombine.low %v3669_v27, %v3679_v19  ;;  %11534 = vst [vmem:[#allocation48_spill] sm:$0xff] %v9836_v14  ;;  %11535 = vst [vmem:[#allocation49_spill] sm:$0xff] %v9842_v0  ;;  %v9853_v27 = vld [vmem:[#allocation2 + $0x70] sm:$0xf]  ;;  %v5216_v19 = vshrl.u32 %v9840_v46, 16  ;;  %v5219_v43 = vshll.u32 %v9840_v46, 16  ;;  %v11538_v17 = vcombine.low %v9599_v10, %v9601_v45 }
 0x13c   : > { %7923 = vmatmul.mubr.bf16.vlgmr.msra.gmra.mxu1 %v11536_v20  ;;  %v5225_v6 = vshll.u32 %v9853_v27, 16  ;;  %11537 = vst [vmem:[#allocation50_spill] sm:$0xff] %v9860_v56  ;;  %v11539_v32 = vcombine.low %v9717_v42, %v9726_v37  ;;  %v4128_v20 = vrot.slane %v4126_v28, 4  ;;  %v5229_v51 = vshrl.u32 %v9853_v27, 16  ;;  %v9890_v29 = vpop.f32.mrf.mxu1  ;;  %v10147_v14 = vld [vmem:[#allocation2 + $0xc4] sm:$0xf] }
 0x13d   : > { %7903 = vmatmul.mubr.bf16.gmra.mxu0 %v6975_v50  ;;  %8003 = vmatpush3.bf16.msra.mxu1 %v9512_v54  ;;  %v8221_v54 = vld [vmem:[%s11350_s3 + $0x1e8] sm:$0xff]   ;;  %v9873_v50 = vsel %vm8352_vm2, %v4121_v33, %v4122_v30  ;;  %v9882_v37 = vsel %vm8352_vm2, %v6990_v25, %v4126_v28  ;;  %v9886_v30 = vld [vmem:[#allocation2 + $0x78] sm:$0xf]  ;;  %v9888_v33 = vld [vmem:[#allocation2 + $0x7c] sm:$0xf]  ;;  %11542 = vst [vmem:[#allocation53_spill] sm:$0xff] %v9890_v29  ;;  %v9907_v29 = vpop.f32.mrf.mxu0 }
 0x13e   : > { %7970 = vmatprep.mubr.bf16.mxu0 %v11538_v17  ;;  %7926 = vmatprep.mubr.bf16.mxu1 %v11539_v32  ;;  %11540 = vst [vmem:[#allocation51_spill] sm:$0xff] %v9886_v30  ;;  %11541 = vst [vmem:[#allocation52_spill] sm:$0xff] %v9888_v33  ;;  %v9894_v47 = vsel %vm8352_vm2, %v4128_v20, %v4129_v9  ;;  %v9896_v17 = vrot.slane %v5216_v19, 4  ;;  %v9898_v42 = vrot.slane %v5219_v43, 5  ;;  %v9900_v0 = vrot.slane %v5225_v6, 5  ;;  %v8218_v9 = vld [vmem:[%s11350_s3 + $0x230] sm:$0xff]  }
 0x13f   : > { %8004 = vmatprep.subr.bf16.mxu1 %v8217_v2  ;;  %v9902_v25 = vrot.slane %v5229_v51, 4  ;;  %v6991_v28 = vrot.slane %v9417_v31, 9  ;;  %v4133_v32 = vrot.slane %v9430_v60, 5  ;;  %v4136_v56 = vrot.slane %v9433_v48, 5  ;;  %11547 = vst [vmem:[#allocation58_spill] sm:$0xff] %v9907_v29  ;;  %v8225_v51 = vld [vmem:[%s11350_s3 + $0x1e0] sm:$0xff]  }
 0x140   : > { %11543 = vst [vmem:[#allocation54_spill] sm:$0xff] %v9896_v17  ;;  %11544 = vst [vmem:[#allocation55_spill] sm:$0xff] %v9898_v42  ;;  %v9918_v60 = vld [vmem:[#allocation2 + $0x84] sm:$0xf]  ;;  %v6992_v6 = vrot.slane %v9440_v34, 9  ;;  %v4140_v20 = vrot.slane %v9453_v15, 5  ;;  %v11550_v19 = vcombine.low %v9618_v49, %v9623_v39  ;;  %v11605_v63 = vcombine.low %v9840_v46, %v9853_v27 }
 0x141   : > { %11545 = vst [vmem:[#allocation56_spill] sm:$0xff] %v9900_v0  ;;  %8005 = vmatpush3.bf16.msra.mxu1 %v8217_v2  ;;  %11546 = vst [vmem:[#allocation57_spill] sm:$0xff] %v9902_v25  ;;  %v4135_v48 = vrot.slane %v4133_v32, 4  ;;  %v9923_v25 = vld [vmem:[#allocation2 + $0x88] sm:$0xf]  ;;  %v9925_v0 = vpop.f32.mrf.mxu1  ;;  %v11549_v2 = vcombine.low %v9777_v26, %v9785_v41  ;;  %v9935_v31 = vsel %vm8352_vm2, %v6991_v28, %v4133_v32  ;;  %v4143_v34 = vrot.slane %v9458_v61, 5 }
 0x142   : > { %8006 = vmatprep.subr.bf16.mxu1 %v8221_v54  ;;  %11548 = vst [vmem:[#allocation59_spill] sm:$0xff] %v9925_v0  ;;  %v5264_v15 = vshrl.u32 %v9918_v60, 16  ;;  %v5267_v43 = vshll.u32 %v9918_v60, 16  ;;  %v11551_v26 = vcombine.low %v9789_v38, %v9806_v24  ;;  %v4142_v28 = vrot.slane %v4140_v20, 4  ;;  %v8222_v38 = vld [vmem:[%s11350_s3 + $0x228] sm:$0xff]  }
 0x143   : > { %v9948_v41 = vsel %vm8352_vm2, %v4135_v48, %v4136_v56  ;;  %v5273_v61 = vshll.u32 %v9923_v25, 16  ;;  %v9964_v56 = vsel %vm8352_vm2, %v6992_v6, %v4140_v20  ;;  %v9979_v6 = vld [vmem:[#allocation2 + $0x90] sm:$0xf]  ;;  %v9981_v20 = vld [vmem:[#allocation2 + $0x94] sm:$0xf]  ;;  %v9983_v48 = vpop.f32.mrf.mxu1 }
 0x144   : > { %7927 = vmatmul.mubr.bf16.gmra.mxu1 %v11549_v2  ;;  %v9952_v2 = vpop.f32.mrf.mxu0  ;;  %v9975_v32 = vrot.slane %v5264_v15, 4  ;;  %v9977_v24 = vrot.slane %v5267_v43, 5  ;;  %11556 = vst [vmem:[#allocation63_spill] sm:$0xff] %v9983_v48  ;;  %v6993_v43 = vrot.slane %v9465_v40, 9  ;;  %v4147_v15 = vrot.slane %v9470_v58, 5 }
 0x145   : > { %7971 = vmatmul.mubr.bf16.vlgmr.msra.gmra.mxu0 %v11550_v19  ;;  %7930 = vmatprep.mubr.bf16.mxu1 %v11551_v26  ;;  %11552 = vst [vmem:[#allocation60_spill] sm:$0xff] %v9952_v2  ;;  %v11553_v19 = vcombine.low %v9655_v3, %v9662_v1  ;;  %v5277_v26 = vshrl.u32 %v9923_v25, 16  ;;  %v11578_v2 = vld [vmem:[#allocation8_spill] sm:$0xff] }
 0x146   : > { %8051 = vmatpush3.bf16.msra.mxu0 %v9520_v35  ;;  %8007 = vmatpush3.bf16.msra.mxu1 %v8221_v54  ;;  %11554 = vst [vmem:[#allocation61_spill] sm:$0xff] %v9975_v32  ;;  %11555 = vst [vmem:[#allocation62_spill] sm:$0xff] %v9977_v24  ;;  %v9985_v0 = vpop.f32.mrf.mxu0  ;;  %v9987_v54 = vrot.slane %v5273_v61, 5  ;;  %v4150_v61 = vrot.slane %v9484_v55, 5  ;;  %v4149_v32 = vrot.slane %v4147_v15, 4  ;;  %v8226_v55 = vld [vmem:[%s11350_s3 + $0x220] sm:$0xff]  }
 0x147   : > { %7974 = vmatprep.mubr.bf16.mxu0 %v11553_v19  ;;  %8052 = vmatprep.subr.bf16.mxu0 %v8218_v9  ;;  %v9973_v19 = vsel %vm8352_vm2, %v4142_v28, %v4143_v34  ;;  %11557 = vst [vmem:[#allocation64_spill] sm:$0xff] %v9985_v0  ;;  %v8229_v34 = vld [vmem:[%s11350_s3 + $0x1d8] sm:$0xff]   ;;  %v9997_v24 = vrot.slane %v5277_v26, 4  ;;  %v11561_v0 = vld [vmem:[#allocation6_spill] sm:$0xff]  ;;  %v10009_v28 = vld [vmem:[#allocation2 + $0xa0] sm:$0xf]  ;;  %v10016_v26 = vsel %vm8352_vm2, %v6993_v43, %v4147_v15 }
 0x148   : > { %8008 = vmatprep.subr.bf16.mxu1 %v8225_v51  ;;  %11558 = vst [vmem:[#allocation65_spill] sm:$0xff] %v9987_v54  ;;  %v10001_v54 = vld [vmem:[#allocation2 + $0x9c] sm:$0xf]  ;;  %v10003_v35 = vpop.f32.mrf.mxu0  ;;  %v6994_v42 = vrot.slane %v11561_v0, 9  ;;  %v10030_v17 = vsel %vm8352_vm2, %v4149_v32, %v4150_v61  ;;  %v5321_v15 = vshll.u32 %v10009_v28, 16  ;;  %v4164_v29 = vrot.slane %v11578_v2, 5 }
 0x149   : > { %11559 = vst [vmem:[#allocation66_spill] sm:$0xff] %v9997_v24  ;;  %11560 = vst [vmem:[#allocation67_spill] sm:$0xff] %v10003_v35  ;;  %v11563_v24 = vld [vmem:[#allocation9_spill] sm:$0xff]  ;;  %v5312_v58 = vshrl.u32 %v10001_v54, 16  ;;  %v10021_v35 = vpop.f32.mrf.mxu1  ;;  %v5315_v43 = vshll.u32 %v10001_v54, 16 }
 0x14a   : > { %8053 = vmatpush3.bf16.msra.mxu0 %v8218_v9  ;;  %8009 = vmatpush3.bf16.msra.mxu1 %v8225_v51  ;;  %v11562_v9 = vld [vmem:[#allocation7_spill] sm:$0xff]  ;;  %v4157_v40 = vrot.slane %v11563_v24, 5  ;;  %11564 = vst [vmem:[#allocation6_spill] sm:$0xff] %v10021_v35  ;;  %v10023_v0 = vpop.f32.mrf.mxu0  ;;  %v11566_v51 = vcombine.low %v9849_v57, %v9873_v50  ;;  %v5325_v24 = vshrl.u32 %v10009_v28, 16  ;;  %v11568_v57 = vcombine.low %v9882_v37, %v9894_v47  ;;  %v10061_v32 = vld [vmem:[#allocation2 + $0xa8] sm:$0xf] }
 0x14b   : > { %8054 = vmatprep.subr.bf16.mxu0 %v8222_v38  ;;  %v4154_v48 = vrot.slane %v11562_v9, 5  ;;  %11565 = vst [vmem:[#allocation7_spill] sm:$0xff] %v10023_v0  ;;  %8010 = vmatprep.subr.bf16.mxu1 %v8229_v34  ;;  %v8233_v9 = vld [vmem:[%s11350_s3 + $0x1d0] sm:$0xff]   ;;  %v11567_v0 = vcombine.low %v9698_v16, %v9700_v62  ;;  %v11569_v35 = vcombine.low %v9722_v59, %v9732_v18  ;;  %v10057_v37 = vrot.slane %v5312_v58, 4  ;;  %v10063_v50 = vld [vmem:[#allocation2 + $0xac] sm:$0xf] }
 0x14c   : > { %7931 = vmatmul.mubr.bf16.gmra.mxu1 %v11566_v51  ;;  %v10065_v51 = vpop.f32.mrf.mxu0 }
 0x14d   : > { %7975 = vmatmul.mubr.bf16.gmra.mxu0 %v11567_v0  ;;  %7934 = vmatprep.mubr.bf16.mxu1 %v11568_v57  ;;  %v4156_v61 = vrot.slane %v4154_v48, 4  ;;  %v10055_v47 = vsel %vm8352_vm2, %v6994_v42, %v4154_v48  ;;  %11570 = vst [vmem:[#allocation9_spill] sm:$0xff] %v10057_v37  ;;  %v10059_v57 = vrot.slane %v5315_v43, 5  ;;  %11572 = vst [vmem:[#allocation69_spill] sm:$0xff] %v10065_v51  ;;  %v10074_v48 = vrot.slane %v5321_v15, 5  ;;  %v11575_v43 = vld [vmem:[#allocation5_spill] sm:$0xff] }
 0x14e   : > { %7978 = vmatprep.mubr.bf16.mxu0 %v11569_v35  ;;  %8055 = vmatpush3.bf16.msra.mxu0 %v8222_v38  ;;  %v8230_v38 = vld [vmem:[%s11350_s3 + $0x218] sm:$0xff]   ;;  %v4161_v0 = vrot.slane %v11575_v43, 5  ;;  %v10080_v37 = vrot.slane %v5325_v24, 4  ;;  %v10088_v15 = vpop.f32.mrf.mxu0  ;;  %v6996_v51 = vrot.slane %v9538_v11, 9 }
 0x14f   : > { %11571 = vst [vmem:[#allocation68_spill] sm:$0xff] %v10059_v57  ;;  %8056 = vmatprep.subr.bf16.mxu0 %v8226_v55  ;;  %8011 = vmatpush3.bf16.msra.mxu1 %v8229_v34  ;;  %v10072_v42 = vsel %vm8352_vm2, %v4156_v61, %v4157_v40  ;;  %11573 = vst [vmem:[#allocation70_spill] sm:$0xff] %v10074_v48  ;;  %v11574_v35 = vld [vmem:[#allocation4_spill] sm:$0xff]  ;;  %v10078_v57 = vpop.f32.mrf.mxu1  ;;  %v8237_v40 = vld [vmem:[%s11350_s3 + $0x1c8] sm:$0xff]  }
 0x150   : > { %v6995_v58 = vrot.slane %v11574_v35, 9  ;;  %11576 = vst [vmem:[#allocation4_spill] sm:$0xff] %v10078_v57  ;;  %11577 = vst [vmem:[#allocation5_spill] sm:$0xff] %v10080_v37  ;;  %8012 = vmatprep.subr.bf16.mxu1 %v8233_v9  ;;  %v4163_v35 = vrot.slane %v4161_v0, 4  ;;  %v10095_v34 = vld [vmem:[#allocation2 + $0xb4] sm:$0xf]  ;;  %v10106_v4 = vpop.f32.mrf.mxu0 }
 0x151   : > { %11579 = vst [vmem:[#allocation8_spill] sm:$0xff] %v10088_v15  ;;  %v11580_v57 = vld [vmem:[#allocation10_spill] sm:$0xff]  ;;  %v11581_v37 = vld [vmem:[#allocation12_spill] sm:$0xff]  ;;  %v5360_v11 = vshrl.u32 %v10095_v34, 16 }
 0x152   : > { %8057 = vmatpush3.bf16.msra.mxu0 %v8226_v55  ;;  %v10099_v2 = vsel %vm8352_vm2, %v6995_v58, %v4161_v0  ;;  %v4168_v15 = vrot.slane %v11580_v57, 5  ;;  %v4171_v48 = vrot.slane %v11581_v37, 5  ;;  %v10104_v61 = vld [vmem:[#allocation2 + $0xb8] sm:$0xf]  ;;  %11582 = vst [vmem:[#allocation10_spill] sm:$0xff] %v10106_v4  ;;  %v10110_v43 = vsel %vm8352_vm2, %v4163_v35, %v4164_v29  ;;  %v8234_v55 = vld [vmem:[%s11350_s3 + $0x210] sm:$0xff]   ;;  %v10118_v57 = vpop.f32.mrf.mxu1 }
 0x153   : > { %8058 = vmatprep.subr.bf16.mxu0 %v8230_v38  ;;  %8013 = vmatpush3.bf16.msra.mxu1 %v8233_v9  ;;  %v5363_v0 = vshll.u32 %v10095_v34, 16  ;;  %v5369_v37 = vshll.u32 %v10104_v61, 16  ;;  %11583 = vst [vmem:[#allocation12_spill] sm:$0xff] %v10118_v57  ;;  %v11584_v58 = vcombine.low %v9935_v31, %v9948_v41  ;;  %v5373_v24 = vshrl.u32 %v10104_v61, 16  ;;  %v8241_v4 = vld [vmem:[%s11350_s3 + $0x1c0] sm:$0xff]   ;;  %v10163_v9 = vpop.f32.mrf.mxu0 }
 0x154   : > { %v4170_v35 = vrot.slane %v4168_v15, 4  ;;  %8014 = vmatprep.subr.bf16.mxu1 %v8237_v40  ;;  %v11586_v31 = vcombine.low %v9964_v56, %v9973_v19  ;;  %v10143_v29 = vrot.slane %v5360_v11, 4  ;;  %v10145_v57 = vld [vmem:[#allocation2 + $0xc0] sm:$0xf]  ;;  %v11589_v56 = vcombine.low %v9791_v13, %v9793_v12 }
 0x155   : > { %7935 = vmatmul.mubr.bf16.gmra.mxu1 %v11584_v58  ;;  %7979 = vmatmul.mubr.bf16.gmra.mxu0 %v11585_v44  ;;  %v10139_v58 = vsel %vm8352_vm2, %v6996_v51, %v4168_v15  ;;  %v10149_v44 = vpop.f32.mrf.mxu1  ;;  %v10158_v51 = vrot.slane %v5363_v0, 5  ;;  %v10160_v15 = vrot.slane %v5369_v37, 5  ;;  %v11592_v11 = vld [vmem:[#allocation13_spill] sm:$0xff]  ;;  %v10165_v41 = vrot.slane %v5373_v24, 4  ;;  %v10189_v37 = vld [vmem:[#allocation2 + $0xd0] sm:$0xf] }
 0x156   : > { %7938 = vmatprep.mubr.bf16.mxu1 %v11586_v31  ;;  %11587 = vst [vmem:[#allocation71_spill] sm:$0xff] %v10143_v29  ;;  %11588 = vst [vmem:[#allocation72_spill] sm:$0xff] %v10149_v44  ;;  %7982 = vmatprep.mubr.bf16.mxu0 %v11589_v56  ;;  %v10156_v19 = vsel %vm8352_vm2, %v4170_v35, %v4171_v48  ;;  %v6997_v31 = vrot.slane %v11592_v11, 9  ;;  %v11595_v29 = vld [vmem:[#allocation11_spill] sm:$0xff]  ;;  %v8238_v48 = vld [vmem:[%s11350_s3 + $0x208] sm:$0xff]   ;;  %v5417_v13 = vshll.u32 %v10189_v37, 16 }
 0x157   : > { %8059 = vmatpush3.bf16.msra.mxu0 %v8230_v38  ;;  %11590 = vst [vmem:[#allocation73_spill] sm:$0xff] %v10158_v51  ;;  %11591 = vst [vmem:[#allocation74_spill] sm:$0xff] %v10160_v15  ;;  %v4175_v56 = vrot.slane %v11595_v29, 5  ;;  %v11596_v38 = vld [vmem:[#allocation14_spill] sm:$0xff]  ;;  %8015 = vmatpush3.bf16.msra.mxu1 %v8237_v40  ;;  %v10173_v0 = vpop.f32.mrf.mxu1  ;;  %v11598_v11 = vld [vmem:[#allocation15_spill] sm:$0xff] }
 0x158   : > { %11593 = vst [vmem:[#allocation13_spill] sm:$0xff] %v10163_v9  ;;  %8060 = vmatprep.subr.bf16.mxu0 %v8234_v55  ;;  %11594 = vst [vmem:[#allocation75_spill] sm:$0xff] %v10165_v41  ;;  %v4178_v12 = vrot.slane %v11596_v38, 5  ;;  %v6998_v44 = vrot.slane %v11598_v11, 9  ;;  %v10181_v29 = vld [vmem:[#allocation2 + $0xcc] sm:$0xf]  ;;  %8016 = vmatprep.subr.bf16.mxu1 %v8241_v4 }
 0x159   : > { %11597 = vst [vmem:[#allocation11_spill] sm:$0xff] %v10173_v0  ;;  %v10185_v40 = vsel %vm8352_vm2, %v6997_v31, %v4175_v56  ;;  %v4177_v38 = vrot.slane %v4175_v56, 4  ;;  %v11599_v9 = vld [vmem:[#allocation16_spill] sm:$0xff]  ;;  %v11600_v41 = vld [vmem:[#allocation17_spill] sm:$0xff]  ;;  %v10191_v35 = vpop.f32.mrf.mxu1  ;;  %v5408_v11 = vshrl.u32 %v10181_v29, 16  ;;  %v5411_v51 = vshll.u32 %v10181_v29, 16  ;;  %v10197_v31 = vpop.f32.mrf.mxu0 }
 0x15a   : > { %v4182_v0 = vrot.slane %v11599_v9, 5  ;;  %v4185_v15 = vrot.slane %v11600_v41, 5  ;;  %11601 = vst [vmem:[#allocation14_spill] sm:$0xff] %v10191_v35  ;;  %11602 = vst [vmem:[#allocation15_spill] sm:$0xff] %v10197_v31  ;;  %v8242_v24 = vld [vmem:[%s11350_s3 + $0x200] sm:$0xff]   ;;  %v11603_v31 = vcombine.low %v10016_v26, %v10030_v17  ;;  %v11606_v17 = vcombine.low %v10055_v47, %v10072_v42 }
 0x15b   : > { %8061 = vmatpush3.bf16.msra.mxu0 %v8234_v55  ;;  %v10201_v9 = vsel %vm8352_vm2, %v4177_v38, %v4178_v12  ;;  %v5421_v55 = vshrl.u32 %v10189_v37, 16  ;;  %8017 = vmatpush3.bf16.msra.mxu1 %v8241_v4  ;;  %v10208_v35 = vpop.f32.mrf.mxu1  ;;  %v10222_v7 = vpop.f32.mrf.mxu0  ;;  %v11610_v4 = vcombine.low %v9886_v30, %v9888_v33  ;;  %v6999_v47 = vrot.slane %v9753_v8, 9 }
 0x15c   : > { %8062 = vmatprep.subr.bf16.mxu0 %v8238_v48  ;;  %v4184_v56 = vrot.slane %v4182_v0, 4  ;;  %v10218_v41 = vsel %vm8352_vm2, %v6998_v44, %v4182_v0  ;;  %11604 = vst [vmem:[#allocation16_spill] sm:$0xff] %v10222_v7  ;;  %v10234_v44 = vrot.slane %v5408_v11, 4  ;;  %v10236_v0 = vrot.slane %v5411_v51, 5  ;;  %v4586_v7 = vld [vmem:[#allocation2 + $0x2c] sm:$0x1] }
 0x15d   : > { %7939 = vmatmul.mubr.bf16.gmra.mxu1 %v11603_v31  ;;  %7983 = vmatmul.mubr.bf16.gmra.mxu0 %v11605_v63  ;;  %v10238_v31 = vrot.slane %v5417_v13, 5  ;;  %v2122_v38 = vpop.f32.mrf.mxu1  ;;  %v10243_v63 = vrot.slane %v5421_v55, 4  ;;  %v4189_v42 = vrot.slane %v9758_v36, 5  ;;  %v10248_v11 = vpop.f32.mrf.mxu0  ;;  %v7120_v13 = vrot.slane %v9599_v10, 9 }
 0x15e   : > { %7942 = vmatprep.mubr.bf16.mxu1 %v11606_v17  ;;  %v10232_v26 = vsel %vm8352_vm2, %v4184_v56, %v4185_v15  ;;  %11607 = vst [vmem:[#allocation17_spill] sm:$0xff] %v10234_v44  ;;  %11608 = vst [vmem:[#allocation76_spill] sm:$0xff] %v10236_v0  ;;  %7986 = vmatprep.mubr.bf16.mxu0 %v11610_v4  ;;  %v4192_v15 = vrot.slane %v9760_v5, 5  ;;  %v5835_v51 = vrot.slane %v9601_v45, 5  ;;  %v5838_v56 = vrot.slane %v4583_v23, 5 }
 0x15f   : > { %11609 = vst [vmem:[#allocation77_spill] sm:$0xff] %v10238_v31  ;;  %8063 = vmatpush3.bf16.msra.mxu0 %v8238_v48  ;;  %11611 = vst [vmem:[#allocation78_spill] sm:$0xff] %v10243_v63  ;;  %v11613_v17 = vshrl.u32 %v9599_v10, 16  ;;  %v7733_v48 = vpop.f32.mrf.mxu1  ;;  %v4191_v12 = vrot.slane %v4189_v42, 4  ;;  %v11614_v8 = vshll.u32 %v9599_v10, 16  ;;  %v5057_v5 = vshll.u32 %v9601_v45, 16 }
 0x160   : > { %11612 = vst [vmem:[#allocation79_spill] sm:$0xff] %v10248_v11  ;;  %8064 = vmatprep.subr.bf16.mxu0 %v8242_v24  ;;  %v10258_v11 = vpop.f32.mrf.mxu0  ;;  %v10262_v63 = vsel %vm8352_vm2, %v6999_v47, %v4189_v42  ;;  %v5837_v31 = vrot.slane %v5835_v51, 4  ;;  %v11616_v0 = vshrl.u32 %v9601_v45, 16  ;;  %v5067_v44 = vshll.u32 %v4583_v23, 16 }
 0x161   : > { %v5050_v4 = vrot.slane %v11613_v17, 4  ;;  %v5053_v36 = vrot.slane %v11614_v8, 5  ;;  %11615 = vst [vmem:[#allocation80_spill] sm:$0xff] %v10258_v11  ;;  %v2125_v33 = vpop.f32.mrf.mxu1  ;;  %v10269_v10 = vsel %vm8352_vm2, %v4191_v12, %v4192_v15  ;;  %v5059_v30 = vrot.slane %v5057_v5, 5 }
 0x162   : > { %v5063_v17 = vrot.slane %v11616_v0, 4  ;;  %v7030_v11 = vcombine.low %v10218_v41, %v10232_v26  ;;  %v10275_v47 = vsel %vm8352_vm2, %v7120_v13, %v5835_v51  ;;  %v10279_v45 = vsel %vm8352_vm2, %v5837_v31, %v5838_v56  ;;  %v10296_v13 = vpop.f32.mrf.mxu0  ;;  %v11623_v56 = vld [vmem:[#allocation29_spill] sm:$0xff] }
 0x163   : > { %8065 = vmatpush3.bf16.msra.mxu0 %v8242_v24  ;;  %v5054_v8 = vor.u32 %v5053_v36, %v5050_v4  ;;  %v5845_v23 = vrot.slane %v4586_v7, 5  ;;  %v10281_v0 = vpop.f32.mrf.mxu1  ;;  %v11617_v12 = vcombine.low %v10099_v2, %v10110_v43  ;;  %v11618_v26 = vrot.slane %v9623_v39, 5  ;;  %11620 = vst [vmem:[#allocation81_spill] sm:$0xff] %v10296_v13  ;;  %v11625_v4 = vld [vmem:[#allocation21_spill] sm:$0xff] }
 0x164   : > { %v5064_v41 = vor.u32 %v5063_v17, %v5059_v30  ;;  %v11619_v15 = vrot.slane %v9618_v49, 9  ;;  %v11621_v51 = vcombine.low %v9918_v60, %v9923_v25  ;;  %v11622_v43 = vcombine.low %v10139_v58, %v10156_v19  ;;  %v11624_v49 = vld [vmem:[#allocation23_spill] sm:$0xff]  ;;  %v11635_v58 = vld [vmem:[#allocation20_spill] sm:$0xff] }
 0x165   : > { %7943 = vmatmul.mubr.bf16.gmra.mxu1 %v11617_v12  ;;  %v5055_v42 = vrot.slane %v5054_v8, 4  ;;  %v5069_v2 = vrot.slane %v5067_v44, 5  ;;  %v10307_v39 = vsel %vm8352_vm2, %v11623_v56, %v5845_v23  ;;  %v11626_v36 = vor.u32 %v11624_v49, %v11625_v4  ;;  %v4589_v8 = vld [vmem:[#allocation2 + $0x38] sm:$0x1]  ;;  %v10312_v12 = vpop.f32.mrf.mxu1  ;;  %v11628_v44 = vld [vmem:[#allocation18_spill] sm:$0xff] }
 0x166   : > { %v10294_v31 = vsel %vm8352_vm2, %v11619_v15, %v11618_v26  ;;  %7987 = vmatmul.mubr.bf16.gmra.mxu0 %v11621_v51  ;;  %7946 = vmatprep.mubr.bf16.mxu1 %v11622_v43  ;;  %v5091_v17 = vshll.u32 %v4586_v7, 16  ;;  %v11627_v26 = vcombine.low %v9979_v6, %v9981_v20  ;;  %v5065_v19 = vrot.slane %v5064_v41, 4  ;;  %v11629_v15 = vld [vmem:[#allocation25_spill] sm:$0xff]  ;;  %v11630_v51 = vld [vmem:[#allocation24_spill] sm:$0xff]  ;;  %v10326_v7 = vpop.f32.mrf.mxu0 }
 0x167   : > { %v5079_v5 = vrot.slane %v11626_v36, 4  ;;  %v10321_v23 = vadd.f32 %v10208_v35, %v11628_v44  ;;  %v11631_v43 = vor.u32 %v11629_v15, %v11630_v51  ;;  %11632 = vst [vmem:[#allocation29_spill] sm:$0xff] %v10326_v7  ;;  %v5060_v49 = vsel %vm8812_vm12, %v5055_v42, %v5059_v30  ;;  %v7737_v41 = vpop.f32.mrf.mxu1  ;;  %v11637_v30 = vld [vmem:[#allocation22_spill] sm:$0xff]  ;;  %v4592_v7 = vld [vmem:[#allocation2 + $0x44] sm:$0x1] }
 0x168   : > { %7990 = vmatprep.mubr.bf16.mxu0 %v11627_v26  ;;  %v5093_v36 = vrot.slane %v5091_v17, 5  ;;  %v11633_v26 = vld [vmem:[#allocation19_spill] sm:$0xff]  ;;  %v7122_v44 = vrot.slane %v9655_v3, 9  ;;  %v5849_v15 = vrot.slane %v9662_v1, 5  ;;  %v10341_v24 = vadd.f32 %v7733_v48, %v11635_v58 }
 0x169   : > { %v5089_v56 = vrot.slane %v11631_v43, 4  ;;  %v10333_v55 = vadd.f32 %v2122_v38, %v11633_v26  ;;  %v5084_v35 = vsel %vm8812_vm12, %v5079_v5, %v11630_v51  ;;  %v5852_v43 = vrot.slane %v4589_v8, 5  ;;  %v2141_v13 = vpop.f32.mrf.mxu1  ;;  %v10350_v5 = vpop.f32.mrf.mxu0 }
 0x16a   : > { %11636 = vst [vmem:[#allocation21_spill] sm:$0xff] %v10341_v24  ;;  %v10344_v42 = vadd.f32 %v2125_v33, %v11637_v30  ;;  %v11639_v17 = vshrl.u32 %v9655_v3, 16  ;;  %v11640_v26 = vshll.u32 %v9655_v3, 16  ;;  %11641 = vst [vmem:[#allocation25_spill] sm:$0xff] %v10350_v5  ;;  %v5070_v51 = vsel %vm8812_vm12, %v5065_v19, %v5069_v2  ;;  %v11657_v5 = vld [vmem:[#allocation30_spill] sm:$0xff] }
 0x16b   : > { %11634 = vst [vmem:[#allocation23_spill] sm:$0xff] %v10333_v55  ;;  %v5094_v48 = vsel %vm8812_vm12, %v5089_v56, %v5093_v36  ;;  %v5851_v58 = vrot.slane %v5849_v15, 4  ;;  %v5105_v33 = vshll.u32 %v9662_v1, 16  ;;  %v10359_v30 = vsel %vm8352_vm2, %v7122_v44, %v5849_v15  ;;  %v10363_v24 = vpop.f32.mrf.mxu1 }
 0x16c   : > { %11638 = vst [vmem:[#allocation18_spill] sm:$0xff] %v10344_v42  ;;  %v5098_v38 = vrot.slane %v11639_v17, 4  ;;  %v5101_v4 = vrot.slane %v11640_v26, 5  ;;  %v11642_v3 = vshrl.u32 %v9662_v1, 16  ;;  %v5115_v42 = vshll.u32 %v4589_v8, 16 }
 0x16d   : > { %v11643_v2 = vcombine.low %v10185_v40, %v10201_v9  ;;  %v10370_v19 = vsel %vm8352_vm2, %v5851_v58, %v5852_v43  ;;  %v5107_v56 = vrot.slane %v5105_v33, 5  ;;  %v11644_v36 = vrot.slane %v9700_v62, 5  ;;  %v10385_v58 = vpop.f32.mrf.mxu1  ;;  %v10387_v33 = vpop.f32.mrf.mxu0  ;;  %v11650_v62 = vld [vmem:[#allocation32_spill] sm:$0xff] }
 0x16e   : > { %v5102_v17 = vor.u32 %v5101_v4, %v5098_v38  ;;  %v5111_v26 = vrot.slane %v11642_v3, 4  ;;  %v5859_v15 = vrot.slane %v4592_v7, 5  ;;  %v11645_v1 = vcombine.low %v10001_v54, %v10009_v28  ;;  %11648 = vst [vmem:[#allocation24_spill] sm:$0xff] %v10387_v33 }
 0x16f   : > { %7947 = vmatmul.mubr.bf16.gmra.mxu1 %v11643_v2  ;;  %v5858_v44 = vrot.slane %v11644_v36, 4  ;;  %v7096_v8 = vcombine.low %v5060_v49, %v5070_v51  ;;  %v5117_v38 = vrot.slane %v5115_v42, 5  ;;  %v11646_v40 = vmov %v11644_v36  ;;  %v11651_v42 = vld [vmem:[#allocation34_spill] sm:$0xff]  ;;  %v11652_v51 = vld [vmem:[#allocation35_spill] sm:$0xff]  ;;  %v10408_v33 = vpop.f32.mrf.mxu1 }
 0x170   : > { %7991 = vmatmul.mubr.bf16.gmra.mxu0 %v11645_v1  ;;  %7950 = vmatprep.mubr.bf16.mxu1 %v7030_v11  ;;  %v5103_v4 = vrot.slane %v5102_v17, 4  ;;  %v11647_v9 = vrot.slane %v9698_v16, 9  ;;  %v11649_v3 = vcombine.low %v10061_v32, %v10063_v50  ;;  %v5112_v11 = vor.u32 %v5111_v26, %v5107_v56  ;;  %v11653_v17 = vld [vmem:[#allocation36_spill] sm:$0xff] }
 0x171   : > { %v10394_v49 = vsel %vm8352_vm2, %v5858_v44, %v5859_v15  ;;  %v5126_v16 = vor.u32 %v11651_v42, %v11650_v62  ;;  %v5136_v2 = vor.u32 %v11653_v17, %v11652_v51  ;;  %v10400_v36 = vcombine.low %v5084_v35, %v5094_v48 }
 0x172   : > { %v10383_v43 = vsel %vm8352_vm2, %v11647_v9, %v11646_v40  ;;  %7994 = vmatprep.mubr.bf16.mxu0 %v11649_v3  ;;  %v11654_v40 = vld [vmem:[#allocation27_spill] sm:$0xff]  ;;  %v5139_v26 = vshll.u32 %v4592_v7, 16  ;;  %v5108_v44 = vsel %vm8812_vm12, %v5103_v4, %v5107_v56  ;;  %v5113_v15 = vrot.slane %v5112_v11, 4  ;;  %v10418_v7 = vpop.f32.mrf.mxu0 }
 0x173   : > { %v10406_v9 = vadd.f32 %v10281_v0, %v11654_v40  ;;  %v4595_v3 = vld [vmem:[#allocation2 + $0x50] sm:$0x1]  ;;  %v5127_v35 = vrot.slane %v5126_v16, 4  ;;  %v5137_v48 = vrot.slane %v5136_v2, 4  ;;  %v7124_v17 = vrot.slane %v9722_v59, 9  ;;  %v10416_v0 = vpop.f32.mrf.mxu1  ;;  %11656 = vst [vmem:[#allocation20_spill] sm:$0xff] %v10418_v7 }
 0x174   : > { %v5141_v42 = vrot.slane %v5139_v26, 5  ;;  %v5863_v1 = vrot.slane %v9732_v18, 5  ;;  %v5118_v40 = vsel %vm8812_vm12, %v5113_v15, %v5117_v38  ;;  %v10424_v56 = vadd.f32 %v10312_v12, %v11657_v5  ;;  %v11660_v26 = vld [vmem:[#allocation33_spill] sm:$0xff]  ;;  %v4598_v38 = vld [vmem:[#allocation2 + $0x5c] sm:$0x1]  ;;  %v10439_v12 = vpop.f32.mrf.mxu0 }
 0x175   : > { %11655 = vst [vmem:[#allocation19_spill] sm:$0xff] %v10406_v9  ;;  %v5866_v4 = vrot.slane %v4595_v3, 5  ;;  %v11659_v11 = vshrl.u32 %v9722_v59, 16  ;;  %v5132_v2 = vsel %vm8812_vm12, %v5127_v35, %v11652_v51  ;;  %v10432_v62 = vadd.f32 %v7737_v41, %v11660_v26  ;;  %v11661_v9 = vld [vmem:[#allocation38_spill] sm:$0xff]  ;;  %v10437_v15 = vpop.f32.mrf.mxu1  ;;  %11663 = vst [vmem:[#allocation34_spill] sm:$0xff] %v10439_v12  ;;  %v11676_v12 = vld [vmem:[#allocation48_spill] sm:$0xff] }
 0x176   : > { %11658 = vst [vmem:[#allocation22_spill] sm:$0xff] %v10424_v56  ;;  %v10435_v7 = vadd.f32 %v2141_v13, %v11661_v9  ;;  %v5865_v55 = vrot.slane %v5863_v1, 4  ;;  %v11664_v5 = vcombine.low %v10262_v63, %v10269_v10  ;;  %v11665_v56 = vshll.u32 %v9722_v59, 16 }
 0x177   : > { %v5146_v16 = vrot.slane %v11659_v11, 4  ;;  %v7098_v11 = vcombine.low %v5108_v44, %v5118_v40  ;;  %v5153_v41 = vshll.u32 %v9732_v18, 16  ;;  %v11666_v35 = vshrl.u32 %v9732_v18, 16  ;;  %v10460_v40 = vpop.f32.mrf.mxu1  ;;  %v10462_v18 = vpop.f32.mrf.mxu0 }
 0x178   : > { %11662 = vst [vmem:[#allocation32_spill] sm:$0xff] %v10435_v7  ;;  %7951 = vmatmul.mubr.bf16.gmra.mxu1 %v11664_v5  ;;  %v5149_v51 = vrot.slane %v11665_v56, 5  ;;  %v11667_v9 = vcombine.low %v10095_v34, %v10104_v61  ;;  %v5142_v26 = vsel %vm8812_vm12, %v5137_v48, %v5141_v42  ;;  %v10456_v63 = vsel %vm8352_vm2, %v7124_v17, %v5863_v1 }
 0x179   : > { %v5159_v13 = vrot.slane %v11666_v35, 4  ;;  %8018 = vmatprep.mubr.bf16.mxu1 %v7096_v8  ;;  %v5163_v10 = vshll.u32 %v4595_v3, 16  ;;  %v11668_v59 = vrot.slane %v9749_v52, 5  ;;  %11669 = vst [vmem:[#allocation35_spill] sm:$0xff] %v10462_v18  ;;  %v11670_v56 = vcombine.low %v10145_v57, %v10147_v14 }
 0x17a   : > { %7995 = vmatmul.mubr.bf16.gmra.mxu0 %v11667_v9  ;;  %v10469_v8 = vsel %vm8352_vm2, %v5865_v55, %v5866_v4  ;;  %v5150_v48 = vor.u32 %v5149_v51, %v5146_v16  ;;  %v5155_v42 = vrot.slane %v5153_v41, 5  ;;  %v5873_v1 = vrot.slane %v4598_v38, 5  ;;  %v11673_v9 = vld [vmem:[#allocation44_spill] sm:$0xff]  ;;  %v10483_v55 = vpop.f32.mrf.mxu1  ;;  %v10485_v4 = vpop.f32.mrf.mxu0 }
 0x17b   : > { %v5872_v44 = vrot.slane %v11668_v59, 4  ;;  %7998 = vmatprep.mubr.bf16.mxu0 %v11670_v56  ;;  %v5165_v17 = vrot.slane %v5163_v10, 5  ;;  %v11671_v3 = vmov %v11668_v59  ;;  %v11672_v5 = vrot.slane %v9742_v53, 9  ;;  %v11674_v59 = vld [vmem:[#allocation45_spill] sm:$0xff]  ;;  %v11675_v56 = vld [vmem:[#allocation47_spill] sm:$0xff]  ;;  %11677 = vst [vmem:[#allocation36_spill] sm:$0xff] %v10485_v4 }
 0x17c   : > { %v5174_v18 = vor.u32 %v11674_v59, %v11673_v9  ;;  %v5184_v7 = vor.u32 %v11676_v12, %v11675_v56  ;;  %v5151_v16 = vrot.slane %v5150_v48, 4  ;;  %v5160_v51 = vor.u32 %v5159_v13, %v5155_v42  ;;  %v4601_v9 = vld [vmem:[#allocation2 + $0x68] sm:$0x1]  ;;  %v10493_v59 = vpop.f32.mrf.mxu1 }
 0x17d   : > { %v10477_v35 = vsel %vm8352_vm2, %v11672_v5, %v11671_v3  ;;  %v10489_v52 = vsel %vm8352_vm2, %v5872_v44, %v5873_v1  ;;  %v5187_v53 = vshll.u32 %v4598_v38, 16  ;;  %v7099_v41 = vcombine.low %v5132_v2, %v5142_v26  ;;  %11678 = vst [vmem:[#allocation27_spill] sm:$0xff] %v10493_v59  ;;  %v11679_v48 = vld [vmem:[#allocation42_spill] sm:$0xff]  ;;  %v10501_v1 = vpop.f32.mrf.mxu0  ;;  %v11684_v26 = vld [vmem:[#allocation40_spill] sm:$0xff]  ;;  %v4604_v59 = vld [vmem:[#allocation2 + $0x74] sm:$0x1] }
 0x17e   : > { %v5175_v3 = vrot.slane %v5174_v18, 4  ;;  %v5185_v5 = vrot.slane %v5184_v7, 4  ;;  %v5161_v12 = vrot.slane %v5160_v51, 4  ;;  %v10499_v13 = vadd.f32 %v10363_v24, %v11679_v48  ;;  %11681 = vst [vmem:[#allocation33_spill] sm:$0xff] %v10501_v1  ;;  %v11682_v38 = vld [vmem:[#allocation46_spill] sm:$0xff]  ;;  %v11685_v51 = vld [vmem:[#allocation41_spill] sm:$0xff] }
 0x17f   : > { %v5189_v44 = vrot.slane %v5187_v53, 5  ;;  %v5156_v2 = vsel %vm8812_vm12, %v5151_v16, %v5155_v42  ;;  %v10507_v7 = vadd.f32 %v10385_v58, %v11682_v38  ;;  %v7126_v18 = vrot.slane %v11684_v26, 9  ;;  %v11686_v48 = vld [vmem:[#allocation50_spill] sm:$0xff]  ;;  %v10520_v58 = vpop.f32.mrf.mxu1  ;;  %v10522_v38 = vpop.f32.mrf.mxu0 }
 0x180   : > { %11680 = vst [vmem:[#allocation30_spill] sm:$0xff] %v10499_v13  ;;  %v5877_v10 = vrot.slane %v11685_v51, 5  ;;  %8019 = vmatmul.mubr.bf16.vlgmr.msra.gmra.mxu1 %v10400_v36  ;;  %v5166_v24 = vsel %vm8812_vm12, %v5161_v12, %v5165_v17  ;;  %v10516_v53 = vadd.f32 %v10408_v33, %v11686_v48  ;;  %v5880_v4 = vrot.slane %v4601_v9, 5  ;;  %11689 = vst [vmem:[#allocation45_spill] sm:$0xff] %v10522_v38  ;;  %v11691_v17 = vld [vmem:[#allocation58_spill] sm:$0xff] }
 0x181   : > { %11683 = vst [vmem:[#allocation38_spill] sm:$0xff] %v10507_v7  ;;  %v11688_v42 = vshrl.u32 %v11684_v26, 16  ;;  %v11690_v1 = vcombine.low %v10181_v29, %v10189_v37  ;;  %8022 = vmatprep.mubr.bf16.mxu1 %v7098_v11  ;;  %v5180_v36 = vsel %vm8812_vm12, %v5175_v3, %v11675_v56  ;;  %v5190_v33 = vsel %vm8812_vm12, %v5185_v5, %v5189_v44  ;;  %v10544_v7 = vpop.f32.mrf.mxu1  ;;  %v10546_v5 = vpop.f32.mrf.mxu0 }
 0x182   : > { %11687 = vst [vmem:[#allocation44_spill] sm:$0xff] %v10516_v53  ;;  %v10534_v12 = vadd.f32 %v10416_v0, %v11691_v17  ;;  %v5879_v48 = vrot.slane %v5877_v10, 4  ;;  %v11694_v38 = vshll.u32 %v11684_v26, 16  ;;  %v5201_v11 = vshll.u32 %v11685_v51, 16  ;;  %11696 = vst [vmem:[#allocation48_spill] sm:$0xff] %v10546_v5 }
 0x183   : > { %v5194_v16 = vrot.slane %v11688_v42, 4  ;;  %7999 = vmatmul.mubr.bf16.gmra.mxu0 %v11690_v1  ;;  %v11693_v42 = vcombine.low %v10275_v47, %v10279_v45  ;;  %v11695_v53 = vshrl.u32 %v11685_v51, 16  ;;  %v5211_v3 = vshll.u32 %v4601_v9, 16  ;;  %v10580_v5 = vpop.f32.mrf.mxu0 }
 0x184   : > { %11692 = vst [vmem:[#allocation47_spill] sm:$0xff] %v10534_v12  ;;  %v5197_v1 = vrot.slane %v11694_v38, 5  ;;  %v7100_v0 = vcombine.low %v5156_v2, %v5166_v24  ;;  %v10550_v44 = vsel %vm8352_vm2, %v7126_v18, %v5877_v10  ;;  %v11697_v47 = vrot.slane %v9853_v27, 5  ;;  %v10566_v10 = vpop.f32.mrf.mxu1  ;;  %v11700_v24 = vld [vmem:[#allocation60_spill] sm:$0xff] }
 0x185   : > { %8066 = vmatprep.mubr.bf16.mxu0 %v11693_v42  ;;  %v5207_v56 = vrot.slane %v11695_v53, 4  ;;  %v5887_v26 = vrot.slane %v4604_v59, 5  ;;  %v10556_v38 = vsel %vm8352_vm2, %v5879_v48, %v5880_v4  ;;  %v5203_v53 = vrot.slane %v5201_v11, 5  ;;  %v11702_v4 = vld [vmem:[#allocation55_spill] sm:$0xff] }
 0x186   : > { %v5886_v45 = vrot.slane %v11697_v47, 4  ;;  %v5198_v51 = vor.u32 %v5197_v1, %v5194_v16  ;;  %v11698_v9 = vmov %v11697_v47  ;;  %v11699_v17 = vrot.slane %v9840_v46, 9  ;;  %v11701_v47 = vld [vmem:[#allocation54_spill] sm:$0xff]  ;;  %v11703_v16 = vld [vmem:[#allocation56_spill] sm:$0xff]  ;;  %v11704_v1 = vld [vmem:[#allocation57_spill] sm:$0xff] }
 0x187   : > { %v5213_v18 = vrot.slane %v5211_v3, 5  ;;  %v10570_v42 = vadd.f32 %v10437_v15, %v11700_v24  ;;  %v5222_v48 = vor.u32 %v11702_v4, %v11701_v47  ;;  %v5232_v11 = vor.u32 %v11704_v1, %v11703_v16  ;;  %v11705_v15 = vld [vmem:[#allocation64_spill] sm:$0xff]  ;;  %v11706_v47 = vld [vmem:[#allocation67_spill] sm:$0xff] }
 0x188   : > { %v10564_v2 = vsel %vm8352_vm2, %v11699_v17, %v11698_v9  ;;  %v5199_v27 = vrot.slane %v5198_v51, 4  ;;  %v5208_v12 = vor.u32 %v5207_v56, %v5203_v53  ;;  %v10578_v46 = vsel %vm8352_vm2, %v5886_v45, %v5887_v26  ;;  %v4607_v17 = vld [vmem:[#allocation2 + $0x80] sm:$0x1]  ;;  %8023 = vmatmul.mubr.bf16.gmra.mxu1 %v7099_v41  ;;  %v10592_v51 = vpop.f32.mrf.mxu1  ;;  %v11708_v1 = vld [vmem:[#allocation51_spill] sm:$0xff] }
 0x189   : > { %v5235_v9 = vshll.u32 %v4604_v59, 16  ;;  %v5223_v3 = vrot.slane %v5222_v48, 4  ;;  %v5233_v13 = vrot.slane %v5232_v11, 4  ;;  %v10584_v24 = vadd.f32 %v10460_v40, %v11705_v15  ;;  %8026 = vmatprep.mubr.bf16.mxu1 %v7100_v0  ;;  %v11709_v11 = vld [vmem:[#allocation52_spill] sm:$0xff] }
 0x18a   : > { %v10588_v4 = vadd.f32 %v10483_v55, %v11706_v47  ;;  %v7101_v56 = vcombine.low %v5180_v36, %v5190_v33  ;;  %v5209_v26 = vrot.slane %v5208_v12, 4  ;;  %v11707_v48 = vcombine.low %v10294_v31, %v10307_v39  ;;  %v4610_v47 = vld [vmem:[#allocation2 + $0x8c] sm:$0x1] }
 0x18b   : > { %v5237_v59 = vrot.slane %v5235_v9, 5  ;;  %v7128_v55 = vrot.slane %v11708_v1, 9  ;;  %v5891_v41 = vrot.slane %v11709_v11, 5  ;;  %v5894_v36 = vrot.slane %v4607_v17, 5 }
 0x18c   : > { %8067 = vmatmul.mubr.bf16.vlgmr.msra.gmra.mxu0 %v11707_v48  ;;  %v11710_v33 = vcombine.low %v10359_v30, %v10370_v19  ;;  %v5204_v12 = vsel %vm8812_vm12, %v5199_v27, %v5203_v53  ;;  %v5214_v31 = vsel %vm8812_vm12, %v5209_v26, %v5213_v18  ;;  %v11711_v39 = vshrl.u32 %v11708_v1, 16  ;;  %v10612_v48 = vpop.f32.mrf.mxu0 }
 0x18d   : > { %v11712_v9 = vshll.u32 %v11708_v1, 16  ;;  %v5228_v30 = vsel %vm8812_vm12, %v5223_v3, %v11703_v16  ;;  %v5238_v19 = vsel %vm8812_vm12, %v5233_v13, %v5237_v59  ;;  %v10621_v53 = vsel %vm8352_vm2, %v7128_v55, %v5891_v41 }
 0x18e   : > { %8070 = vmatprep.mubr.bf16.mxu0 %v11710_v33  ;;  %v5242_v0 = vrot.slane %v11711_v39, 4  ;;  %v5893_v18 = vrot.slane %v5891_v41, 4  ;;  %v5249_v26 = vshll.u32 %v11709_v11, 16  ;;  %v11713_v1 = vshrl.u32 %v11709_v11, 16  ;;  %v10628_v40 = vpop.f32.mrf.mxu0 }
 0x18f   : > { %v5245_v15 = vrot.slane %v11712_v9, 5  ;;  %v5259_v39 = vshll.u32 %v4607_v17, 16  ;;  %v10626_v9 = vpop.f32.mrf.mxu1  ;;  %11714 = vst [vmem:[#allocation42_spill] sm:$0xff] %v10628_v40  ;;  %v7102_v16 = vcombine.low %v5204_v12, %v5214_v31  ;;  %v11715_v3 = vrot.slane %v9923_v25, 5  ;;  %v4613_v40 = vld [vmem:[#allocation2 + $0x98] sm:$0x1] }
 0x190   : > { %v5255_v33 = vrot.slane %v11713_v1, 4  ;;  %v10632_v13 = vsel %vm8352_vm2, %v5893_v18, %v5894_v36  ;;  %v5901_v55 = vrot.slane %v4610_v47, 5  ;;  %v7103_v41 = vcombine.low %v5228_v30, %v5238_v19  ;;  %v10646_v31 = vpop.f32.mrf.mxu0  ;;  %v11719_v19 = vld [vmem:[#allocation61_spill] sm:$0xff]  ;;  %v11720_v18 = vld [vmem:[#allocation62_spill] sm:$0xff]  ;;  %8027 = vmatmul.mubr.bf16.gmra.mxu1 %v7101_v56 }
 0x191   : > { %v5246_v27 = vor.u32 %v5245_v15, %v5242_v0  ;;  %v5900_v59 = vrot.slane %v11715_v3, 4  ;;  %v5251_v15 = vrot.slane %v5249_v26, 5  ;;  %v11716_v11 = vmov %v11715_v3  ;;  %v10644_v12 = vpop.f32.mrf.mxu1  ;;  %11718 = vst [vmem:[#allocation46_spill] sm:$0xff] %v10646_v31  ;;  %8030 = vmatprep.mubr.bf16.mxu1 %v7102_v16 }
 0x192   : > { %v11717_v17 = vrot.slane %v9918_v60, 9  ;;  %v5270_v25 = vor.u32 %v11720_v18, %v11719_v19  ;;  %v11722_v60 = vld [vmem:[#allocation66_spill] sm:$0xff]  ;;  %v5283_v31 = vshll.u32 %v4610_v47, 16  ;;  %v11726_v18 = vld [vmem:[#allocation28_spill] sm:$0xff]  ;;  %v10682_v16 = vpop.f32.mrf.mxu0 }
 0x193   : > { %v5247_v0 = vrot.slane %v5246_v27, 4  ;;  %v10652_v30 = vsel %vm8352_vm2, %v5900_v59, %v5901_v55  ;;  %v11721_v27 = vld [vmem:[#allocation65_spill] sm:$0xff]  ;;  %v5256_v3 = vor.u32 %v5255_v33, %v5251_v15  ;;  %v10662_v36 = vpop.f32.mrf.mxu1  ;;  %v11724_v59 = vcombine.low %v10383_v43, %v10394_v49  ;;  %v11727_v43 = vld [vmem:[#allocation31_spill] sm:$0xff]  ;;  %11728 = vst [vmem:[#allocation40_spill] sm:$0xff] %v10682_v16 }
 0x194   : > { %v10642_v1 = vsel %vm8352_vm2, %v11717_v17, %v11716_v11  ;;  %v5280_v26 = vor.u32 %v11722_v60, %v11721_v27  ;;  %v5261_v11 = vrot.slane %v5259_v39, 5  ;;  %v11723_v17 = vld [vmem:[#allocation26_spill] sm:$0xff]  ;;  %v5271_v33 = vrot.slane %v5270_v25, 4 }
 0x195   : > { %v10660_v45 = vadd.f32 %v10520_v58, %v11723_v17  ;;  %8071 = vmatmul.mubr.bf16.gmra.mxu0 %v11724_v59  ;;  %v5252_v55 = vsel %vm8812_vm12, %v5247_v0, %v5251_v15  ;;  %v11725_v58 = vcombine.low %v10456_v63, %v10469_v8  ;;  %v5257_v47 = vrot.slane %v5256_v3, 4  ;;  %v4616_v59 = vld [vmem:[#allocation2 + $0xa4] sm:$0x1] }
 0x196   : > { %v5281_v39 = vrot.slane %v5280_v26, 4  ;;  %v5285_v19 = vrot.slane %v5283_v31, 5  ;;  %v10676_v60 = vadd.f32 %v10544_v7, %v11726_v18  ;;  %v10680_v49 = vadd.f32 %v10566_v10, %v11727_v43  ;;  %v11730_v26 = vld [vmem:[#allocation37_spill] sm:$0xff] }
 0x197   : > { %8074 = vmatprep.mubr.bf16.mxu0 %v11725_v58  ;;  %v7130_v0 = vrot.slane %v9979_v6, 9  ;;  %v5905_v15 = vrot.slane %v9981_v20, 5  ;;  %v5908_v25 = vrot.slane %v4613_v40, 5  ;;  %v11729_v63 = vshrl.u32 %v9979_v6, 16  ;;  %v2205_v58 = vpop.f32.mrf.mxu1 }
 0x198   : > { %v5262_v31 = vsel %vm8812_vm12, %v5257_v47, %v5261_v11  ;;  %v10692_v7 = vadd.f32 %v10592_v51, %v11730_v26  ;;  %v11731_v10 = vshll.u32 %v9979_v6, 16  ;;  %v5297_v17 = vshll.u32 %v9981_v20, 16  ;;  %8031 = vmatmul.mubr.bf16.gmra.mxu1 %v7103_v41 }
 0x199   : > { %v5290_v8 = vrot.slane %v11729_v63, 4  ;;  %v7104_v18 = vcombine.low %v5252_v55, %v5262_v31  ;;  %v5276_v43 = vsel %vm8812_vm12, %v5271_v33, %v11721_v27  ;;  %v5286_v63 = vsel %vm8812_vm12, %v5281_v39, %v5285_v19 }
 0x19a   : > { %v5293_v3 = vrot.slane %v11731_v10, 5  ;;  %v5907_v11 = vrot.slane %v5905_v15, 4  ;;  %v5299_v56 = vrot.slane %v5297_v17, 5  ;;  %v11732_v51 = vshrl.u32 %v9981_v20, 16  ;;  %v10704_v10 = vpop.f32.mrf.mxu0 }
 0x19b   : > { %v5307_v6 = vshll.u32 %v4613_v40, 16  ;;  %v10708_v16 = vsel %vm8352_vm2, %v7130_v0, %v5905_v15  ;;  %v11733_v27 = vrot.slane %v10009_v28, 5  ;;  %v5915_v39 = vrot.slane %v4616_v59, 5  ;;  %v10724_v15 = vpop.f32.mrf.mxu1  ;;  %8034 = vmatprep.mubr.bf16.mxu1 %v7104_v18  ;;  %v11738_v28 = vld [vmem:[#allocation9_spill] sm:$0xff]  ;;  %v11741_v18 = vld [vmem:[#allocation70_spill] sm:$0xff] }
 0x19c   : > { %v5294_v47 = vor.u32 %v5293_v3, %v5290_v8  ;;  %v5303_v26 = vrot.slane %v11732_v51, 4  ;;  %v10712_v55 = vsel %vm8352_vm2, %v5907_v11, %v5908_v25  ;;  %v11735_v31 = vrot.slane %v10001_v54, 9  ;;  %v10726_v25 = vpop.f32.mrf.mxu0  ;;  %v11739_v54 = vld [vmem:[#allocation68_spill] sm:$0xff] }
 0x19d   : > { %v5914_v33 = vrot.slane %v11733_v27, 4  ;;  %v5309_v20 = vrot.slane %v5307_v6, 5  ;;  %v11734_v40 = vmov %v11733_v27  ;;  %11736 = vst [vmem:[#allocation41_spill] sm:$0xff] %v10726_v25  ;;  %v11737_v3 = vcombine.low %v10477_v35, %v10489_v52  ;;  %v4619_v6 = vld [vmem:[#allocation2 + $0xb0] sm:$0x1]  ;;  %v2218_v27 = vpop.f32.mrf.mxu1 }
 0x19e   : > { %v5295_v19 = vrot.slane %v5294_v47, 4  ;;  %v5304_v8 = vor.u32 %v5303_v26, %v5299_v56  ;;  %v10722_v0 = vsel %vm8352_vm2, %v11735_v31, %v11734_v40  ;;  %v7105_v41 = vcombine.low %v5276_v43, %v5286_v63  ;;  %v11742_v43 = vld [vmem:[#allocation5_spill] sm:$0xff] }
 0x19f   : > { %8075 = vmatmul.mubr.bf16.gmra.mxu0 %v11737_v3  ;;  %v10733_v17 = vsel %vm8352_vm2, %v5914_v33, %v5915_v39  ;;  %v5318_v11 = vor.u32 %v11739_v54, %v11738_v28  ;;  %v5331_v47 = vshll.u32 %v4616_v59, 16  ;;  %v11740_v51 = vcombine.low %v10550_v44, %v10556_v38  ;;  %v10746_v33 = vpop.f32.mrf.mxu0  ;;  %v11744_v39 = vld [vmem:[#allocation39_spill] sm:$0xff]  ;;  %v7757_v28 = vpop.f32.mrf.mxu1 }
 0x1a0   : > { %v5300_v35 = vsel %vm8812_vm12, %v5295_v19, %v5299_v56  ;;  %v5305_v52 = vrot.slane %v5304_v8, 4  ;;  %v5328_v63 = vor.u32 %v11742_v43, %v11741_v18  ;;  %11743 = vst [vmem:[#allocation50_spill] sm:$0xff] %v10746_v33  ;;  %v10752_v44 = vadd.f32 %v10626_v9, %v11744_v39  ;;  %v11745_v8 = vld [vmem:[#allocation43_spill] sm:$0xff]  ;;  %8035 = vmatmul.mubr.bf16.gmra.mxu1 %v7105_v41 }
 0x1a1   : > { %8078 = vmatprep.mubr.bf16.mxu0 %v11740_v51  ;;  %v5319_v38 = vrot.slane %v5318_v11, 4  ;;  %v5333_v40 = vrot.slane %v5331_v47, 5  ;;  %v10758_v31 = vadd.f32 %v10644_v12, %v11745_v8  ;;  %v7132_v3 = vrot.slane %v10061_v32, 9  ;;  %v10761_v54 = vpop.f32.mrf.mxu0  ;;  %v4622_v8 = vld [vmem:[#allocation2 + $0xbc] sm:$0x1] }
 0x1a2   : > { %v5310_v56 = vsel %vm8812_vm12, %v5305_v52, %v5309_v20  ;;  %v5329_v19 = vrot.slane %v5328_v63, 4  ;;  %11746 = vst [vmem:[#allocation58_spill] sm:$0xff] %v10761_v54  ;;  %v5919_v11 = vrot.slane %v10063_v50, 5  ;;  %v5922_v47 = vrot.slane %v4619_v6, 5 }
 0x1a3   : > { %v7106_v51 = vcombine.low %v5300_v35, %v5310_v56  ;;  %v5324_v9 = vsel %vm8812_vm12, %v5319_v38, %v11741_v18  ;;  %v11747_v52 = vshrl.u32 %v10061_v32, 16  ;;  %v11748_v43 = vshll.u32 %v10061_v32, 16  ;;  %v10774_v35 = vpop.f32.mrf.mxu1  ;;  %v11749_v56 = vld [vmem:[#allocation49_spill] sm:$0xff]  ;;  %v10785_v33 = vpop.f32.mrf.mxu0 }
 0x1a4   : > { %v5334_v20 = vsel %vm8812_vm12, %v5329_v19, %v5333_v40  ;;  %v5345_v39 = vshll.u32 %v10063_v50, 16  ;;  %v10778_v18 = vadd.f32 %v10662_v36, %v11749_v56  ;;  %v11750_v38 = vld [vmem:[#allocation53_spill] sm:$0xff]  ;;  %v5921_v26 = vrot.slane %v5919_v11, 4 }
 0x1a5   : > { %v5338_v12 = vrot.slane %v11747_v52, 4  ;;  %v5341_v63 = vrot.slane %v11748_v43, 5  ;;  %v10781_v59 = vadd.f32 %v2205_v58, %v11750_v38  ;;  %v11751_v40 = vshrl.u32 %v10063_v50, 16  ;;  %8038 = vmatprep.mubr.bf16.mxu1 %v7106_v51 }
 0x1a6   : > { %v7107_v52 = vcombine.low %v5324_v9, %v5334_v20  ;;  %v5347_v43 = vrot.slane %v5345_v39, 5  ;;  %v5355_v54 = vshll.u32 %v4619_v6, 16  ;;  %v11752_v25 = vcombine.low %v10564_v2, %v10578_v46 }
 0x1a7   : > { %v5351_v19 = vrot.slane %v11751_v40, 4  ;;  %v5342_v32 = vor.u32 %v5341_v63, %v5338_v12  ;;  %v10792_v36 = vsel %vm8352_vm2, %v7132_v3, %v5919_v11  ;;  %v10796_v50 = vsel %vm8352_vm2, %v5921_v26, %v5922_v47  ;;  %v7760_v26 = vpop.f32.mrf.mxu1  ;;  %v10811_v11 = vpop.f32.mrf.mxu0  ;;  %v11759_v63 = vld [vmem:[#allocation74_spill] sm:$0xff]  ;;  %v11761_v40 = vld [vmem:[#allocation59_spill] sm:$0xff] }
 0x1a8   : > { %8079 = vmatmul.mubr.bf16.gmra.mxu0 %v11752_v25  ;;  %v11753_v58 = vrot.slane %v10104_v61, 5  ;;  %v5929_v9 = vrot.slane %v4622_v8, 5  ;;  %v11754_v6 = vcombine.low %v10621_v53, %v10632_v13  ;;  %v5357_v46 = vrot.slane %v5355_v54, 5  ;;  %v11757_v53 = vld [vmem:[#allocation71_spill] sm:$0xff]  ;;  %v11758_v13 = vld [vmem:[#allocation73_spill] sm:$0xff]  ;;  %8039 = vmatmul.mubr.bf16.gmra.mxu1 %v7107_v52 }
 0x1a9   : > { %v5343_v20 = vrot.slane %v5342_v32, 4  ;;  %v5352_v2 = vor.u32 %v5351_v19, %v5347_v43  ;;  %v11756_v3 = vrot.slane %v10095_v34, 9  ;;  %v5366_v12 = vor.u32 %v11758_v13, %v11757_v53  ;;  %v11760_v54 = vld [vmem:[#allocation75_spill] sm:$0xff]  ;;  %v4625_v32 = vld [vmem:[#allocation2 + $0xc8] sm:$0x1]  ;;  %v11780_v34 = vld [vmem:[#allocation12_spill] sm:$0xff] }
 0x1aa   : > { %v5928_v41 = vrot.slane %v11753_v58, 4  ;;  %8082 = vmatprep.mubr.bf16.mxu0 %v11754_v6  ;;  %v11755_v25 = vmov %v11753_v58  ;;  %v5376_v39 = vor.u32 %v11760_v54, %v11759_v63  ;;  %v5379_v61 = vshll.u32 %v4622_v8, 16  ;;  %v2234_v58 = vpop.f32.mrf.mxu1  ;;  %v11762_v53 = vld [vmem:[#allocation63_spill] sm:$0xff] }
 0x1ab   : > { %v10809_v51 = vsel %vm8352_vm2, %v11756_v3, %v11755_v25  ;;  %v5348_v56 = vsel %vm8812_vm12, %v5343_v20, %v5347_v43  ;;  %v5353_v38 = vrot.slane %v5352_v2, 4  ;;  %v10827_v19 = vadd.f32 %v10724_v15, %v11761_v40  ;;  %v4628_v40 = vld [vmem:[#allocation2 + $0xd4] sm:$0x1] }
 0x1ac   : > { %v10815_v47 = vsel %vm8352_vm2, %v5928_v41, %v5929_v9  ;;  %v10829_v41 = vpop.f32.mrf.mxu0  ;;  %v5367_v6 = vrot.slane %v5366_v12, 4  ;;  %v5377_v8 = vrot.slane %v5376_v39, 4  ;;  %v5381_v25 = vrot.slane %v5379_v61, 5  ;;  %v10840_v2 = vpop.f32.mrf.mxu1  ;;  %v11763_v12 = vld [vmem:[#allocation6_spill] sm:$0xff] }
 0x1ad   : > { %v5358_v3 = vsel %vm8812_vm12, %v5353_v38, %v5357_v46  ;;  %v10836_v43 = vadd.f32 %v2218_v27, %v11762_v53  ;;  %v7134_v20 = vrot.slane %v10145_v57, 9  ;;  %v5933_v15 = vrot.slane %v10147_v14, 5 }
 0x1ae   : > { %v7108_v13 = vcombine.low %v5348_v56, %v5358_v3  ;;  %v5372_v54 = vsel %vm8812_vm12, %v5367_v6, %v11759_v63  ;;  %v10846_v39 = vadd.f32 %v7757_v28, %v11763_v12  ;;  %v5936_v61 = vrot.slane %v4625_v32, 5  ;;  %v10848_v46 = vpop.f32.mrf.mxu0  ;;  %v10858_v63 = vpop.f32.mrf.mxu1 }
 0x1af   : > { %v5382_v27 = vsel %vm8812_vm12, %v5377_v8, %v5381_v25  ;;  %v10854_v38 = vsel %vm8352_vm2, %v7134_v20, %v5933_v15  ;;  %v5935_v56 = vrot.slane %v5933_v15, 4  ;;  %v11764_v3 = vshrl.u32 %v10145_v57, 16 }
 0x1b0   : > { %v11765_v28 = vcombine.low %v10642_v1, %v10652_v30  ;;  %8042 = vmatprep.mubr.bf16.mxu1 %v7108_v13  ;;  %v11766_v52 = vshll.u32 %v10145_v57, 16  ;;  %v5393_v8 = vshll.u32 %v10147_v14, 16  ;;  %v11767_v25 = vshrl.u32 %v10147_v14, 16 }
 0x1b1   : > { %v5386_v53 = vrot.slane %v11764_v3, 4  ;;  %v5403_v12 = vshll.u32 %v4625_v32, 16  ;;  %v11768_v15 = vcombine.low %v10708_v16, %v10712_v55  ;;  %v11769_v3 = vld [vmem:[#allocation4_spill] sm:$0xff]  ;;  %v10877_v1 = vsel %vm8352_vm2, %v5935_v56, %v5936_v61 }
 0x1b2   : > { %8083 = vmatmul.mubr.bf16.gmra.mxu0 %v11765_v28  ;;  %v5389_v6 = vrot.slane %v11766_v52, 5  ;;  %v5399_v20 = vrot.slane %v11767_v25, 4  ;;  %v10873_v9 = vadd.f32 %v10774_v35, %v11769_v3  ;;  %v11770_v57 = vrot.slane %v10189_v37, 5  ;;  %v7828_v28 = vpop.f32.mrf.mxu1  ;;  %v10889_v35 = vpop.f32.mrf.mxu0  ;;  %v11779_v37 = vld [vmem:[#allocation78_spill] sm:$0xff] }
 0x1b3   : > { %8086 = vmatprep.mubr.bf16.mxu0 %v11768_v15  ;;  %v5943_v13 = vrot.slane %v4628_v40, 5  ;;  %v7109_v14 = vcombine.low %v5372_v54, %v5382_v27  ;;  %v5395_v32 = vrot.slane %v5393_v8, 5  ;;  %v11772_v16 = vrot.slane %v10181_v29, 9  ;;  %11774 = vst [vmem:[#allocation54_spill] sm:$0xff] %v10889_v35  ;;  %v11776_v54 = vld [vmem:[#allocation17_spill] sm:$0xff]  ;;  %v11777_v27 = vld [vmem:[#allocation76_spill] sm:$0xff] }
 0x1b4   : > { %v5942_v30 = vrot.slane %v11770_v57, 4  ;;  %v5390_v52 = vor.u32 %v5389_v6, %v5386_v53  ;;  %v11771_v25 = vmov %v11770_v57  ;;  %v5414_v53 = vor.u32 %v11777_v27, %v11776_v54  ;;  %v11778_v6 = vld [vmem:[#allocation77_spill] sm:$0xff]  ;;  %v3105_v29 = vpop.f32.mrf.mxu1 }
 0x1b5   : > { %v10887_v55 = vsel %vm8352_vm2, %v11772_v16, %v11771_v25  ;;  %v5424_v8 = vor.u32 %v11779_v37, %v11778_v6  ;;  %v5400_v3 = vor.u32 %v5399_v20, %v5395_v32  ;;  %v5405_v57 = vrot.slane %v5403_v12, 5  ;;  %v10901_v16 = vpop.f32.mrf.mxu0  ;;  %8043 = vmatmul.mubr.bf16.gmra.mxu1 %v7109_v14 }
 0x1b6   : > { %11773 = vst [vmem:[#allocation60_spill] sm:$0xff] %v10887_v55  ;;  %v10895_v56 = vsel %vm8352_vm2, %v5942_v30, %v5943_v13  ;;  %v5391_v15 = vrot.slane %v5390_v52, 4  ;;  %v5427_v25 = vshll.u32 %v4628_v40, 16  ;;  %v10906_v21 = vadd.f32 %v7760_v26, %v11780_v34  ;;  %v7829_v35 = vpop.f32.mrf.mxu1  ;;  %v11781_v52 = vld [vmem:[#allocation72_spill] sm:$0xff]  ;;  %v11783_v26 = vld [vmem:[#allocation69_spill] sm:$0xff]  ;;  %v11787_v55 = vld [vmem:[#allocation10_spill] sm:$0xff] }
 0x1b7   : > { %11775 = vst [vmem:[#allocation55_spill] sm:$0xff] %v10895_v56  ;;  %v5415_v30 = vrot.slane %v5414_v53, 4  ;;  %v5425_v13 = vrot.slane %v5424_v8, 4  ;;  %v5401_v27 = vrot.slane %v5400_v3, 4  ;;  %v2277_v20 = vadd.f32 %v2234_v58, %v11781_v52  ;;  %v10911_v12 = vpop.f32.mrf.mxu0  ;;  %v11784_v53 = vld [vmem:[#allocation23_spill] sm:$0xff]  ;;  %v11785_v8 = vld [vmem:[#allocation8_spill] sm:$0xff] }
 0x1b8   : > { %v5396_v54 = vsel %vm8812_vm12, %v5391_v15, %v5395_v32  ;;  %v5429_v37 = vrot.slane %v5427_v25, 5  ;;  %11782 = vst [vmem:[#allocation56_spill] sm:$0xff] %v10911_v12  ;;  %v2768_v34 = vadd.f32 %v11783_v26, %v10321_v23  ;;  %v2766_v61 = vadd.f32 %v11785_v8, %v11784_v53  ;;  %v11786_v56 = vld [vmem:[#allocation21_spill] sm:$0xff]  ;;  %v3108_v15 = vpop.f32.mrf.mxu1  ;;  %v11789_v25 = vld [vmem:[#allocation18_spill] sm:$0xff]  ;;  %v11791_v52 = vld [vmem:[#allocation19_spill] sm:$0xff] }
 0x1b9   : > { %v5420_v40 = vsel %vm8812_vm12, %v5415_v30, %v11778_v6  ;;  %v2769_v32 = vadd.f32 %v11787_v55, %v11786_v56  ;;  %v11788_v58 = vcombine.low %v10722_v0, %v10733_v17  ;;  %v5406_v14 = vsel %vm8812_vm12, %v5401_v27, %v5405_v57  ;;  %v3878_v3 = vpop.f32.mrf.mxu0  ;;  %v11790_v23 = vld [vmem:[#allocation13_spill] sm:$0xff]  ;;  %v11792_v26 = vld [vmem:[#allocation15_spill] sm:$0xff]  ;;  %v11795_v12 = vld [vmem:[#allocation22_spill] sm:$0xff] }
 0x1ba   : > { %v5430_v6 = vsel %vm8812_vm12, %v5425_v13, %v5429_v37  ;;  %v2767_v30 = vadd.f32 %v11790_v23, %v11789_v25  ;;  %v2772_v53 = vadd.f32 %v11792_v26, %v11791_v52  ;;  %v11793_v55 = vcombine.low %v10792_v36, %v10796_v50  ;;  %v11794_v0 = vld [vmem:[#allocation11_spill] sm:$0xff]  ;;  %v7832_v27 = vpop.f32.mrf.mxu1  ;;  %v11796_v25 = vld [vmem:[#allocation16_spill] sm:$0xff]  ;;  %v11797_v26 = vld [vmem:[#allocation14_spill] sm:$0xff] }
 0x1bb   : > { %8087 = vmatmul.mubr.bf16.gmra.mxu0 %v11788_v58  ;;  %v7110_v56 = vcombine.low %v5396_v54, %v5406_v14  ;;  %v2280_v17 = vadd.f32 %v10840_v2, %v11794_v0  ;;  %v3234_v8 = vadd.f32 %v7828_v28, %v2768_v34  ;;  %v3232_v57 = vadd.f32 %v3105_v29, %v2766_v61  ;;  %v7880_v37 = vpop.f32.mrf.mxu0  ;;  %v11798_v54 = vld [vmem:[#allocation79_spill] sm:$0xff]  ;;  %v11799_v2 = vld [vmem:[#allocation32_spill] sm:$0xff]  ;;  %v11801_v34 = vld [vmem:[#allocation30_spill] sm:$0xff] }
 0x1bc   : > { %8090 = vmatprep.mubr.bf16.mxu0 %v11793_v55  ;;  %v3235_v22 = vadd.f32 %v7829_v35, %v2769_v32  ;;  %v3233_v13 = vadd.f32 %v3108_v15, %v2767_v30  ;;  %v3238_v58 = vadd.f32 %v7832_v27, %v2772_v53  ;;  %v2770_v23 = vadd.f32 %v11796_v25, %v11795_v12  ;;  %v3121_v50 = vpop.f32.mrf.mxu1  ;;  %v11800_v28 = vld [vmem:[#allocation80_spill] sm:$0xff]  ;;  %v11802_v32 = vld [vmem:[#allocation81_spill] sm:$0xff]  ;;  %v11803_v30 = vld [vmem:[#allocation38_spill] sm:$0xff] }
 0x1bd   : > { %8046 = vmatprep.mubr.bf16.mxu1 %v7110_v56  ;;  %v7111_v52 = vcombine.low %v5420_v40, %v5430_v6  ;;  %v2278_v36 = vadd.f32 %v10858_v63, %v11797_v26  ;;  %v2773_v14 = vadd.f32 %v11798_v54, %v10432_v62  ;;  %v2771_v61 = vadd.f32 %v11800_v28, %v11799_v2  ;;  %v3891_v29 = vpop.f32.mrf.mxu0  ;;  %v11804_v53 = vld [vmem:[#allocation29_spill] sm:$0xff]  ;;  %v11805_v40 = vld [vmem:[#allocation20_spill] sm:$0xff]  ;;  %v11808_v62 = vld [vmem:[#allocation34_spill] sm:$0xff] }
 0x1be   : > { %v3236_v35 = vadd.f32 %v3121_v50, %v2770_v23  ;;  %v2776_v15 = vadd.f32 %v11802_v32, %v11801_v34  ;;  %v2774_v12 = vadd.f32 %v11804_v53, %v11803_v30  ;;  %v2780_v6 = vadd.f32 %v11805_v40, %v10570_v42  ;;  %v7833_v55 = vpop.f32.mrf.mxu1  ;;  %v11806_v63 = vld [vmem:[#allocation44_spill] sm:$0xff]  ;;  %v11807_v56 = vld [vmem:[#allocation25_spill] sm:$0xff]  ;;  %v11809_v25 = vld [vmem:[#allocation35_spill] sm:$0xff] }
 0x1bf   : > { %v2777_v0 = vadd.f32 %v11807_v56, %v11806_v63  ;;  %v2778_v27 = vadd.f32 %v11808_v62, %v10584_v24  ;;  %v2781_v26 = vadd.f32 %v11809_v25, %v10588_v4  ;;  %v11810_v23 = vld [vmem:[#allocation33_spill] sm:$0xff]  ;;  %v7881_v54 = vpop.f32.mrf.mxu0  ;;  %v3239_v2 = vadd.f32 %v7833_v55, %v2773_v14  ;;  %v11812_v42 = vld [vmem:[#allocation48_spill] sm:$0xff]  ;;  %8047 = vmatmul.mubr.bf16.gmra.mxu1 %v7111_v52  ;;  %v11813_v14 = vld [vmem:[#allocation42_spill] sm:$0xff] }
 0x1c0   : > { %v10960_v50 = vadd.f32 %v11810_v23, %v10660_v45  ;;  %v11811_v28 = vld [vmem:[#allocation45_spill] sm:$0xff]  ;;  %v10968_v32 = vadd.f32 %v11812_v42, %v10680_v49  ;;  %v10972_v24 = vadd.f32 %v10580_v5, %v10692_v7  ;;  %v3124_v4 = vpop.f32.mrf.mxu1  ;;  %v10976_v45 = vadd.f32 %v10612_v48, %v10752_v44  ;;  %v11815_v49 = vld [vmem:[#allocation40_spill] sm:$0xff]  ;;  %v11823_v25 = vld [vmem:[#allocation47_spill] sm:$0xff] }
 0x1c1   : > { %v10964_v34 = vadd.f32 %v11811_v28, %v10676_v60  ;;  %v10980_v30 = vadd.f32 %v11813_v14, %v10758_v31  ;;  %v11814_v60 = vld [vmem:[#allocation46_spill] sm:$0xff]  ;;  %v10988_v40 = vadd.f32 %v11815_v49, %v10781_v59  ;;  %v11816_v5 = vcombine.low %v10809_v51, %v10815_v47  ;;  %v3894_v7 = vpop.f32.mrf.mxu0  ;;  %v11817_v44 = vld [vmem:[#allocation41_spill] sm:$0xff]  ;;  %v11824_v23 = vld [vmem:[#allocation24_spill] sm:$0xff] }
 0x1c2   : > { %v10984_v53 = vadd.f32 %v11814_v60, %v10778_v18  ;;  %v3237_v52 = vadd.f32 %v3124_v4, %v2771_v61  ;;  %v10995_v48 = vadd.f32 %v10704_v10, %v10827_v19  ;;  %v10999_v31 = vadd.f32 %v11817_v44, %v10836_v43  ;;  %v11818_v18 = vld [vmem:[#allocation50_spill] sm:$0xff]  ;;  %v7836_v51 = vpop.f32.mrf.mxu1  ;;  %v11828_v42 = vld [vmem:[#allocation7_spill] sm:$0xff] }
 0x1c3   : > { %8091 = vmatmul.mubr.bf16.gmra.mxu0 %v11816_v5  ;;  %v11003_v55 = vadd.f32 %v11818_v18, %v10846_v39  ;;  %v11819_v59 = vcombine.low %v10854_v38, %v10877_v1  ;;  %v11820_v47 = vld [vmem:[#allocation58_spill] sm:$0xff]  ;;  %v11014_v10 = vadd.f32 %v10785_v33, %v10906_v21  ;;  %v11017_v19 = vadd.f32 %v10811_v11, %v2277_v20  ;;  %v7884_v56 = vpop.f32.mrf.mxu0  ;;  %v11822_v33 = vld [vmem:[#allocation56_spill] sm:$0xff]  ;;  %v11829_v4 = vld [vmem:[#allocation27_spill] sm:$0xff] }
 0x1c4   : > { %v11010_v61 = vadd.f32 %v11820_v47, %v10873_v9  ;;  %v11020_v43 = vadd.f32 %v10829_v41, %v2280_v17  ;;  %v3242_v39 = vadd.f32 %v7836_v51, %v2776_v15  ;;  %v11023_v63 = vadd.f32 %v10848_v46, %v2278_v36  ;;  %v11821_v38 = vld [vmem:[#allocation54_spill] sm:$0xff]  ;;  %v3137_v62 = vpop.f32.mrf.mxu1  ;;  %v11830_v18 = vld [vmem:[#allocation36_spill] sm:$0xff] }
 0x1c5   : > { %8094 = vmatprep.mubr.bf16.mxu0 %v11819_v59  ;;  %v11026_v1 = vadd.f32 %v11821_v38, %v3234_v8  ;;  %v11029_v9 = vadd.f32 %v10901_v16, %v3232_v57  ;;  %v11032_v21 = vadd.f32 %v11822_v33, %v3235_v22  ;;  %v11034_v11 = vadd.f32 %v3878_v3, %v3233_v13  ;;  %v3907_v16 = vpop.f32.mrf.mxu0 }
 0x1c6   : > { %v11036_v20 = vadd.f32 %v7880_v37, %v3238_v58  ;;  %v11038_v41 = vadd.f32 %v3891_v29, %v3236_v35  ;;  %v3240_v17 = vadd.f32 %v3137_v62, %v2774_v12  ;;  %v11040_v46 = vadd.f32 %v7881_v54, %v3239_v2  ;;  %v7837_v57 = vpop.f32.mrf.mxu1  ;;  %v11825_v37 = vld [vmem:[#allocation60_spill] sm:$0xff]  ;;  %v11826_v58 = vld [vmem:[#allocation55_spill] sm:$0xff] }
 0x1c7   : > { %v11042_v36 = vadd.f32 %v3894_v7, %v3237_v52  ;;  %v11044_v8 = vadd.f32 %v7884_v56, %v3242_v39  ;;  %v3243_v15 = vadd.f32 %v7837_v57, %v2777_v0  ;;  %v2775_v22 = vadd.f32 %v11824_v23, %v11823_v25  ;;  %v7885_v3 = vpop.f32.mrf.mxu0 }
 0x1c8   : > { %v11048_v28 = vadd.f32 %v3907_v16, %v3240_v17  ;;  %v3140_v13 = vpop.f32.mrf.mxu1  ;;  %v11827_v29 = vcombine.low %v11825_v37, %v11826_v58  ;;  %v2262_v14 = vadd.f32 %v11829_v4, %v11828_v42 }
 0x1c9   : > { %v3241_v35 = vadd.f32 %v3140_v13, %v2775_v22  ;;  %v11053_v12 = vadd.f32 %v7885_v3, %v3243_v15  ;;  %v3910_v54 = vpop.f32.mrf.mxu0 }
 0x1ca   : > { %v7840_v2 = vpop.f32.mrf.mxu1  ;;  %v2779_v59 = vadd.f32 %v11830_v18, %v2262_v14 }
 0x1cb   : > { %8095 = vmatmul.mubr.bf16.gmra.mxu0 %v11827_v29  ;;  %v3246_v0 = vadd.f32 %v7840_v2, %v2780_v6  ;;  %v11057_v60 = vadd.f32 %v3910_v54, %v3241_v35  ;;  %v7888_v7 = vpop.f32.mrf.mxu0 }
 0x1cc   : > { %v3153_v49 = vpop.f32.mrf.mxu1 }
 0x1cd   : > { %v3244_v5 = vadd.f32 %v3153_v49, %v2778_v27  ;;  %v11060_v51 = vadd.f32 %v7888_v7, %v3246_v0  ;;  %v3923_v47 = vpop.f32.mrf.mxu0 }
 0x1ce   : > { %v7841_v52 = vpop.f32.mrf.mxu1 }
 0x1cf   : > { %v3247_v44 = vadd.f32 %v7841_v52, %v2781_v26  ;;  %v11062_v56 = vadd.f32 %v3923_v47, %v3244_v5  ;;  %v7889_v62 = vpop.f32.mrf.mxu0 }
 0x1d0   : > { %v3156_v39 = vpop.f32.mrf.mxu1 }
 0x1d1   : > { %v3245_v38 = vadd.f32 %v3156_v39, %v2779_v59  ;;  %v11065_v17 = vadd.f32 %v7889_v62, %v3247_v44  ;;  %v3926_v16 = vpop.f32.mrf.mxu0 }
 0x1d2   : > { %v7844_v33 = vpop.f32.mrf.mxu1 }
 0x1d3   : > { %v3250_v6 = vadd.f32 %v7844_v33, %v10960_v50  ;;  %v11068_v26 = vadd.f32 %v3926_v16, %v3245_v38  ;;  %v7892_v15 = vpop.f32.mrf.mxu0 }
 0x1d4   : > { %v3169_v27 = vpop.f32.mrf.mxu1 }
 0x1d5   : > { %v3248_v57 = vadd.f32 %v3169_v27, %v10964_v34  ;;  %v11071_v22 = vadd.f32 %v7892_v15, %v3250_v6  ;;  %v3939_v3 = vpop.f32.mrf.mxu0 }
 0x1d6   : > { %v7845_v25 = vpop.f32.mrf.mxu1 }
 0x1d7   : > { %v3251_v23 = vadd.f32 %v7845_v25, %v10968_v32  ;;  %v11074_v58 = vadd.f32 %v3939_v3, %v3248_v57  ;;  %v7893_v50 = vpop.f32.mrf.mxu0 }
 0x1d8   : > { %v3172_v13 = vpop.f32.mrf.mxu1 }
 0x1d9   : > { %v3249_v37 = vadd.f32 %v3172_v13, %v10972_v24  ;;  %v11077_v54 = vadd.f32 %v7893_v50, %v3251_v23  ;;  %v3942_v34 = vpop.f32.mrf.mxu0 }
 0x1da   : > { %v7848_v29 = vpop.f32.mrf.mxu1 }
 0x1db   : > { %v3254_v35 = vadd.f32 %v7848_v29, %v10976_v45  ;;  %v11080_v4 = vadd.f32 %v3942_v34, %v3249_v37  ;;  %v7896_v0 = vpop.f32.mrf.mxu0 }
 0x1dc   : > { %v3185_v2 = vpop.f32.mrf.mxu1 }
 0x1dd   : > { %v3252_v42 = vadd.f32 %v3185_v2, %v10980_v30  ;;  %v11084_v5 = vadd.f32 %v7896_v0, %v3254_v35  ;;  %v3955_v7 = vpop.f32.mrf.mxu0 }
 0x1de   : > { %v7849_v32 = vpop.f32.mrf.mxu1 }
 0x1df   : > { %v3255_v14 = vadd.f32 %v7849_v32, %v10984_v53  ;;  %v11087_v44 = vadd.f32 %v3955_v7, %v3252_v42  ;;  %v7897_v18 = vpop.f32.mrf.mxu0 }
 0x1e0   : > { %v3188_v49 = vpop.f32.mrf.mxu1 }
 0x1e1   : > { %v3253_v24 = vadd.f32 %v3188_v49, %v10988_v40  ;;  %11831 = vst [vmem:[#allocation57_spill] sm:$0xff] %v11087_v44  ;;  %v11090_v47 = vadd.f32 %v7897_v18, %v3255_v14  ;;  %v3958_v39 = vpop.f32.mrf.mxu0 }
 0x1e2   : > { %v7852_v52 = vpop.f32.mrf.mxu1 }
 0x1e3   : > { %v3258_v45 = vadd.f32 %v7852_v52, %v10995_v48  ;;  %11832 = vst [vmem:[#allocation64_spill] sm:$0xff] %v11090_v47  ;;  %v11093_v62 = vadd.f32 %v3958_v39, %v3253_v24  ;;  %v7900_v40 = vpop.f32.mrf.mxu0 }
 0x1e4   : > { %v3201_v59 = vpop.f32.mrf.mxu1 }
 0x1e5   : > { %v3256_v30 = vadd.f32 %v3201_v59, %v10999_v31  ;;  %11833 = vst [vmem:[#allocation67_spill] sm:$0xff] %v11093_v62  ;;  %v11096_v16 = vadd.f32 %v7900_v40, %v3258_v45  ;;  %v3971_v48 = vpop.f32.mrf.mxu0 }
 0x1e6   : > { %v7853_v53 = vpop.f32.mrf.mxu1 }
 0x1e7   : > { %v3259_v38 = vadd.f32 %v7853_v53, %v11003_v55  ;;  %v11098_v27 = vadd.f32 %v3971_v48, %v3256_v30  ;;  %v7901_v57 = vpop.f32.mrf.mxu0 }
 0x1e8   : > { %v3204_v33 = vpop.f32.mrf.mxu1 }
 0x1e9   : > { %v3257_v6 = vadd.f32 %v3204_v33, %v11010_v61  ;;  %11834 = vst [vmem:[#allocation51_spill] sm:$0xff] %v11098_v27  ;;  %v11100_v15 = vadd.f32 %v7901_v57, %v3259_v38  ;;  %v3974_v31 = vpop.f32.mrf.mxu0 }
 0x1eb   : > { %11835 = vst [vmem:[#allocation52_spill] sm:$0xff] %v11100_v15  ;;  %v11102_v25 = vadd.f32 %v3974_v31, %v3257_v6 }
 0x1ed   : > { %11836 = vst [vmem:[#allocation61_spill] sm:$0xff] %v11102_v25 }
 0x1f4   : > { %v7856_v23 = vpop.f32.mrf.mxu1 }
 0x1f5   : > { %v3262_v55 = vadd.f32 %v7856_v23, %v11014_v10 }
 0x1f6   : > { %v3217_v3 = vpop.f32.mrf.mxu1 }
 0x1f7   : > { %v3260_v13 = vadd.f32 %v3217_v3, %v11017_v19 }
 0x1f8   : > { %v7857_v37 = vpop.f32.mrf.mxu1 }
 0x1f9   : > { %v3263_v61 = vadd.f32 %v7857_v37, %v11020_v43 }
 0x1fa   : > { %v3220_v50 = vpop.f32.mrf.mxu1 }
 0x1fb   : > { %v3261_v29 = vadd.f32 %v3220_v50, %v11023_v63 }
 0x1fc   : > { %v7924_v35 = vpop.f32.mrf.mxu1 }
 0x1fd   : > { %v7904_v34 = vpop.f32.mrf.mxu0  ;;  %v4518_v2 = vadd.f32 %v7924_v35, %v11026_v1 }
 0x1fe   : > { %v4389_v42 = vpop.f32.mrf.mxu1  ;;  %v11109_v32 = vadd.f32 %v7904_v34, %v3262_v55 }
 0x1ff   : > { %v3987_v14 = vpop.f32.mrf.mxu0  ;;  %v4516_v0 = vadd.f32 %v4389_v42, %v11029_v9 }
 0x200   : > { %v11112_v10 = vpop.f32.mrf.mxu1  ;;  %v11114_v49 = vadd.f32 %v3987_v14, %v3260_v13 }
 0x201   : > { %v7905_v19 = vpop.f32.mrf.mxu0 }
 0x202   : > { %11837 = vst [vmem:[#allocation62_spill] sm:$0xff] %v11114_v49  ;;  %v11116_v24 = vpop.f32.mrf.mxu1  ;;  %v11118_v43 = vadd.f32 %v7905_v19, %v3263_v61 }
 0x203   : > { %v3990_v63 = vpop.f32.mrf.mxu0 }
 0x204   : > { %11838 = vst [vmem:[#allocation65_spill] sm:$0xff] %v11118_v43  ;;  %v7928_v7 = vpop.f32.mrf.mxu1  ;;  %v11120_v52 = vadd.f32 %v3990_v63, %v3261_v29 }
 0x205   : > { %v7972_v1 = vpop.f32.mrf.mxu0  ;;  %v4522_v45 = vadd.f32 %v7928_v7, %v11036_v20 }
 0x206   : > { %11839 = vst [vmem:[#allocation66_spill] sm:$0xff] %v11120_v52  ;;  %v11123_v18 = vpop.f32.mrf.mxu1  ;;  %v11125_v59 = vadd.f32 %v7972_v1, %v4518_v2 }
 0x207   : > { %v4856_v9 = vpop.f32.mrf.mxu0 }
 0x208   : > { %v11127_v30 = vpop.f32.mrf.mxu1  ;;  %v11129_v39 = vadd.f32 %v4856_v9, %v4516_v0 }
 0x209   : > { %v11131_v53 = vpop.f32.mrf.mxu0 }
 0x20a   : > { %v11133_v38 = vpop.f32.mrf.mxu1 }
 0x20b   : > { %v11135_v40 = vpop.f32.mrf.mxu0 }
 0x20c   : > { %v7932_v33 = vpop.f32.mrf.mxu1 }
 0x20d   : > { %v7976_v6 = vpop.f32.mrf.mxu0  ;;  %v4526_v48 = vadd.f32 %v7932_v33, %v11044_v8 }
 0x20e   : > { %v11138_v20 = vpop.f32.mrf.mxu1  ;;  %v11140_v57 = vadd.f32 %v7976_v6, %v4522_v45 }
 0x20f   : > { %v11142_v31 = vpop.f32.mrf.mxu0 }
 0x210   : > { %v11144_v23 = vpop.f32.mrf.mxu1 }
 0x211   : > { %v11146_v55 = vpop.f32.mrf.mxu0 }
 0x212   : > { %v11148_v3 = vpop.f32.mrf.mxu1 }
 0x213   : > { %v11150_v13 = vpop.f32.mrf.mxu0 }
 0x215   : > { %v7936_v37 = vpop.f32.mrf.mxu1  ;;  %v7980_v61 = vpop.f32.mrf.mxu0 }
 0x216   : > { %v4530_v50 = vadd.f32 %v7936_v37, %v11060_v51  ;;  %v11155_v8 = vadd.f32 %v7980_v61, %v4526_v48 }
 0x217   : > { %v11153_v29 = vpop.f32.mrf.mxu1  ;;  %v11157_v35 = vpop.f32.mrf.mxu0 }
 0x219   : > { %v11159_v34 = vpop.f32.mrf.mxu1  ;;  %v11161_v2 = vpop.f32.mrf.mxu0 }
 0x21b   : > { %v11163_v42 = vpop.f32.mrf.mxu1  ;;  %v11165_v14 = vpop.f32.mrf.mxu0 }
 0x21d   : > { %v7940_v0 = vpop.f32.mrf.mxu1  ;;  %v7984_v19 = vpop.f32.mrf.mxu0 }
 0x21e   : > { %v4534_v63 = vadd.f32 %v7940_v0, %v11071_v22  ;;  %v11170_v51 = vadd.f32 %v7984_v19, %v4530_v50 }
 0x21f   : > { %v11168_v7 = vpop.f32.mrf.mxu1  ;;  %v11172_v1 = vpop.f32.mrf.mxu0 }
 0x221   : > { %v11174_v45 = vpop.f32.mrf.mxu1  ;;  %v11176_v9 = vpop.f32.mrf.mxu0 }
 0x223   : > { %v11178_v33 = vpop.f32.mrf.mxu1  ;;  %v11180_v6 = vpop.f32.mrf.mxu0 }
 0x225   : > { %v7944_v48 = vpop.f32.mrf.mxu1 }
 0x226   : > { %v7988_v37 = vpop.f32.mrf.mxu0  ;;  %v4538_v61 = vadd.f32 %v7944_v48, %v11084_v5 }
 0x227   : > { %v11183_v52 = vpop.f32.mrf.mxu1  ;;  %v11185_v22 = vadd.f32 %v7988_v37, %v4534_v63 }
 0x228   : > { %11840 = vst [vmem:[#allocation26_spill] sm:$0xff] %v11183_v52  ;;  %v11187_v50 = vpop.f32.mrf.mxu0 }
 0x229   : > { %11841 = vst [vmem:[#allocation28_spill] sm:$0xff] %v11185_v22  ;;  %v11189_v0 = vpop.f32.mrf.mxu1 }
 0x22a   : > { %11842 = vst [vmem:[#allocation31_spill] sm:$0xff] %v11189_v0  ;;  %v11191_v19 = vpop.f32.mrf.mxu0 }
 0x22b   : > { %v11193_v43 = vpop.f32.mrf.mxu1 }
 0x22c   : > { %11843 = vst [vmem:[#allocation37_spill] sm:$0xff] %v11193_v43  ;;  %v11195_v49 = vpop.f32.mrf.mxu0 }
 0x22f   : > { %v7948_v25 = vpop.f32.mrf.mxu1 }
 0x230   : > { %v7992_v15 = vpop.f32.mrf.mxu0  ;;  %v4542_v27 = vadd.f32 %v7948_v25, %v11096_v16 }
 0x231   : > { %v11198_v62 = vpop.f32.mrf.mxu1  ;;  %v11200_v5 = vadd.f32 %v7992_v15, %v4538_v61 }
 0x232   : > { %11844 = vst [vmem:[#allocation9_spill] sm:$0xff] %v11198_v62  ;;  %v11202_v63 = vpop.f32.mrf.mxu0 }
 0x233   : > { %11845 = vst [vmem:[#allocation68_spill] sm:$0xff] %v11200_v5  ;;  %v11204_v48 = vpop.f32.mrf.mxu1 }
 0x234   : > { %11846 = vst [vmem:[#allocation70_spill] sm:$0xff] %v11204_v48  ;;  %v11206_v37 = vpop.f32.mrf.mxu0 }
 0x235   : > { %11847 = vst [vmem:[#allocation5_spill] sm:$0xff] %v11206_v37  ;;  %v11208_v0 = vpop.f32.mrf.mxu1 }
 0x236   : > { %11848 = vst [vmem:[#allocation39_spill] sm:$0xff] %v11208_v0  ;;  %v11210_v47 = vpop.f32.mrf.mxu0 }
 0x237   : > { %11849 = vst [vmem:[#allocation43_spill] sm:$0xff] %v11210_v47 }
 0x238   : > { %v7952_v43 = vpop.f32.mrf.mxu1 }
 0x239   : > { %v4546_v44 = vadd.f32 %v7952_v43, %v11109_v32 }
 0x23a   : > { %v7996_v52 = vpop.f32.mrf.mxu0  ;;  %v11213_v22 = vpop.f32.mrf.mxu1 }
 0x23b   : > { %11850 = vst [vmem:[#allocation49_spill] sm:$0xff] %v11213_v22  ;;  %v11215_v16 = vadd.f32 %v7996_v52, %v4542_v27  ;;  %v4519_v27 = vadd.f32 %v11112_v10, %v11032_v21 }
 0x23c   : > { %v11217_v15 = vpop.f32.mrf.mxu0  ;;  %v11219_v25 = vpop.f32.mrf.mxu1 }
 0x23d   : > { %11851 = vst [vmem:[#allocation53_spill] sm:$0xff] %v11215_v16  ;;  %11852 = vst [vmem:[#allocation71_spill] sm:$0xff] %v11217_v15  ;;  %v4986_v16 = vadd.f32 %v11131_v53, %v4519_v27 }
 0x23e   : > { %11853 = vst [vmem:[#allocation73_spill] sm:$0xff] %v11219_v25  ;;  %v11221_v61 = vpop.f32.mrf.mxu0  ;;  %v11223_v48 = vpop.f32.mrf.mxu1  ;;  %v4517_v25 = vadd.f32 %v11116_v24, %v11034_v11  ;;  %v4523_v11 = vadd.f32 %v11127_v30, %v11040_v46 }
 0x23f   : > { %11854 = vst [vmem:[#allocation74_spill] sm:$0xff] %v11221_v61  ;;  %11855 = vst [vmem:[#allocation75_spill] sm:$0xff] %v11223_v48 }
 0x240   : > { %v11225_v62 = vpop.f32.mrf.mxu0  ;;  %v8020_v0 = vpop.f32.mrf.mxu1  ;;  %v4990_v30 = vadd.f32 %v11146_v55, %v4523_v11  ;;  %v4527_v55 = vadd.f32 %v11144_v23, %v11053_v12 }
 0x241   : > { %11856 = vst [vmem:[#allocation59_spill] sm:$0xff] %v11225_v62 }
 0x242   : > { %v5626_v47 = vpop.f32.mrf.mxu1 }
 0x243   : > { %v8000_v5 = vpop.f32.mrf.mxu0  ;;  %v5753_v21 = vadd.f32 %v5626_v47, %v11129_v39  ;;  %v4521_v47 = vadd.f32 %v11133_v38, %v11042_v36 }
 0x244   : > { %v11227_v37 = vadd.f32 %v8000_v5, %v4546_v44  ;;  %v8021_v43 = vpop.f32.mrf.mxu1  ;;  %v4520_v44 = vadd.f32 %v11123_v18, %v11038_v41 }
 0x245   : > { %v11229_v32 = vpop.f32.mrf.mxu0  ;;  %v5756_v10 = vadd.f32 %v8021_v43, %v4986_v16 }
 0x246   : > { %11857 = vst [vmem:[#allocation63_spill] sm:$0xff] %v11227_v37  ;;  %11858 = vst [vmem:[#allocation6_spill] sm:$0xff] %v11229_v32  ;;  %v5629_v22 = vpop.f32.mrf.mxu1  ;;  %v5755_v37 = vadd.f32 %v8020_v0, %v11125_v59  ;;  %v4987_v18 = vadd.f32 %v11142_v31, %v4520_v44  ;;  %v4524_v44 = vadd.f32 %v11138_v20, %v11048_v28 }
 0x247   : > { %v11233_v52 = vpop.f32.mrf.mxu0 }
 0x248   : > { %11859 = vst [vmem:[#allocation4_spill] sm:$0xff] %v11233_v52  ;;  %v8024_v62 = vpop.f32.mrf.mxu1  ;;  %v4984_v52 = vadd.f32 %v11135_v40, %v4517_v25 }
 0x249   : > { %v11237_v48 = vpop.f32.mrf.mxu0 }
 0x24a   : > { %11860 = vst [vmem:[#allocation17_spill] sm:$0xff] %v11237_v48  ;;  %v5642_v32 = vpop.f32.mrf.mxu1  ;;  %v5754_v48 = vadd.f32 %v5629_v22, %v4984_v52 }
 0x24b   : > { %v5757_v22 = vadd.f32 %v5642_v32, %v4987_v18  ;;  %v4988_v32 = vadd.f32 %v11150_v13, %v4521_v47  ;;  %v4991_v13 = vadd.f32 %v11157_v35, %v4524_v44  ;;  %v4528_v35 = vadd.f32 %v11153_v29, %v11062_v56 }
 0x24c   : > { %v8068_v5 = vpop.f32.mrf.mxu0  ;;  %v8025_v53 = vpop.f32.mrf.mxu1 }
 0x24d   : > { %v6269_v61 = vadd.f32 %v8068_v5, %v5755_v37  ;;  %v5759_v37 = vadd.f32 %v8024_v62, %v11140_v57  ;;  %v5760_v16 = vadd.f32 %v8025_v53, %v4990_v30 }
 0x24e   : > { %v6140_v24 = vpop.f32.mrf.mxu0  ;;  %v5645_v59 = vpop.f32.mrf.mxu1 }
 0x24f   : > { %v6267_v15 = vadd.f32 %v6140_v24, %v5753_v21  ;;  %v6563_v5 = vmul.f32 %v6269_v61, %v6269_v61  ;;  %v5758_v53 = vadd.f32 %v5645_v59, %v4988_v32 }
 0x250   : > { %v8069_v27 = vpop.f32.mrf.mxu0  ;;  %v8028_v0 = vpop.f32.mrf.mxu1 }
 0x251   : > { %v6270_v41 = vadd.f32 %v8069_v27, %v5756_v10  ;;  %v6561_v36 = vmul.f32 %v6267_v15, %v6267_v15 }
 0x252   : > { %v6143_v46 = vpop.f32.mrf.mxu0  ;;  %v5658_v52 = vpop.f32.mrf.mxu1 }
 0x253   : > { %v7348_v39 = vpack.c.bf16 %v6270_v41, %v6269_v61  ;;  %v6268_v40 = vadd.f32 %v6143_v46, %v5754_v48  ;;  %v6564_v11 = vmul.f32 %v6270_v41, %v6270_v41 }
 0x254   : > { %v8029_v10 = vpop.f32.mrf.mxu1 }
 0x255   : > { %v8072_v31 = vpop.f32.mrf.mxu0  ;;  %7435 = vst [vmem:[%s11255_s7 + $0x8] sm:$0xff] %v7348_v39   ;;  %v7343_v38 = vpack.c.bf16 %v6268_v40, %v6267_v15  ;;  %v6523_v25 = vadd.f32 %v6268_v40, %v6267_v15  ;;  %v6562_v43 = vmul.f32 %v6268_v40, %v6268_v40  ;;  %v4525_v15 = vadd.f32 %v11148_v3, %v11057_v60 }
 0x256   : > { %v6273_v28 = vadd.f32 %v8072_v31, %v5759_v37  ;;  %v5661_v23 = vpop.f32.mrf.mxu1 }
 0x257   : > { %v6156_v48 = vpop.f32.mrf.mxu0  ;;  %7344 = vst [vmem:[%s11255_s7] sm:$0xff] %v7343_v38   ;;  %v6524_v21 = vadd.f32 %v6523_v25, %v6269_v61  ;;  %v6593_v62 = vadd.f32 %v6562_v43, %v6561_v36  ;;  %v4994_v61 = vadd.f32 %v11161_v2, %v4527_v55  ;;  %v4992_v37 = vadd.f32 %v11165_v14, %v4525_v15 }
 0x258   : > { %v6271_v57 = vadd.f32 %v6156_v48, %v5757_v22  ;;  %v8032_v40 = vpop.f32.mrf.mxu1  ;;  %v5761_v22 = vadd.f32 %v5658_v52, %v4991_v13  ;;  %v4531_v43 = vadd.f32 %v11159_v34, %v11065_v17  ;;  %v4529_v52 = vadd.f32 %v11163_v42, %v11068_v26 }
 0x259   : > { %v8073_v24 = vpop.f32.mrf.mxu0  ;;  %v6594_v27 = vadd.f32 %v6593_v62, %v6563_v5  ;;  %v6525_v20 = vadd.f32 %v6524_v21, %v6270_v41  ;;  %v5763_v41 = vadd.f32 %v8028_v0, %v11155_v8  ;;  %v5764_v31 = vadd.f32 %v8029_v10, %v4994_v61 }
 0x25a   : > { %v6274_v12 = vadd.f32 %v8073_v24, %v5760_v16  ;;  %v6565_v46 = vmul.f32 %v6271_v57, %v6271_v57  ;;  %v5674_v16 = vpop.f32.mrf.mxu1  ;;  %v5762_v44 = vadd.f32 %v5661_v23, %v4992_v37  ;;  %v6567_v8 = vmul.f32 %v6273_v28, %v6273_v28 }
 0x25b   : > { %v6159_v18 = vpop.f32.mrf.mxu0  ;;  %v6526_v47 = vadd.f32 %v6525_v20, %v6271_v57  ;;  %v6595_v30 = vadd.f32 %v6594_v27, %v6564_v11  ;;  %v4995_v17 = vadd.f32 %v11172_v1, %v4528_v35  ;;  %v4998_v42 = vadd.f32 %v11176_v9, %v4531_v43 }
 0x25c   : > { %v7358_v39 = vpack.c.bf16 %v6274_v12, %v6273_v28  ;;  %v6272_v60 = vadd.f32 %v6159_v18, %v5758_v53  ;;  %v8033_v55 = vpop.f32.mrf.mxu1  ;;  %v6568_v21 = vmul.f32 %v6274_v12, %v6274_v12  ;;  %v4996_v15 = vadd.f32 %v11180_v6, %v4529_v52 }
 0x25d   : > { %v6596_v59 = vadd.f32 %v6595_v30, %v6565_v46  ;;  %v5765_v20 = vadd.f32 %v5674_v16, %v4995_v17  ;;  %v5768_v13 = vadd.f32 %v8033_v55, %v4998_v42  ;;  %v4532_v61 = vadd.f32 %v11168_v7, %v11074_v58  ;;  %v11867_v17 = vld [vmem:[#allocation37_spill] sm:$0xff] }
 0x25e   : > { %7437 = vst [vmem:[%s11255_s7 + $0x18] sm:$0xff] %v7358_v39   ;;  %v7353_v2 = vpack.c.bf16 %v6272_v60, %v6271_v57  ;;  %v6527_v36 = vadd.f32 %v6526_v47, %v6272_v60  ;;  %v6566_v38 = vmul.f32 %v6272_v60, %v6272_v60  ;;  %v5677_v29 = vpop.f32.mrf.mxu1  ;;  %v4535_v46 = vadd.f32 %v11174_v45, %v11077_v54 }
 0x25f   : > { %v8076_v3 = vpop.f32.mrf.mxu0  ;;  %v4533_v30 = vadd.f32 %v11178_v33, %v11080_v4  ;;  %v5766_v39 = vadd.f32 %v5677_v29, %v4996_v15  ;;  %v4999_v54 = vadd.f32 %v11187_v50, %v4532_v61 }
 0x260   : > { %7436 = vst [vmem:[%s11255_s7 + $0x10] sm:$0xff] %v7353_v2   ;;  %v6528_v0 = vadd.f32 %v6527_v36, %v6273_v28  ;;  %v6597_v14 = vadd.f32 %v6596_v59, %v6566_v38  ;;  %v6277_v5 = vadd.f32 %v8076_v3, %v5763_v41  ;;  %v8036_v11 = vpop.f32.mrf.mxu1  ;;  %v5002_v33 = vadd.f32 %v11191_v19, %v4535_v46 }
 0x261   : > { %v6172_v25 = vpop.f32.mrf.mxu0  ;;  %v5000_v2 = vadd.f32 %v11195_v49, %v4533_v30  ;;  %v11869_v30 = vld [vmem:[#allocation43_spill] sm:$0xff] }
 0x262   : > { %v6275_v48 = vadd.f32 %v6172_v25, %v5761_v22  ;;  %v6598_v62 = vadd.f32 %v6597_v14, %v6567_v8  ;;  %v6529_v57 = vadd.f32 %v6528_v0, %v6274_v12  ;;  %v5767_v12 = vadd.f32 %v8032_v40, %v11170_v51  ;;  %v5690_v1 = vpop.f32.mrf.mxu1  ;;  %v11861_v0 = vld [vmem:[#allocation28_spill] sm:$0xff] }
 0x263   : > { %v8077_v32 = vpop.f32.mrf.mxu0  ;;  %v6571_v3 = vmul.f32 %v6277_v5, %v6277_v5  ;;  %v5771_v14 = vadd.f32 %v8036_v11, %v11861_v0 }
 0x264   : > { %v6278_v56 = vadd.f32 %v8077_v32, %v5764_v31  ;;  %v6530_v24 = vadd.f32 %v6529_v57, %v6275_v48  ;;  %v6569_v53 = vmul.f32 %v6275_v48, %v6275_v48  ;;  %v6599_v27 = vadd.f32 %v6598_v62, %v6568_v21  ;;  %v8037_v60 = vpop.f32.mrf.mxu1  ;;  %v11862_v32 = vld [vmem:[#allocation57_spill] sm:$0xff]  ;;  %v11864_v21 = vld [vmem:[#allocation64_spill] sm:$0xff]  ;;  %v11865_v62 = vld [vmem:[#allocation31_spill] sm:$0xff] }
 0x265   : > { %v6175_v10 = vpop.f32.mrf.mxu0  ;;  %v4539_v57 = vadd.f32 %v11865_v62, %v11864_v21  ;;  %v11877_v62 = vld [vmem:[#allocation71_spill] sm:$0xff] }
 0x266   : > { %v7368_v34 = vpack.c.bf16 %v6278_v56, %v6277_v5  ;;  %v6276_v26 = vadd.f32 %v6175_v10, %v5762_v44  ;;  %v6600_v9 = vadd.f32 %v6599_v27, %v6569_v53  ;;  %v5693_v58 = vpop.f32.mrf.mxu1  ;;  %v6572_v7 = vmul.f32 %v6278_v56, %v6278_v56  ;;  %v11866_v10 = vld [vmem:[#allocation67_spill] sm:$0xff] }
 0x267   : > { %v5769_v44 = vadd.f32 %v5690_v1, %v4999_v54 }
 0x268   : > { %v8080_v28 = vpop.f32.mrf.mxu0  ;;  %7439 = vst [vmem:[%s11255_s7 + $0x28] sm:$0xff] %v7368_v34   ;;  %v7363_v23 = vpack.c.bf16 %v6276_v26, %v6275_v48  ;;  %v6570_v18 = vmul.f32 %v6276_v26, %v6276_v26  ;;  %v6531_v47 = vadd.f32 %v6530_v24, %v6276_v26  ;;  %v8040_v36 = vpop.f32.mrf.mxu1  ;;  %v5772_v48 = vadd.f32 %v8037_v60, %v5002_v33 }
 0x269   : > { %v6281_v41 = vadd.f32 %v8080_v28, %v5767_v12  ;;  %v4537_v34 = vadd.f32 %v11867_v17, %v11866_v10  ;;  %v5770_v26 = vadd.f32 %v5693_v58, %v5000_v2  ;;  %v11873_v2 = vld [vmem:[#allocation52_spill] sm:$0xff] }
 0x26a   : > { %v6188_v6 = vpop.f32.mrf.mxu0  ;;  %7438 = vst [vmem:[%s11255_s7 + $0x20] sm:$0xff] %v7363_v23   ;;  %v6532_v22 = vadd.f32 %v6531_v47, %v6277_v5  ;;  %v6601_v51 = vadd.f32 %v6600_v9, %v6570_v18  ;;  %v5706_v50 = vpop.f32.mrf.mxu1  ;;  %v11863_v5 = vld [vmem:[#allocation26_spill] sm:$0xff] }
 0x26b   : > { %v6279_v40 = vadd.f32 %v6188_v6, %v5765_v20  ;;  %v6575_v15 = vmul.f32 %v6281_v41, %v6281_v41  ;;  %v11868_v6 = vld [vmem:[#allocation5_spill] sm:$0xff] }
 0x26c   : > { %v8081_v59 = vpop.f32.mrf.mxu0  ;;  %v6602_v37 = vadd.f32 %v6601_v51, %v6571_v3  ;;  %v6533_v16 = vadd.f32 %v6532_v22, %v6278_v56  ;;  %v4536_v56 = vadd.f32 %v11863_v5, %v11862_v32  ;;  %v8041_v42 = vpop.f32.mrf.mxu1  ;;  %v5006_v46 = vadd.f32 %v11868_v6, %v4539_v57 }
 0x26d   : > { %v6282_v31 = vadd.f32 %v8081_v59, %v5768_v13  ;;  %v6573_v25 = vmul.f32 %v6279_v40, %v6279_v40 }
 0x26e   : > { %v6191_v35 = vpop.f32.mrf.mxu0  ;;  %v6534_v38 = vadd.f32 %v6533_v16, %v6279_v40  ;;  %v6603_v43 = vadd.f32 %v6602_v37, %v6572_v7  ;;  %v5709_v23 = vpop.f32.mrf.mxu1  ;;  %v5003_v61 = vadd.f32 %v11202_v63, %v4536_v56  ;;  %v5776_v37 = vadd.f32 %v8041_v42, %v5006_v46  ;;  %v11871_v16 = vld [vmem:[#allocation51_spill] sm:$0xff] }
 0x26f   : > { %v7378_v45 = vpack.c.bf16 %v6282_v31, %v6281_v41  ;;  %v6280_v4 = vadd.f32 %v6191_v35, %v5766_v39  ;;  %v6576_v18 = vmul.f32 %v6282_v31, %v6282_v31  ;;  %v5004_v39 = vadd.f32 %v11869_v30, %v4537_v34  ;;  %v11872_v35 = vld [vmem:[#allocation9_spill] sm:$0xff]  ;;  %v11878_v34 = vld [vmem:[#allocation74_spill] sm:$0xff]  ;;  %v11879_v42 = vld [vmem:[#allocation59_spill] sm:$0xff] }
 0x270   : > { %v6604_v19 = vadd.f32 %v6603_v43, %v6573_v25  ;;  %v5773_v59 = vadd.f32 %v5706_v50, %v5003_v61  ;;  %v4540_v54 = vadd.f32 %v11872_v35, %v11871_v16  ;;  %v11875_v43 = vld [vmem:[#allocation61_spill] sm:$0xff] }
 0x271   : > { %7441 = vst [vmem:[%s11255_s7 + $0x38] sm:$0xff] %v7378_v45   ;;  %v7373_v55 = vpack.c.bf16 %v6280_v4, %v6279_v40  ;;  %v6574_v8 = vmul.f32 %v6280_v4, %v6280_v4  ;;  %v6535_v29 = vadd.f32 %v6534_v38, %v6280_v4  ;;  %v11874_v38 = vld [vmem:[#allocation70_spill] sm:$0xff] }
 0x272   : > { %v8084_v52 = vpop.f32.mrf.mxu0  ;;  %v4543_v25 = vadd.f32 %v11874_v38, %v11873_v2  ;;  %v5007_v57 = vadd.f32 %v11877_v62, %v4540_v54  ;;  %v11887_v38 = vld [vmem:[#allocation6_spill] sm:$0xff] }
 0x273   : > { %7440 = vst [vmem:[%s11255_s7 + $0x30] sm:$0xff] %v7373_v55   ;;  %v6536_v24 = vadd.f32 %v6535_v29, %v6281_v41  ;;  %v6605_v11 = vadd.f32 %v6604_v19, %v6574_v8  ;;  %v6285_v28 = vadd.f32 %v8084_v52, %v5771_v14  ;;  %v11876_v52 = vld [vmem:[#allocation39_spill] sm:$0xff]  ;;  %v5774_v55 = vadd.f32 %v5709_v23, %v5004_v39 }
 0x274   : > { %v6204_v49 = vpop.f32.mrf.mxu0 }
 0x275   : > { %v6283_v53 = vadd.f32 %v6204_v49, %v5769_v44  ;;  %v6606_v12 = vadd.f32 %v6605_v11, %v6575_v15  ;;  %v6537_v13 = vadd.f32 %v6536_v24, %v6282_v31  ;;  %v8044_v60 = vpop.f32.mrf.mxu1  ;;  %v11870_v31 = vld [vmem:[#allocation68_spill] sm:$0xff]  ;;  %v4541_v44 = vadd.f32 %v11876_v52, %v11875_v43 }
 0x276   : > { %v8085_v27 = vpop.f32.mrf.mxu0  ;;  %v5775_v7 = vadd.f32 %v8040_v36, %v11870_v31  ;;  %v6579_v0 = vmul.f32 %v6285_v28, %v6285_v28 }
 0x277   : > { %v6286_v20 = vadd.f32 %v8085_v27, %v5772_v48  ;;  %v6538_v3 = vadd.f32 %v6537_v13, %v6283_v53  ;;  %v6577_v22 = vmul.f32 %v6283_v53, %v6283_v53  ;;  %v6607_v51 = vadd.f32 %v6606_v12, %v6576_v18  ;;  %v5722_v63 = vpop.f32.mrf.mxu1 }
 0x278   : > { %v6207_v1 = vpop.f32.mrf.mxu0  ;;  %v5008_v15 = vadd.f32 %v11879_v42, %v4541_v44  ;;  %v5777_v23 = vadd.f32 %v5722_v63, %v5007_v57  ;;  %v11888_v44 = vld [vmem:[#allocation4_spill] sm:$0xff] }
 0x279   : > { %v7388_v9 = vpack.c.bf16 %v6286_v20, %v6285_v28  ;;  %v6284_v47 = vadd.f32 %v6207_v1, %v5770_v26  ;;  %v6608_v45 = vadd.f32 %v6607_v51, %v6577_v22  ;;  %v8045_v8 = vpop.f32.mrf.mxu1  ;;  %v6580_v19 = vmul.f32 %v6286_v20, %v6286_v20  ;;  %v11884_v22 = vld [vmem:[#allocation73_spill] sm:$0xff] }
 0x27a   : > { %v5010_v26 = vadd.f32 %v11878_v34, %v4543_v25 }
 0x27b   : > { %v8088_v40 = vpop.f32.mrf.mxu0  ;;  %7443 = vst [vmem:[%s11255_s7 + $0x48] sm:$0xff] %v7388_v9   ;;  %v7383_v41 = vpack.c.bf16 %v6284_v47, %v6283_v53  ;;  %v6578_v58 = vmul.f32 %v6284_v47, %v6284_v47  ;;  %v6539_v4 = vadd.f32 %v6538_v3, %v6284_v47  ;;  %v5725_v56 = vpop.f32.mrf.mxu1  ;;  %v11881_v9 = vld [vmem:[#allocation62_spill] sm:$0xff]  ;;  %v11882_v47 = vld [vmem:[#allocation49_spill] sm:$0xff] }
 0x27c   : > { %v6289_v32 = vadd.f32 %v8088_v40, %v5775_v7  ;;  %v5780_v1 = vadd.f32 %v8045_v8, %v5010_v26  ;;  %v4544_v6 = vadd.f32 %v11882_v47, %v11881_v9  ;;  %v11883_v3 = vld [vmem:[#allocation65_spill] sm:$0xff]  ;;  %v11885_v40 = vld [vmem:[#allocation66_spill] sm:$0xff] }
 0x27d   : > { %v6220_v33 = vpop.f32.mrf.mxu0  ;;  %7442 = vst [vmem:[%s11255_s7 + $0x40] sm:$0xff] %v7383_v41   ;;  %v6540_v14 = vadd.f32 %v6539_v4, %v6285_v28  ;;  %v6609_v36 = vadd.f32 %v6608_v45, %v6578_v58  ;;  %v4547_v51 = vadd.f32 %v11884_v22, %v11883_v3  ;;  %v5778_v58 = vadd.f32 %v5725_v56, %v5008_v15  ;;  %v11889_v8 = vld [vmem:[#allocation17_spill] sm:$0xff] }
 0x27e   : > { %v6287_v48 = vadd.f32 %v6220_v33, %v5773_v59  ;;  %v11886_v59 = vld [vmem:[#allocation75_spill] sm:$0xff]  ;;  %v6583_v31 = vmul.f32 %v6289_v32, %v6289_v32  ;;  %v5011_v25 = vadd.f32 %v11887_v38, %v4544_v6 }
 0x27f   : > { %v8089_v50 = vpop.f32.mrf.mxu0  ;;  %v6610_v29 = vadd.f32 %v6609_v36, %v6579_v0  ;;  %v6541_v49 = vadd.f32 %v6540_v14, %v6286_v20  ;;  %v8048_v24 = vpop.f32.mrf.mxu1  ;;  %v11880_v20 = vld [vmem:[#allocation53_spill] sm:$0xff]  ;;  %v4545_v41 = vadd.f32 %v11886_v59, %v11885_v40 }
 0x280   : > { %v6290_v5 = vadd.f32 %v8089_v50, %v5776_v37  ;;  %v6581_v53 = vmul.f32 %v6287_v48, %v6287_v48  ;;  %v5779_v13 = vadd.f32 %v8044_v60, %v11880_v20 }
 0x281   : > { %v6223_v21 = vpop.f32.mrf.mxu0  ;;  %v6542_v11 = vadd.f32 %v6541_v49, %v6287_v48  ;;  %v6611_v27 = vadd.f32 %v6610_v29, %v6580_v19  ;;  %v5738_v61 = vpop.f32.mrf.mxu1  ;;  %v5012_v0 = vadd.f32 %v11889_v8, %v4545_v41 }
 0x282   : > { %v7398_v10 = vpack.c.bf16 %v6290_v5, %v6289_v32  ;;  %v6288_v17 = vadd.f32 %v6223_v21, %v5774_v55  ;;  %v6584_v45 = vmul.f32 %v6290_v5, %v6290_v5  ;;  %v5014_v55 = vadd.f32 %v11888_v44, %v4547_v51 }
 0x283   : > { %v8092_v28 = vpop.f32.mrf.mxu0  ;;  %v6612_v46 = vadd.f32 %v6611_v27, %v6581_v53  ;;  %v8049_v16 = vpop.f32.mrf.mxu1 }
 0x284   : > { %7445 = vst [vmem:[%s11255_s7 + $0x58] sm:$0xff] %v7398_v10   ;;  %v7393_v18 = vpack.c.bf16 %v6288_v17, %v6287_v48  ;;  %v6582_v12 = vmul.f32 %v6288_v17, %v6288_v17  ;;  %v6543_v30 = vadd.f32 %v6542_v11, %v6288_v17  ;;  %v6293_v35 = vadd.f32 %v8092_v28, %v5779_v13 }
 0x285   : > { %v6236_v39 = vpop.f32.mrf.mxu0  ;;  %v5741_v56 = vpop.f32.mrf.mxu1  ;;  %v5784_v21 = vadd.f32 %v8049_v16, %v5014_v55 }
 0x286   : > { %7444 = vst [vmem:[%s11255_s7 + $0x50] sm:$0xff] %v7393_v18   ;;  %v6544_v7 = vadd.f32 %v6543_v30, %v6289_v32  ;;  %v6613_v37 = vadd.f32 %v6612_v46, %v6582_v12  ;;  %v6291_v60 = vadd.f32 %v6236_v39, %v5777_v23  ;;  %v5781_v32 = vadd.f32 %v5738_v61, %v5011_v25 }
 0x287   : > { %v8093_v63 = vpop.f32.mrf.mxu0  ;;  %v5782_v17 = vadd.f32 %v5741_v56, %v5012_v0  ;;  %v6587_v34 = vmul.f32 %v6293_v35, %v6293_v35 }
 0x288   : > { %v6294_v54 = vadd.f32 %v8093_v63, %v5780_v1  ;;  %v6614_v4 = vadd.f32 %v6613_v37, %v6583_v31  ;;  %v6545_v33 = vadd.f32 %v6544_v7, %v6290_v5  ;;  %v6585_v36 = vmul.f32 %v6291_v60, %v6291_v60  ;;  %v11890_v5 = vld [vmem:[#allocation63_spill] sm:$0xff] }
 0x289   : > { %v6239_v2 = vpop.f32.mrf.mxu0  ;;  %v5783_v49 = vadd.f32 %v8048_v24, %v11890_v5 }
 0x28a   : > { %v7408_v43 = vpack.c.bf16 %v6294_v54, %v6293_v35  ;;  %v6292_v52 = vadd.f32 %v6239_v2, %v5778_v58  ;;  %v6546_v14 = vadd.f32 %v6545_v33, %v6291_v60  ;;  %v6615_v48 = vadd.f32 %v6614_v4, %v6584_v45 }
 0x28b   : > { %v8096_v50 = vpop.f32.mrf.mxu0  ;;  %v6588_v28 = vmul.f32 %v6294_v54, %v6294_v54 }
 0x28c   : > { %7447 = vst [vmem:[%s11255_s7 + $0x68] sm:$0xff] %v7408_v43   ;;  %v7403_v19 = vpack.c.bf16 %v6292_v52, %v6291_v60  ;;  %v6586_v29 = vmul.f32 %v6292_v52, %v6292_v52  ;;  %v6616_v62 = vadd.f32 %v6615_v48, %v6585_v36  ;;  %v6547_v57 = vadd.f32 %v6546_v14, %v6292_v52 }
 0x28d   : > { %v6252_v10 = vpop.f32.mrf.mxu0  ;;  %v6297_v53 = vadd.f32 %v8096_v50, %v5783_v49 }
 0x28e   : > { %7446 = vst [vmem:[%s11255_s7 + $0x60] sm:$0xff] %v7403_v19   ;;  %v6548_v26 = vadd.f32 %v6547_v57, %v6293_v35  ;;  %v6617_v42 = vadd.f32 %v6616_v62, %v6586_v29  ;;  %v6295_v15 = vadd.f32 %v6252_v10, %v5781_v32 }
 0x28f   : > { %v8097_v11 = vpop.f32.mrf.mxu0  ;;  %v6591_v30 = vmul.f32 %v6297_v53, %v6297_v53 }
 0x290   : > { %v6298_v27 = vadd.f32 %v8097_v11, %v5784_v21  ;;  %v6618_v23 = vadd.f32 %v6617_v42, %v6587_v34  ;;  %v6549_v18 = vadd.f32 %v6548_v26, %v6294_v54  ;;  %v6589_v1 = vmul.f32 %v6295_v15, %v6295_v15 }
 0x291   : > { %v6255_v12 = vpop.f32.mrf.mxu0 }
 0x292   : > { %v7418_v24 = vpack.c.bf16 %v6298_v27, %v6297_v53  ;;  %v6296_v20 = vadd.f32 %v6255_v12, %v5782_v17  ;;  %v6550_v13 = vadd.f32 %v6549_v18, %v6295_v15  ;;  %v6619_v61 = vadd.f32 %v6618_v23, %v6588_v28 }
 0x293   : > { %v6592_v22 = vmul.f32 %v6298_v27, %v6298_v27 }
 0x294   : > { %7449 = vst [vmem:[%s11255_s7 + $0x78] sm:$0xff] %v7418_v24   ;;  %v7413_v9 = vpack.c.bf16 %v6296_v20, %v6295_v15  ;;  %v6590_v47 = vmul.f32 %v6296_v20, %v6296_v20  ;;  %v6620_v6 = vadd.f32 %v6619_v61, %v6589_v1  ;;  %v6551_v46 = vadd.f32 %v6550_v13, %v6296_v20 }
 0x296   : > { %7448 = vst [vmem:[%s11255_s7 + $0x70] sm:$0xff] %v7413_v9   ;;  %v6552_v39 = vadd.f32 %v6551_v46, %v6297_v53  ;;  %v6621_v3 = vadd.f32 %v6620_v6, %v6590_v47 }
 0x298   : > { %v6553_v51 = vadd.f32 %v6552_v39, %v6298_v27  ;;  %v6622_v40 = vadd.f32 %v6621_v3, %v6591_v30 }
 0x29a   : > { %v6554_v59 = vrot.slane %v6553_v51, 4  ;;  %v6623_v41 = vadd.f32 %v6622_v40, %v6592_v22 }
 0x29c   : > { %v6555_v58 = vadd.f32 %v6554_v59, %v6553_v51  ;;  %v6624_v31 = vrot.slane %v6623_v41, 4 }
 0x29e   : > { %v6556_v7 = vrot.slane %v6555_v58, 2  ;;  %v6625_v37 = vadd.f32 %v6624_v31, %v6623_v41 }
 0x2a0   : > { %v6557_v60 = vadd.f32 %v6556_v7, %v6555_v58  ;;  %v6626_v63 = vrot.slane %v6625_v37, 2 }
 0x2a2   : > { %v6558_v16 = vrot.slane %v6557_v60, 1  ;;  %v6627_v35 = vadd.f32 %v6626_v63, %v6625_v37 }
 0x2a4   : > { %v6559_v54 = vadd.f32 %v6558_v16, %v6557_v60  ;;  %v6628_v45 = vrot.slane %v6627_v35, 1 }
 0x2a6   : > { %6560 = vst [vmem:[%s273_s8] sm:$0x1] %v6559_v54  ;;  %v6629_v4 = vadd.f32 %v6628_v45, %v6627_v35 }
 0x2a8   : > { %6630 = vst [vmem:[%s276_s12] sm:$0x1] %v6629_v4 }
 0x2a9 PF: > { %s17_s21 = sadd.s32 1, %s8259_s21  }
 0x2aa   : > { %p14_p5 = scmp.ge.s32.totalorder %s17_s21, 4  }
 0x2ac   :  { %16 = sbr.rel (!%p14_p5) target bundleno = 1 (0x1), region = 100 }

</bundles_post_ra>
